<compile_context>
chip_gen: v7x
topology: tpu7x:2x2x1
jax: 0.10.0
libtpu: 0.0.40
codegen_flags: <defaults>
</compile_context>

<pallas_src>
import functools

import numpy as np
import jax
import jax.numpy as jnp
from jax.experimental import pallas as pl
from jax.experimental.pallas import tpu as pltpu

# ------------------------------- configuration ------------------------------
IMG_SIZE = 16          # small stand-in for 224
PATCH_SIZE = 4
IN_CHANS = 3
EMBED_DIM = 16
DEPTHS = (2, 2)        # small stand-in for (2, 2, 6, 2)
NUM_HEADS = (2, 4)
WINDOW_SIZE = 2        # small stand-in for 7
MLP_RATIO = 4.0
NUM_CLASSES = 2
EPS = 1e-5
DTYPE = jnp.float32

# Matmul operand dtype: bf16 operands + f32 accumulation (MXU-friendly).
MM_DTYPE = jnp.bfloat16

PATCH_RES = IMG_SIZE // PATCH_SIZE                      # 4 -> 16 tokens
NUM_LAYERS = len(DEPTHS)
NUM_FEATURES = EMBED_DIM * 2 ** (NUM_LAYERS - 1)        # 32

# ------------------------------ in-kernel helpers ----------------------------


def _mm(a, b):
    """a @ b with bf16 operands, f32 accumulation (MXU)."""
    return jnp.dot(a.astype(MM_DTYPE), b.astype(MM_DTYPE),
                   preferred_element_type=jnp.float32)


def _mm_t(a, b):
    """a @ b.T (contract last dims of both), bf16 operands, f32 acc."""
    return jax.lax.dot_general(a.astype(MM_DTYPE), b.astype(MM_DTYPE),
                               (((1,), (1,)), ((), ())),
                               preferred_element_type=jnp.float32)


def _ln_rows(x, g, b):
    """LayerNorm over the last axis; x:(R,C), g,b:(1,C), f32 math."""
    mean = jnp.mean(x, axis=-1, keepdims=True)
    xc = x - mean
    var = jnp.mean(xc * xc, axis=-1, keepdims=True)
    return xc * jax.lax.rsqrt(var + EPS) * g + b


def _erf(x):
    # TODO(synk): lax.erf lowering in Mosaic is not guaranteed; use the
    # Abramowitz & Stegun 7.1.26 rational approximation (|err| < 1.5e-7),
    # built only from exp/mul/add/div (EUP + VPU).
    a1, a2, a3, a4, a5 = (0.254829592, -0.284496736, 1.421413741,
                          -1.453152027, 1.061405429)
    pp = 0.3275911
    sgn = jnp.where(x >= 0.0, 1.0, -1.0)
    ax = jnp.abs(x)
    t = 1.0 / (1.0 + pp * ax)
    poly = ((((a5 * t + a4) * t + a3) * t + a2) * t + a1) * t
    return sgn * (1.0 - poly * jnp.exp(-ax * ax))


def _gelu_exact(x):
    return 0.5 * x * (1.0 + _erf(x * 0.7071067811865475))


# ----------------------------- fused forward kernel --------------------------


def _swin_block(x, bp, heads):
    """One Swin block on a per-sample (L, C) slab.  Shift + window partition
    are a static permutation matmul; attention runs per ws^2-token window."""
    l, c = x.shape
    dh = c // heads

    # ---- attention branch: LN1 -> QKV (scale pre-folded into Q) ----
    xn = _ln_rows(x, bp["norm1_g"][...], bp["norm1_b"][...])
    qkv = _mm(xn, bp["qkv_w"][...]) + bp["qkv_b"][...]          # (L, 3C)

    has_perm = bp["perm"] is not None
    if has_perm:                                                # shift + window partition
        qkv = _mm(bp["perm"][...], qkv)

    bias_ref = bp["attn_bias"]                                  # (nW, heads, N, N)
    n_win = bias_ref.shape[0]
    n_tok = bias_ref.shape[2]

    win_outs = []
    for w in range(n_win):                                      # static unroll
        r0 = w * n_tok
        head_outs = []
        for hd in range(heads):                                 # static unroll
            q = qkv[r0:r0 + n_tok, hd * dh:(hd + 1) * dh]
            k = qkv[r0:r0 + n_tok, c + hd * dh:c + (hd + 1) * dh]
            v = qkv[r0:r0 + n_tok, 2 * c + hd * dh:2 * c + (hd + 1) * dh]
            s = _mm_t(q, k) + bias_ref[w, hd]                   # (N, N)
            s = s - jnp.max(s, axis=-1, keepdims=True)
            e = jnp.exp(s)
            p = e * pl.reciprocal(jnp.sum(e, axis=-1, keepdims=True), approx=True)
            head_outs.append(_mm(p, v))                         # (N, dh)
        win_outs.append(jnp.concatenate(head_outs, axis=1))     # (N, C)
    attn = jnp.concatenate(win_outs, axis=0)                    # (L, C), window order

    attn = _mm(attn, bp["proj_w"][...])                         # single output proj
    if has_perm:                                                # reverse partition+shift
        attn = _mm(bp["perm_inv"][...], attn)
    x = x + attn + bp["proj_b"][...]        # dropout / drop_path = identity (eval)

    # ---- MLP branch: LN2 -> fc1 -> GELU -> fc2 ----
    xn2 = _ln_rows(x, bp["norm2_g"][...], bp["norm2_b"][...])
    hdn = _gelu_exact(_mm(xn2, bp["fc1_w"][...]) + bp["fc1_b"][...])
    return x + _mm(hdn, bp["fc2_w"][...]) + bp["fc2_b"][...]


def _fused_forward_kernel(xp_ref, *rest, treedef, depths, num_heads):
    """Whole forward for ONE sample (grid is over batch)."""
    out_ref = rest[-1]
    p = jax.tree_util.tree_unflatten(treedef, rest[:-1])

    # ---- patch embed: conv-as-matmul on im2col'd patches + LayerNorm ----
    pe = p["patch_embed"]
    x = _mm(xp_ref[0], pe["proj_w"][...]) + pe["proj_b"][...]   # (L0, E)
    x = _ln_rows(x, pe["norm_g"][...], pe["norm_b"][...])
    # ape=False -> no absolute positional embedding; pos_drop(p=0) -> identity

    # ---- stages ----
    for li in range(len(depths)):
        layer = p["layers"][li]
        for bi in range(depths[li]):
            x = _swin_block(x, layer["blocks"][bi], num_heads[li])
        ds = layer["downsample"]
        if ds is not None:
            # patch merging: static even/odd selection matmuls + LN + Linear
            merged = jnp.concatenate(
                [_mm(ds["sel"][k], x) for k in range(4)], axis=1)   # (L/4, 4C)
            merged = _ln_rows(merged, ds["norm_g"][...], ds["norm_b"][...])
            x = _mm(merged, ds["red_w"][...])                       # (L/4, 2C)

    # ---- head: LN -> token mean-pool -> Linear -> safe log-softmax ----
    xn = _ln_rows(x, p["norm_g"][...], p["norm_b"][...])
    pooled = jnp.mean(xn, axis=0, keepdims=True)                    # (1, C)
    logits = _mm(pooled, p["head_w"][...]) + p["head_b"][...]       # (1, n_cls)
    z = logits - jnp.max(logits, axis=-1, keepdims=True)
    lse = jnp.log(jnp.sum(jnp.exp(z), axis=-1, keepdims=True))
    out_ref[...] = (z - lse)[None].astype(out_ref.dtype)            # (1,1,n_cls)


# ----------------------- static Swin metadata (numpy) ------------------------


def _relative_position_index(ws):
    coords = np.stack(np.meshgrid(np.arange(ws), np.arange(ws), indexing="ij"))
    coords_flat = coords.reshape(2, -1)
    rel = coords_flat[:, :, None] - coords_flat[:, None, :]
    rel = rel.transpose(1, 2, 0).astype(np.int64)
    rel[:, :, 0] += ws - 1
    rel[:, :, 1] += ws - 1
    rel[:, :, 0] *= 2 * ws - 1
    return rel.sum(-1)                                       # (N, N)


def _shift_window_mask(h, w, ws, shift):
    # Standard Swin shifted-window mask, (nW, N, N) with 0 / -100 entries.
    img_mask = np.zeros((h, w), np.float32)
    slices = (slice(0, -ws), slice(-ws, -shift), slice(-shift, None))
    cnt = 0
    for hs in slices:
        for wsl in slices:
            img_mask[hs, wsl] = cnt
            cnt += 1
    mw = img_mask.reshape(h // ws, ws, w // ws, ws)
    mw = mw.transpose(0, 2, 1, 3).reshape(-1, ws * ws)
    am = mw[:, None, :] - mw[:, :, None]
    return np.where(am != 0, np.float32(-100.0), np.float32(0.0))


def _window_permutation(res, ws, shift):
    """(L, L) 0/1 matrix P so that P @ x reorders row-major tokens into
    window-major order of the (-shift)-rolled image.  P.T reverses it."""
    H = W = res
    L = H * W
    src = np.zeros(L, np.int64)
    r = 0
    for wi in range(res // ws):
        for wj in range(res // ws):
            for ti in range(ws):
                for tj in range(ws):
                    si, sj = wi * ws + ti, wj * ws + tj          # shifted coords
                    src[r] = ((si + shift) % H) * W + ((sj + shift) % W)
                    r += 1
    P = np.zeros((L, L), np.float32)
    P[np.arange(L), src] = 1.0
    return P


def _window_bias(res, ws, shift, heads, rel_table):
    """Per-window additive bias (nW, heads, N, N): rel-pos bias (+ shift mask)."""
    N = ws * ws
    n_win = (res // ws) ** 2
    rel_index = _relative_position_index(ws)
    rel_bias = rel_table[rel_index.reshape(-1)].reshape(N, N, heads)
    rel_bias = rel_bias.transpose(2, 0, 1)                       # (heads, N, N)
    bias = np.broadcast_to(rel_bias, (n_win, heads, N, N)).copy()
    if shift > 0:
        mask = _shift_window_mask(res, res, ws, shift)           # (nW, N, N)
        bias = bias + mask[:, None, :, :]
    return bias.astype(np.float32)


def _merge_select(res):
    """(4, L/4, L) 0/1 matrices selecting the (0,0),(1,0),(0,1),(1,1) strided
    sub-grids (PatchMerging x0..x3 channel-group order)."""
    half = res // 2
    sel = np.zeros((4, half * half, res * res), np.float32)
    for k, (di, dj) in enumerate(((0, 0), (1, 0), (0, 1), (1, 1))):
        for i in range(half):
            for j in range(half):
                sel[k, i * half + j, (2 * i + di) * res + (2 * j + dj)] = 1.0
    return sel


# ------------------------------ parameter init -------------------------------


def _key_stream(key):
    while True:
        key, sub = jax.random.split(key)
        yield sub


def init_params(key):
    ks = _key_stream(key)

    def w_init(shape, std=0.02):
        return (jax.random.normal(next(ks), shape, DTYPE) * std).astype(DTYPE)

    zeros = lambda s: jnp.zeros(s, DTYPE)
    ones = lambda s: jnp.ones(s, DTYPE)

    params = {
        "patch_embed": {
            "proj_w": w_init((IN_CHANS * PATCH_SIZE * PATCH_SIZE, EMBED_DIM)),
            "proj_b": zeros((1, EMBED_DIM)),
            "norm_g": ones((1, EMBED_DIM)),
            "norm_b": zeros((1, EMBED_DIM)),
        },
        "layers": [],
        "norm_g": ones((1, NUM_FEATURES)),
        "norm_b": zeros((1, NUM_FEATURES)),
        "head_w": w_init((NUM_FEATURES, NUM_CLASSES)),
        "head_b": zeros((1, NUM_CLASSES)),
    }
    for li in range(NUM_LAYERS):
        dim = EMBED_DIM * 2 ** li
        heads = NUM_HEADS[li]
        hidden = int(dim * MLP_RATIO)
        res = PATCH_RES // (2 ** li)
        # Swin clamps window size & disables shift when resolution <= window.
        ws_eff = res if res <= WINDOW_SIZE else WINDOW_SIZE
        scale = (dim // heads) ** -0.5
        blocks = []
        for bi in range(DEPTHS[li]):
            shift = 0 if (bi % 2 == 0 or res <= WINDOW_SIZE) else WINDOW_SIZE // 2
            rel_table = np.array(w_init(((2 * ws_eff - 1) ** 2, heads)), np.float32)
            # fold the qk scale into the Q slice of the QKV projection at init.
            qkv_w = np.array(w_init((dim, 3 * dim)), np.float32)
            qkv_b = np.zeros((1, 3 * dim), np.float32)
            qkv_w[:, :dim] *= scale
            qkv_b[:, :dim] *= scale
            n_win = (res // ws_eff) ** 2
            need_perm = not (n_win == 1 and shift == 0)
            perm = _window_permutation(res, ws_eff, shift) if need_perm else None
            blocks.append({
                "norm1_g": ones((1, dim)), "norm1_b": zeros((1, dim)),
                "qkv_w": jnp.asarray(qkv_w), "qkv_b": jnp.asarray(qkv_b),
                "attn_bias": jnp.asarray(
                    _window_bias(res, ws_eff, shift, heads, rel_table)),
                "perm": None if perm is None else jnp.asarray(perm),
                "perm_inv": None if perm is None else jnp.asarray(perm.T.copy()),
                "proj_w": w_init((dim, dim)), "proj_b": zeros((1, dim)),
                "norm2_g": ones((1, dim)), "norm2_b": zeros((1, dim)),
                "fc1_w": w_init((dim, hidden)), "fc1_b": zeros((1, hidden)),
                "fc2_w": w_init((hidden, dim)), "fc2_b": zeros((1, dim)),
            })
        layer = {"blocks": blocks, "downsample": None}
        if li < NUM_LAYERS - 1:
            layer["downsample"] = {
                "norm_g": ones((1, 4 * dim)), "norm_b": zeros((1, 4 * dim)),
                "red_w": w_init((4 * dim, 2 * dim)),      # Linear(4C,2C,bias=False)
                "sel": jnp.asarray(_merge_select(res)),
            }
        params["layers"].append(layer)
    return params


# -------------------------------- model glue ---------------------------------


def _const_spec(shape):
    nd = len(shape)
    return pl.BlockSpec(tuple(shape), lambda i, _n=nd: (0,) * _n)


def model_forward(params, x_image, x_phenotype):
    # x_phenotype is accepted but unused, exactly like the reference forward().
    del x_phenotype
    b = x_image.shape[0]
    ps = PATCH_SIZE

    # one-time im2col of the raw image for conv-as-matmul patch embedding.
    xp = x_image.astype(DTYPE).reshape(b, IN_CHANS, PATCH_RES, ps, PATCH_RES, ps)
    xp = jnp.transpose(xp, (0, 2, 4, 1, 3, 5)).reshape(
        b, PATCH_RES * PATCH_RES, IN_CHANS * ps * ps)

    flat, treedef = jax.tree_util.tree_flatten(params)
    kernel = functools.partial(_fused_forward_kernel, treedef=treedef,
                               depths=DEPTHS, num_heads=NUM_HEADS)

    in_specs = [pl.BlockSpec((1,) + xp.shape[1:], lambda i: (i, 0, 0))]
    in_specs += [_const_spec(jnp.shape(w)) for w in flat]

    out = pl.pallas_call(
        kernel,
        out_shape=jax.ShapeDtypeStruct((b, 1, NUM_CLASSES), DTYPE),
        grid_spec=pltpu.PrefetchScalarGridSpec(
            num_scalar_prefetch=0,
            grid=(b,),                                   # one sample per step
            in_specs=in_specs,
            out_specs=pl.BlockSpec((1, 1, NUM_CLASSES), lambda i: (i, 0, 0))),
        compiler_params=pltpu.CompilerParams(
            dimension_semantics=("parallel",)),          # megacore over batch
    )(xp, *flat)
    return out.reshape(b, NUM_CLASSES)


# ----------------------------------- main ------------------------------------

if __name__ == "__main__":
    key = jax.random.PRNGKey(0)
    k_param, k_img, k_phen = jax.random.split(key, 3)

    BATCH = 2
    params = init_params(k_param)               # batch-size agnostic
    x_image = jax.random.normal(k_img, (BATCH, IN_CHANS, IMG_SIZE, IMG_SIZE), DTYPE)
    x_phenotype = jax.random.normal(k_phen, (BATCH, 4), DTYPE)

    fwd = jax.jit(model_forward)
    out = jax.block_until_ready(fwd(params, x_image, x_phenotype))

    assert out.shape == (BATCH, NUM_CLASSES), out.shape
    assert bool(jnp.all(jnp.isfinite(out)))
    # rows of log-softmax must exponentiate-sum to 1
    assert bool(jnp.allclose(jnp.sum(jnp.exp(out), axis=1), 1.0, atol=1e-4))
    print("KERNEL_OK")
</pallas_src>

<mosaic_0001>
module attributes {stable_mosaic.version = 11 : i64} {
  func.func @_fused_forward_kernel(%arg0: i32, %arg1: memref<1x16x48xf32, #tpu.memory_space<vmem>>, %arg2: memref<1x2xf32, #tpu.memory_space<vmem>>, %arg3: memref<32x2xf32, #tpu.memory_space<vmem>>, %arg4: memref<4x2x4x4xf32, #tpu.memory_space<vmem>>, %arg5: memref<1x64xf32, #tpu.memory_space<vmem>>, %arg6: memref<16x64xf32, #tpu.memory_space<vmem>>, %arg7: memref<1x16xf32, #tpu.memory_space<vmem>>, %arg8: memref<64x16xf32, #tpu.memory_space<vmem>>, %arg9: memref<1x16xf32, #tpu.memory_space<vmem>>, %arg10: memref<1x16xf32, #tpu.memory_space<vmem>>, %arg11: memref<1x16xf32, #tpu.memory_space<vmem>>, %arg12: memref<1x16xf32, #tpu.memory_space<vmem>>, %arg13: memref<16x16xf32, #tpu.memory_space<vmem>>, %arg14: memref<16x16xf32, #tpu.memory_space<vmem>>, %arg15: memref<1x16xf32, #tpu.memory_space<vmem>>, %arg16: memref<16x16xf32, #tpu.memory_space<vmem>>, %arg17: memref<1x48xf32, #tpu.memory_space<vmem>>, %arg18: memref<16x48xf32, #tpu.memory_space<vmem>>, %arg19: memref<4x2x4x4xf32, #tpu.memory_space<vmem>>, %arg20: memref<1x64xf32, #tpu.memory_space<vmem>>, %arg21: memref<16x64xf32, #tpu.memory_space<vmem>>, %arg22: memref<1x16xf32, #tpu.memory_space<vmem>>, %arg23: memref<64x16xf32, #tpu.memory_space<vmem>>, %arg24: memref<1x16xf32, #tpu.memory_space<vmem>>, %arg25: memref<1x16xf32, #tpu.memory_space<vmem>>, %arg26: memref<1x16xf32, #tpu.memory_space<vmem>>, %arg27: memref<1x16xf32, #tpu.memory_space<vmem>>, %arg28: memref<16x16xf32, #tpu.memory_space<vmem>>, %arg29: memref<16x16xf32, #tpu.memory_space<vmem>>, %arg30: memref<1x16xf32, #tpu.memory_space<vmem>>, %arg31: memref<16x16xf32, #tpu.memory_space<vmem>>, %arg32: memref<1x48xf32, #tpu.memory_space<vmem>>, %arg33: memref<16x48xf32, #tpu.memory_space<vmem>>, %arg34: memref<1x64xf32, #tpu.memory_space<vmem>>, %arg35: memref<1x64xf32, #tpu.memory_space<vmem>>, %arg36: memref<64x32xf32, #tpu.memory_space<vmem>>, %arg37: memref<4x4x16xf32, #tpu.memory_space<vmem>>, %arg38: memref<1x4x4x4xf32, #tpu.memory_space<vmem>>, %arg39: memref<1x128xf32, #tpu.memory_space<vmem>>, %arg40: memref<32x128xf32, #tpu.memory_space<vmem>>, %arg41: memref<1x32xf32, #tpu.memory_space<vmem>>, %arg42: memref<128x32xf32, #tpu.memory_space<vmem>>, %arg43: memref<1x32xf32, #tpu.memory_space<vmem>>, %arg44: memref<1x32xf32, #tpu.memory_space<vmem>>, %arg45: memref<1x32xf32, #tpu.memory_space<vmem>>, %arg46: memref<1x32xf32, #tpu.memory_space<vmem>>, %arg47: memref<1x32xf32, #tpu.memory_space<vmem>>, %arg48: memref<32x32xf32, #tpu.memory_space<vmem>>, %arg49: memref<1x96xf32, #tpu.memory_space<vmem>>, %arg50: memref<32x96xf32, #tpu.memory_space<vmem>>, %arg51: memref<1x4x4x4xf32, #tpu.memory_space<vmem>>, %arg52: memref<1x128xf32, #tpu.memory_space<vmem>>, %arg53: memref<32x128xf32, #tpu.memory_space<vmem>>, %arg54: memref<1x32xf32, #tpu.memory_space<vmem>>, %arg55: memref<128x32xf32, #tpu.memory_space<vmem>>, %arg56: memref<1x32xf32, #tpu.memory_space<vmem>>, %arg57: memref<1x32xf32, #tpu.memory_space<vmem>>, %arg58: memref<1x32xf32, #tpu.memory_space<vmem>>, %arg59: memref<1x32xf32, #tpu.memory_space<vmem>>, %arg60: memref<1x32xf32, #tpu.memory_space<vmem>>, %arg61: memref<32x32xf32, #tpu.memory_space<vmem>>, %arg62: memref<1x96xf32, #tpu.memory_space<vmem>>, %arg63: memref<32x96xf32, #tpu.memory_space<vmem>>, %arg64: memref<1x32xf32, #tpu.memory_space<vmem>>, %arg65: memref<1x32xf32, #tpu.memory_space<vmem>>, %arg66: memref<1x16xf32, #tpu.memory_space<vmem>>, %arg67: memref<1x16xf32, #tpu.memory_space<vmem>>, %arg68: memref<1x16xf32, #tpu.memory_space<vmem>>, %arg69: memref<48x16xf32, #tpu.memory_space<vmem>>, %arg70: memref<1x1x2xf32, #tpu.memory_space<vmem>>) attributes {dimension_semantics = [#tpu.dimension_semantics<parallel>], iteration_bounds = array<i64: 2>, scalar_prefetch = 0 : i64, scratch_operands = 0 : i64, tpu.core_type = #tpu.core_type<tc>, window_params = [{transform_indices = @transform_0, window_bounds = array<i64: 1, 16, 48>}, {pipeline_mode = #tpu.pipeline_mode<synchronous>, transform_indices = @transform_1, window_bounds = array<i64: 1, 2>}, {pipeline_mode = #tpu.pipeline_mode<synchronous>, transform_indices = @transform_2, window_bounds = array<i64: 32, 2>}, {pipeline_mode = #tpu.pipeline_mode<synchronous>, transform_indices = @transform_3, window_bounds = array<i64: 4, 2, 4, 4>}, {pipeline_mode = #tpu.pipeline_mode<synchronous>, transform_indices = @transform_4, window_bounds = array<i64: 1, 64>}, {pipeline_mode = #tpu.pipeline_mode<synchronous>, transform_indices = @transform_5, window_bounds = array<i64: 16, 64>}, {pipeline_mode = #tpu.pipeline_mode<synchronous>, transform_indices = @transform_6, window_bounds = array<i64: 1, 16>}, {pipeline_mode = #tpu.pipeline_mode<synchronous>, transform_indices = @transform_7, window_bounds = array<i64: 64, 16>}, {pipeline_mode = #tpu.pipeline_mode<synchronous>, transform_indices = @transform_8, window_bounds = array<i64: 1, 16>}, {pipeline_mode = #tpu.pipeline_mode<synchronous>, transform_indices = @transform_9, window_bounds = array<i64: 1, 16>}, {pipeline_mode = #tpu.pipeline_mode<synchronous>, transform_indices = @transform_10, window_bounds = array<i64: 1, 16>}, {pipeline_mode = #tpu.pipeline_mode<synchronous>, transform_indices = @transform_11, window_bounds = array<i64: 1, 16>}, {pipeline_mode = #tpu.pipeline_mode<synchronous>, transform_indices = @transform_12, window_bounds = array<i64: 16, 16>}, {pipeline_mode = #tpu.pipeline_mode<synchronous>, transform_indices = @transform_13, window_bounds = array<i64: 16, 16>}, {pipeline_mode = #tpu.pipeline_mode<synchronous>, transform_indices = @transform_14, window_bounds = array<i64: 1, 16>}, {pipeline_mode = #tpu.pipeline_mode<synchronous>, transform_indices = @transform_15, window_bounds = array<i64: 16, 16>}, {pipeline_mode = #tpu.pipeline_mode<synchronous>, transform_indices = @transform_16, window_bounds = array<i64: 1, 48>}, {pipeline_mode = #tpu.pipeline_mode<synchronous>, transform_indices = @transform_17, window_bounds = array<i64: 16, 48>}, {pipeline_mode = #tpu.pipeline_mode<synchronous>, transform_indices = @transform_18, window_bounds = array<i64: 4, 2, 4, 4>}, {pipeline_mode = #tpu.pipeline_mode<synchronous>, transform_indices = @transform_19, window_bounds = array<i64: 1, 64>}, {pipeline_mode = #tpu.pipeline_mode<synchronous>, transform_indices = @transform_20, window_bounds = array<i64: 16, 64>}, {pipeline_mode = #tpu.pipeline_mode<synchronous>, transform_indices = @transform_21, window_bounds = array<i64: 1, 16>}, {pipeline_mode = #tpu.pipeline_mode<synchronous>, transform_indices = @transform_22, window_bounds = array<i64: 64, 16>}, {pipeline_mode = #tpu.pipeline_mode<synchronous>, transform_indices = @transform_23, window_bounds = array<i64: 1, 16>}, {pipeline_mode = #tpu.pipeline_mode<synchronous>, transform_indices = @transform_24, window_bounds = array<i64: 1, 16>}, {pipeline_mode = #tpu.pipeline_mode<synchronous>, transform_indices = @transform_25, window_bounds = array<i64: 1, 16>}, {pipeline_mode = #tpu.pipeline_mode<synchronous>, transform_indices = @transform_26, window_bounds = array<i64: 1, 16>}, {pipeline_mode = #tpu.pipeline_mode<synchronous>, transform_indices = @transform_27, window_bounds = array<i64: 16, 16>}, {pipeline_mode = #tpu.pipeline_mode<synchronous>, transform_indices = @transform_28, window_bounds = array<i64: 16, 16>}, {pipeline_mode = #tpu.pipeline_mode<synchronous>, transform_indices = @transform_29, window_bounds = array<i64: 1, 16>}, {pipeline_mode = #tpu.pipeline_mode<synchronous>, transform_indices = @transform_30, window_bounds = array<i64: 16, 16>}, {pipeline_mode = #tpu.pipeline_mode<synchronous>, transform_indices = @transform_31, window_bounds = array<i64: 1, 48>}, {pipeline_mode = #tpu.pipeline_mode<synchronous>, transform_indices = @transform_32, window_bounds = array<i64: 16, 48>}, {pipeline_mode = #tpu.pipeline_mode<synchronous>, transform_indices = @transform_33, window_bounds = array<i64: 1, 64>}, {pipeline_mode = #tpu.pipeline_mode<synchronous>, transform_indices = @transform_34, window_bounds = array<i64: 1, 64>}, {pipeline_mode = #tpu.pipeline_mode<synchronous>, transform_indices = @transform_35, window_bounds = array<i64: 64, 32>}, {pipeline_mode = #tpu.pipeline_mode<synchronous>, transform_indices = @transform_36, window_bounds = array<i64: 4, 4, 16>}, {pipeline_mode = #tpu.pipeline_mode<synchronous>, transform_indices = @transform_37, window_bounds = array<i64: 1, 4, 4, 4>}, {pipeline_mode = #tpu.pipeline_mode<synchronous>, transform_indices = @transform_38, window_bounds = array<i64: 1, 128>}, {pipeline_mode = #tpu.pipeline_mode<synchronous>, transform_indices = @transform_39, window_bounds = array<i64: 32, 128>}, {pipeline_mode = #tpu.pipeline_mode<synchronous>, transform_indices = @transform_40, window_bounds = array<i64: 1, 32>}, {pipeline_mode = #tpu.pipeline_mode<synchronous>, transform_indices = @transform_41, window_bounds = array<i64: 128, 32>}, {pipeline_mode = #tpu.pipeline_mode<synchronous>, transform_indices = @transform_42, window_bounds = array<i64: 1, 32>}, {pipeline_mode = #tpu.pipeline_mode<synchronous>, transform_indices = @transform_43, window_bounds = array<i64: 1, 32>}, {pipeline_mode = #tpu.pipeline_mode<synchronous>, transform_indices = @transform_44, window_bounds = array<i64: 1, 32>}, {pipeline_mode = #tpu.pipeline_mode<synchronous>, transform_indices = @transform_45, window_bounds = array<i64: 1, 32>}, {pipeline_mode = #tpu.pipeline_mode<synchronous>, transform_indices = @transform_46, window_bounds = array<i64: 1, 32>}, {pipeline_mode = #tpu.pipeline_mode<synchronous>, transform_indices = @transform_47, window_bounds = array<i64: 32, 32>}, {pipeline_mode = #tpu.pipeline_mode<synchronous>, transform_indices = @transform_48, window_bounds = array<i64: 1, 96>}, {pipeline_mode = #tpu.pipeline_mode<synchronous>, transform_indices = @transform_49, window_bounds = array<i64: 32, 96>}, {pipeline_mode = #tpu.pipeline_mode<synchronous>, transform_indices = @transform_50, window_bounds = array<i64: 1, 4, 4, 4>}, {pipeline_mode = #tpu.pipeline_mode<synchronous>, transform_indices = @transform_51, window_bounds = array<i64: 1, 128>}, {pipeline_mode = #tpu.pipeline_mode<synchronous>, transform_indices = @transform_52, window_bounds = array<i64: 32, 128>}, {pipeline_mode = #tpu.pipeline_mode<synchronous>, transform_indices = @transform_53, window_bounds = array<i64: 1, 32>}, {pipeline_mode = #tpu.pipeline_mode<synchronous>, transform_indices = @transform_54, window_bounds = array<i64: 128, 32>}, {pipeline_mode = #tpu.pipeline_mode<synchronous>, transform_indices = @transform_55, window_bounds = array<i64: 1, 32>}, {pipeline_mode = #tpu.pipeline_mode<synchronous>, transform_indices = @transform_56, window_bounds = array<i64: 1, 32>}, {pipeline_mode = #tpu.pipeline_mode<synchronous>, transform_indices = @transform_57, window_bounds = array<i64: 1, 32>}, {pipeline_mode = #tpu.pipeline_mode<synchronous>, transform_indices = @transform_58, window_bounds = array<i64: 1, 32>}, {pipeline_mode = #tpu.pipeline_mode<synchronous>, transform_indices = @transform_59, window_bounds = array<i64: 1, 32>}, {pipeline_mode = #tpu.pipeline_mode<synchronous>, transform_indices = @transform_60, window_bounds = array<i64: 32, 32>}, {pipeline_mode = #tpu.pipeline_mode<synchronous>, transform_indices = @transform_61, window_bounds = array<i64: 1, 96>}, {pipeline_mode = #tpu.pipeline_mode<synchronous>, transform_indices = @transform_62, window_bounds = array<i64: 32, 96>}, {pipeline_mode = #tpu.pipeline_mode<synchronous>, transform_indices = @transform_63, window_bounds = array<i64: 1, 32>}, {pipeline_mode = #tpu.pipeline_mode<synchronous>, transform_indices = @transform_64, window_bounds = array<i64: 1, 32>}, {pipeline_mode = #tpu.pipeline_mode<synchronous>, transform_indices = @transform_65, window_bounds = array<i64: 1, 16>}, {pipeline_mode = #tpu.pipeline_mode<synchronous>, transform_indices = @transform_66, window_bounds = array<i64: 1, 16>}, {pipeline_mode = #tpu.pipeline_mode<synchronous>, transform_indices = @transform_67, window_bounds = array<i64: 1, 16>}, {pipeline_mode = #tpu.pipeline_mode<synchronous>, transform_indices = @transform_68, window_bounds = array<i64: 48, 16>}, {transform_indices = @transform_69, window_bounds = array<i64: 1, 1, 2>}]} {
    %c0 = arith.constant 0 : index
    %c0_0 = arith.constant 0 : index
    %c0_1 = arith.constant 0 : index
    %0 = vector.load %arg1[%c0, %c0_0, %c0_1] : memref<1x16x48xf32, #tpu.memory_space<vmem>>, vector<1x16x48xf32>
    %1 = vector.shape_cast %0 : vector<1x16x48xf32> to vector<16x48xf32>
    %c0_2 = arith.constant 0 : index
    %c0_3 = arith.constant 0 : index
    %2 = vector.load %arg69[%c0_2, %c0_3] : memref<48x16xf32, #tpu.memory_space<vmem>>, vector<48x16xf32>
    %3 = arith.truncf %1 : vector<16x48xf32> to vector<16x48xbf16>
    %4 = arith.truncf %2 : vector<48x16xf32> to vector<48x16xbf16>
    %cst = arith.constant dense<0.000000e+00> : vector<16x16xf32>
    %5 = tpu.matmul %3, %4, %cst {dimension_numbers = #tpu.dot_dimension_numbers<[1], [0], [0], [1], [0, 0, 1, 1], [], []>} : vector<16x48xbf16>, vector<48x16xbf16>, vector<16x16xf32> -> vector<16x16xf32>
    %c0_4 = arith.constant 0 : index
    %c0_5 = arith.constant 0 : index
    %6 = vector.load %arg68[%c0_4, %c0_5] : memref<1x16xf32, #tpu.memory_space<vmem>>, vector<1x16xf32>
    %7 = vector.broadcast %6 : vector<1x16xf32> to vector<16x16xf32>
    %8 = arith.addf %5, %7 : vector<16x16xf32>
    %c0_6 = arith.constant 0 : index
    %c0_7 = arith.constant 0 : index
    %9 = vector.load %arg67[%c0_6, %c0_7] : memref<1x16xf32, #tpu.memory_space<vmem>>, vector<1x16xf32>
    %c0_8 = arith.constant 0 : index
    %c0_9 = arith.constant 0 : index
    %10 = vector.load %arg66[%c0_8, %c0_9] : memref<1x16xf32, #tpu.memory_space<vmem>>, vector<1x16xf32>
    %cst_10 = arith.constant dense<0.000000e+00> : vector<16xf32>
    %11 = vector.multi_reduction <add>, %8, %cst_10 [1] : vector<16x16xf32> to vector<16xf32>
    %12 = vector.shape_cast %11 : vector<16xf32> to vector<16x1xf32>
    %cst_11 = arith.constant 1.600000e+01 : f32
    %13 = vector.broadcast %cst_11 : f32 to vector<16x1xf32>
    %14 = arith.divf %12, %13 : vector<16x1xf32>
    %15 = vector.broadcast %14 : vector<16x1xf32> to vector<16x16xf32>
    %16 = arith.subf %8, %15 : vector<16x16xf32>
    %17 = arith.mulf %16, %16 : vector<16x16xf32>
    %cst_12 = arith.constant dense<0.000000e+00> : vector<16xf32>
    %18 = vector.multi_reduction <add>, %17, %cst_12 [1] : vector<16x16xf32> to vector<16xf32>
    %19 = vector.shape_cast %18 : vector<16xf32> to vector<16x1xf32>
    %cst_13 = arith.constant 1.600000e+01 : f32
    %20 = vector.broadcast %cst_13 : f32 to vector<16x1xf32>
    %21 = arith.divf %19, %20 : vector<16x1xf32>
    %cst_14 = arith.constant 9.99999974E-6 : f32
    %22 = vector.broadcast %cst_14 : f32 to vector<16x1xf32>
    %23 = arith.addf %21, %22 : vector<16x1xf32>
    %24 = math.rsqrt %23 : vector<16x1xf32>
    %25 = vector.broadcast %24 : vector<16x1xf32> to vector<16x16xf32>
    %26 = arith.mulf %16, %25 : vector<16x16xf32>
    %27 = vector.broadcast %9 : vector<1x16xf32> to vector<16x16xf32>
    %28 = arith.mulf %26, %27 : vector<16x16xf32>
    %29 = vector.broadcast %10 : vector<1x16xf32> to vector<16x16xf32>
    %30 = arith.addf %28, %29 : vector<16x16xf32>
    %c0_15 = arith.constant 0 : index
    %c0_16 = arith.constant 0 : index
    %31 = vector.load %arg10[%c0_15, %c0_16] : memref<1x16xf32, #tpu.memory_space<vmem>>, vector<1x16xf32>
    %c0_17 = arith.constant 0 : index
    %c0_18 = arith.constant 0 : index
    %32 = vector.load %arg9[%c0_17, %c0_18] : memref<1x16xf32, #tpu.memory_space<vmem>>, vector<1x16xf32>
    %cst_19 = arith.constant dense<0.000000e+00> : vector<16xf32>
    %33 = vector.multi_reduction <add>, %30, %cst_19 [1] : vector<16x16xf32> to vector<16xf32>
    %34 = vector.shape_cast %33 : vector<16xf32> to vector<16x1xf32>
    %cst_20 = arith.constant 1.600000e+01 : f32
    %35 = vector.broadcast %cst_20 : f32 to vector<16x1xf32>
    %36 = arith.divf %34, %35 : vector<16x1xf32>
    %37 = vector.broadcast %36 : vector<16x1xf32> to vector<16x16xf32>
    %38 = arith.subf %30, %37 : vector<16x16xf32>
    %39 = arith.mulf %38, %38 : vector<16x16xf32>
    %cst_21 = arith.constant dense<0.000000e+00> : vector<16xf32>
    %40 = vector.multi_reduction <add>, %39, %cst_21 [1] : vector<16x16xf32> to vector<16xf32>
    %41 = vector.shape_cast %40 : vector<16xf32> to vector<16x1xf32>
    %cst_22 = arith.constant 1.600000e+01 : f32
    %42 = vector.broadcast %cst_22 : f32 to vector<16x1xf32>
    %43 = arith.divf %41, %42 : vector<16x1xf32>
    %cst_23 = arith.constant 9.99999974E-6 : f32
    %44 = vector.broadcast %cst_23 : f32 to vector<16x1xf32>
    %45 = arith.addf %43, %44 : vector<16x1xf32>
    %46 = math.rsqrt %45 : vector<16x1xf32>
    %47 = vector.broadcast %46 : vector<16x1xf32> to vector<16x16xf32>
    %48 = arith.mulf %38, %47 : vector<16x16xf32>
    %49 = vector.broadcast %31 : vector<1x16xf32> to vector<16x16xf32>
    %50 = arith.mulf %48, %49 : vector<16x16xf32>
    %51 = vector.broadcast %32 : vector<1x16xf32> to vector<16x16xf32>
    %52 = arith.addf %50, %51 : vector<16x16xf32>
    %c0_24 = arith.constant 0 : index
    %c0_25 = arith.constant 0 : index
    %53 = vector.load %arg18[%c0_24, %c0_25] : memref<16x48xf32, #tpu.memory_space<vmem>>, vector<16x48xf32>
    %54 = arith.truncf %52 : vector<16x16xf32> to vector<16x16xbf16>
    %55 = arith.truncf %53 : vector<16x48xf32> to vector<16x48xbf16>
    %cst_26 = arith.constant dense<0.000000e+00> : vector<16x48xf32>
    %56 = tpu.matmul %54, %55, %cst_26 {dimension_numbers = #tpu.dot_dimension_numbers<[1], [0], [0], [1], [0, 0, 1, 1], [], []>} : vector<16x16xbf16>, vector<16x48xbf16>, vector<16x48xf32> -> vector<16x48xf32>
    %c0_27 = arith.constant 0 : index
    %c0_28 = arith.constant 0 : index
    %57 = vector.load %arg17[%c0_27, %c0_28] : memref<1x48xf32, #tpu.memory_space<vmem>>, vector<1x48xf32>
    %58 = vector.broadcast %57 : vector<1x48xf32> to vector<16x48xf32>
    %59 = arith.addf %56, %58 : vector<16x48xf32>
    %c0_29 = arith.constant 0 : index
    %c0_30 = arith.constant 0 : index
    %60 = vector.load %arg13[%c0_29, %c0_30] : memref<16x16xf32, #tpu.memory_space<vmem>>, vector<16x16xf32>
    %61 = arith.truncf %60 : vector<16x16xf32> to vector<16x16xbf16>
    %62 = arith.truncf %59 : vector<16x48xf32> to vector<16x48xbf16>
    %cst_31 = arith.constant dense<0.000000e+00> : vector<16x48xf32>
    %63 = tpu.matmul %61, %62, %cst_31 {dimension_numbers = #tpu.dot_dimension_numbers<[1], [0], [0], [1], [0, 0, 1, 1], [], []>} : vector<16x16xbf16>, vector<16x48xbf16>, vector<16x48xf32> -> vector<16x48xf32>
    %64 = vector.extract_strided_slice %63 {offsets = [0, 0], sizes = [4, 8], strides = [1, 1]} : vector<16x48xf32> to vector<4x8xf32>
    %65 = vector.extract_strided_slice %63 {offsets = [0, 16], sizes = [4, 8], strides = [1, 1]} : vector<16x48xf32> to vector<4x8xf32>
    %66 = vector.extract_strided_slice %63 {offsets = [0, 32], sizes = [4, 8], strides = [1, 1]} : vector<16x48xf32> to vector<4x8xf32>
    %67 = arith.truncf %64 : vector<4x8xf32> to vector<4x8xbf16>
    %68 = arith.truncf %65 : vector<4x8xf32> to vector<4x8xbf16>
    %cst_32 = arith.constant dense<0.000000e+00> : vector<4x4xf32>
    %69 = tpu.matmul %67, %68, %cst_32 {dimension_numbers = #tpu.dot_dimension_numbers<[1], [1], [0], [0], [0, 0, 1, 0], [], []>} : vector<4x8xbf16>, vector<4x8xbf16>, vector<4x4xf32> -> vector<4x4xf32>
    %c0_33 = arith.constant 0 : index
    %c0_34 = arith.constant 0 : index
    %c0_35 = arith.constant 0 : index
    %c0_36 = arith.constant 0 : index
    %70 = vector.load %arg4[%c0_33, %c0_34, %c0_35, %c0_36] : memref<4x2x4x4xf32, #tpu.memory_space<vmem>>, vector<1x1x4x4xf32>
    %71 = vector.shape_cast %70 : vector<1x1x4x4xf32> to vector<4x4xf32>
    %72 = arith.addf %69, %71 : vector<4x4xf32>
    %cst_37 = arith.constant dense<0xFF800000> : vector<4xf32>
    %73 = vector.multi_reduction <maximumf>, %72, %cst_37 [1] : vector<4x4xf32> to vector<4xf32>
    %74 = vector.shape_cast %73 : vector<4xf32> to vector<4x1xf32>
    %75 = vector.broadcast %74 : vector<4x1xf32> to vector<4x4xf32>
    %76 = arith.subf %72, %75 : vector<4x4xf32>
    %77 = math.exp %76 : vector<4x4xf32>
    %cst_38 = arith.constant dense<0.000000e+00> : vector<4xf32>
    %78 = vector.multi_reduction <add>, %77, %cst_38 [1] : vector<4x4xf32> to vector<4xf32>
    %79 = vector.shape_cast %78 : vector<4xf32> to vector<4x1xf32>
    %80 = tpu.reciprocal %79 {approx = true} : vector<4x1xf32> -> vector<4x1xf32>
    %81 = vector.broadcast %80 : vector<4x1xf32> to vector<4x4xf32>
    %82 = arith.mulf %77, %81 : vector<4x4xf32>
    %83 = arith.truncf %82 : vector<4x4xf32> to vector<4x4xbf16>
    %84 = arith.truncf %66 : vector<4x8xf32> to vector<4x8xbf16>
    %cst_39 = arith.constant dense<0.000000e+00> : vector<4x8xf32>
    %85 = tpu.matmul %83, %84, %cst_39 {dimension_numbers = #tpu.dot_dimension_numbers<[1], [0], [0], [1], [0, 0, 1, 1], [], []>} : vector<4x4xbf16>, vector<4x8xbf16>, vector<4x8xf32> -> vector<4x8xf32>
    %86 = vector.extract_strided_slice %63 {offsets = [0, 8], sizes = [4, 8], strides = [1, 1]} : vector<16x48xf32> to vector<4x8xf32>
    %87 = vector.extract_strided_slice %63 {offsets = [0, 24], sizes = [4, 8], strides = [1, 1]} : vector<16x48xf32> to vector<4x8xf32>
    %88 = vector.extract_strided_slice %63 {offsets = [0, 40], sizes = [4, 8], strides = [1, 1]} : vector<16x48xf32> to vector<4x8xf32>
    %89 = arith.truncf %86 : vector<4x8xf32> to vector<4x8xbf16>
    %90 = arith.truncf %87 : vector<4x8xf32> to vector<4x8xbf16>
    %cst_40 = arith.constant dense<0.000000e+00> : vector<4x4xf32>
    %91 = tpu.matmul %89, %90, %cst_40 {dimension_numbers = #tpu.dot_dimension_numbers<[1], [1], [0], [0], [0, 0, 1, 0], [], []>} : vector<4x8xbf16>, vector<4x8xbf16>, vector<4x4xf32> -> vector<4x4xf32>
    %c0_41 = arith.constant 0 : index
    %c1 = arith.constant 1 : index
    %c0_42 = arith.constant 0 : index
    %c0_43 = arith.constant 0 : index
    %92 = vector.load %arg4[%c0_41, %c1, %c0_42, %c0_43] : memref<4x2x4x4xf32, #tpu.memory_space<vmem>>, vector<1x1x4x4xf32>
    %93 = vector.shape_cast %92 : vector<1x1x4x4xf32> to vector<4x4xf32>
    %94 = arith.addf %91, %93 : vector<4x4xf32>
    %cst_44 = arith.constant dense<0xFF800000> : vector<4xf32>
    %95 = vector.multi_reduction <maximumf>, %94, %cst_44 [1] : vector<4x4xf32> to vector<4xf32>
    %96 = vector.shape_cast %95 : vector<4xf32> to vector<4x1xf32>
    %97 = vector.broadcast %96 : vector<4x1xf32> to vector<4x4xf32>
    %98 = arith.subf %94, %97 : vector<4x4xf32>
    %99 = math.exp %98 : vector<4x4xf32>
    %cst_45 = arith.constant dense<0.000000e+00> : vector<4xf32>
    %100 = vector.multi_reduction <add>, %99, %cst_45 [1] : vector<4x4xf32> to vector<4xf32>
    %101 = vector.shape_cast %100 : vector<4xf32> to vector<4x1xf32>
    %102 = tpu.reciprocal %101 {approx = true} : vector<4x1xf32> -> vector<4x1xf32>
    %103 = vector.broadcast %102 : vector<4x1xf32> to vector<4x4xf32>
    %104 = arith.mulf %99, %103 : vector<4x4xf32>
    %105 = arith.truncf %104 : vector<4x4xf32> to vector<4x4xbf16>
    %106 = arith.truncf %88 : vector<4x8xf32> to vector<4x8xbf16>
    %cst_46 = arith.constant dense<0.000000e+00> : vector<4x8xf32>
    %107 = tpu.matmul %105, %106, %cst_46 {dimension_numbers = #tpu.dot_dimension_numbers<[1], [0], [0], [1], [0, 0, 1, 1], [], []>} : vector<4x4xbf16>, vector<4x8xbf16>, vector<4x8xf32> -> vector<4x8xf32>
    %108 = tpu.concatenate %85, %107 in 1 : vector<4x8xf32>, vector<4x8xf32> -> vector<4x16xf32>
    %109 = vector.extract_strided_slice %63 {offsets = [4, 0], sizes = [4, 8], strides = [1, 1]} : vector<16x48xf32> to vector<4x8xf32>
    %110 = vector.extract_strided_slice %63 {offsets = [4, 16], sizes = [4, 8], strides = [1, 1]} : vector<16x48xf32> to vector<4x8xf32>
    %111 = vector.extract_strided_slice %63 {offsets = [4, 32], sizes = [4, 8], strides = [1, 1]} : vector<16x48xf32> to vector<4x8xf32>
    %112 = arith.truncf %109 : vector<4x8xf32> to vector<4x8xbf16>
    %113 = arith.truncf %110 : vector<4x8xf32> to vector<4x8xbf16>
    %cst_47 = arith.constant dense<0.000000e+00> : vector<4x4xf32>
    %114 = tpu.matmul %112, %113, %cst_47 {dimension_numbers = #tpu.dot_dimension_numbers<[1], [1], [0], [0], [0, 0, 1, 0], [], []>} : vector<4x8xbf16>, vector<4x8xbf16>, vector<4x4xf32> -> vector<4x4xf32>
    %c1_48 = arith.constant 1 : index
    %c0_49 = arith.constant 0 : index
    %c0_50 = arith.constant 0 : index
    %c0_51 = arith.constant 0 : index
    %115 = vector.load %arg4[%c1_48, %c0_49, %c0_50, %c0_51] : memref<4x2x4x4xf32, #tpu.memory_space<vmem>>, vector<1x1x4x4xf32>
    %116 = vector.shape_cast %115 : vector<1x1x4x4xf32> to vector<4x4xf32>
    %117 = arith.addf %114, %116 : vector<4x4xf32>
    %cst_52 = arith.constant dense<0xFF800000> : vector<4xf32>
    %118 = vector.multi_reduction <maximumf>, %117, %cst_52 [1] : vector<4x4xf32> to vector<4xf32>
    %119 = vector.shape_cast %118 : vector<4xf32> to vector<4x1xf32>
    %120 = vector.broadcast %119 : vector<4x1xf32> to vector<4x4xf32>
    %121 = arith.subf %117, %120 : vector<4x4xf32>
    %122 = math.exp %121 : vector<4x4xf32>
    %cst_53 = arith.constant dense<0.000000e+00> : vector<4xf32>
    %123 = vector.multi_reduction <add>, %122, %cst_53 [1] : vector<4x4xf32> to vector<4xf32>
    %124 = vector.shape_cast %123 : vector<4xf32> to vector<4x1xf32>
    %125 = tpu.reciprocal %124 {approx = true} : vector<4x1xf32> -> vector<4x1xf32>
    %126 = vector.broadcast %125 : vector<4x1xf32> to vector<4x4xf32>
    %127 = arith.mulf %122, %126 : vector<4x4xf32>
    %128 = arith.truncf %127 : vector<4x4xf32> to vector<4x4xbf16>
    %129 = arith.truncf %111 : vector<4x8xf32> to vector<4x8xbf16>
    %cst_54 = arith.constant dense<0.000000e+00> : vector<4x8xf32>
    %130 = tpu.matmul %128, %129, %cst_54 {dimension_numbers = #tpu.dot_dimension_numbers<[1], [0], [0], [1], [0, 0, 1, 1], [], []>} : vector<4x4xbf16>, vector<4x8xbf16>, vector<4x8xf32> -> vector<4x8xf32>
    %131 = vector.extract_strided_slice %63 {offsets = [4, 8], sizes = [4, 8], strides = [1, 1]} : vector<16x48xf32> to vector<4x8xf32>
    %132 = vector.extract_strided_slice %63 {offsets = [4, 24], sizes = [4, 8], strides = [1, 1]} : vector<16x48xf32> to vector<4x8xf32>
    %133 = vector.extract_strided_slice %63 {offsets = [4, 40], sizes = [4, 8], strides = [1, 1]} : vector<16x48xf32> to vector<4x8xf32>
    %134 = arith.truncf %131 : vector<4x8xf32> to vector<4x8xbf16>
    %135 = arith.truncf %132 : vector<4x8xf32> to vector<4x8xbf16>
    %cst_55 = arith.constant dense<0.000000e+00> : vector<4x4xf32>
    %136 = tpu.matmul %134, %135, %cst_55 {dimension_numbers = #tpu.dot_dimension_numbers<[1], [1], [0], [0], [0, 0, 1, 0], [], []>} : vector<4x8xbf16>, vector<4x8xbf16>, vector<4x4xf32> -> vector<4x4xf32>
    %c1_56 = arith.constant 1 : index
    %c1_57 = arith.constant 1 : index
    %c0_58 = arith.constant 0 : index
    %c0_59 = arith.constant 0 : index
    %137 = vector.load %arg4[%c1_56, %c1_57, %c0_58, %c0_59] : memref<4x2x4x4xf32, #tpu.memory_space<vmem>>, vector<1x1x4x4xf32>
    %138 = vector.shape_cast %137 : vector<1x1x4x4xf32> to vector<4x4xf32>
    %139 = arith.addf %136, %138 : vector<4x4xf32>
    %cst_60 = arith.constant dense<0xFF800000> : vector<4xf32>
    %140 = vector.multi_reduction <maximumf>, %139, %cst_60 [1] : vector<4x4xf32> to vector<4xf32>
    %141 = vector.shape_cast %140 : vector<4xf32> to vector<4x1xf32>
    %142 = vector.broadcast %141 : vector<4x1xf32> to vector<4x4xf32>
    %143 = arith.subf %139, %142 : vector<4x4xf32>
    %144 = math.exp %143 : vector<4x4xf32>
    %cst_61 = arith.constant dense<0.000000e+00> : vector<4xf32>
    %145 = vector.multi_reduction <add>, %144, %cst_61 [1] : vector<4x4xf32> to vector<4xf32>
    %146 = vector.shape_cast %145 : vector<4xf32> to vector<4x1xf32>
    %147 = tpu.reciprocal %146 {approx = true} : vector<4x1xf32> -> vector<4x1xf32>
    %148 = vector.broadcast %147 : vector<4x1xf32> to vector<4x4xf32>
    %149 = arith.mulf %144, %148 : vector<4x4xf32>
    %150 = arith.truncf %149 : vector<4x4xf32> to vector<4x4xbf16>
    %151 = arith.truncf %133 : vector<4x8xf32> to vector<4x8xbf16>
    %cst_62 = arith.constant dense<0.000000e+00> : vector<4x8xf32>
    %152 = tpu.matmul %150, %151, %cst_62 {dimension_numbers = #tpu.dot_dimension_numbers<[1], [0], [0], [1], [0, 0, 1, 1], [], []>} : vector<4x4xbf16>, vector<4x8xbf16>, vector<4x8xf32> -> vector<4x8xf32>
    %153 = tpu.concatenate %130, %152 in 1 : vector<4x8xf32>, vector<4x8xf32> -> vector<4x16xf32>
    %154 = vector.extract_strided_slice %63 {offsets = [8, 0], sizes = [4, 8], strides = [1, 1]} : vector<16x48xf32> to vector<4x8xf32>
    %155 = vector.extract_strided_slice %63 {offsets = [8, 16], sizes = [4, 8], strides = [1, 1]} : vector<16x48xf32> to vector<4x8xf32>
    %156 = vector.extract_strided_slice %63 {offsets = [8, 32], sizes = [4, 8], strides = [1, 1]} : vector<16x48xf32> to vector<4x8xf32>
    %157 = arith.truncf %154 : vector<4x8xf32> to vector<4x8xbf16>
    %158 = arith.truncf %155 : vector<4x8xf32> to vector<4x8xbf16>
    %cst_63 = arith.constant dense<0.000000e+00> : vector<4x4xf32>
    %159 = tpu.matmul %157, %158, %cst_63 {dimension_numbers = #tpu.dot_dimension_numbers<[1], [1], [0], [0], [0, 0, 1, 0], [], []>} : vector<4x8xbf16>, vector<4x8xbf16>, vector<4x4xf32> -> vector<4x4xf32>
    %c2 = arith.constant 2 : index
    %c0_64 = arith.constant 0 : index
    %c0_65 = arith.constant 0 : index
    %c0_66 = arith.constant 0 : index
    %160 = vector.load %arg4[%c2, %c0_64, %c0_65, %c0_66] : memref<4x2x4x4xf32, #tpu.memory_space<vmem>>, vector<1x1x4x4xf32>
    %161 = vector.shape_cast %160 : vector<1x1x4x4xf32> to vector<4x4xf32>
    %162 = arith.addf %159, %161 : vector<4x4xf32>
    %cst_67 = arith.constant dense<0xFF800000> : vector<4xf32>
    %163 = vector.multi_reduction <maximumf>, %162, %cst_67 [1] : vector<4x4xf32> to vector<4xf32>
    %164 = vector.shape_cast %163 : vector<4xf32> to vector<4x1xf32>
    %165 = vector.broadcast %164 : vector<4x1xf32> to vector<4x4xf32>
    %166 = arith.subf %162, %165 : vector<4x4xf32>
    %167 = math.exp %166 : vector<4x4xf32>
    %cst_68 = arith.constant dense<0.000000e+00> : vector<4xf32>
    %168 = vector.multi_reduction <add>, %167, %cst_68 [1] : vector<4x4xf32> to vector<4xf32>
    %169 = vector.shape_cast %168 : vector<4xf32> to vector<4x1xf32>
    %170 = tpu.reciprocal %169 {approx = true} : vector<4x1xf32> -> vector<4x1xf32>
    %171 = vector.broadcast %170 : vector<4x1xf32> to vector<4x4xf32>
    %172 = arith.mulf %167, %171 : vector<4x4xf32>
    %173 = arith.truncf %172 : vector<4x4xf32> to vector<4x4xbf16>
    %174 = arith.truncf %156 : vector<4x8xf32> to vector<4x8xbf16>
    %cst_69 = arith.constant dense<0.000000e+00> : vector<4x8xf32>
    %175 = tpu.matmul %173, %174, %cst_69 {dimension_numbers = #tpu.dot_dimension_numbers<[1], [0], [0], [1], [0, 0, 1, 1], [], []>} : vector<4x4xbf16>, vector<4x8xbf16>, vector<4x8xf32> -> vector<4x8xf32>
    %176 = vector.extract_strided_slice %63 {offsets = [8, 8], sizes = [4, 8], strides = [1, 1]} : vector<16x48xf32> to vector<4x8xf32>
    %177 = vector.extract_strided_slice %63 {offsets = [8, 24], sizes = [4, 8], strides = [1, 1]} : vector<16x48xf32> to vector<4x8xf32>
    %178 = vector.extract_strided_slice %63 {offsets = [8, 40], sizes = [4, 8], strides = [1, 1]} : vector<16x48xf32> to vector<4x8xf32>
    %179 = arith.truncf %176 : vector<4x8xf32> to vector<4x8xbf16>
    %180 = arith.truncf %177 : vector<4x8xf32> to vector<4x8xbf16>
    %cst_70 = arith.constant dense<0.000000e+00> : vector<4x4xf32>
    %181 = tpu.matmul %179, %180, %cst_70 {dimension_numbers = #tpu.dot_dimension_numbers<[1], [1], [0], [0], [0, 0, 1, 0], [], []>} : vector<4x8xbf16>, vector<4x8xbf16>, vector<4x4xf32> -> vector<4x4xf32>
    %c2_71 = arith.constant 2 : index
    %c1_72 = arith.constant 1 : index
    %c0_73 = arith.constant 0 : index
    %c0_74 = arith.constant 0 : index
    %182 = vector.load %arg4[%c2_71, %c1_72, %c0_73, %c0_74] : memref<4x2x4x4xf32, #tpu.memory_space<vmem>>, vector<1x1x4x4xf32>
    %183 = vector.shape_cast %182 : vector<1x1x4x4xf32> to vector<4x4xf32>
    %184 = arith.addf %181, %183 : vector<4x4xf32>
    %cst_75 = arith.constant dense<0xFF800000> : vector<4xf32>
    %185 = vector.multi_reduction <maximumf>, %184, %cst_75 [1] : vector<4x4xf32> to vector<4xf32>
    %186 = vector.shape_cast %185 : vector<4xf32> to vector<4x1xf32>
    %187 = vector.broadcast %186 : vector<4x1xf32> to vector<4x4xf32>
    %188 = arith.subf %184, %187 : vector<4x4xf32>
    %189 = math.exp %188 : vector<4x4xf32>
    %cst_76 = arith.constant dense<0.000000e+00> : vector<4xf32>
    %190 = vector.multi_reduction <add>, %189, %cst_76 [1] : vector<4x4xf32> to vector<4xf32>
    %191 = vector.shape_cast %190 : vector<4xf32> to vector<4x1xf32>
    %192 = tpu.reciprocal %191 {approx = true} : vector<4x1xf32> -> vector<4x1xf32>
    %193 = vector.broadcast %192 : vector<4x1xf32> to vector<4x4xf32>
    %194 = arith.mulf %189, %193 : vector<4x4xf32>
    %195 = arith.truncf %194 : vector<4x4xf32> to vector<4x4xbf16>
    %196 = arith.truncf %178 : vector<4x8xf32> to vector<4x8xbf16>
    %cst_77 = arith.constant dense<0.000000e+00> : vector<4x8xf32>
    %197 = tpu.matmul %195, %196, %cst_77 {dimension_numbers = #tpu.dot_dimension_numbers<[1], [0], [0], [1], [0, 0, 1, 1], [], []>} : vector<4x4xbf16>, vector<4x8xbf16>, vector<4x8xf32> -> vector<4x8xf32>
    %198 = tpu.concatenate %175, %197 in 1 : vector<4x8xf32>, vector<4x8xf32> -> vector<4x16xf32>
    %199 = vector.extract_strided_slice %63 {offsets = [12, 0], sizes = [4, 8], strides = [1, 1]} : vector<16x48xf32> to vector<4x8xf32>
    %200 = vector.extract_strided_slice %63 {offsets = [12, 16], sizes = [4, 8], strides = [1, 1]} : vector<16x48xf32> to vector<4x8xf32>
    %201 = vector.extract_strided_slice %63 {offsets = [12, 32], sizes = [4, 8], strides = [1, 1]} : vector<16x48xf32> to vector<4x8xf32>
    %202 = arith.truncf %199 : vector<4x8xf32> to vector<4x8xbf16>
    %203 = arith.truncf %200 : vector<4x8xf32> to vector<4x8xbf16>
    %cst_78 = arith.constant dense<0.000000e+00> : vector<4x4xf32>
    %204 = tpu.matmul %202, %203, %cst_78 {dimension_numbers = #tpu.dot_dimension_numbers<[1], [1], [0], [0], [0, 0, 1, 0], [], []>} : vector<4x8xbf16>, vector<4x8xbf16>, vector<4x4xf32> -> vector<4x4xf32>
    %c3 = arith.constant 3 : index
    %c0_79 = arith.constant 0 : index
    %c0_80 = arith.constant 0 : index
    %c0_81 = arith.constant 0 : index
    %205 = vector.load %arg4[%c3, %c0_79, %c0_80, %c0_81] : memref<4x2x4x4xf32, #tpu.memory_space<vmem>>, vector<1x1x4x4xf32>
    %206 = vector.shape_cast %205 : vector<1x1x4x4xf32> to vector<4x4xf32>
    %207 = arith.addf %204, %206 : vector<4x4xf32>
    %cst_82 = arith.constant dense<0xFF800000> : vector<4xf32>
    %208 = vector.multi_reduction <maximumf>, %207, %cst_82 [1] : vector<4x4xf32> to vector<4xf32>
    %209 = vector.shape_cast %208 : vector<4xf32> to vector<4x1xf32>
    %210 = vector.broadcast %209 : vector<4x1xf32> to vector<4x4xf32>
    %211 = arith.subf %207, %210 : vector<4x4xf32>
    %212 = math.exp %211 : vector<4x4xf32>
    %cst_83 = arith.constant dense<0.000000e+00> : vector<4xf32>
    %213 = vector.multi_reduction <add>, %212, %cst_83 [1] : vector<4x4xf32> to vector<4xf32>
    %214 = vector.shape_cast %213 : vector<4xf32> to vector<4x1xf32>
    %215 = tpu.reciprocal %214 {approx = true} : vector<4x1xf32> -> vector<4x1xf32>
    %216 = vector.broadcast %215 : vector<4x1xf32> to vector<4x4xf32>
    %217 = arith.mulf %212, %216 : vector<4x4xf32>
    %218 = arith.truncf %217 : vector<4x4xf32> to vector<4x4xbf16>
    %219 = arith.truncf %201 : vector<4x8xf32> to vector<4x8xbf16>
    %cst_84 = arith.constant dense<0.000000e+00> : vector<4x8xf32>
    %220 = tpu.matmul %218, %219, %cst_84 {dimension_numbers = #tpu.dot_dimension_numbers<[1], [0], [0], [1], [0, 0, 1, 1], [], []>} : vector<4x4xbf16>, vector<4x8xbf16>, vector<4x8xf32> -> vector<4x8xf32>
    %221 = vector.extract_strided_slice %63 {offsets = [12, 8], sizes = [4, 8], strides = [1, 1]} : vector<16x48xf32> to vector<4x8xf32>
    %222 = vector.extract_strided_slice %63 {offsets = [12, 24], sizes = [4, 8], strides = [1, 1]} : vector<16x48xf32> to vector<4x8xf32>
    %223 = vector.extract_strided_slice %63 {offsets = [12, 40], sizes = [4, 8], strides = [1, 1]} : vector<16x48xf32> to vector<4x8xf32>
    %224 = arith.truncf %221 : vector<4x8xf32> to vector<4x8xbf16>
    %225 = arith.truncf %222 : vector<4x8xf32> to vector<4x8xbf16>
    %cst_85 = arith.constant dense<0.000000e+00> : vector<4x4xf32>
    %226 = tpu.matmul %224, %225, %cst_85 {dimension_numbers = #tpu.dot_dimension_numbers<[1], [1], [0], [0], [0, 0, 1, 0], [], []>} : vector<4x8xbf16>, vector<4x8xbf16>, vector<4x4xf32> -> vector<4x4xf32>
    %c3_86 = arith.constant 3 : index
    %c1_87 = arith.constant 1 : index
    %c0_88 = arith.constant 0 : index
    %c0_89 = arith.constant 0 : index
    %227 = vector.load %arg4[%c3_86, %c1_87, %c0_88, %c0_89] : memref<4x2x4x4xf32, #tpu.memory_space<vmem>>, vector<1x1x4x4xf32>
    %228 = vector.shape_cast %227 : vector<1x1x4x4xf32> to vector<4x4xf32>
    %229 = arith.addf %226, %228 : vector<4x4xf32>
    %cst_90 = arith.constant dense<0xFF800000> : vector<4xf32>
    %230 = vector.multi_reduction <maximumf>, %229, %cst_90 [1] : vector<4x4xf32> to vector<4xf32>
    %231 = vector.shape_cast %230 : vector<4xf32> to vector<4x1xf32>
    %232 = vector.broadcast %231 : vector<4x1xf32> to vector<4x4xf32>
    %233 = arith.subf %229, %232 : vector<4x4xf32>
    %234 = math.exp %233 : vector<4x4xf32>
    %cst_91 = arith.constant dense<0.000000e+00> : vector<4xf32>
    %235 = vector.multi_reduction <add>, %234, %cst_91 [1] : vector<4x4xf32> to vector<4xf32>
    %236 = vector.shape_cast %235 : vector<4xf32> to vector<4x1xf32>
    %237 = tpu.reciprocal %236 {approx = true} : vector<4x1xf32> -> vector<4x1xf32>
    %238 = vector.broadcast %237 : vector<4x1xf32> to vector<4x4xf32>
    %239 = arith.mulf %234, %238 : vector<4x4xf32>
    %240 = arith.truncf %239 : vector<4x4xf32> to vector<4x4xbf16>
    %241 = arith.truncf %223 : vector<4x8xf32> to vector<4x8xbf16>
    %cst_92 = arith.constant dense<0.000000e+00> : vector<4x8xf32>
    %242 = tpu.matmul %240, %241, %cst_92 {dimension_numbers = #tpu.dot_dimension_numbers<[1], [0], [0], [1], [0, 0, 1, 1], [], []>} : vector<4x4xbf16>, vector<4x8xbf16>, vector<4x8xf32> -> vector<4x8xf32>
    %243 = tpu.concatenate %220, %242 in 1 : vector<4x8xf32>, vector<4x8xf32> -> vector<4x16xf32>
    %244 = tpu.concatenate %108, %153, %198, %243 in 0 : vector<4x16xf32>, vector<4x16xf32>, vector<4x16xf32>, vector<4x16xf32> -> vector<16x16xf32>
    %c0_93 = arith.constant 0 : index
    %c0_94 = arith.constant 0 : index
    %245 = vector.load %arg16[%c0_93, %c0_94] : memref<16x16xf32, #tpu.memory_space<vmem>>, vector<16x16xf32>
    %246 = arith.truncf %244 : vector<16x16xf32> to vector<16x16xbf16>
    %247 = arith.truncf %245 : vector<16x16xf32> to vector<16x16xbf16>
    %cst_95 = arith.constant dense<0.000000e+00> : vector<16x16xf32>
    %248 = tpu.matmul %246, %247, %cst_95 {dimension_numbers = #tpu.dot_dimension_numbers<[1], [0], [0], [1], [0, 0, 1, 1], [], []>} : vector<16x16xbf16>, vector<16x16xbf16>, vector<16x16xf32> -> vector<16x16xf32>
    %c0_96 = arith.constant 0 : index
    %c0_97 = arith.constant 0 : index
    %249 = vector.load %arg14[%c0_96, %c0_97] : memref<16x16xf32, #tpu.memory_space<vmem>>, vector<16x16xf32>
    %250 = arith.truncf %249 : vector<16x16xf32> to vector<16x16xbf16>
    %251 = arith.truncf %248 : vector<16x16xf32> to vector<16x16xbf16>
    %cst_98 = arith.constant dense<0.000000e+00> : vector<16x16xf32>
    %252 = tpu.matmul %250, %251, %cst_98 {dimension_numbers = #tpu.dot_dimension_numbers<[1], [0], [0], [1], [0, 0, 1, 1], [], []>} : vector<16x16xbf16>, vector<16x16xbf16>, vector<16x16xf32> -> vector<16x16xf32>
    %253 = arith.addf %30, %252 : vector<16x16xf32>
    %c0_99 = arith.constant 0 : index
    %c0_100 = arith.constant 0 : index
    %254 = vector.load %arg15[%c0_99, %c0_100] : memref<1x16xf32, #tpu.memory_space<vmem>>, vector<1x16xf32>
    %255 = vector.broadcast %254 : vector<1x16xf32> to vector<16x16xf32>
    %256 = arith.addf %253, %255 : vector<16x16xf32>
    %c0_101 = arith.constant 0 : index
    %c0_102 = arith.constant 0 : index
    %257 = vector.load %arg12[%c0_101, %c0_102] : memref<1x16xf32, #tpu.memory_space<vmem>>, vector<1x16xf32>
    %c0_103 = arith.constant 0 : index
    %c0_104 = arith.constant 0 : index
    %258 = vector.load %arg11[%c0_103, %c0_104] : memref<1x16xf32, #tpu.memory_space<vmem>>, vector<1x16xf32>
    %cst_105 = arith.constant dense<0.000000e+00> : vector<16xf32>
    %259 = vector.multi_reduction <add>, %256, %cst_105 [1] : vector<16x16xf32> to vector<16xf32>
    %260 = vector.shape_cast %259 : vector<16xf32> to vector<16x1xf32>
    %cst_106 = arith.constant 1.600000e+01 : f32
    %261 = vector.broadcast %cst_106 : f32 to vector<16x1xf32>
    %262 = arith.divf %260, %261 : vector<16x1xf32>
    %263 = vector.broadcast %262 : vector<16x1xf32> to vector<16x16xf32>
    %264 = arith.subf %256, %263 : vector<16x16xf32>
    %265 = arith.mulf %264, %264 : vector<16x16xf32>
    %cst_107 = arith.constant dense<0.000000e+00> : vector<16xf32>
    %266 = vector.multi_reduction <add>, %265, %cst_107 [1] : vector<16x16xf32> to vector<16xf32>
    %267 = vector.shape_cast %266 : vector<16xf32> to vector<16x1xf32>
    %cst_108 = arith.constant 1.600000e+01 : f32
    %268 = vector.broadcast %cst_108 : f32 to vector<16x1xf32>
    %269 = arith.divf %267, %268 : vector<16x1xf32>
    %cst_109 = arith.constant 9.99999974E-6 : f32
    %270 = vector.broadcast %cst_109 : f32 to vector<16x1xf32>
    %271 = arith.addf %269, %270 : vector<16x1xf32>
    %272 = math.rsqrt %271 : vector<16x1xf32>
    %273 = vector.broadcast %272 : vector<16x1xf32> to vector<16x16xf32>
    %274 = arith.mulf %264, %273 : vector<16x16xf32>
    %275 = vector.broadcast %257 : vector<1x16xf32> to vector<16x16xf32>
    %276 = arith.mulf %274, %275 : vector<16x16xf32>
    %277 = vector.broadcast %258 : vector<1x16xf32> to vector<16x16xf32>
    %278 = arith.addf %276, %277 : vector<16x16xf32>
    %c0_110 = arith.constant 0 : index
    %c0_111 = arith.constant 0 : index
    %279 = vector.load %arg6[%c0_110, %c0_111] : memref<16x64xf32, #tpu.memory_space<vmem>>, vector<16x64xf32>
    %280 = arith.truncf %278 : vector<16x16xf32> to vector<16x16xbf16>
    %281 = arith.truncf %279 : vector<16x64xf32> to vector<16x64xbf16>
    %cst_112 = arith.constant dense<0.000000e+00> : vector<16x64xf32>
    %282 = tpu.matmul %280, %281, %cst_112 {dimension_numbers = #tpu.dot_dimension_numbers<[1], [0], [0], [1], [0, 0, 1, 1], [], []>} : vector<16x16xbf16>, vector<16x64xbf16>, vector<16x64xf32> -> vector<16x64xf32>
    %c0_113 = arith.constant 0 : index
    %c0_114 = arith.constant 0 : index
    %283 = vector.load %arg5[%c0_113, %c0_114] : memref<1x64xf32, #tpu.memory_space<vmem>>, vector<1x64xf32>
    %284 = vector.broadcast %283 : vector<1x64xf32> to vector<16x64xf32>
    %285 = arith.addf %282, %284 : vector<16x64xf32>
    %cst_115 = arith.constant 5.000000e-01 : f32
    %286 = vector.broadcast %cst_115 : f32 to vector<16x64xf32>
    %287 = arith.mulf %286, %285 : vector<16x64xf32>
    %cst_116 = arith.constant 0.707106769 : f32
    %288 = vector.broadcast %cst_116 : f32 to vector<16x64xf32>
    %289 = arith.mulf %285, %288 : vector<16x64xf32>
    %cst_117 = arith.constant 0.000000e+00 : f32
    %290 = vector.broadcast %cst_117 : f32 to vector<16x64xf32>
    %291 = arith.cmpf oge, %289, %290 : vector<16x64xf32>
    %cst_118 = arith.constant 1.000000e+00 : f32
    %cst_119 = arith.constant -1.000000e+00 : f32
    %292 = vector.broadcast %cst_118 : f32 to vector<16x64xf32>
    %293 = vector.broadcast %cst_119 : f32 to vector<16x64xf32>
    %294 = arith.select %291, %292, %293 : vector<16x64xi1>, vector<16x64xf32>
    %295 = math.absf %289 : vector<16x64xf32>
    %cst_120 = arith.constant 0.327591091 : f32
    %296 = vector.broadcast %cst_120 : f32 to vector<16x64xf32>
    %297 = arith.mulf %296, %295 : vector<16x64xf32>
    %cst_121 = arith.constant 1.000000e+00 : f32
    %298 = vector.broadcast %cst_121 : f32 to vector<16x64xf32>
    %299 = arith.addf %298, %297 : vector<16x64xf32>
    %cst_122 = arith.constant 1.000000e+00 : f32
    %300 = vector.broadcast %cst_122 : f32 to vector<16x64xf32>
    %301 = arith.divf %300, %299 : vector<16x64xf32>
    %cst_123 = arith.constant 1.06140542 : f32
    %302 = vector.broadcast %cst_123 : f32 to vector<16x64xf32>
    %303 = arith.mulf %302, %301 : vector<16x64xf32>
    %cst_124 = arith.constant -1.45315206 : f32
    %304 = vector.broadcast %cst_124 : f32 to vector<16x64xf32>
    %305 = arith.addf %303, %304 : vector<16x64xf32>
    %306 = arith.mulf %305, %301 : vector<16x64xf32>
    %cst_125 = arith.constant 1.42141378 : f32
    %307 = vector.broadcast %cst_125 : f32 to vector<16x64xf32>
    %308 = arith.addf %306, %307 : vector<16x64xf32>
    %309 = arith.mulf %308, %301 : vector<16x64xf32>
    %cst_126 = arith.constant -0.284496725 : f32
    %310 = vector.broadcast %cst_126 : f32 to vector<16x64xf32>
    %311 = arith.addf %309, %310 : vector<16x64xf32>
    %312 = arith.mulf %311, %301 : vector<16x64xf32>
    %cst_127 = arith.constant 0.254829586 : f32
    %313 = vector.broadcast %cst_127 : f32 to vector<16x64xf32>
    %314 = arith.addf %312, %313 : vector<16x64xf32>
    %315 = arith.mulf %314, %301 : vector<16x64xf32>
    %cst_128 = arith.constant 0.000000e+00 : f32
    %316 = vector.broadcast %cst_128 : f32 to vector<16x64xf32>
    %317 = arith.subf %316, %295 : vector<16x64xf32>
    %318 = arith.mulf %317, %295 : vector<16x64xf32>
    %319 = math.exp %318 : vector<16x64xf32>
    %320 = arith.mulf %315, %319 : vector<16x64xf32>
    %cst_129 = arith.constant 1.000000e+00 : f32
    %321 = vector.broadcast %cst_129 : f32 to vector<16x64xf32>
    %322 = arith.subf %321, %320 : vector<16x64xf32>
    %323 = arith.mulf %294, %322 : vector<16x64xf32>
    %cst_130 = arith.constant 1.000000e+00 : f32
    %324 = vector.broadcast %cst_130 : f32 to vector<16x64xf32>
    %325 = arith.addf %324, %323 : vector<16x64xf32>
    %326 = arith.mulf %287, %325 : vector<16x64xf32>
    %c0_131 = arith.constant 0 : index
    %c0_132 = arith.constant 0 : index
    %327 = vector.load %arg8[%c0_131, %c0_132] : memref<64x16xf32, #tpu.memory_space<vmem>>, vector<64x16xf32>
    %328 = arith.truncf %326 : vector<16x64xf32> to vector<16x64xbf16>
    %329 = arith.truncf %327 : vector<64x16xf32> to vector<64x16xbf16>
    %cst_133 = arith.constant dense<0.000000e+00> : vector<16x16xf32>
    %330 = tpu.matmul %328, %329, %cst_133 {dimension_numbers = #tpu.dot_dimension_numbers<[1], [0], [0], [1], [0, 0, 1, 1], [], []>} : vector<16x64xbf16>, vector<64x16xbf16>, vector<16x16xf32> -> vector<16x16xf32>
    %331 = arith.addf %256, %330 : vector<16x16xf32>
    %c0_134 = arith.constant 0 : index
    %c0_135 = arith.constant 0 : index
    %332 = vector.load %arg7[%c0_134, %c0_135] : memref<1x16xf32, #tpu.memory_space<vmem>>, vector<1x16xf32>
    %333 = vector.broadcast %332 : vector<1x16xf32> to vector<16x16xf32>
    %334 = arith.addf %331, %333 : vector<16x16xf32>
    %c0_136 = arith.constant 0 : index
    %c0_137 = arith.constant 0 : index
    %335 = vector.load %arg25[%c0_136, %c0_137] : memref<1x16xf32, #tpu.memory_space<vmem>>, vector<1x16xf32>
    %c0_138 = arith.constant 0 : index
    %c0_139 = arith.constant 0 : index
    %336 = vector.load %arg24[%c0_138, %c0_139] : memref<1x16xf32, #tpu.memory_space<vmem>>, vector<1x16xf32>
    %cst_140 = arith.constant dense<0.000000e+00> : vector<16xf32>
    %337 = vector.multi_reduction <add>, %334, %cst_140 [1] : vector<16x16xf32> to vector<16xf32>
    %338 = vector.shape_cast %337 : vector<16xf32> to vector<16x1xf32>
    %cst_141 = arith.constant 1.600000e+01 : f32
    %339 = vector.broadcast %cst_141 : f32 to vector<16x1xf32>
    %340 = arith.divf %338, %339 : vector<16x1xf32>
    %341 = vector.broadcast %340 : vector<16x1xf32> to vector<16x16xf32>
    %342 = arith.subf %334, %341 : vector<16x16xf32>
    %343 = arith.mulf %342, %342 : vector<16x16xf32>
    %cst_142 = arith.constant dense<0.000000e+00> : vector<16xf32>
    %344 = vector.multi_reduction <add>, %343, %cst_142 [1] : vector<16x16xf32> to vector<16xf32>
    %345 = vector.shape_cast %344 : vector<16xf32> to vector<16x1xf32>
    %cst_143 = arith.constant 1.600000e+01 : f32
    %346 = vector.broadcast %cst_143 : f32 to vector<16x1xf32>
    %347 = arith.divf %345, %346 : vector<16x1xf32>
    %cst_144 = arith.constant 9.99999974E-6 : f32
    %348 = vector.broadcast %cst_144 : f32 to vector<16x1xf32>
    %349 = arith.addf %347, %348 : vector<16x1xf32>
    %350 = math.rsqrt %349 : vector<16x1xf32>
    %351 = vector.broadcast %350 : vector<16x1xf32> to vector<16x16xf32>
    %352 = arith.mulf %342, %351 : vector<16x16xf32>
    %353 = vector.broadcast %335 : vector<1x16xf32> to vector<16x16xf32>
    %354 = arith.mulf %352, %353 : vector<16x16xf32>
    %355 = vector.broadcast %336 : vector<1x16xf32> to vector<16x16xf32>
    %356 = arith.addf %354, %355 : vector<16x16xf32>
    %c0_145 = arith.constant 0 : index
    %c0_146 = arith.constant 0 : index
    %357 = vector.load %arg33[%c0_145, %c0_146] : memref<16x48xf32, #tpu.memory_space<vmem>>, vector<16x48xf32>
    %358 = arith.truncf %356 : vector<16x16xf32> to vector<16x16xbf16>
    %359 = arith.truncf %357 : vector<16x48xf32> to vector<16x48xbf16>
    %cst_147 = arith.constant dense<0.000000e+00> : vector<16x48xf32>
    %360 = tpu.matmul %358, %359, %cst_147 {dimension_numbers = #tpu.dot_dimension_numbers<[1], [0], [0], [1], [0, 0, 1, 1], [], []>} : vector<16x16xbf16>, vector<16x48xbf16>, vector<16x48xf32> -> vector<16x48xf32>
    %c0_148 = arith.constant 0 : index
    %c0_149 = arith.constant 0 : index
    %361 = vector.load %arg32[%c0_148, %c0_149] : memref<1x48xf32, #tpu.memory_space<vmem>>, vector<1x48xf32>
    %362 = vector.broadcast %361 : vector<1x48xf32> to vector<16x48xf32>
    %363 = arith.addf %360, %362 : vector<16x48xf32>
    %c0_150 = arith.constant 0 : index
    %c0_151 = arith.constant 0 : index
    %364 = vector.load %arg28[%c0_150, %c0_151] : memref<16x16xf32, #tpu.memory_space<vmem>>, vector<16x16xf32>
    %365 = arith.truncf %364 : vector<16x16xf32> to vector<16x16xbf16>
    %366 = arith.truncf %363 : vector<16x48xf32> to vector<16x48xbf16>
    %cst_152 = arith.constant dense<0.000000e+00> : vector<16x48xf32>
    %367 = tpu.matmul %365, %366, %cst_152 {dimension_numbers = #tpu.dot_dimension_numbers<[1], [0], [0], [1], [0, 0, 1, 1], [], []>} : vector<16x16xbf16>, vector<16x48xbf16>, vector<16x48xf32> -> vector<16x48xf32>
    %368 = vector.extract_strided_slice %367 {offsets = [0, 0], sizes = [4, 8], strides = [1, 1]} : vector<16x48xf32> to vector<4x8xf32>
    %369 = vector.extract_strided_slice %367 {offsets = [0, 16], sizes = [4, 8], strides = [1, 1]} : vector<16x48xf32> to vector<4x8xf32>
    %370 = vector.extract_strided_slice %367 {offsets = [0, 32], sizes = [4, 8], strides = [1, 1]} : vector<16x48xf32> to vector<4x8xf32>
    %371 = arith.truncf %368 : vector<4x8xf32> to vector<4x8xbf16>
    %372 = arith.truncf %369 : vector<4x8xf32> to vector<4x8xbf16>
    %cst_153 = arith.constant dense<0.000000e+00> : vector<4x4xf32>
    %373 = tpu.matmul %371, %372, %cst_153 {dimension_numbers = #tpu.dot_dimension_numbers<[1], [1], [0], [0], [0, 0, 1, 0], [], []>} : vector<4x8xbf16>, vector<4x8xbf16>, vector<4x4xf32> -> vector<4x4xf32>
    %c0_154 = arith.constant 0 : index
    %c0_155 = arith.constant 0 : index
    %c0_156 = arith.constant 0 : index
    %c0_157 = arith.constant 0 : index
    %374 = vector.load %arg19[%c0_154, %c0_155, %c0_156, %c0_157] : memref<4x2x4x4xf32, #tpu.memory_space<vmem>>, vector<1x1x4x4xf32>
    %375 = vector.shape_cast %374 : vector<1x1x4x4xf32> to vector<4x4xf32>
    %376 = arith.addf %373, %375 : vector<4x4xf32>
    %cst_158 = arith.constant dense<0xFF800000> : vector<4xf32>
    %377 = vector.multi_reduction <maximumf>, %376, %cst_158 [1] : vector<4x4xf32> to vector<4xf32>
    %378 = vector.shape_cast %377 : vector<4xf32> to vector<4x1xf32>
    %379 = vector.broadcast %378 : vector<4x1xf32> to vector<4x4xf32>
    %380 = arith.subf %376, %379 : vector<4x4xf32>
    %381 = math.exp %380 : vector<4x4xf32>
    %cst_159 = arith.constant dense<0.000000e+00> : vector<4xf32>
    %382 = vector.multi_reduction <add>, %381, %cst_159 [1] : vector<4x4xf32> to vector<4xf32>
    %383 = vector.shape_cast %382 : vector<4xf32> to vector<4x1xf32>
    %384 = tpu.reciprocal %383 {approx = true} : vector<4x1xf32> -> vector<4x1xf32>
    %385 = vector.broadcast %384 : vector<4x1xf32> to vector<4x4xf32>
    %386 = arith.mulf %381, %385 : vector<4x4xf32>
    %387 = arith.truncf %386 : vector<4x4xf32> to vector<4x4xbf16>
    %388 = arith.truncf %370 : vector<4x8xf32> to vector<4x8xbf16>
    %cst_160 = arith.constant dense<0.000000e+00> : vector<4x8xf32>
    %389 = tpu.matmul %387, %388, %cst_160 {dimension_numbers = #tpu.dot_dimension_numbers<[1], [0], [0], [1], [0, 0, 1, 1], [], []>} : vector<4x4xbf16>, vector<4x8xbf16>, vector<4x8xf32> -> vector<4x8xf32>
    %390 = vector.extract_strided_slice %367 {offsets = [0, 8], sizes = [4, 8], strides = [1, 1]} : vector<16x48xf32> to vector<4x8xf32>
    %391 = vector.extract_strided_slice %367 {offsets = [0, 24], sizes = [4, 8], strides = [1, 1]} : vector<16x48xf32> to vector<4x8xf32>
    %392 = vector.extract_strided_slice %367 {offsets = [0, 40], sizes = [4, 8], strides = [1, 1]} : vector<16x48xf32> to vector<4x8xf32>
    %393 = arith.truncf %390 : vector<4x8xf32> to vector<4x8xbf16>
    %394 = arith.truncf %391 : vector<4x8xf32> to vector<4x8xbf16>
    %cst_161 = arith.constant dense<0.000000e+00> : vector<4x4xf32>
    %395 = tpu.matmul %393, %394, %cst_161 {dimension_numbers = #tpu.dot_dimension_numbers<[1], [1], [0], [0], [0, 0, 1, 0], [], []>} : vector<4x8xbf16>, vector<4x8xbf16>, vector<4x4xf32> -> vector<4x4xf32>
    %c0_162 = arith.constant 0 : index
    %c1_163 = arith.constant 1 : index
    %c0_164 = arith.constant 0 : index
    %c0_165 = arith.constant 0 : index
    %396 = vector.load %arg19[%c0_162, %c1_163, %c0_164, %c0_165] : memref<4x2x4x4xf32, #tpu.memory_space<vmem>>, vector<1x1x4x4xf32>
    %397 = vector.shape_cast %396 : vector<1x1x4x4xf32> to vector<4x4xf32>
    %398 = arith.addf %395, %397 : vector<4x4xf32>
    %cst_166 = arith.constant dense<0xFF800000> : vector<4xf32>
    %399 = vector.multi_reduction <maximumf>, %398, %cst_166 [1] : vector<4x4xf32> to vector<4xf32>
    %400 = vector.shape_cast %399 : vector<4xf32> to vector<4x1xf32>
    %401 = vector.broadcast %400 : vector<4x1xf32> to vector<4x4xf32>
    %402 = arith.subf %398, %401 : vector<4x4xf32>
    %403 = math.exp %402 : vector<4x4xf32>
    %cst_167 = arith.constant dense<0.000000e+00> : vector<4xf32>
    %404 = vector.multi_reduction <add>, %403, %cst_167 [1] : vector<4x4xf32> to vector<4xf32>
    %405 = vector.shape_cast %404 : vector<4xf32> to vector<4x1xf32>
    %406 = tpu.reciprocal %405 {approx = true} : vector<4x1xf32> -> vector<4x1xf32>
    %407 = vector.broadcast %406 : vector<4x1xf32> to vector<4x4xf32>
    %408 = arith.mulf %403, %407 : vector<4x4xf32>
    %409 = arith.truncf %408 : vector<4x4xf32> to vector<4x4xbf16>
    %410 = arith.truncf %392 : vector<4x8xf32> to vector<4x8xbf16>
    %cst_168 = arith.constant dense<0.000000e+00> : vector<4x8xf32>
    %411 = tpu.matmul %409, %410, %cst_168 {dimension_numbers = #tpu.dot_dimension_numbers<[1], [0], [0], [1], [0, 0, 1, 1], [], []>} : vector<4x4xbf16>, vector<4x8xbf16>, vector<4x8xf32> -> vector<4x8xf32>
    %412 = tpu.concatenate %389, %411 in 1 : vector<4x8xf32>, vector<4x8xf32> -> vector<4x16xf32>
    %413 = vector.extract_strided_slice %367 {offsets = [4, 0], sizes = [4, 8], strides = [1, 1]} : vector<16x48xf32> to vector<4x8xf32>
    %414 = vector.extract_strided_slice %367 {offsets = [4, 16], sizes = [4, 8], strides = [1, 1]} : vector<16x48xf32> to vector<4x8xf32>
    %415 = vector.extract_strided_slice %367 {offsets = [4, 32], sizes = [4, 8], strides = [1, 1]} : vector<16x48xf32> to vector<4x8xf32>
    %416 = arith.truncf %413 : vector<4x8xf32> to vector<4x8xbf16>
    %417 = arith.truncf %414 : vector<4x8xf32> to vector<4x8xbf16>
    %cst_169 = arith.constant dense<0.000000e+00> : vector<4x4xf32>
    %418 = tpu.matmul %416, %417, %cst_169 {dimension_numbers = #tpu.dot_dimension_numbers<[1], [1], [0], [0], [0, 0, 1, 0], [], []>} : vector<4x8xbf16>, vector<4x8xbf16>, vector<4x4xf32> -> vector<4x4xf32>
    %c1_170 = arith.constant 1 : index
    %c0_171 = arith.constant 0 : index
    %c0_172 = arith.constant 0 : index
    %c0_173 = arith.constant 0 : index
    %419 = vector.load %arg19[%c1_170, %c0_171, %c0_172, %c0_173] : memref<4x2x4x4xf32, #tpu.memory_space<vmem>>, vector<1x1x4x4xf32>
    %420 = vector.shape_cast %419 : vector<1x1x4x4xf32> to vector<4x4xf32>
    %421 = arith.addf %418, %420 : vector<4x4xf32>
    %cst_174 = arith.constant dense<0xFF800000> : vector<4xf32>
    %422 = vector.multi_reduction <maximumf>, %421, %cst_174 [1] : vector<4x4xf32> to vector<4xf32>
    %423 = vector.shape_cast %422 : vector<4xf32> to vector<4x1xf32>
    %424 = vector.broadcast %423 : vector<4x1xf32> to vector<4x4xf32>
    %425 = arith.subf %421, %424 : vector<4x4xf32>
    %426 = math.exp %425 : vector<4x4xf32>
    %cst_175 = arith.constant dense<0.000000e+00> : vector<4xf32>
    %427 = vector.multi_reduction <add>, %426, %cst_175 [1] : vector<4x4xf32> to vector<4xf32>
    %428 = vector.shape_cast %427 : vector<4xf32> to vector<4x1xf32>
    %429 = tpu.reciprocal %428 {approx = true} : vector<4x1xf32> -> vector<4x1xf32>
    %430 = vector.broadcast %429 : vector<4x1xf32> to vector<4x4xf32>
    %431 = arith.mulf %426, %430 : vector<4x4xf32>
    %432 = arith.truncf %431 : vector<4x4xf32> to vector<4x4xbf16>
    %433 = arith.truncf %415 : vector<4x8xf32> to vector<4x8xbf16>
    %cst_176 = arith.constant dense<0.000000e+00> : vector<4x8xf32>
    %434 = tpu.matmul %432, %433, %cst_176 {dimension_numbers = #tpu.dot_dimension_numbers<[1], [0], [0], [1], [0, 0, 1, 1], [], []>} : vector<4x4xbf16>, vector<4x8xbf16>, vector<4x8xf32> -> vector<4x8xf32>
    %435 = vector.extract_strided_slice %367 {offsets = [4, 8], sizes = [4, 8], strides = [1, 1]} : vector<16x48xf32> to vector<4x8xf32>
    %436 = vector.extract_strided_slice %367 {offsets = [4, 24], sizes = [4, 8], strides = [1, 1]} : vector<16x48xf32> to vector<4x8xf32>
    %437 = vector.extract_strided_slice %367 {offsets = [4, 40], sizes = [4, 8], strides = [1, 1]} : vector<16x48xf32> to vector<4x8xf32>
    %438 = arith.truncf %435 : vector<4x8xf32> to vector<4x8xbf16>
    %439 = arith.truncf %436 : vector<4x8xf32> to vector<4x8xbf16>
    %cst_177 = arith.constant dense<0.000000e+00> : vector<4x4xf32>
    %440 = tpu.matmul %438, %439, %cst_177 {dimension_numbers = #tpu.dot_dimension_numbers<[1], [1], [0], [0], [0, 0, 1, 0], [], []>} : vector<4x8xbf16>, vector<4x8xbf16>, vector<4x4xf32> -> vector<4x4xf32>
    %c1_178 = arith.constant 1 : index
    %c1_179 = arith.constant 1 : index
    %c0_180 = arith.constant 0 : index
    %c0_181 = arith.constant 0 : index
    %441 = vector.load %arg19[%c1_178, %c1_179, %c0_180, %c0_181] : memref<4x2x4x4xf32, #tpu.memory_space<vmem>>, vector<1x1x4x4xf32>
    %442 = vector.shape_cast %441 : vector<1x1x4x4xf32> to vector<4x4xf32>
    %443 = arith.addf %440, %442 : vector<4x4xf32>
    %cst_182 = arith.constant dense<0xFF800000> : vector<4xf32>
    %444 = vector.multi_reduction <maximumf>, %443, %cst_182 [1] : vector<4x4xf32> to vector<4xf32>
    %445 = vector.shape_cast %444 : vector<4xf32> to vector<4x1xf32>
    %446 = vector.broadcast %445 : vector<4x1xf32> to vector<4x4xf32>
    %447 = arith.subf %443, %446 : vector<4x4xf32>
    %448 = math.exp %447 : vector<4x4xf32>
    %cst_183 = arith.constant dense<0.000000e+00> : vector<4xf32>
    %449 = vector.multi_reduction <add>, %448, %cst_183 [1] : vector<4x4xf32> to vector<4xf32>
    %450 = vector.shape_cast %449 : vector<4xf32> to vector<4x1xf32>
    %451 = tpu.reciprocal %450 {approx = true} : vector<4x1xf32> -> vector<4x1xf32>
    %452 = vector.broadcast %451 : vector<4x1xf32> to vector<4x4xf32>
    %453 = arith.mulf %448, %452 : vector<4x4xf32>
    %454 = arith.truncf %453 : vector<4x4xf32> to vector<4x4xbf16>
    %455 = arith.truncf %437 : vector<4x8xf32> to vector<4x8xbf16>
    %cst_184 = arith.constant dense<0.000000e+00> : vector<4x8xf32>
    %456 = tpu.matmul %454, %455, %cst_184 {dimension_numbers = #tpu.dot_dimension_numbers<[1], [0], [0], [1], [0, 0, 1, 1], [], []>} : vector<4x4xbf16>, vector<4x8xbf16>, vector<4x8xf32> -> vector<4x8xf32>
    %457 = tpu.concatenate %434, %456 in 1 : vector<4x8xf32>, vector<4x8xf32> -> vector<4x16xf32>
    %458 = vector.extract_strided_slice %367 {offsets = [8, 0], sizes = [4, 8], strides = [1, 1]} : vector<16x48xf32> to vector<4x8xf32>
    %459 = vector.extract_strided_slice %367 {offsets = [8, 16], sizes = [4, 8], strides = [1, 1]} : vector<16x48xf32> to vector<4x8xf32>
    %460 = vector.extract_strided_slice %367 {offsets = [8, 32], sizes = [4, 8], strides = [1, 1]} : vector<16x48xf32> to vector<4x8xf32>
    %461 = arith.truncf %458 : vector<4x8xf32> to vector<4x8xbf16>
    %462 = arith.truncf %459 : vector<4x8xf32> to vector<4x8xbf16>
    %cst_185 = arith.constant dense<0.000000e+00> : vector<4x4xf32>
    %463 = tpu.matmul %461, %462, %cst_185 {dimension_numbers = #tpu.dot_dimension_numbers<[1], [1], [0], [0], [0, 0, 1, 0], [], []>} : vector<4x8xbf16>, vector<4x8xbf16>, vector<4x4xf32> -> vector<4x4xf32>
    %c2_186 = arith.constant 2 : index
    %c0_187 = arith.constant 0 : index
    %c0_188 = arith.constant 0 : index
    %c0_189 = arith.constant 0 : index
    %464 = vector.load %arg19[%c2_186, %c0_187, %c0_188, %c0_189] : memref<4x2x4x4xf32, #tpu.memory_space<vmem>>, vector<1x1x4x4xf32>
    %465 = vector.shape_cast %464 : vector<1x1x4x4xf32> to vector<4x4xf32>
    %466 = arith.addf %463, %465 : vector<4x4xf32>
    %cst_190 = arith.constant dense<0xFF800000> : vector<4xf32>
    %467 = vector.multi_reduction <maximumf>, %466, %cst_190 [1] : vector<4x4xf32> to vector<4xf32>
    %468 = vector.shape_cast %467 : vector<4xf32> to vector<4x1xf32>
    %469 = vector.broadcast %468 : vector<4x1xf32> to vector<4x4xf32>
    %470 = arith.subf %466, %469 : vector<4x4xf32>
    %471 = math.exp %470 : vector<4x4xf32>
    %cst_191 = arith.constant dense<0.000000e+00> : vector<4xf32>
    %472 = vector.multi_reduction <add>, %471, %cst_191 [1] : vector<4x4xf32> to vector<4xf32>
    %473 = vector.shape_cast %472 : vector<4xf32> to vector<4x1xf32>
    %474 = tpu.reciprocal %473 {approx = true} : vector<4x1xf32> -> vector<4x1xf32>
    %475 = vector.broadcast %474 : vector<4x1xf32> to vector<4x4xf32>
    %476 = arith.mulf %471, %475 : vector<4x4xf32>
    %477 = arith.truncf %476 : vector<4x4xf32> to vector<4x4xbf16>
    %478 = arith.truncf %460 : vector<4x8xf32> to vector<4x8xbf16>
    %cst_192 = arith.constant dense<0.000000e+00> : vector<4x8xf32>
    %479 = tpu.matmul %477, %478, %cst_192 {dimension_numbers = #tpu.dot_dimension_numbers<[1], [0], [0], [1], [0, 0, 1, 1], [], []>} : vector<4x4xbf16>, vector<4x8xbf16>, vector<4x8xf32> -> vector<4x8xf32>
    %480 = vector.extract_strided_slice %367 {offsets = [8, 8], sizes = [4, 8], strides = [1, 1]} : vector<16x48xf32> to vector<4x8xf32>
    %481 = vector.extract_strided_slice %367 {offsets = [8, 24], sizes = [4, 8], strides = [1, 1]} : vector<16x48xf32> to vector<4x8xf32>
    %482 = vector.extract_strided_slice %367 {offsets = [8, 40], sizes = [4, 8], strides = [1, 1]} : vector<16x48xf32> to vector<4x8xf32>
    %483 = arith.truncf %480 : vector<4x8xf32> to vector<4x8xbf16>
    %484 = arith.truncf %481 : vector<4x8xf32> to vector<4x8xbf16>
    %cst_193 = arith.constant dense<0.000000e+00> : vector<4x4xf32>
    %485 = tpu.matmul %483, %484, %cst_193 {dimension_numbers = #tpu.dot_dimension_numbers<[1], [1], [0], [0], [0, 0, 1, 0], [], []>} : vector<4x8xbf16>, vector<4x8xbf16>, vector<4x4xf32> -> vector<4x4xf32>
    %c2_194 = arith.constant 2 : index
    %c1_195 = arith.constant 1 : index
    %c0_196 = arith.constant 0 : index
    %c0_197 = arith.constant 0 : index
    %486 = vector.load %arg19[%c2_194, %c1_195, %c0_196, %c0_197] : memref<4x2x4x4xf32, #tpu.memory_space<vmem>>, vector<1x1x4x4xf32>
    %487 = vector.shape_cast %486 : vector<1x1x4x4xf32> to vector<4x4xf32>
    %488 = arith.addf %485, %487 : vector<4x4xf32>
    %cst_198 = arith.constant dense<0xFF800000> : vector<4xf32>
    %489 = vector.multi_reduction <maximumf>, %488, %cst_198 [1] : vector<4x4xf32> to vector<4xf32>
    %490 = vector.shape_cast %489 : vector<4xf32> to vector<4x1xf32>
    %491 = vector.broadcast %490 : vector<4x1xf32> to vector<4x4xf32>
    %492 = arith.subf %488, %491 : vector<4x4xf32>
    %493 = math.exp %492 : vector<4x4xf32>
    %cst_199 = arith.constant dense<0.000000e+00> : vector<4xf32>
    %494 = vector.multi_reduction <add>, %493, %cst_199 [1] : vector<4x4xf32> to vector<4xf32>
    %495 = vector.shape_cast %494 : vector<4xf32> to vector<4x1xf32>
    %496 = tpu.reciprocal %495 {approx = true} : vector<4x1xf32> -> vector<4x1xf32>
    %497 = vector.broadcast %496 : vector<4x1xf32> to vector<4x4xf32>
    %498 = arith.mulf %493, %497 : vector<4x4xf32>
    %499 = arith.truncf %498 : vector<4x4xf32> to vector<4x4xbf16>
    %500 = arith.truncf %482 : vector<4x8xf32> to vector<4x8xbf16>
    %cst_200 = arith.constant dense<0.000000e+00> : vector<4x8xf32>
    %501 = tpu.matmul %499, %500, %cst_200 {dimension_numbers = #tpu.dot_dimension_numbers<[1], [0], [0], [1], [0, 0, 1, 1], [], []>} : vector<4x4xbf16>, vector<4x8xbf16>, vector<4x8xf32> -> vector<4x8xf32>
    %502 = tpu.concatenate %479, %501 in 1 : vector<4x8xf32>, vector<4x8xf32> -> vector<4x16xf32>
    %503 = vector.extract_strided_slice %367 {offsets = [12, 0], sizes = [4, 8], strides = [1, 1]} : vector<16x48xf32> to vector<4x8xf32>
    %504 = vector.extract_strided_slice %367 {offsets = [12, 16], sizes = [4, 8], strides = [1, 1]} : vector<16x48xf32> to vector<4x8xf32>
    %505 = vector.extract_strided_slice %367 {offsets = [12, 32], sizes = [4, 8], strides = [1, 1]} : vector<16x48xf32> to vector<4x8xf32>
    %506 = arith.truncf %503 : vector<4x8xf32> to vector<4x8xbf16>
    %507 = arith.truncf %504 : vector<4x8xf32> to vector<4x8xbf16>
    %cst_201 = arith.constant dense<0.000000e+00> : vector<4x4xf32>
    %508 = tpu.matmul %506, %507, %cst_201 {dimension_numbers = #tpu.dot_dimension_numbers<[1], [1], [0], [0], [0, 0, 1, 0], [], []>} : vector<4x8xbf16>, vector<4x8xbf16>, vector<4x4xf32> -> vector<4x4xf32>
    %c3_202 = arith.constant 3 : index
    %c0_203 = arith.constant 0 : index
    %c0_204 = arith.constant 0 : index
    %c0_205 = arith.constant 0 : index
    %509 = vector.load %arg19[%c3_202, %c0_203, %c0_204, %c0_205] : memref<4x2x4x4xf32, #tpu.memory_space<vmem>>, vector<1x1x4x4xf32>
    %510 = vector.shape_cast %509 : vector<1x1x4x4xf32> to vector<4x4xf32>
    %511 = arith.addf %508, %510 : vector<4x4xf32>
    %cst_206 = arith.constant dense<0xFF800000> : vector<4xf32>
    %512 = vector.multi_reduction <maximumf>, %511, %cst_206 [1] : vector<4x4xf32> to vector<4xf32>
    %513 = vector.shape_cast %512 : vector<4xf32> to vector<4x1xf32>
    %514 = vector.broadcast %513 : vector<4x1xf32> to vector<4x4xf32>
    %515 = arith.subf %511, %514 : vector<4x4xf32>
    %516 = math.exp %515 : vector<4x4xf32>
    %cst_207 = arith.constant dense<0.000000e+00> : vector<4xf32>
    %517 = vector.multi_reduction <add>, %516, %cst_207 [1] : vector<4x4xf32> to vector<4xf32>
    %518 = vector.shape_cast %517 : vector<4xf32> to vector<4x1xf32>
    %519 = tpu.reciprocal %518 {approx = true} : vector<4x1xf32> -> vector<4x1xf32>
    %520 = vector.broadcast %519 : vector<4x1xf32> to vector<4x4xf32>
    %521 = arith.mulf %516, %520 : vector<4x4xf32>
    %522 = arith.truncf %521 : vector<4x4xf32> to vector<4x4xbf16>
    %523 = arith.truncf %505 : vector<4x8xf32> to vector<4x8xbf16>
    %cst_208 = arith.constant dense<0.000000e+00> : vector<4x8xf32>
    %524 = tpu.matmul %522, %523, %cst_208 {dimension_numbers = #tpu.dot_dimension_numbers<[1], [0], [0], [1], [0, 0, 1, 1], [], []>} : vector<4x4xbf16>, vector<4x8xbf16>, vector<4x8xf32> -> vector<4x8xf32>
    %525 = vector.extract_strided_slice %367 {offsets = [12, 8], sizes = [4, 8], strides = [1, 1]} : vector<16x48xf32> to vector<4x8xf32>
    %526 = vector.extract_strided_slice %367 {offsets = [12, 24], sizes = [4, 8], strides = [1, 1]} : vector<16x48xf32> to vector<4x8xf32>
    %527 = vector.extract_strided_slice %367 {offsets = [12, 40], sizes = [4, 8], strides = [1, 1]} : vector<16x48xf32> to vector<4x8xf32>
    %528 = arith.truncf %525 : vector<4x8xf32> to vector<4x8xbf16>
    %529 = arith.truncf %526 : vector<4x8xf32> to vector<4x8xbf16>
    %cst_209 = arith.constant dense<0.000000e+00> : vector<4x4xf32>
    %530 = tpu.matmul %528, %529, %cst_209 {dimension_numbers = #tpu.dot_dimension_numbers<[1], [1], [0], [0], [0, 0, 1, 0], [], []>} : vector<4x8xbf16>, vector<4x8xbf16>, vector<4x4xf32> -> vector<4x4xf32>
    %c3_210 = arith.constant 3 : index
    %c1_211 = arith.constant 1 : index
    %c0_212 = arith.constant 0 : index
    %c0_213 = arith.constant 0 : index
    %531 = vector.load %arg19[%c3_210, %c1_211, %c0_212, %c0_213] : memref<4x2x4x4xf32, #tpu.memory_space<vmem>>, vector<1x1x4x4xf32>
    %532 = vector.shape_cast %531 : vector<1x1x4x4xf32> to vector<4x4xf32>
    %533 = arith.addf %530, %532 : vector<4x4xf32>
    %cst_214 = arith.constant dense<0xFF800000> : vector<4xf32>
    %534 = vector.multi_reduction <maximumf>, %533, %cst_214 [1] : vector<4x4xf32> to vector<4xf32>
    %535 = vector.shape_cast %534 : vector<4xf32> to vector<4x1xf32>
    %536 = vector.broadcast %535 : vector<4x1xf32> to vector<4x4xf32>
    %537 = arith.subf %533, %536 : vector<4x4xf32>
    %538 = math.exp %537 : vector<4x4xf32>
    %cst_215 = arith.constant dense<0.000000e+00> : vector<4xf32>
    %539 = vector.multi_reduction <add>, %538, %cst_215 [1] : vector<4x4xf32> to vector<4xf32>
    %540 = vector.shape_cast %539 : vector<4xf32> to vector<4x1xf32>
    %541 = tpu.reciprocal %540 {approx = true} : vector<4x1xf32> -> vector<4x1xf32>
    %542 = vector.broadcast %541 : vector<4x1xf32> to vector<4x4xf32>
    %543 = arith.mulf %538, %542 : vector<4x4xf32>
    %544 = arith.truncf %543 : vector<4x4xf32> to vector<4x4xbf16>
    %545 = arith.truncf %527 : vector<4x8xf32> to vector<4x8xbf16>
    %cst_216 = arith.constant dense<0.000000e+00> : vector<4x8xf32>
    %546 = tpu.matmul %544, %545, %cst_216 {dimension_numbers = #tpu.dot_dimension_numbers<[1], [0], [0], [1], [0, 0, 1, 1], [], []>} : vector<4x4xbf16>, vector<4x8xbf16>, vector<4x8xf32> -> vector<4x8xf32>
    %547 = tpu.concatenate %524, %546 in 1 : vector<4x8xf32>, vector<4x8xf32> -> vector<4x16xf32>
    %548 = tpu.concatenate %412, %457, %502, %547 in 0 : vector<4x16xf32>, vector<4x16xf32>, vector<4x16xf32>, vector<4x16xf32> -> vector<16x16xf32>
    %c0_217 = arith.constant 0 : index
    %c0_218 = arith.constant 0 : index
    %549 = vector.load %arg31[%c0_217, %c0_218] : memref<16x16xf32, #tpu.memory_space<vmem>>, vector<16x16xf32>
    %550 = arith.truncf %548 : vector<16x16xf32> to vector<16x16xbf16>
    %551 = arith.truncf %549 : vector<16x16xf32> to vector<16x16xbf16>
    %cst_219 = arith.constant dense<0.000000e+00> : vector<16x16xf32>
    %552 = tpu.matmul %550, %551, %cst_219 {dimension_numbers = #tpu.dot_dimension_numbers<[1], [0], [0], [1], [0, 0, 1, 1], [], []>} : vector<16x16xbf16>, vector<16x16xbf16>, vector<16x16xf32> -> vector<16x16xf32>
    %c0_220 = arith.constant 0 : index
    %c0_221 = arith.constant 0 : index
    %553 = vector.load %arg29[%c0_220, %c0_221] : memref<16x16xf32, #tpu.memory_space<vmem>>, vector<16x16xf32>
    %554 = arith.truncf %553 : vector<16x16xf32> to vector<16x16xbf16>
    %555 = arith.truncf %552 : vector<16x16xf32> to vector<16x16xbf16>
    %cst_222 = arith.constant dense<0.000000e+00> : vector<16x16xf32>
    %556 = tpu.matmul %554, %555, %cst_222 {dimension_numbers = #tpu.dot_dimension_numbers<[1], [0], [0], [1], [0, 0, 1, 1], [], []>} : vector<16x16xbf16>, vector<16x16xbf16>, vector<16x16xf32> -> vector<16x16xf32>
    %557 = arith.addf %334, %556 : vector<16x16xf32>
    %c0_223 = arith.constant 0 : index
    %c0_224 = arith.constant 0 : index
    %558 = vector.load %arg30[%c0_223, %c0_224] : memref<1x16xf32, #tpu.memory_space<vmem>>, vector<1x16xf32>
    %559 = vector.broadcast %558 : vector<1x16xf32> to vector<16x16xf32>
    %560 = arith.addf %557, %559 : vector<16x16xf32>
    %c0_225 = arith.constant 0 : index
    %c0_226 = arith.constant 0 : index
    %561 = vector.load %arg27[%c0_225, %c0_226] : memref<1x16xf32, #tpu.memory_space<vmem>>, vector<1x16xf32>
    %c0_227 = arith.constant 0 : index
    %c0_228 = arith.constant 0 : index
    %562 = vector.load %arg26[%c0_227, %c0_228] : memref<1x16xf32, #tpu.memory_space<vmem>>, vector<1x16xf32>
    %cst_229 = arith.constant dense<0.000000e+00> : vector<16xf32>
    %563 = vector.multi_reduction <add>, %560, %cst_229 [1] : vector<16x16xf32> to vector<16xf32>
    %564 = vector.shape_cast %563 : vector<16xf32> to vector<16x1xf32>
    %cst_230 = arith.constant 1.600000e+01 : f32
    %565 = vector.broadcast %cst_230 : f32 to vector<16x1xf32>
    %566 = arith.divf %564, %565 : vector<16x1xf32>
    %567 = vector.broadcast %566 : vector<16x1xf32> to vector<16x16xf32>
    %568 = arith.subf %560, %567 : vector<16x16xf32>
    %569 = arith.mulf %568, %568 : vector<16x16xf32>
    %cst_231 = arith.constant dense<0.000000e+00> : vector<16xf32>
    %570 = vector.multi_reduction <add>, %569, %cst_231 [1] : vector<16x16xf32> to vector<16xf32>
    %571 = vector.shape_cast %570 : vector<16xf32> to vector<16x1xf32>
    %cst_232 = arith.constant 1.600000e+01 : f32
    %572 = vector.broadcast %cst_232 : f32 to vector<16x1xf32>
    %573 = arith.divf %571, %572 : vector<16x1xf32>
    %cst_233 = arith.constant 9.99999974E-6 : f32
    %574 = vector.broadcast %cst_233 : f32 to vector<16x1xf32>
    %575 = arith.addf %573, %574 : vector<16x1xf32>
    %576 = math.rsqrt %575 : vector<16x1xf32>
    %577 = vector.broadcast %576 : vector<16x1xf32> to vector<16x16xf32>
    %578 = arith.mulf %568, %577 : vector<16x16xf32>
    %579 = vector.broadcast %561 : vector<1x16xf32> to vector<16x16xf32>
    %580 = arith.mulf %578, %579 : vector<16x16xf32>
    %581 = vector.broadcast %562 : vector<1x16xf32> to vector<16x16xf32>
    %582 = arith.addf %580, %581 : vector<16x16xf32>
    %c0_234 = arith.constant 0 : index
    %c0_235 = arith.constant 0 : index
    %583 = vector.load %arg21[%c0_234, %c0_235] : memref<16x64xf32, #tpu.memory_space<vmem>>, vector<16x64xf32>
    %584 = arith.truncf %582 : vector<16x16xf32> to vector<16x16xbf16>
    %585 = arith.truncf %583 : vector<16x64xf32> to vector<16x64xbf16>
    %cst_236 = arith.constant dense<0.000000e+00> : vector<16x64xf32>
    %586 = tpu.matmul %584, %585, %cst_236 {dimension_numbers = #tpu.dot_dimension_numbers<[1], [0], [0], [1], [0, 0, 1, 1], [], []>} : vector<16x16xbf16>, vector<16x64xbf16>, vector<16x64xf32> -> vector<16x64xf32>
    %c0_237 = arith.constant 0 : index
    %c0_238 = arith.constant 0 : index
    %587 = vector.load %arg20[%c0_237, %c0_238] : memref<1x64xf32, #tpu.memory_space<vmem>>, vector<1x64xf32>
    %588 = vector.broadcast %587 : vector<1x64xf32> to vector<16x64xf32>
    %589 = arith.addf %586, %588 : vector<16x64xf32>
    %cst_239 = arith.constant 5.000000e-01 : f32
    %590 = vector.broadcast %cst_239 : f32 to vector<16x64xf32>
    %591 = arith.mulf %590, %589 : vector<16x64xf32>
    %cst_240 = arith.constant 0.707106769 : f32
    %592 = vector.broadcast %cst_240 : f32 to vector<16x64xf32>
    %593 = arith.mulf %589, %592 : vector<16x64xf32>
    %cst_241 = arith.constant 0.000000e+00 : f32
    %594 = vector.broadcast %cst_241 : f32 to vector<16x64xf32>
    %595 = arith.cmpf oge, %593, %594 : vector<16x64xf32>
    %cst_242 = arith.constant 1.000000e+00 : f32
    %cst_243 = arith.constant -1.000000e+00 : f32
    %596 = vector.broadcast %cst_242 : f32 to vector<16x64xf32>
    %597 = vector.broadcast %cst_243 : f32 to vector<16x64xf32>
    %598 = arith.select %595, %596, %597 : vector<16x64xi1>, vector<16x64xf32>
    %599 = math.absf %593 : vector<16x64xf32>
    %cst_244 = arith.constant 0.327591091 : f32
    %600 = vector.broadcast %cst_244 : f32 to vector<16x64xf32>
    %601 = arith.mulf %600, %599 : vector<16x64xf32>
    %cst_245 = arith.constant 1.000000e+00 : f32
    %602 = vector.broadcast %cst_245 : f32 to vector<16x64xf32>
    %603 = arith.addf %602, %601 : vector<16x64xf32>
    %cst_246 = arith.constant 1.000000e+00 : f32
    %604 = vector.broadcast %cst_246 : f32 to vector<16x64xf32>
    %605 = arith.divf %604, %603 : vector<16x64xf32>
    %cst_247 = arith.constant 1.06140542 : f32
    %606 = vector.broadcast %cst_247 : f32 to vector<16x64xf32>
    %607 = arith.mulf %606, %605 : vector<16x64xf32>
    %cst_248 = arith.constant -1.45315206 : f32
    %608 = vector.broadcast %cst_248 : f32 to vector<16x64xf32>
    %609 = arith.addf %607, %608 : vector<16x64xf32>
    %610 = arith.mulf %609, %605 : vector<16x64xf32>
    %cst_249 = arith.constant 1.42141378 : f32
    %611 = vector.broadcast %cst_249 : f32 to vector<16x64xf32>
    %612 = arith.addf %610, %611 : vector<16x64xf32>
    %613 = arith.mulf %612, %605 : vector<16x64xf32>
    %cst_250 = arith.constant -0.284496725 : f32
    %614 = vector.broadcast %cst_250 : f32 to vector<16x64xf32>
    %615 = arith.addf %613, %614 : vector<16x64xf32>
    %616 = arith.mulf %615, %605 : vector<16x64xf32>
    %cst_251 = arith.constant 0.254829586 : f32
    %617 = vector.broadcast %cst_251 : f32 to vector<16x64xf32>
    %618 = arith.addf %616, %617 : vector<16x64xf32>
    %619 = arith.mulf %618, %605 : vector<16x64xf32>
    %cst_252 = arith.constant 0.000000e+00 : f32
    %620 = vector.broadcast %cst_252 : f32 to vector<16x64xf32>
    %621 = arith.subf %620, %599 : vector<16x64xf32>
    %622 = arith.mulf %621, %599 : vector<16x64xf32>
    %623 = math.exp %622 : vector<16x64xf32>
    %624 = arith.mulf %619, %623 : vector<16x64xf32>
    %cst_253 = arith.constant 1.000000e+00 : f32
    %625 = vector.broadcast %cst_253 : f32 to vector<16x64xf32>
    %626 = arith.subf %625, %624 : vector<16x64xf32>
    %627 = arith.mulf %598, %626 : vector<16x64xf32>
    %cst_254 = arith.constant 1.000000e+00 : f32
    %628 = vector.broadcast %cst_254 : f32 to vector<16x64xf32>
    %629 = arith.addf %628, %627 : vector<16x64xf32>
    %630 = arith.mulf %591, %629 : vector<16x64xf32>
    %c0_255 = arith.constant 0 : index
    %c0_256 = arith.constant 0 : index
    %631 = vector.load %arg23[%c0_255, %c0_256] : memref<64x16xf32, #tpu.memory_space<vmem>>, vector<64x16xf32>
    %632 = arith.truncf %630 : vector<16x64xf32> to vector<16x64xbf16>
    %633 = arith.truncf %631 : vector<64x16xf32> to vector<64x16xbf16>
    %cst_257 = arith.constant dense<0.000000e+00> : vector<16x16xf32>
    %634 = tpu.matmul %632, %633, %cst_257 {dimension_numbers = #tpu.dot_dimension_numbers<[1], [0], [0], [1], [0, 0, 1, 1], [], []>} : vector<16x64xbf16>, vector<64x16xbf16>, vector<16x16xf32> -> vector<16x16xf32>
    %635 = arith.addf %560, %634 : vector<16x16xf32>
    %c0_258 = arith.constant 0 : index
    %c0_259 = arith.constant 0 : index
    %636 = vector.load %arg22[%c0_258, %c0_259] : memref<1x16xf32, #tpu.memory_space<vmem>>, vector<1x16xf32>
    %637 = vector.broadcast %636 : vector<1x16xf32> to vector<16x16xf32>
    %638 = arith.addf %635, %637 : vector<16x16xf32>
    %c0_260 = arith.constant 0 : index
    %c0_261 = arith.constant 0 : index
    %c0_262 = arith.constant 0 : index
    %639 = vector.load %arg37[%c0_260, %c0_261, %c0_262] : memref<4x4x16xf32, #tpu.memory_space<vmem>>, vector<1x4x16xf32>
    %640 = vector.shape_cast %639 : vector<1x4x16xf32> to vector<4x16xf32>
    %641 = arith.truncf %640 : vector<4x16xf32> to vector<4x16xbf16>
    %642 = arith.truncf %638 : vector<16x16xf32> to vector<16x16xbf16>
    %cst_263 = arith.constant dense<0.000000e+00> : vector<4x16xf32>
    %643 = tpu.matmul %641, %642, %cst_263 {dimension_numbers = #tpu.dot_dimension_numbers<[1], [0], [0], [1], [0, 0, 1, 1], [], []>} : vector<4x16xbf16>, vector<16x16xbf16>, vector<4x16xf32> -> vector<4x16xf32>
    %c1_264 = arith.constant 1 : index
    %c0_265 = arith.constant 0 : index
    %c0_266 = arith.constant 0 : index
    %644 = vector.load %arg37[%c1_264, %c0_265, %c0_266] : memref<4x4x16xf32, #tpu.memory_space<vmem>>, vector<1x4x16xf32>
    %645 = vector.shape_cast %644 : vector<1x4x16xf32> to vector<4x16xf32>
    %646 = arith.truncf %645 : vector<4x16xf32> to vector<4x16xbf16>
    %647 = arith.truncf %638 : vector<16x16xf32> to vector<16x16xbf16>
    %cst_267 = arith.constant dense<0.000000e+00> : vector<4x16xf32>
    %648 = tpu.matmul %646, %647, %cst_267 {dimension_numbers = #tpu.dot_dimension_numbers<[1], [0], [0], [1], [0, 0, 1, 1], [], []>} : vector<4x16xbf16>, vector<16x16xbf16>, vector<4x16xf32> -> vector<4x16xf32>
    %c2_268 = arith.constant 2 : index
    %c0_269 = arith.constant 0 : index
    %c0_270 = arith.constant 0 : index
    %649 = vector.load %arg37[%c2_268, %c0_269, %c0_270] : memref<4x4x16xf32, #tpu.memory_space<vmem>>, vector<1x4x16xf32>
    %650 = vector.shape_cast %649 : vector<1x4x16xf32> to vector<4x16xf32>
    %651 = arith.truncf %650 : vector<4x16xf32> to vector<4x16xbf16>
    %652 = arith.truncf %638 : vector<16x16xf32> to vector<16x16xbf16>
    %cst_271 = arith.constant dense<0.000000e+00> : vector<4x16xf32>
    %653 = tpu.matmul %651, %652, %cst_271 {dimension_numbers = #tpu.dot_dimension_numbers<[1], [0], [0], [1], [0, 0, 1, 1], [], []>} : vector<4x16xbf16>, vector<16x16xbf16>, vector<4x16xf32> -> vector<4x16xf32>
    %c3_272 = arith.constant 3 : index
    %c0_273 = arith.constant 0 : index
    %c0_274 = arith.constant 0 : index
    %654 = vector.load %arg37[%c3_272, %c0_273, %c0_274] : memref<4x4x16xf32, #tpu.memory_space<vmem>>, vector<1x4x16xf32>
    %655 = vector.shape_cast %654 : vector<1x4x16xf32> to vector<4x16xf32>
    %656 = arith.truncf %655 : vector<4x16xf32> to vector<4x16xbf16>
    %657 = arith.truncf %638 : vector<16x16xf32> to vector<16x16xbf16>
    %cst_275 = arith.constant dense<0.000000e+00> : vector<4x16xf32>
    %658 = tpu.matmul %656, %657, %cst_275 {dimension_numbers = #tpu.dot_dimension_numbers<[1], [0], [0], [1], [0, 0, 1, 1], [], []>} : vector<4x16xbf16>, vector<16x16xbf16>, vector<4x16xf32> -> vector<4x16xf32>
    %659 = tpu.concatenate %643, %648, %653, %658 in 1 : vector<4x16xf32>, vector<4x16xf32>, vector<4x16xf32>, vector<4x16xf32> -> vector<4x64xf32>
    %c0_276 = arith.constant 0 : index
    %c0_277 = arith.constant 0 : index
    %660 = vector.load %arg35[%c0_276, %c0_277] : memref<1x64xf32, #tpu.memory_space<vmem>>, vector<1x64xf32>
    %c0_278 = arith.constant 0 : index
    %c0_279 = arith.constant 0 : index
    %661 = vector.load %arg34[%c0_278, %c0_279] : memref<1x64xf32, #tpu.memory_space<vmem>>, vector<1x64xf32>
    %cst_280 = arith.constant dense<0.000000e+00> : vector<4xf32>
    %662 = vector.multi_reduction <add>, %659, %cst_280 [1] : vector<4x64xf32> to vector<4xf32>
    %663 = vector.shape_cast %662 : vector<4xf32> to vector<4x1xf32>
    %cst_281 = arith.constant 6.400000e+01 : f32
    %664 = vector.broadcast %cst_281 : f32 to vector<4x1xf32>
    %665 = arith.divf %663, %664 : vector<4x1xf32>
    %666 = vector.broadcast %665 : vector<4x1xf32> to vector<4x64xf32>
    %667 = arith.subf %659, %666 : vector<4x64xf32>
    %668 = arith.mulf %667, %667 : vector<4x64xf32>
    %cst_282 = arith.constant dense<0.000000e+00> : vector<4xf32>
    %669 = vector.multi_reduction <add>, %668, %cst_282 [1] : vector<4x64xf32> to vector<4xf32>
    %670 = vector.shape_cast %669 : vector<4xf32> to vector<4x1xf32>
    %cst_283 = arith.constant 6.400000e+01 : f32
    %671 = vector.broadcast %cst_283 : f32 to vector<4x1xf32>
    %672 = arith.divf %670, %671 : vector<4x1xf32>
    %cst_284 = arith.constant 9.99999974E-6 : f32
    %673 = vector.broadcast %cst_284 : f32 to vector<4x1xf32>
    %674 = arith.addf %672, %673 : vector<4x1xf32>
    %675 = math.rsqrt %674 : vector<4x1xf32>
    %676 = vector.broadcast %675 : vector<4x1xf32> to vector<4x64xf32>
    %677 = arith.mulf %667, %676 : vector<4x64xf32>
    %678 = vector.broadcast %660 : vector<1x64xf32> to vector<4x64xf32>
    %679 = arith.mulf %677, %678 : vector<4x64xf32>
    %680 = vector.broadcast %661 : vector<1x64xf32> to vector<4x64xf32>
    %681 = arith.addf %679, %680 : vector<4x64xf32>
    %c0_285 = arith.constant 0 : index
    %c0_286 = arith.constant 0 : index
    %682 = vector.load %arg36[%c0_285, %c0_286] : memref<64x32xf32, #tpu.memory_space<vmem>>, vector<64x32xf32>
    %683 = arith.truncf %681 : vector<4x64xf32> to vector<4x64xbf16>
    %684 = arith.truncf %682 : vector<64x32xf32> to vector<64x32xbf16>
    %cst_287 = arith.constant dense<0.000000e+00> : vector<4x32xf32>
    %685 = tpu.matmul %683, %684, %cst_287 {dimension_numbers = #tpu.dot_dimension_numbers<[1], [0], [0], [1], [0, 0, 1, 1], [], []>} : vector<4x64xbf16>, vector<64x32xbf16>, vector<4x32xf32> -> vector<4x32xf32>
    %c0_288 = arith.constant 0 : index
    %c0_289 = arith.constant 0 : index
    %686 = vector.load %arg44[%c0_288, %c0_289] : memref<1x32xf32, #tpu.memory_space<vmem>>, vector<1x32xf32>
    %c0_290 = arith.constant 0 : index
    %c0_291 = arith.constant 0 : index
    %687 = vector.load %arg43[%c0_290, %c0_291] : memref<1x32xf32, #tpu.memory_space<vmem>>, vector<1x32xf32>
    %cst_292 = arith.constant dense<0.000000e+00> : vector<4xf32>
    %688 = vector.multi_reduction <add>, %685, %cst_292 [1] : vector<4x32xf32> to vector<4xf32>
    %689 = vector.shape_cast %688 : vector<4xf32> to vector<4x1xf32>
    %cst_293 = arith.constant 3.200000e+01 : f32
    %690 = vector.broadcast %cst_293 : f32 to vector<4x1xf32>
    %691 = arith.divf %689, %690 : vector<4x1xf32>
    %692 = vector.broadcast %691 : vector<4x1xf32> to vector<4x32xf32>
    %693 = arith.subf %685, %692 : vector<4x32xf32>
    %694 = arith.mulf %693, %693 : vector<4x32xf32>
    %cst_294 = arith.constant dense<0.000000e+00> : vector<4xf32>
    %695 = vector.multi_reduction <add>, %694, %cst_294 [1] : vector<4x32xf32> to vector<4xf32>
    %696 = vector.shape_cast %695 : vector<4xf32> to vector<4x1xf32>
    %cst_295 = arith.constant 3.200000e+01 : f32
    %697 = vector.broadcast %cst_295 : f32 to vector<4x1xf32>
    %698 = arith.divf %696, %697 : vector<4x1xf32>
    %cst_296 = arith.constant 9.99999974E-6 : f32
    %699 = vector.broadcast %cst_296 : f32 to vector<4x1xf32>
    %700 = arith.addf %698, %699 : vector<4x1xf32>
    %701 = math.rsqrt %700 : vector<4x1xf32>
    %702 = vector.broadcast %701 : vector<4x1xf32> to vector<4x32xf32>
    %703 = arith.mulf %693, %702 : vector<4x32xf32>
    %704 = vector.broadcast %686 : vector<1x32xf32> to vector<4x32xf32>
    %705 = arith.mulf %703, %704 : vector<4x32xf32>
    %706 = vector.broadcast %687 : vector<1x32xf32> to vector<4x32xf32>
    %707 = arith.addf %705, %706 : vector<4x32xf32>
    %c0_297 = arith.constant 0 : index
    %c0_298 = arith.constant 0 : index
    %708 = vector.load %arg50[%c0_297, %c0_298] : memref<32x96xf32, #tpu.memory_space<vmem>>, vector<32x96xf32>
    %709 = arith.truncf %707 : vector<4x32xf32> to vector<4x32xbf16>
    %710 = arith.truncf %708 : vector<32x96xf32> to vector<32x96xbf16>
    %cst_299 = arith.constant dense<0.000000e+00> : vector<4x96xf32>
    %711 = tpu.matmul %709, %710, %cst_299 {dimension_numbers = #tpu.dot_dimension_numbers<[1], [0], [0], [1], [0, 0, 1, 1], [], []>} : vector<4x32xbf16>, vector<32x96xbf16>, vector<4x96xf32> -> vector<4x96xf32>
    %c0_300 = arith.constant 0 : index
    %c0_301 = arith.constant 0 : index
    %712 = vector.load %arg49[%c0_300, %c0_301] : memref<1x96xf32, #tpu.memory_space<vmem>>, vector<1x96xf32>
    %713 = vector.broadcast %712 : vector<1x96xf32> to vector<4x96xf32>
    %714 = arith.addf %711, %713 : vector<4x96xf32>
    %715 = vector.extract_strided_slice %714 {offsets = [0, 0], sizes = [4, 8], strides = [1, 1]} : vector<4x96xf32> to vector<4x8xf32>
    %716 = vector.extract_strided_slice %714 {offsets = [0, 32], sizes = [4, 8], strides = [1, 1]} : vector<4x96xf32> to vector<4x8xf32>
    %717 = vector.extract_strided_slice %714 {offsets = [0, 64], sizes = [4, 8], strides = [1, 1]} : vector<4x96xf32> to vector<4x8xf32>
    %718 = arith.truncf %715 : vector<4x8xf32> to vector<4x8xbf16>
    %719 = arith.truncf %716 : vector<4x8xf32> to vector<4x8xbf16>
    %cst_302 = arith.constant dense<0.000000e+00> : vector<4x4xf32>
    %720 = tpu.matmul %718, %719, %cst_302 {dimension_numbers = #tpu.dot_dimension_numbers<[1], [1], [0], [0], [0, 0, 1, 0], [], []>} : vector<4x8xbf16>, vector<4x8xbf16>, vector<4x4xf32> -> vector<4x4xf32>
    %c0_303 = arith.constant 0 : index
    %c0_304 = arith.constant 0 : index
    %c0_305 = arith.constant 0 : index
    %c0_306 = arith.constant 0 : index
    %721 = vector.load %arg38[%c0_303, %c0_304, %c0_305, %c0_306] : memref<1x4x4x4xf32, #tpu.memory_space<vmem>>, vector<1x1x4x4xf32>
    %722 = vector.shape_cast %721 : vector<1x1x4x4xf32> to vector<4x4xf32>
    %723 = arith.addf %720, %722 : vector<4x4xf32>
    %cst_307 = arith.constant dense<0xFF800000> : vector<4xf32>
    %724 = vector.multi_reduction <maximumf>, %723, %cst_307 [1] : vector<4x4xf32> to vector<4xf32>
    %725 = vector.shape_cast %724 : vector<4xf32> to vector<4x1xf32>
    %726 = vector.broadcast %725 : vector<4x1xf32> to vector<4x4xf32>
    %727 = arith.subf %723, %726 : vector<4x4xf32>
    %728 = math.exp %727 : vector<4x4xf32>
    %cst_308 = arith.constant dense<0.000000e+00> : vector<4xf32>
    %729 = vector.multi_reduction <add>, %728, %cst_308 [1] : vector<4x4xf32> to vector<4xf32>
    %730 = vector.shape_cast %729 : vector<4xf32> to vector<4x1xf32>
    %731 = tpu.reciprocal %730 {approx = true} : vector<4x1xf32> -> vector<4x1xf32>
    %732 = vector.broadcast %731 : vector<4x1xf32> to vector<4x4xf32>
    %733 = arith.mulf %728, %732 : vector<4x4xf32>
    %734 = arith.truncf %733 : vector<4x4xf32> to vector<4x4xbf16>
    %735 = arith.truncf %717 : vector<4x8xf32> to vector<4x8xbf16>
    %cst_309 = arith.constant dense<0.000000e+00> : vector<4x8xf32>
    %736 = tpu.matmul %734, %735, %cst_309 {dimension_numbers = #tpu.dot_dimension_numbers<[1], [0], [0], [1], [0, 0, 1, 1], [], []>} : vector<4x4xbf16>, vector<4x8xbf16>, vector<4x8xf32> -> vector<4x8xf32>
    %737 = vector.extract_strided_slice %714 {offsets = [0, 8], sizes = [4, 8], strides = [1, 1]} : vector<4x96xf32> to vector<4x8xf32>
    %738 = vector.extract_strided_slice %714 {offsets = [0, 40], sizes = [4, 8], strides = [1, 1]} : vector<4x96xf32> to vector<4x8xf32>
    %739 = vector.extract_strided_slice %714 {offsets = [0, 72], sizes = [4, 8], strides = [1, 1]} : vector<4x96xf32> to vector<4x8xf32>
    %740 = arith.truncf %737 : vector<4x8xf32> to vector<4x8xbf16>
    %741 = arith.truncf %738 : vector<4x8xf32> to vector<4x8xbf16>
    %cst_310 = arith.constant dense<0.000000e+00> : vector<4x4xf32>
    %742 = tpu.matmul %740, %741, %cst_310 {dimension_numbers = #tpu.dot_dimension_numbers<[1], [1], [0], [0], [0, 0, 1, 0], [], []>} : vector<4x8xbf16>, vector<4x8xbf16>, vector<4x4xf32> -> vector<4x4xf32>
    %c0_311 = arith.constant 0 : index
    %c1_312 = arith.constant 1 : index
    %c0_313 = arith.constant 0 : index
    %c0_314 = arith.constant 0 : index
    %743 = vector.load %arg38[%c0_311, %c1_312, %c0_313, %c0_314] : memref<1x4x4x4xf32, #tpu.memory_space<vmem>>, vector<1x1x4x4xf32>
    %744 = vector.shape_cast %743 : vector<1x1x4x4xf32> to vector<4x4xf32>
    %745 = arith.addf %742, %744 : vector<4x4xf32>
    %cst_315 = arith.constant dense<0xFF800000> : vector<4xf32>
    %746 = vector.multi_reduction <maximumf>, %745, %cst_315 [1] : vector<4x4xf32> to vector<4xf32>
    %747 = vector.shape_cast %746 : vector<4xf32> to vector<4x1xf32>
    %748 = vector.broadcast %747 : vector<4x1xf32> to vector<4x4xf32>
    %749 = arith.subf %745, %748 : vector<4x4xf32>
    %750 = math.exp %749 : vector<4x4xf32>
    %cst_316 = arith.constant dense<0.000000e+00> : vector<4xf32>
    %751 = vector.multi_reduction <add>, %750, %cst_316 [1] : vector<4x4xf32> to vector<4xf32>
    %752 = vector.shape_cast %751 : vector<4xf32> to vector<4x1xf32>
    %753 = tpu.reciprocal %752 {approx = true} : vector<4x1xf32> -> vector<4x1xf32>
    %754 = vector.broadcast %753 : vector<4x1xf32> to vector<4x4xf32>
    %755 = arith.mulf %750, %754 : vector<4x4xf32>
    %756 = arith.truncf %755 : vector<4x4xf32> to vector<4x4xbf16>
    %757 = arith.truncf %739 : vector<4x8xf32> to vector<4x8xbf16>
    %cst_317 = arith.constant dense<0.000000e+00> : vector<4x8xf32>
    %758 = tpu.matmul %756, %757, %cst_317 {dimension_numbers = #tpu.dot_dimension_numbers<[1], [0], [0], [1], [0, 0, 1, 1], [], []>} : vector<4x4xbf16>, vector<4x8xbf16>, vector<4x8xf32> -> vector<4x8xf32>
    %759 = vector.extract_strided_slice %714 {offsets = [0, 16], sizes = [4, 8], strides = [1, 1]} : vector<4x96xf32> to vector<4x8xf32>
    %760 = vector.extract_strided_slice %714 {offsets = [0, 48], sizes = [4, 8], strides = [1, 1]} : vector<4x96xf32> to vector<4x8xf32>
    %761 = vector.extract_strided_slice %714 {offsets = [0, 80], sizes = [4, 8], strides = [1, 1]} : vector<4x96xf32> to vector<4x8xf32>
    %762 = arith.truncf %759 : vector<4x8xf32> to vector<4x8xbf16>
    %763 = arith.truncf %760 : vector<4x8xf32> to vector<4x8xbf16>
    %cst_318 = arith.constant dense<0.000000e+00> : vector<4x4xf32>
    %764 = tpu.matmul %762, %763, %cst_318 {dimension_numbers = #tpu.dot_dimension_numbers<[1], [1], [0], [0], [0, 0, 1, 0], [], []>} : vector<4x8xbf16>, vector<4x8xbf16>, vector<4x4xf32> -> vector<4x4xf32>
    %c0_319 = arith.constant 0 : index
    %c2_320 = arith.constant 2 : index
    %c0_321 = arith.constant 0 : index
    %c0_322 = arith.constant 0 : index
    %765 = vector.load %arg38[%c0_319, %c2_320, %c0_321, %c0_322] : memref<1x4x4x4xf32, #tpu.memory_space<vmem>>, vector<1x1x4x4xf32>
    %766 = vector.shape_cast %765 : vector<1x1x4x4xf32> to vector<4x4xf32>
    %767 = arith.addf %764, %766 : vector<4x4xf32>
    %cst_323 = arith.constant dense<0xFF800000> : vector<4xf32>
    %768 = vector.multi_reduction <maximumf>, %767, %cst_323 [1] : vector<4x4xf32> to vector<4xf32>
    %769 = vector.shape_cast %768 : vector<4xf32> to vector<4x1xf32>
    %770 = vector.broadcast %769 : vector<4x1xf32> to vector<4x4xf32>
    %771 = arith.subf %767, %770 : vector<4x4xf32>
    %772 = math.exp %771 : vector<4x4xf32>
    %cst_324 = arith.constant dense<0.000000e+00> : vector<4xf32>
    %773 = vector.multi_reduction <add>, %772, %cst_324 [1] : vector<4x4xf32> to vector<4xf32>
    %774 = vector.shape_cast %773 : vector<4xf32> to vector<4x1xf32>
    %775 = tpu.reciprocal %774 {approx = true} : vector<4x1xf32> -> vector<4x1xf32>
    %776 = vector.broadcast %775 : vector<4x1xf32> to vector<4x4xf32>
    %777 = arith.mulf %772, %776 : vector<4x4xf32>
    %778 = arith.truncf %777 : vector<4x4xf32> to vector<4x4xbf16>
    %779 = arith.truncf %761 : vector<4x8xf32> to vector<4x8xbf16>
    %cst_325 = arith.constant dense<0.000000e+00> : vector<4x8xf32>
    %780 = tpu.matmul %778, %779, %cst_325 {dimension_numbers = #tpu.dot_dimension_numbers<[1], [0], [0], [1], [0, 0, 1, 1], [], []>} : vector<4x4xbf16>, vector<4x8xbf16>, vector<4x8xf32> -> vector<4x8xf32>
    %781 = vector.extract_strided_slice %714 {offsets = [0, 24], sizes = [4, 8], strides = [1, 1]} : vector<4x96xf32> to vector<4x8xf32>
    %782 = vector.extract_strided_slice %714 {offsets = [0, 56], sizes = [4, 8], strides = [1, 1]} : vector<4x96xf32> to vector<4x8xf32>
    %783 = vector.extract_strided_slice %714 {offsets = [0, 88], sizes = [4, 8], strides = [1, 1]} : vector<4x96xf32> to vector<4x8xf32>
    %784 = arith.truncf %781 : vector<4x8xf32> to vector<4x8xbf16>
    %785 = arith.truncf %782 : vector<4x8xf32> to vector<4x8xbf16>
    %cst_326 = arith.constant dense<0.000000e+00> : vector<4x4xf32>
    %786 = tpu.matmul %784, %785, %cst_326 {dimension_numbers = #tpu.dot_dimension_numbers<[1], [1], [0], [0], [0, 0, 1, 0], [], []>} : vector<4x8xbf16>, vector<4x8xbf16>, vector<4x4xf32> -> vector<4x4xf32>
    %c0_327 = arith.constant 0 : index
    %c3_328 = arith.constant 3 : index
    %c0_329 = arith.constant 0 : index
    %c0_330 = arith.constant 0 : index
    %787 = vector.load %arg38[%c0_327, %c3_328, %c0_329, %c0_330] : memref<1x4x4x4xf32, #tpu.memory_space<vmem>>, vector<1x1x4x4xf32>
    %788 = vector.shape_cast %787 : vector<1x1x4x4xf32> to vector<4x4xf32>
    %789 = arith.addf %786, %788 : vector<4x4xf32>
    %cst_331 = arith.constant dense<0xFF800000> : vector<4xf32>
    %790 = vector.multi_reduction <maximumf>, %789, %cst_331 [1] : vector<4x4xf32> to vector<4xf32>
    %791 = vector.shape_cast %790 : vector<4xf32> to vector<4x1xf32>
    %792 = vector.broadcast %791 : vector<4x1xf32> to vector<4x4xf32>
    %793 = arith.subf %789, %792 : vector<4x4xf32>
    %794 = math.exp %793 : vector<4x4xf32>
    %cst_332 = arith.constant dense<0.000000e+00> : vector<4xf32>
    %795 = vector.multi_reduction <add>, %794, %cst_332 [1] : vector<4x4xf32> to vector<4xf32>
    %796 = vector.shape_cast %795 : vector<4xf32> to vector<4x1xf32>
    %797 = tpu.reciprocal %796 {approx = true} : vector<4x1xf32> -> vector<4x1xf32>
    %798 = vector.broadcast %797 : vector<4x1xf32> to vector<4x4xf32>
    %799 = arith.mulf %794, %798 : vector<4x4xf32>
    %800 = arith.truncf %799 : vector<4x4xf32> to vector<4x4xbf16>
    %801 = arith.truncf %783 : vector<4x8xf32> to vector<4x8xbf16>
    %cst_333 = arith.constant dense<0.000000e+00> : vector<4x8xf32>
    %802 = tpu.matmul %800, %801, %cst_333 {dimension_numbers = #tpu.dot_dimension_numbers<[1], [0], [0], [1], [0, 0, 1, 1], [], []>} : vector<4x4xbf16>, vector<4x8xbf16>, vector<4x8xf32> -> vector<4x8xf32>
    %803 = tpu.concatenate %736, %758, %780, %802 in 1 : vector<4x8xf32>, vector<4x8xf32>, vector<4x8xf32>, vector<4x8xf32> -> vector<4x32xf32>
    %c0_334 = arith.constant 0 : index
    %c0_335 = arith.constant 0 : index
    %804 = vector.load %arg48[%c0_334, %c0_335] : memref<32x32xf32, #tpu.memory_space<vmem>>, vector<32x32xf32>
    %805 = arith.truncf %803 : vector<4x32xf32> to vector<4x32xbf16>
    %806 = arith.truncf %804 : vector<32x32xf32> to vector<32x32xbf16>
    %cst_336 = arith.constant dense<0.000000e+00> : vector<4x32xf32>
    %807 = tpu.matmul %805, %806, %cst_336 {dimension_numbers = #tpu.dot_dimension_numbers<[1], [0], [0], [1], [0, 0, 1, 1], [], []>} : vector<4x32xbf16>, vector<32x32xbf16>, vector<4x32xf32> -> vector<4x32xf32>
    %808 = arith.addf %685, %807 : vector<4x32xf32>
    %c0_337 = arith.constant 0 : index
    %c0_338 = arith.constant 0 : index
    %809 = vector.load %arg47[%c0_337, %c0_338] : memref<1x32xf32, #tpu.memory_space<vmem>>, vector<1x32xf32>
    %810 = vector.broadcast %809 : vector<1x32xf32> to vector<4x32xf32>
    %811 = arith.addf %808, %810 : vector<4x32xf32>
    %c0_339 = arith.constant 0 : index
    %c0_340 = arith.constant 0 : index
    %812 = vector.load %arg46[%c0_339, %c0_340] : memref<1x32xf32, #tpu.memory_space<vmem>>, vector<1x32xf32>
    %c0_341 = arith.constant 0 : index
    %c0_342 = arith.constant 0 : index
    %813 = vector.load %arg45[%c0_341, %c0_342] : memref<1x32xf32, #tpu.memory_space<vmem>>, vector<1x32xf32>
    %cst_343 = arith.constant dense<0.000000e+00> : vector<4xf32>
    %814 = vector.multi_reduction <add>, %811, %cst_343 [1] : vector<4x32xf32> to vector<4xf32>
    %815 = vector.shape_cast %814 : vector<4xf32> to vector<4x1xf32>
    %cst_344 = arith.constant 3.200000e+01 : f32
    %816 = vector.broadcast %cst_344 : f32 to vector<4x1xf32>
    %817 = arith.divf %815, %816 : vector<4x1xf32>
    %818 = vector.broadcast %817 : vector<4x1xf32> to vector<4x32xf32>
    %819 = arith.subf %811, %818 : vector<4x32xf32>
    %820 = arith.mulf %819, %819 : vector<4x32xf32>
    %cst_345 = arith.constant dense<0.000000e+00> : vector<4xf32>
    %821 = vector.multi_reduction <add>, %820, %cst_345 [1] : vector<4x32xf32> to vector<4xf32>
    %822 = vector.shape_cast %821 : vector<4xf32> to vector<4x1xf32>
    %cst_346 = arith.constant 3.200000e+01 : f32
    %823 = vector.broadcast %cst_346 : f32 to vector<4x1xf32>
    %824 = arith.divf %822, %823 : vector<4x1xf32>
    %cst_347 = arith.constant 9.99999974E-6 : f32
    %825 = vector.broadcast %cst_347 : f32 to vector<4x1xf32>
    %826 = arith.addf %824, %825 : vector<4x1xf32>
    %827 = math.rsqrt %826 : vector<4x1xf32>
    %828 = vector.broadcast %827 : vector<4x1xf32> to vector<4x32xf32>
    %829 = arith.mulf %819, %828 : vector<4x32xf32>
    %830 = vector.broadcast %812 : vector<1x32xf32> to vector<4x32xf32>
    %831 = arith.mulf %829, %830 : vector<4x32xf32>
    %832 = vector.broadcast %813 : vector<1x32xf32> to vector<4x32xf32>
    %833 = arith.addf %831, %832 : vector<4x32xf32>
    %c0_348 = arith.constant 0 : index
    %c0_349 = arith.constant 0 : index
    %834 = vector.load %arg40[%c0_348, %c0_349] : memref<32x128xf32, #tpu.memory_space<vmem>>, vector<32x128xf32>
    %835 = arith.truncf %833 : vector<4x32xf32> to vector<4x32xbf16>
    %836 = arith.truncf %834 : vector<32x128xf32> to vector<32x128xbf16>
    %cst_350 = arith.constant dense<0.000000e+00> : vector<4x128xf32>
    %837 = tpu.matmul %835, %836, %cst_350 {dimension_numbers = #tpu.dot_dimension_numbers<[1], [0], [0], [1], [0, 0, 1, 1], [], []>} : vector<4x32xbf16>, vector<32x128xbf16>, vector<4x128xf32> -> vector<4x128xf32>
    %c0_351 = arith.constant 0 : index
    %c0_352 = arith.constant 0 : index
    %838 = vector.load %arg39[%c0_351, %c0_352] : memref<1x128xf32, #tpu.memory_space<vmem>>, vector<1x128xf32>
    %839 = vector.broadcast %838 : vector<1x128xf32> to vector<4x128xf32>
    %840 = arith.addf %837, %839 : vector<4x128xf32>
    %cst_353 = arith.constant 5.000000e-01 : f32
    %841 = vector.broadcast %cst_353 : f32 to vector<4x128xf32>
    %842 = arith.mulf %841, %840 : vector<4x128xf32>
    %cst_354 = arith.constant 0.707106769 : f32
    %843 = vector.broadcast %cst_354 : f32 to vector<4x128xf32>
    %844 = arith.mulf %840, %843 : vector<4x128xf32>
    %cst_355 = arith.constant 0.000000e+00 : f32
    %845 = vector.broadcast %cst_355 : f32 to vector<4x128xf32>
    %846 = arith.cmpf oge, %844, %845 : vector<4x128xf32>
    %cst_356 = arith.constant 1.000000e+00 : f32
    %cst_357 = arith.constant -1.000000e+00 : f32
    %847 = vector.broadcast %cst_356 : f32 to vector<4x128xf32>
    %848 = vector.broadcast %cst_357 : f32 to vector<4x128xf32>
    %849 = arith.select %846, %847, %848 : vector<4x128xi1>, vector<4x128xf32>
    %850 = math.absf %844 : vector<4x128xf32>
    %cst_358 = arith.constant 0.327591091 : f32
    %851 = vector.broadcast %cst_358 : f32 to vector<4x128xf32>
    %852 = arith.mulf %851, %850 : vector<4x128xf32>
    %cst_359 = arith.constant 1.000000e+00 : f32
    %853 = vector.broadcast %cst_359 : f32 to vector<4x128xf32>
    %854 = arith.addf %853, %852 : vector<4x128xf32>
    %cst_360 = arith.constant 1.000000e+00 : f32
    %855 = vector.broadcast %cst_360 : f32 to vector<4x128xf32>
    %856 = arith.divf %855, %854 : vector<4x128xf32>
    %cst_361 = arith.constant 1.06140542 : f32
    %857 = vector.broadcast %cst_361 : f32 to vector<4x128xf32>
    %858 = arith.mulf %857, %856 : vector<4x128xf32>
    %cst_362 = arith.constant -1.45315206 : f32
    %859 = vector.broadcast %cst_362 : f32 to vector<4x128xf32>
    %860 = arith.addf %858, %859 : vector<4x128xf32>
    %861 = arith.mulf %860, %856 : vector<4x128xf32>
    %cst_363 = arith.constant 1.42141378 : f32
    %862 = vector.broadcast %cst_363 : f32 to vector<4x128xf32>
    %863 = arith.addf %861, %862 : vector<4x128xf32>
    %864 = arith.mulf %863, %856 : vector<4x128xf32>
    %cst_364 = arith.constant -0.284496725 : f32
    %865 = vector.broadcast %cst_364 : f32 to vector<4x128xf32>
    %866 = arith.addf %864, %865 : vector<4x128xf32>
    %867 = arith.mulf %866, %856 : vector<4x128xf32>
    %cst_365 = arith.constant 0.254829586 : f32
    %868 = vector.broadcast %cst_365 : f32 to vector<4x128xf32>
    %869 = arith.addf %867, %868 : vector<4x128xf32>
    %870 = arith.mulf %869, %856 : vector<4x128xf32>
    %cst_366 = arith.constant 0.000000e+00 : f32
    %871 = vector.broadcast %cst_366 : f32 to vector<4x128xf32>
    %872 = arith.subf %871, %850 : vector<4x128xf32>
    %873 = arith.mulf %872, %850 : vector<4x128xf32>
    %874 = math.exp %873 : vector<4x128xf32>
    %875 = arith.mulf %870, %874 : vector<4x128xf32>
    %cst_367 = arith.constant 1.000000e+00 : f32
    %876 = vector.broadcast %cst_367 : f32 to vector<4x128xf32>
    %877 = arith.subf %876, %875 : vector<4x128xf32>
    %878 = arith.mulf %849, %877 : vector<4x128xf32>
    %cst_368 = arith.constant 1.000000e+00 : f32
    %879 = vector.broadcast %cst_368 : f32 to vector<4x128xf32>
    %880 = arith.addf %879, %878 : vector<4x128xf32>
    %881 = arith.mulf %842, %880 : vector<4x128xf32>
    %c0_369 = arith.constant 0 : index
    %c0_370 = arith.constant 0 : index
    %882 = vector.load %arg42[%c0_369, %c0_370] : memref<128x32xf32, #tpu.memory_space<vmem>>, vector<128x32xf32>
    %883 = arith.truncf %881 : vector<4x128xf32> to vector<4x128xbf16>
    %884 = arith.truncf %882 : vector<128x32xf32> to vector<128x32xbf16>
    %cst_371 = arith.constant dense<0.000000e+00> : vector<4x32xf32>
    %885 = tpu.matmul %883, %884, %cst_371 {dimension_numbers = #tpu.dot_dimension_numbers<[1], [0], [0], [1], [0, 0, 1, 1], [], []>} : vector<4x128xbf16>, vector<128x32xbf16>, vector<4x32xf32> -> vector<4x32xf32>
    %886 = arith.addf %811, %885 : vector<4x32xf32>
    %c0_372 = arith.constant 0 : index
    %c0_373 = arith.constant 0 : index
    %887 = vector.load %arg41[%c0_372, %c0_373] : memref<1x32xf32, #tpu.memory_space<vmem>>, vector<1x32xf32>
    %888 = vector.broadcast %887 : vector<1x32xf32> to vector<4x32xf32>
    %889 = arith.addf %886, %888 : vector<4x32xf32>
    %c0_374 = arith.constant 0 : index
    %c0_375 = arith.constant 0 : index
    %890 = vector.load %arg57[%c0_374, %c0_375] : memref<1x32xf32, #tpu.memory_space<vmem>>, vector<1x32xf32>
    %c0_376 = arith.constant 0 : index
    %c0_377 = arith.constant 0 : index
    %891 = vector.load %arg56[%c0_376, %c0_377] : memref<1x32xf32, #tpu.memory_space<vmem>>, vector<1x32xf32>
    %cst_378 = arith.constant dense<0.000000e+00> : vector<4xf32>
    %892 = vector.multi_reduction <add>, %889, %cst_378 [1] : vector<4x32xf32> to vector<4xf32>
    %893 = vector.shape_cast %892 : vector<4xf32> to vector<4x1xf32>
    %cst_379 = arith.constant 3.200000e+01 : f32
    %894 = vector.broadcast %cst_379 : f32 to vector<4x1xf32>
    %895 = arith.divf %893, %894 : vector<4x1xf32>
    %896 = vector.broadcast %895 : vector<4x1xf32> to vector<4x32xf32>
    %897 = arith.subf %889, %896 : vector<4x32xf32>
    %898 = arith.mulf %897, %897 : vector<4x32xf32>
    %cst_380 = arith.constant dense<0.000000e+00> : vector<4xf32>
    %899 = vector.multi_reduction <add>, %898, %cst_380 [1] : vector<4x32xf32> to vector<4xf32>
    %900 = vector.shape_cast %899 : vector<4xf32> to vector<4x1xf32>
    %cst_381 = arith.constant 3.200000e+01 : f32
    %901 = vector.broadcast %cst_381 : f32 to vector<4x1xf32>
    %902 = arith.divf %900, %901 : vector<4x1xf32>
    %cst_382 = arith.constant 9.99999974E-6 : f32
    %903 = vector.broadcast %cst_382 : f32 to vector<4x1xf32>
    %904 = arith.addf %902, %903 : vector<4x1xf32>
    %905 = math.rsqrt %904 : vector<4x1xf32>
    %906 = vector.broadcast %905 : vector<4x1xf32> to vector<4x32xf32>
    %907 = arith.mulf %897, %906 : vector<4x32xf32>
    %908 = vector.broadcast %890 : vector<1x32xf32> to vector<4x32xf32>
    %909 = arith.mulf %907, %908 : vector<4x32xf32>
    %910 = vector.broadcast %891 : vector<1x32xf32> to vector<4x32xf32>
    %911 = arith.addf %909, %910 : vector<4x32xf32>
    %c0_383 = arith.constant 0 : index
    %c0_384 = arith.constant 0 : index
    %912 = vector.load %arg63[%c0_383, %c0_384] : memref<32x96xf32, #tpu.memory_space<vmem>>, vector<32x96xf32>
    %913 = arith.truncf %911 : vector<4x32xf32> to vector<4x32xbf16>
    %914 = arith.truncf %912 : vector<32x96xf32> to vector<32x96xbf16>
    %cst_385 = arith.constant dense<0.000000e+00> : vector<4x96xf32>
    %915 = tpu.matmul %913, %914, %cst_385 {dimension_numbers = #tpu.dot_dimension_numbers<[1], [0], [0], [1], [0, 0, 1, 1], [], []>} : vector<4x32xbf16>, vector<32x96xbf16>, vector<4x96xf32> -> vector<4x96xf32>
    %c0_386 = arith.constant 0 : index
    %c0_387 = arith.constant 0 : index
    %916 = vector.load %arg62[%c0_386, %c0_387] : memref<1x96xf32, #tpu.memory_space<vmem>>, vector<1x96xf32>
    %917 = vector.broadcast %916 : vector<1x96xf32> to vector<4x96xf32>
    %918 = arith.addf %915, %917 : vector<4x96xf32>
    %919 = vector.extract_strided_slice %918 {offsets = [0, 0], sizes = [4, 8], strides = [1, 1]} : vector<4x96xf32> to vector<4x8xf32>
    %920 = vector.extract_strided_slice %918 {offsets = [0, 32], sizes = [4, 8], strides = [1, 1]} : vector<4x96xf32> to vector<4x8xf32>
    %921 = vector.extract_strided_slice %918 {offsets = [0, 64], sizes = [4, 8], strides = [1, 1]} : vector<4x96xf32> to vector<4x8xf32>
    %922 = arith.truncf %919 : vector<4x8xf32> to vector<4x8xbf16>
    %923 = arith.truncf %920 : vector<4x8xf32> to vector<4x8xbf16>
    %cst_388 = arith.constant dense<0.000000e+00> : vector<4x4xf32>
    %924 = tpu.matmul %922, %923, %cst_388 {dimension_numbers = #tpu.dot_dimension_numbers<[1], [1], [0], [0], [0, 0, 1, 0], [], []>} : vector<4x8xbf16>, vector<4x8xbf16>, vector<4x4xf32> -> vector<4x4xf32>
    %c0_389 = arith.constant 0 : index
    %c0_390 = arith.constant 0 : index
    %c0_391 = arith.constant 0 : index
    %c0_392 = arith.constant 0 : index
    %925 = vector.load %arg51[%c0_389, %c0_390, %c0_391, %c0_392] : memref<1x4x4x4xf32, #tpu.memory_space<vmem>>, vector<1x1x4x4xf32>
    %926 = vector.shape_cast %925 : vector<1x1x4x4xf32> to vector<4x4xf32>
    %927 = arith.addf %924, %926 : vector<4x4xf32>
    %cst_393 = arith.constant dense<0xFF800000> : vector<4xf32>
    %928 = vector.multi_reduction <maximumf>, %927, %cst_393 [1] : vector<4x4xf32> to vector<4xf32>
    %929 = vector.shape_cast %928 : vector<4xf32> to vector<4x1xf32>
    %930 = vector.broadcast %929 : vector<4x1xf32> to vector<4x4xf32>
    %931 = arith.subf %927, %930 : vector<4x4xf32>
    %932 = math.exp %931 : vector<4x4xf32>
    %cst_394 = arith.constant dense<0.000000e+00> : vector<4xf32>
    %933 = vector.multi_reduction <add>, %932, %cst_394 [1] : vector<4x4xf32> to vector<4xf32>
    %934 = vector.shape_cast %933 : vector<4xf32> to vector<4x1xf32>
    %935 = tpu.reciprocal %934 {approx = true} : vector<4x1xf32> -> vector<4x1xf32>
    %936 = vector.broadcast %935 : vector<4x1xf32> to vector<4x4xf32>
    %937 = arith.mulf %932, %936 : vector<4x4xf32>
    %938 = arith.truncf %937 : vector<4x4xf32> to vector<4x4xbf16>
    %939 = arith.truncf %921 : vector<4x8xf32> to vector<4x8xbf16>
    %cst_395 = arith.constant dense<0.000000e+00> : vector<4x8xf32>
    %940 = tpu.matmul %938, %939, %cst_395 {dimension_numbers = #tpu.dot_dimension_numbers<[1], [0], [0], [1], [0, 0, 1, 1], [], []>} : vector<4x4xbf16>, vector<4x8xbf16>, vector<4x8xf32> -> vector<4x8xf32>
    %941 = vector.extract_strided_slice %918 {offsets = [0, 8], sizes = [4, 8], strides = [1, 1]} : vector<4x96xf32> to vector<4x8xf32>
    %942 = vector.extract_strided_slice %918 {offsets = [0, 40], sizes = [4, 8], strides = [1, 1]} : vector<4x96xf32> to vector<4x8xf32>
    %943 = vector.extract_strided_slice %918 {offsets = [0, 72], sizes = [4, 8], strides = [1, 1]} : vector<4x96xf32> to vector<4x8xf32>
    %944 = arith.truncf %941 : vector<4x8xf32> to vector<4x8xbf16>
    %945 = arith.truncf %942 : vector<4x8xf32> to vector<4x8xbf16>
    %cst_396 = arith.constant dense<0.000000e+00> : vector<4x4xf32>
    %946 = tpu.matmul %944, %945, %cst_396 {dimension_numbers = #tpu.dot_dimension_numbers<[1], [1], [0], [0], [0, 0, 1, 0], [], []>} : vector<4x8xbf16>, vector<4x8xbf16>, vector<4x4xf32> -> vector<4x4xf32>
    %c0_397 = arith.constant 0 : index
    %c1_398 = arith.constant 1 : index
    %c0_399 = arith.constant 0 : index
    %c0_400 = arith.constant 0 : index
    %947 = vector.load %arg51[%c0_397, %c1_398, %c0_399, %c0_400] : memref<1x4x4x4xf32, #tpu.memory_space<vmem>>, vector<1x1x4x4xf32>
    %948 = vector.shape_cast %947 : vector<1x1x4x4xf32> to vector<4x4xf32>
    %949 = arith.addf %946, %948 : vector<4x4xf32>
    %cst_401 = arith.constant dense<0xFF800000> : vector<4xf32>
    %950 = vector.multi_reduction <maximumf>, %949, %cst_401 [1] : vector<4x4xf32> to vector<4xf32>
    %951 = vector.shape_cast %950 : vector<4xf32> to vector<4x1xf32>
    %952 = vector.broadcast %951 : vector<4x1xf32> to vector<4x4xf32>
    %953 = arith.subf %949, %952 : vector<4x4xf32>
    %954 = math.exp %953 : vector<4x4xf32>
    %cst_402 = arith.constant dense<0.000000e+00> : vector<4xf32>
    %955 = vector.multi_reduction <add>, %954, %cst_402 [1] : vector<4x4xf32> to vector<4xf32>
    %956 = vector.shape_cast %955 : vector<4xf32> to vector<4x1xf32>
    %957 = tpu.reciprocal %956 {approx = true} : vector<4x1xf32> -> vector<4x1xf32>
    %958 = vector.broadcast %957 : vector<4x1xf32> to vector<4x4xf32>
    %959 = arith.mulf %954, %958 : vector<4x4xf32>
    %960 = arith.truncf %959 : vector<4x4xf32> to vector<4x4xbf16>
    %961 = arith.truncf %943 : vector<4x8xf32> to vector<4x8xbf16>
    %cst_403 = arith.constant dense<0.000000e+00> : vector<4x8xf32>
    %962 = tpu.matmul %960, %961, %cst_403 {dimension_numbers = #tpu.dot_dimension_numbers<[1], [0], [0], [1], [0, 0, 1, 1], [], []>} : vector<4x4xbf16>, vector<4x8xbf16>, vector<4x8xf32> -> vector<4x8xf32>
    %963 = vector.extract_strided_slice %918 {offsets = [0, 16], sizes = [4, 8], strides = [1, 1]} : vector<4x96xf32> to vector<4x8xf32>
    %964 = vector.extract_strided_slice %918 {offsets = [0, 48], sizes = [4, 8], strides = [1, 1]} : vector<4x96xf32> to vector<4x8xf32>
    %965 = vector.extract_strided_slice %918 {offsets = [0, 80], sizes = [4, 8], strides = [1, 1]} : vector<4x96xf32> to vector<4x8xf32>
    %966 = arith.truncf %963 : vector<4x8xf32> to vector<4x8xbf16>
    %967 = arith.truncf %964 : vector<4x8xf32> to vector<4x8xbf16>
    %cst_404 = arith.constant dense<0.000000e+00> : vector<4x4xf32>
    %968 = tpu.matmul %966, %967, %cst_404 {dimension_numbers = #tpu.dot_dimension_numbers<[1], [1], [0], [0], [0, 0, 1, 0], [], []>} : vector<4x8xbf16>, vector<4x8xbf16>, vector<4x4xf32> -> vector<4x4xf32>
    %c0_405 = arith.constant 0 : index
    %c2_406 = arith.constant 2 : index
    %c0_407 = arith.constant 0 : index
    %c0_408 = arith.constant 0 : index
    %969 = vector.load %arg51[%c0_405, %c2_406, %c0_407, %c0_408] : memref<1x4x4x4xf32, #tpu.memory_space<vmem>>, vector<1x1x4x4xf32>
    %970 = vector.shape_cast %969 : vector<1x1x4x4xf32> to vector<4x4xf32>
    %971 = arith.addf %968, %970 : vector<4x4xf32>
    %cst_409 = arith.constant dense<0xFF800000> : vector<4xf32>
    %972 = vector.multi_reduction <maximumf>, %971, %cst_409 [1] : vector<4x4xf32> to vector<4xf32>
    %973 = vector.shape_cast %972 : vector<4xf32> to vector<4x1xf32>
    %974 = vector.broadcast %973 : vector<4x1xf32> to vector<4x4xf32>
    %975 = arith.subf %971, %974 : vector<4x4xf32>
    %976 = math.exp %975 : vector<4x4xf32>
    %cst_410 = arith.constant dense<0.000000e+00> : vector<4xf32>
    %977 = vector.multi_reduction <add>, %976, %cst_410 [1] : vector<4x4xf32> to vector<4xf32>
    %978 = vector.shape_cast %977 : vector<4xf32> to vector<4x1xf32>
    %979 = tpu.reciprocal %978 {approx = true} : vector<4x1xf32> -> vector<4x1xf32>
    %980 = vector.broadcast %979 : vector<4x1xf32> to vector<4x4xf32>
    %981 = arith.mulf %976, %980 : vector<4x4xf32>
    %982 = arith.truncf %981 : vector<4x4xf32> to vector<4x4xbf16>
    %983 = arith.truncf %965 : vector<4x8xf32> to vector<4x8xbf16>
    %cst_411 = arith.constant dense<0.000000e+00> : vector<4x8xf32>
    %984 = tpu.matmul %982, %983, %cst_411 {dimension_numbers = #tpu.dot_dimension_numbers<[1], [0], [0], [1], [0, 0, 1, 1], [], []>} : vector<4x4xbf16>, vector<4x8xbf16>, vector<4x8xf32> -> vector<4x8xf32>
    %985 = vector.extract_strided_slice %918 {offsets = [0, 24], sizes = [4, 8], strides = [1, 1]} : vector<4x96xf32> to vector<4x8xf32>
    %986 = vector.extract_strided_slice %918 {offsets = [0, 56], sizes = [4, 8], strides = [1, 1]} : vector<4x96xf32> to vector<4x8xf32>
    %987 = vector.extract_strided_slice %918 {offsets = [0, 88], sizes = [4, 8], strides = [1, 1]} : vector<4x96xf32> to vector<4x8xf32>
    %988 = arith.truncf %985 : vector<4x8xf32> to vector<4x8xbf16>
    %989 = arith.truncf %986 : vector<4x8xf32> to vector<4x8xbf16>
    %cst_412 = arith.constant dense<0.000000e+00> : vector<4x4xf32>
    %990 = tpu.matmul %988, %989, %cst_412 {dimension_numbers = #tpu.dot_dimension_numbers<[1], [1], [0], [0], [0, 0, 1, 0], [], []>} : vector<4x8xbf16>, vector<4x8xbf16>, vector<4x4xf32> -> vector<4x4xf32>
    %c0_413 = arith.constant 0 : index
    %c3_414 = arith.constant 3 : index
    %c0_415 = arith.constant 0 : index
    %c0_416 = arith.constant 0 : index
    %991 = vector.load %arg51[%c0_413, %c3_414, %c0_415, %c0_416] : memref<1x4x4x4xf32, #tpu.memory_space<vmem>>, vector<1x1x4x4xf32>
    %992 = vector.shape_cast %991 : vector<1x1x4x4xf32> to vector<4x4xf32>
    %993 = arith.addf %990, %992 : vector<4x4xf32>
    %cst_417 = arith.constant dense<0xFF800000> : vector<4xf32>
    %994 = vector.multi_reduction <maximumf>, %993, %cst_417 [1] : vector<4x4xf32> to vector<4xf32>
    %995 = vector.shape_cast %994 : vector<4xf32> to vector<4x1xf32>
    %996 = vector.broadcast %995 : vector<4x1xf32> to vector<4x4xf32>
    %997 = arith.subf %993, %996 : vector<4x4xf32>
    %998 = math.exp %997 : vector<4x4xf32>
    %cst_418 = arith.constant dense<0.000000e+00> : vector<4xf32>
    %999 = vector.multi_reduction <add>, %998, %cst_418 [1] : vector<4x4xf32> to vector<4xf32>
    %1000 = vector.shape_cast %999 : vector<4xf32> to vector<4x1xf32>
    %1001 = tpu.reciprocal %1000 {approx = true} : vector<4x1xf32> -> vector<4x1xf32>
    %1002 = vector.broadcast %1001 : vector<4x1xf32> to vector<4x4xf32>
    %1003 = arith.mulf %998, %1002 : vector<4x4xf32>
    %1004 = arith.truncf %1003 : vector<4x4xf32> to vector<4x4xbf16>
    %1005 = arith.truncf %987 : vector<4x8xf32> to vector<4x8xbf16>
    %cst_419 = arith.constant dense<0.000000e+00> : vector<4x8xf32>
    %1006 = tpu.matmul %1004, %1005, %cst_419 {dimension_numbers = #tpu.dot_dimension_numbers<[1], [0], [0], [1], [0, 0, 1, 1], [], []>} : vector<4x4xbf16>, vector<4x8xbf16>, vector<4x8xf32> -> vector<4x8xf32>
    %1007 = tpu.concatenate %940, %962, %984, %1006 in 1 : vector<4x8xf32>, vector<4x8xf32>, vector<4x8xf32>, vector<4x8xf32> -> vector<4x32xf32>
    %c0_420 = arith.constant 0 : index
    %c0_421 = arith.constant 0 : index
    %1008 = vector.load %arg61[%c0_420, %c0_421] : memref<32x32xf32, #tpu.memory_space<vmem>>, vector<32x32xf32>
    %1009 = arith.truncf %1007 : vector<4x32xf32> to vector<4x32xbf16>
    %1010 = arith.truncf %1008 : vector<32x32xf32> to vector<32x32xbf16>
    %cst_422 = arith.constant dense<0.000000e+00> : vector<4x32xf32>
    %1011 = tpu.matmul %1009, %1010, %cst_422 {dimension_numbers = #tpu.dot_dimension_numbers<[1], [0], [0], [1], [0, 0, 1, 1], [], []>} : vector<4x32xbf16>, vector<32x32xbf16>, vector<4x32xf32> -> vector<4x32xf32>
    %1012 = arith.addf %889, %1011 : vector<4x32xf32>
    %c0_423 = arith.constant 0 : index
    %c0_424 = arith.constant 0 : index
    %1013 = vector.load %arg60[%c0_423, %c0_424] : memref<1x32xf32, #tpu.memory_space<vmem>>, vector<1x32xf32>
    %1014 = vector.broadcast %1013 : vector<1x32xf32> to vector<4x32xf32>
    %1015 = arith.addf %1012, %1014 : vector<4x32xf32>
    %c0_425 = arith.constant 0 : index
    %c0_426 = arith.constant 0 : index
    %1016 = vector.load %arg59[%c0_425, %c0_426] : memref<1x32xf32, #tpu.memory_space<vmem>>, vector<1x32xf32>
    %c0_427 = arith.constant 0 : index
    %c0_428 = arith.constant 0 : index
    %1017 = vector.load %arg58[%c0_427, %c0_428] : memref<1x32xf32, #tpu.memory_space<vmem>>, vector<1x32xf32>
    %cst_429 = arith.constant dense<0.000000e+00> : vector<4xf32>
    %1018 = vector.multi_reduction <add>, %1015, %cst_429 [1] : vector<4x32xf32> to vector<4xf32>
    %1019 = vector.shape_cast %1018 : vector<4xf32> to vector<4x1xf32>
    %cst_430 = arith.constant 3.200000e+01 : f32
    %1020 = vector.broadcast %cst_430 : f32 to vector<4x1xf32>
    %1021 = arith.divf %1019, %1020 : vector<4x1xf32>
    %1022 = vector.broadcast %1021 : vector<4x1xf32> to vector<4x32xf32>
    %1023 = arith.subf %1015, %1022 : vector<4x32xf32>
    %1024 = arith.mulf %1023, %1023 : vector<4x32xf32>
    %cst_431 = arith.constant dense<0.000000e+00> : vector<4xf32>
    %1025 = vector.multi_reduction <add>, %1024, %cst_431 [1] : vector<4x32xf32> to vector<4xf32>
    %1026 = vector.shape_cast %1025 : vector<4xf32> to vector<4x1xf32>
    %cst_432 = arith.constant 3.200000e+01 : f32
    %1027 = vector.broadcast %cst_432 : f32 to vector<4x1xf32>
    %1028 = arith.divf %1026, %1027 : vector<4x1xf32>
    %cst_433 = arith.constant 9.99999974E-6 : f32
    %1029 = vector.broadcast %cst_433 : f32 to vector<4x1xf32>
    %1030 = arith.addf %1028, %1029 : vector<4x1xf32>
    %1031 = math.rsqrt %1030 : vector<4x1xf32>
    %1032 = vector.broadcast %1031 : vector<4x1xf32> to vector<4x32xf32>
    %1033 = arith.mulf %1023, %1032 : vector<4x32xf32>
    %1034 = vector.broadcast %1016 : vector<1x32xf32> to vector<4x32xf32>
    %1035 = arith.mulf %1033, %1034 : vector<4x32xf32>
    %1036 = vector.broadcast %1017 : vector<1x32xf32> to vector<4x32xf32>
    %1037 = arith.addf %1035, %1036 : vector<4x32xf32>
    %c0_434 = arith.constant 0 : index
    %c0_435 = arith.constant 0 : index
    %1038 = vector.load %arg53[%c0_434, %c0_435] : memref<32x128xf32, #tpu.memory_space<vmem>>, vector<32x128xf32>
    %1039 = arith.truncf %1037 : vector<4x32xf32> to vector<4x32xbf16>
    %1040 = arith.truncf %1038 : vector<32x128xf32> to vector<32x128xbf16>
    %cst_436 = arith.constant dense<0.000000e+00> : vector<4x128xf32>
    %1041 = tpu.matmul %1039, %1040, %cst_436 {dimension_numbers = #tpu.dot_dimension_numbers<[1], [0], [0], [1], [0, 0, 1, 1], [], []>} : vector<4x32xbf16>, vector<32x128xbf16>, vector<4x128xf32> -> vector<4x128xf32>
    %c0_437 = arith.constant 0 : index
    %c0_438 = arith.constant 0 : index
    %1042 = vector.load %arg52[%c0_437, %c0_438] : memref<1x128xf32, #tpu.memory_space<vmem>>, vector<1x128xf32>
    %1043 = vector.broadcast %1042 : vector<1x128xf32> to vector<4x128xf32>
    %1044 = arith.addf %1041, %1043 : vector<4x128xf32>
    %cst_439 = arith.constant 5.000000e-01 : f32
    %1045 = vector.broadcast %cst_439 : f32 to vector<4x128xf32>
    %1046 = arith.mulf %1045, %1044 : vector<4x128xf32>
    %cst_440 = arith.constant 0.707106769 : f32
    %1047 = vector.broadcast %cst_440 : f32 to vector<4x128xf32>
    %1048 = arith.mulf %1044, %1047 : vector<4x128xf32>
    %cst_441 = arith.constant 0.000000e+00 : f32
    %1049 = vector.broadcast %cst_441 : f32 to vector<4x128xf32>
    %1050 = arith.cmpf oge, %1048, %1049 : vector<4x128xf32>
    %cst_442 = arith.constant 1.000000e+00 : f32
    %cst_443 = arith.constant -1.000000e+00 : f32
    %1051 = vector.broadcast %cst_442 : f32 to vector<4x128xf32>
    %1052 = vector.broadcast %cst_443 : f32 to vector<4x128xf32>
    %1053 = arith.select %1050, %1051, %1052 : vector<4x128xi1>, vector<4x128xf32>
    %1054 = math.absf %1048 : vector<4x128xf32>
    %cst_444 = arith.constant 0.327591091 : f32
    %1055 = vector.broadcast %cst_444 : f32 to vector<4x128xf32>
    %1056 = arith.mulf %1055, %1054 : vector<4x128xf32>
    %cst_445 = arith.constant 1.000000e+00 : f32
    %1057 = vector.broadcast %cst_445 : f32 to vector<4x128xf32>
    %1058 = arith.addf %1057, %1056 : vector<4x128xf32>
    %cst_446 = arith.constant 1.000000e+00 : f32
    %1059 = vector.broadcast %cst_446 : f32 to vector<4x128xf32>
    %1060 = arith.divf %1059, %1058 : vector<4x128xf32>
    %cst_447 = arith.constant 1.06140542 : f32
    %1061 = vector.broadcast %cst_447 : f32 to vector<4x128xf32>
    %1062 = arith.mulf %1061, %1060 : vector<4x128xf32>
    %cst_448 = arith.constant -1.45315206 : f32
    %1063 = vector.broadcast %cst_448 : f32 to vector<4x128xf32>
    %1064 = arith.addf %1062, %1063 : vector<4x128xf32>
    %1065 = arith.mulf %1064, %1060 : vector<4x128xf32>
    %cst_449 = arith.constant 1.42141378 : f32
    %1066 = vector.broadcast %cst_449 : f32 to vector<4x128xf32>
    %1067 = arith.addf %1065, %1066 : vector<4x128xf32>
    %1068 = arith.mulf %1067, %1060 : vector<4x128xf32>
    %cst_450 = arith.constant -0.284496725 : f32
    %1069 = vector.broadcast %cst_450 : f32 to vector<4x128xf32>
    %1070 = arith.addf %1068, %1069 : vector<4x128xf32>
    %1071 = arith.mulf %1070, %1060 : vector<4x128xf32>
    %cst_451 = arith.constant 0.254829586 : f32
    %1072 = vector.broadcast %cst_451 : f32 to vector<4x128xf32>
    %1073 = arith.addf %1071, %1072 : vector<4x128xf32>
    %1074 = arith.mulf %1073, %1060 : vector<4x128xf32>
    %cst_452 = arith.constant 0.000000e+00 : f32
    %1075 = vector.broadcast %cst_452 : f32 to vector<4x128xf32>
    %1076 = arith.subf %1075, %1054 : vector<4x128xf32>
    %1077 = arith.mulf %1076, %1054 : vector<4x128xf32>
    %1078 = math.exp %1077 : vector<4x128xf32>
    %1079 = arith.mulf %1074, %1078 : vector<4x128xf32>
    %cst_453 = arith.constant 1.000000e+00 : f32
    %1080 = vector.broadcast %cst_453 : f32 to vector<4x128xf32>
    %1081 = arith.subf %1080, %1079 : vector<4x128xf32>
    %1082 = arith.mulf %1053, %1081 : vector<4x128xf32>
    %cst_454 = arith.constant 1.000000e+00 : f32
    %1083 = vector.broadcast %cst_454 : f32 to vector<4x128xf32>
    %1084 = arith.addf %1083, %1082 : vector<4x128xf32>
    %1085 = arith.mulf %1046, %1084 : vector<4x128xf32>
    %c0_455 = arith.constant 0 : index
    %c0_456 = arith.constant 0 : index
    %1086 = vector.load %arg55[%c0_455, %c0_456] : memref<128x32xf32, #tpu.memory_space<vmem>>, vector<128x32xf32>
    %1087 = arith.truncf %1085 : vector<4x128xf32> to vector<4x128xbf16>
    %1088 = arith.truncf %1086 : vector<128x32xf32> to vector<128x32xbf16>
    %cst_457 = arith.constant dense<0.000000e+00> : vector<4x32xf32>
    %1089 = tpu.matmul %1087, %1088, %cst_457 {dimension_numbers = #tpu.dot_dimension_numbers<[1], [0], [0], [1], [0, 0, 1, 1], [], []>} : vector<4x128xbf16>, vector<128x32xbf16>, vector<4x32xf32> -> vector<4x32xf32>
    %1090 = arith.addf %1015, %1089 : vector<4x32xf32>
    %c0_458 = arith.constant 0 : index
    %c0_459 = arith.constant 0 : index
    %1091 = vector.load %arg54[%c0_458, %c0_459] : memref<1x32xf32, #tpu.memory_space<vmem>>, vector<1x32xf32>
    %1092 = vector.broadcast %1091 : vector<1x32xf32> to vector<4x32xf32>
    %1093 = arith.addf %1090, %1092 : vector<4x32xf32>
    %c0_460 = arith.constant 0 : index
    %c0_461 = arith.constant 0 : index
    %1094 = vector.load %arg65[%c0_460, %c0_461] : memref<1x32xf32, #tpu.memory_space<vmem>>, vector<1x32xf32>
    %c0_462 = arith.constant 0 : index
    %c0_463 = arith.constant 0 : index
    %1095 = vector.load %arg64[%c0_462, %c0_463] : memref<1x32xf32, #tpu.memory_space<vmem>>, vector<1x32xf32>
    %cst_464 = arith.constant dense<0.000000e+00> : vector<4xf32>
    %1096 = vector.multi_reduction <add>, %1093, %cst_464 [1] : vector<4x32xf32> to vector<4xf32>
    %1097 = vector.shape_cast %1096 : vector<4xf32> to vector<4x1xf32>
    %cst_465 = arith.constant 3.200000e+01 : f32
    %1098 = vector.broadcast %cst_465 : f32 to vector<4x1xf32>
    %1099 = arith.divf %1097, %1098 : vector<4x1xf32>
    %1100 = vector.broadcast %1099 : vector<4x1xf32> to vector<4x32xf32>
    %1101 = arith.subf %1093, %1100 : vector<4x32xf32>
    %1102 = arith.mulf %1101, %1101 : vector<4x32xf32>
    %cst_466 = arith.constant dense<0.000000e+00> : vector<4xf32>
    %1103 = vector.multi_reduction <add>, %1102, %cst_466 [1] : vector<4x32xf32> to vector<4xf32>
    %1104 = vector.shape_cast %1103 : vector<4xf32> to vector<4x1xf32>
    %cst_467 = arith.constant 3.200000e+01 : f32
    %1105 = vector.broadcast %cst_467 : f32 to vector<4x1xf32>
    %1106 = arith.divf %1104, %1105 : vector<4x1xf32>
    %cst_468 = arith.constant 9.99999974E-6 : f32
    %1107 = vector.broadcast %cst_468 : f32 to vector<4x1xf32>
    %1108 = arith.addf %1106, %1107 : vector<4x1xf32>
    %1109 = math.rsqrt %1108 : vector<4x1xf32>
    %1110 = vector.broadcast %1109 : vector<4x1xf32> to vector<4x32xf32>
    %1111 = arith.mulf %1101, %1110 : vector<4x32xf32>
    %1112 = vector.broadcast %1094 : vector<1x32xf32> to vector<4x32xf32>
    %1113 = arith.mulf %1111, %1112 : vector<4x32xf32>
    %1114 = vector.broadcast %1095 : vector<1x32xf32> to vector<4x32xf32>
    %1115 = arith.addf %1113, %1114 : vector<4x32xf32>
    %cst_469 = arith.constant dense<0.000000e+00> : vector<32xf32>
    %1116 = vector.multi_reduction <add>, %1115, %cst_469 [0] : vector<4x32xf32> to vector<32xf32>
    %1117 = vector.shape_cast %1116 : vector<32xf32> to vector<1x32xf32>
    %cst_470 = arith.constant 4.000000e+00 : f32
    %1118 = vector.broadcast %cst_470 : f32 to vector<1x32xf32>
    %1119 = arith.divf %1117, %1118 : vector<1x32xf32>
    %c0_471 = arith.constant 0 : index
    %c0_472 = arith.constant 0 : index
    %1120 = vector.load %arg3[%c0_471, %c0_472] : memref<32x2xf32, #tpu.memory_space<vmem>>, vector<32x2xf32>
    %1121 = arith.truncf %1119 : vector<1x32xf32> to vector<1x32xbf16>
    %1122 = arith.truncf %1120 : vector<32x2xf32> to vector<32x2xbf16>
    %cst_473 = arith.constant dense<0.000000e+00> : vector<1x2xf32>
    %1123 = tpu.matmul %1121, %1122, %cst_473 {dimension_numbers = #tpu.dot_dimension_numbers<[1], [0], [0], [1], [0, 0, 1, 1], [], []>} : vector<1x32xbf16>, vector<32x2xbf16>, vector<1x2xf32> -> vector<1x2xf32>
    %c0_474 = arith.constant 0 : index
    %c0_475 = arith.constant 0 : index
    %1124 = vector.load %arg2[%c0_474, %c0_475] : memref<1x2xf32, #tpu.memory_space<vmem>>, vector<1x2xf32>
    %1125 = arith.addf %1123, %1124 : vector<1x2xf32>
    %cst_476 = arith.constant dense<0xFF800000> : vector<1xf32>
    %1126 = vector.multi_reduction <maximumf>, %1125, %cst_476 [1] : vector<1x2xf32> to vector<1xf32>
    %1127 = vector.shape_cast %1126 : vector<1xf32> to vector<1x1xf32>
    %1128 = vector.broadcast %1127 : vector<1x1xf32> to vector<1x2xf32>
    %1129 = arith.subf %1125, %1128 : vector<1x2xf32>
    %1130 = math.exp %1129 : vector<1x2xf32>
    %cst_477 = arith.constant dense<0.000000e+00> : vector<1xf32>
    %1131 = vector.multi_reduction <add>, %1130, %cst_477 [1] : vector<1x2xf32> to vector<1xf32>
    %1132 = vector.shape_cast %1131 : vector<1xf32> to vector<1x1xf32>
    %1133 = math.log %1132 : vector<1x1xf32>
    %1134 = vector.broadcast %1133 : vector<1x1xf32> to vector<1x2xf32>
    %1135 = arith.subf %1129, %1134 : vector<1x2xf32>
    %1136 = vector.shape_cast %1135 : vector<1x2xf32> to vector<1x1x2xf32>
    %c0_478 = arith.constant 0 : index
    %c0_479 = arith.constant 0 : index
    %c0_480 = arith.constant 0 : index
    %1137 = vector.load %arg70[%c0_478, %c0_479, %c0_480] : memref<1x1x2xf32, #tpu.memory_space<vmem>>, vector<1x1x2xf32>
    tpu.vector_store %arg70[%c0_478, %c0_479, %c0_480], %1136 {strides = array<i32>} : memref<1x1x2xf32, #tpu.memory_space<vmem>>, vector<1x1x2xf32>,
    return
  }
  func.func @transform_0(%arg0: i32) -> (i32, i32, i32) {
    %c0_i32 = arith.constant 0 : i32
    %c0_i32_0 = arith.constant 0 : i32
    %c0_i32_1 = arith.constant 0 : i32
    return %arg0, %c0_i32, %c0_i32_0 : i32, i32, i32
  }
  func.func @transform_1(%arg0: i32) -> (i32, i32) {
    %c0_i32 = arith.constant 0 : i32
    %c0_i32_0 = arith.constant 0 : i32
    %c0_i32_1 = arith.constant 0 : i32
    return %c0_i32, %c0_i32_0 : i32, i32
  }
  func.func @transform_2(%arg0: i32) -> (i32, i32) {
    %c0_i32 = arith.constant 0 : i32
    %c0_i32_0 = arith.constant 0 : i32
    %c0_i32_1 = arith.constant 0 : i32
    return %c0_i32, %c0_i32_0 : i32, i32
  }
  func.func @transform_3(%arg0: i32) -> (i32, i32, i32, i32) {
    %c0_i32 = arith.constant 0 : i32
    %c0_i32_0 = arith.constant 0 : i32
    %c0_i32_1 = arith.constant 0 : i32
    %c0_i32_2 = arith.constant 0 : i32
    %c0_i32_3 = arith.constant 0 : i32
    return %c0_i32, %c0_i32_0, %c0_i32_1, %c0_i32_2 : i32, i32, i32, i32
  }
  func.func @transform_4(%arg0: i32) -> (i32, i32) {
    %c0_i32 = arith.constant 0 : i32
    %c0_i32_0 = arith.constant 0 : i32
    %c0_i32_1 = arith.constant 0 : i32
    return %c0_i32, %c0_i32_0 : i32, i32
  }
  func.func @transform_5(%arg0: i32) -> (i32, i32) {
    %c0_i32 = arith.constant 0 : i32
    %c0_i32_0 = arith.constant 0 : i32
    %c0_i32_1 = arith.constant 0 : i32
    return %c0_i32, %c0_i32_0 : i32, i32
  }
  func.func @transform_6(%arg0: i32) -> (i32, i32) {
    %c0_i32 = arith.constant 0 : i32
    %c0_i32_0 = arith.constant 0 : i32
    %c0_i32_1 = arith.constant 0 : i32
    return %c0_i32, %c0_i32_0 : i32, i32
  }
  func.func @transform_7(%arg0: i32) -> (i32, i32) {
    %c0_i32 = arith.constant 0 : i32
    %c0_i32_0 = arith.constant 0 : i32
    %c0_i32_1 = arith.constant 0 : i32
    return %c0_i32, %c0_i32_0 : i32, i32
  }
  func.func @transform_8(%arg0: i32) -> (i32, i32) {
    %c0_i32 = arith.constant 0 : i32
    %c0_i32_0 = arith.constant 0 : i32
    %c0_i32_1 = arith.constant 0 : i32
    return %c0_i32, %c0_i32_0 : i32, i32
  }
  func.func @transform_9(%arg0: i32) -> (i32, i32) {
    %c0_i32 = arith.constant 0 : i32
    %c0_i32_0 = arith.constant 0 : i32
    %c0_i32_1 = arith.constant 0 : i32
    return %c0_i32, %c0_i32_0 : i32, i32
  }
  func.func @transform_10(%arg0: i32) -> (i32, i32) {
    %c0_i32 = arith.constant 0 : i32
    %c0_i32_0 = arith.constant 0 : i32
    %c0_i32_1 = arith.constant 0 : i32
    return %c0_i32, %c0_i32_0 : i32, i32
  }
  func.func @transform_11(%arg0: i32) -> (i32, i32) {
    %c0_i32 = arith.constant 0 : i32
    %c0_i32_0 = arith.constant 0 : i32
    %c0_i32_1 = arith.constant 0 : i32
    return %c0_i32, %c0_i32_0 : i32, i32
  }
  func.func @transform_12(%arg0: i32) -> (i32, i32) {
    %c0_i32 = arith.constant 0 : i32
    %c0_i32_0 = arith.constant 0 : i32
    %c0_i32_1 = arith.constant 0 : i32
    return %c0_i32, %c0_i32_0 : i32, i32
  }
  func.func @transform_13(%arg0: i32) -> (i32, i32) {
    %c0_i32 = arith.constant 0 : i32
    %c0_i32_0 = arith.constant 0 : i32
    %c0_i32_1 = arith.constant 0 : i32
    return %c0_i32, %c0_i32_0 : i32, i32
  }
  func.func @transform_14(%arg0: i32) -> (i32, i32) {
    %c0_i32 = arith.constant 0 : i32
    %c0_i32_0 = arith.constant 0 : i32
    %c0_i32_1 = arith.constant 0 : i32
    return %c0_i32, %c0_i32_0 : i32, i32
  }
  func.func @transform_15(%arg0: i32) -> (i32, i32) {
    %c0_i32 = arith.constant 0 : i32
    %c0_i32_0 = arith.constant 0 : i32
    %c0_i32_1 = arith.constant 0 : i32
    return %c0_i32, %c0_i32_0 : i32, i32
  }
  func.func @transform_16(%arg0: i32) -> (i32, i32) {
    %c0_i32 = arith.constant 0 : i32
    %c0_i32_0 = arith.constant 0 : i32
    %c0_i32_1 = arith.constant 0 : i32
    return %c0_i32, %c0_i32_0 : i32, i32
  }
  func.func @transform_17(%arg0: i32) -> (i32, i32) {
    %c0_i32 = arith.constant 0 : i32
    %c0_i32_0 = arith.constant 0 : i32
    %c0_i32_1 = arith.constant 0 : i32
    return %c0_i32, %c0_i32_0 : i32, i32
  }
  func.func @transform_18(%arg0: i32) -> (i32, i32, i32, i32) {
    %c0_i32 = arith.constant 0 : i32
    %c0_i32_0 = arith.constant 0 : i32
    %c0_i32_1 = arith.constant 0 : i32
    %c0_i32_2 = arith.constant 0 : i32
    %c0_i32_3 = arith.constant 0 : i32
    return %c0_i32, %c0_i32_0, %c0_i32_1, %c0_i32_2 : i32, i32, i32, i32
  }
  func.func @transform_19(%arg0: i32) -> (i32, i32) {
    %c0_i32 = arith.constant 0 : i32
    %c0_i32_0 = arith.constant 0 : i32
    %c0_i32_1 = arith.constant 0 : i32
    return %c0_i32, %c0_i32_0 : i32, i32
  }
  func.func @transform_20(%arg0: i32) -> (i32, i32) {
    %c0_i32 = arith.constant 0 : i32
    %c0_i32_0 = arith.constant 0 : i32
    %c0_i32_1 = arith.constant 0 : i32
    return %c0_i32, %c0_i32_0 : i32, i32
  }
  func.func @transform_21(%arg0: i32) -> (i32, i32) {
    %c0_i32 = arith.constant 0 : i32
    %c0_i32_0 = arith.constant 0 : i32
    %c0_i32_1 = arith.constant 0 : i32
    return %c0_i32, %c0_i32_0 : i32, i32
  }
  func.func @transform_22(%arg0: i32) -> (i32, i32) {
    %c0_i32 = arith.constant 0 : i32
    %c0_i32_0 = arith.constant 0 : i32
    %c0_i32_1 = arith.constant 0 : i32
    return %c0_i32, %c0_i32_0 : i32, i32
  }
  func.func @transform_23(%arg0: i32) -> (i32, i32) {
    %c0_i32 = arith.constant 0 : i32
    %c0_i32_0 = arith.constant 0 : i32
    %c0_i32_1 = arith.constant 0 : i32
    return %c0_i32, %c0_i32_0 : i32, i32
  }
  func.func @transform_24(%arg0: i32) -> (i32, i32) {
    %c0_i32 = arith.constant 0 : i32
    %c0_i32_0 = arith.constant 0 : i32
    %c0_i32_1 = arith.constant 0 : i32
    return %c0_i32, %c0_i32_0 : i32, i32
  }
  func.func @transform_25(%arg0: i32) -> (i32, i32) {
    %c0_i32 = arith.constant 0 : i32
    %c0_i32_0 = arith.constant 0 : i32
    %c0_i32_1 = arith.constant 0 : i32
    return %c0_i32, %c0_i32_0 : i32, i32
  }
  func.func @transform_26(%arg0: i32) -> (i32, i32) {
    %c0_i32 = arith.constant 0 : i32
    %c0_i32_0 = arith.constant 0 : i32
    %c0_i32_1 = arith.constant 0 : i32
    return %c0_i32, %c0_i32_0 : i32, i32
  }
  func.func @transform_27(%arg0: i32) -> (i32, i32) {
    %c0_i32 = arith.constant 0 : i32
    %c0_i32_0 = arith.constant 0 : i32
    %c0_i32_1 = arith.constant 0 : i32
    return %c0_i32, %c0_i32_0 : i32, i32
  }
  func.func @transform_28(%arg0: i32) -> (i32, i32) {
    %c0_i32 = arith.constant 0 : i32
    %c0_i32_0 = arith.constant 0 : i32
    %c0_i32_1 = arith.constant 0 : i32
    return %c0_i32, %c0_i32_0 : i32, i32
  }
  func.func @transform_29(%arg0: i32) -> (i32, i32) {
    %c0_i32 = arith.constant 0 : i32
    %c0_i32_0 = arith.constant 0 : i32
    %c0_i32_1 = arith.constant 0 : i32
    return %c0_i32, %c0_i32_0 : i32, i32
  }
  func.func @transform_30(%arg0: i32) -> (i32, i32) {
    %c0_i32 = arith.constant 0 : i32
    %c0_i32_0 = arith.constant 0 : i32
    %c0_i32_1 = arith.constant 0 : i32
    return %c0_i32, %c0_i32_0 : i32, i32
  }
  func.func @transform_31(%arg0: i32) -> (i32, i32) {
    %c0_i32 = arith.constant 0 : i32
    %c0_i32_0 = arith.constant 0 : i32
    %c0_i32_1 = arith.constant 0 : i32
    return %c0_i32, %c0_i32_0 : i32, i32
  }
  func.func @transform_32(%arg0: i32) -> (i32, i32) {
    %c0_i32 = arith.constant 0 : i32
    %c0_i32_0 = arith.constant 0 : i32
    %c0_i32_1 = arith.constant 0 : i32
    return %c0_i32, %c0_i32_0 : i32, i32
  }
  func.func @transform_33(%arg0: i32) -> (i32, i32) {
    %c0_i32 = arith.constant 0 : i32
    %c0_i32_0 = arith.constant 0 : i32
    %c0_i32_1 = arith.constant 0 : i32
    return %c0_i32, %c0_i32_0 : i32, i32
  }
  func.func @transform_34(%arg0: i32) -> (i32, i32) {
    %c0_i32 = arith.constant 0 : i32
    %c0_i32_0 = arith.constant 0 : i32
    %c0_i32_1 = arith.constant 0 : i32
    return %c0_i32, %c0_i32_0 : i32, i32
  }
  func.func @transform_35(%arg0: i32) -> (i32, i32) {
    %c0_i32 = arith.constant 0 : i32
    %c0_i32_0 = arith.constant 0 : i32
    %c0_i32_1 = arith.constant 0 : i32
    return %c0_i32, %c0_i32_0 : i32, i32
  }
  func.func @transform_36(%arg0: i32) -> (i32, i32, i32) {
    %c0_i32 = arith.constant 0 : i32
    %c0_i32_0 = arith.constant 0 : i32
    %c0_i32_1 = arith.constant 0 : i32
    %c0_i32_2 = arith.constant 0 : i32
    return %c0_i32, %c0_i32_0, %c0_i32_1 : i32, i32, i32
  }
  func.func @transform_37(%arg0: i32) -> (i32, i32, i32, i32) {
    %c0_i32 = arith.constant 0 : i32
    %c0_i32_0 = arith.constant 0 : i32
    %c0_i32_1 = arith.constant 0 : i32
    %c0_i32_2 = arith.constant 0 : i32
    %c0_i32_3 = arith.constant 0 : i32
    return %c0_i32, %c0_i32_0, %c0_i32_1, %c0_i32_2 : i32, i32, i32, i32
  }
  func.func @transform_38(%arg0: i32) -> (i32, i32) {
    %c0_i32 = arith.constant 0 : i32
    %c0_i32_0 = arith.constant 0 : i32
    %c0_i32_1 = arith.constant 0 : i32
    return %c0_i32, %c0_i32_0 : i32, i32
  }
  func.func @transform_39(%arg0: i32) -> (i32, i32) {
    %c0_i32 = arith.constant 0 : i32
    %c0_i32_0 = arith.constant 0 : i32
    %c0_i32_1 = arith.constant 0 : i32
    return %c0_i32, %c0_i32_0 : i32, i32
  }
  func.func @transform_40(%arg0: i32) -> (i32, i32) {
    %c0_i32 = arith.constant 0 : i32
    %c0_i32_0 = arith.constant 0 : i32
    %c0_i32_1 = arith.constant 0 : i32
    return %c0_i32, %c0_i32_0 : i32, i32
  }
  func.func @transform_41(%arg0: i32) -> (i32, i32) {
    %c0_i32 = arith.constant 0 : i32
    %c0_i32_0 = arith.constant 0 : i32
    %c0_i32_1 = arith.constant 0 : i32
    return %c0_i32, %c0_i32_0 : i32, i32
  }
  func.func @transform_42(%arg0: i32) -> (i32, i32) {
    %c0_i32 = arith.constant 0 : i32
    %c0_i32_0 = arith.constant 0 : i32
    %c0_i32_1 = arith.constant 0 : i32
    return %c0_i32, %c0_i32_0 : i32, i32
  }
  func.func @transform_43(%arg0: i32) -> (i32, i32) {
    %c0_i32 = arith.constant 0 : i32
    %c0_i32_0 = arith.constant 0 : i32
    %c0_i32_1 = arith.constant 0 : i32
    return %c0_i32, %c0_i32_0 : i32, i32
  }
  func.func @transform_44(%arg0: i32) -> (i32, i32) {
    %c0_i32 = arith.constant 0 : i32
    %c0_i32_0 = arith.constant 0 : i32
    %c0_i32_1 = arith.constant 0 : i32
    return %c0_i32, %c0_i32_0 : i32, i32
  }
  func.func @transform_45(%arg0: i32) -> (i32, i32) {
    %c0_i32 = arith.constant 0 : i32
    %c0_i32_0 = arith.constant 0 : i32
    %c0_i32_1 = arith.constant 0 : i32
    return %c0_i32, %c0_i32_0 : i32, i32
  }
  func.func @transform_46(%arg0: i32) -> (i32, i32) {
    %c0_i32 = arith.constant 0 : i32
    %c0_i32_0 = arith.constant 0 : i32
    %c0_i32_1 = arith.constant 0 : i32
    return %c0_i32, %c0_i32_0 : i32, i32
  }
  func.func @transform_47(%arg0: i32) -> (i32, i32) {
    %c0_i32 = arith.constant 0 : i32
    %c0_i32_0 = arith.constant 0 : i32
    %c0_i32_1 = arith.constant 0 : i32
    return %c0_i32, %c0_i32_0 : i32, i32
  }
  func.func @transform_48(%arg0: i32) -> (i32, i32) {
    %c0_i32 = arith.constant 0 : i32
    %c0_i32_0 = arith.constant 0 : i32
    %c0_i32_1 = arith.constant 0 : i32
    return %c0_i32, %c0_i32_0 : i32, i32
  }
  func.func @transform_49(%arg0: i32) -> (i32, i32) {
    %c0_i32 = arith.constant 0 : i32
    %c0_i32_0 = arith.constant 0 : i32
    %c0_i32_1 = arith.constant 0 : i32
    return %c0_i32, %c0_i32_0 : i32, i32
  }
  func.func @transform_50(%arg0: i32) -> (i32, i32, i32, i32) {
    %c0_i32 = arith.constant 0 : i32
    %c0_i32_0 = arith.constant 0 : i32
    %c0_i32_1 = arith.constant 0 : i32
    %c0_i32_2 = arith.constant 0 : i32
    %c0_i32_3 = arith.constant 0 : i32
    return %c0_i32, %c0_i32_0, %c0_i32_1, %c0_i32_2 : i32, i32, i32, i32
  }
  func.func @transform_51(%arg0: i32) -> (i32, i32) {
    %c0_i32 = arith.constant 0 : i32
    %c0_i32_0 = arith.constant 0 : i32
    %c0_i32_1 = arith.constant 0 : i32
    return %c0_i32, %c0_i32_0 : i32, i32
  }
  func.func @transform_52(%arg0: i32) -> (i32, i32) {
    %c0_i32 = arith.constant 0 : i32
    %c0_i32_0 = arith.constant 0 : i32
    %c0_i32_1 = arith.constant 0 : i32
    return %c0_i32, %c0_i32_0 : i32, i32
  }
  func.func @transform_53(%arg0: i32) -> (i32, i32) {
    %c0_i32 = arith.constant 0 : i32
    %c0_i32_0 = arith.constant 0 : i32
    %c0_i32_1 = arith.constant 0 : i32
    return %c0_i32, %c0_i32_0 : i32, i32
  }
  func.func @transform_54(%arg0: i32) -> (i32, i32) {
    %c0_i32 = arith.constant 0 : i32
    %c0_i32_0 = arith.constant 0 : i32
    %c0_i32_1 = arith.constant 0 : i32
    return %c0_i32, %c0_i32_0 : i32, i32
  }
  func.func @transform_55(%arg0: i32) -> (i32, i32) {
    %c0_i32 = arith.constant 0 : i32
    %c0_i32_0 = arith.constant 0 : i32
    %c0_i32_1 = arith.constant 0 : i32
    return %c0_i32, %c0_i32_0 : i32, i32
  }
  func.func @transform_56(%arg0: i32) -> (i32, i32) {
    %c0_i32 = arith.constant 0 : i32
    %c0_i32_0 = arith.constant 0 : i32
    %c0_i32_1 = arith.constant 0 : i32
    return %c0_i32, %c0_i32_0 : i32, i32
  }
  func.func @transform_57(%arg0: i32) -> (i32, i32) {
    %c0_i32 = arith.constant 0 : i32
    %c0_i32_0 = arith.constant 0 : i32
    %c0_i32_1 = arith.constant 0 : i32
    return %c0_i32, %c0_i32_0 : i32, i32
  }
  func.func @transform_58(%arg0: i32) -> (i32, i32) {
    %c0_i32 = arith.constant 0 : i32
    %c0_i32_0 = arith.constant 0 : i32
    %c0_i32_1 = arith.constant 0 : i32
    return %c0_i32, %c0_i32_0 : i32, i32
  }
  func.func @transform_59(%arg0: i32) -> (i32, i32) {
    %c0_i32 = arith.constant 0 : i32
    %c0_i32_0 = arith.constant 0 : i32
    %c0_i32_1 = arith.constant 0 : i32
    return %c0_i32, %c0_i32_0 : i32, i32
  }
  func.func @transform_60(%arg0: i32) -> (i32, i32) {
    %c0_i32 = arith.constant 0 : i32
    %c0_i32_0 = arith.constant 0 : i32
    %c0_i32_1 = arith.constant 0 : i32
    return %c0_i32, %c0_i32_0 : i32, i32
  }
  func.func @transform_61(%arg0: i32) -> (i32, i32) {
    %c0_i32 = arith.constant 0 : i32
    %c0_i32_0 = arith.constant 0 : i32
    %c0_i32_1 = arith.constant 0 : i32
    return %c0_i32, %c0_i32_0 : i32, i32
  }
  func.func @transform_62(%arg0: i32) -> (i32, i32) {
    %c0_i32 = arith.constant 0 : i32
    %c0_i32_0 = arith.constant 0 : i32
    %c0_i32_1 = arith.constant 0 : i32
    return %c0_i32, %c0_i32_0 : i32, i32
  }
  func.func @transform_63(%arg0: i32) -> (i32, i32) {
    %c0_i32 = arith.constant 0 : i32
    %c0_i32_0 = arith.constant 0 : i32
    %c0_i32_1 = arith.constant 0 : i32
    return %c0_i32, %c0_i32_0 : i32, i32
  }
  func.func @transform_64(%arg0: i32) -> (i32, i32) {
    %c0_i32 = arith.constant 0 : i32
    %c0_i32_0 = arith.constant 0 : i32
    %c0_i32_1 = arith.constant 0 : i32
    return %c0_i32, %c0_i32_0 : i32, i32
  }
  func.func @transform_65(%arg0: i32) -> (i32, i32) {
    %c0_i32 = arith.constant 0 : i32
    %c0_i32_0 = arith.constant 0 : i32
    %c0_i32_1 = arith.constant 0 : i32
    return %c0_i32, %c0_i32_0 : i32, i32
  }
  func.func @transform_66(%arg0: i32) -> (i32, i32) {
    %c0_i32 = arith.constant 0 : i32
    %c0_i32_0 = arith.constant 0 : i32
    %c0_i32_1 = arith.constant 0 : i32
    return %c0_i32, %c0_i32_0 : i32, i32
  }
  func.func @transform_67(%arg0: i32) -> (i32, i32) {
    %c0_i32 = arith.constant 0 : i32
    %c0_i32_0 = arith.constant 0 : i32
    %c0_i32_1 = arith.constant 0 : i32
    return %c0_i32, %c0_i32_0 : i32, i32
  }
  func.func @transform_68(%arg0: i32) -> (i32, i32) {
    %c0_i32 = arith.constant 0 : i32
    %c0_i32_0 = arith.constant 0 : i32
    %c0_i32_1 = arith.constant 0 : i32
    return %c0_i32, %c0_i32_0 : i32, i32
  }
  func.func @transform_69(%arg0: i32) -> (i32, i32, i32) {
    %c0_i32 = arith.constant 0 : i32
    %c0_i32_0 = arith.constant 0 : i32
    %c0_i32_1 = arith.constant 0 : i32
    return %arg0, %c0_i32, %c0_i32_0 : i32, i32, i32
  }
}

</mosaic_0001>

<bundles_post_ra>
// kernel: model_forward.1
= control target key start
LH: loop header
LB: loop body
LE: loop exit
PB: predicated region body
PF: predicated region fallthrough
CT: control target
= control target key end

     0   :  { %s10055_s6 = smov 1   ;;  %s10056_s10 = smov 2   ;;  %s11951_s0 = inlined_call_operand.smem [shape: u32[70], index: -1, kind: input, shape index: {}] }
   0x1   :  { %s10179_s5 = sld [smem:[%s11951_s0]]   ;;  %s10057_s14 = smov 3  }
   0x2   :  { %s10184_s9 = sld [smem:[%s11951_s0 + %s10055_s6]]   ;;  %s10058_s18 = smov 4  }
   0x3   :  { %s10189_s13 = sld [smem:[%s11951_s0 + %s10056_s10]]   ;;  %s10059_s22 = smov 5  }
   0x4   :  { %s10194_s17 = sld [smem:[%s11951_s0 + %s10057_s14]]   ;;  %s10060_s26 = smov 6  }
   0x5   :  { %s10199_s21 = sld [smem:[%s11951_s0 + %s10058_s18]]   ;;  %s10061_s30 = smov 7  }
   0x6   :  { %s10204_s25 = sld [smem:[%s11951_s0 + %s10059_s22]]   ;;  %s10062_s4 = smov 8  }
   0x7   :  { %12060 = sst [smem:[#allocation63_spill]] %s10179_s5  ;;  %s10063_s10 = smov 9  }
   0x8   :  { %12061 = sst [smem:[#allocation64_spill]] %s10184_s9  ;;  %s10064_s15 = smov 10  }
   0x9   :  { %12062 = sst [smem:[#allocation65_spill]] %s10189_s13  ;;  %s10065_s20 = smov 11  }
   0xa   :  { %12063 = sst [smem:[#allocation66_spill]] %s10194_s17  ;;  %s10067_s1 = smov 13  }
   0xb   :  { %12064 = sst [smem:[#allocation67_spill]] %s10199_s21  ;;  %s10068_s7 = smov 14  }
   0xc   :  { %12065 = sst [smem:[#allocation68_spill]] %s10204_s25  ;;  %s10070_s22 = smov 16  }
   0xd   :  { %s10209_s29 = sld [smem:[%s11951_s0 + %s10060_s26]]   ;;  %s10066_s26 = smov 12  }
   0xe   :  { %s10214_s3 = sld [smem:[%s11951_s0 + %s10061_s30]]   ;;  %s10071_s28 = smov 17  }
   0xf   :  { %s10219_s8 = sld [smem:[%s11951_s0 + %s10062_s4]]  }
  0x10   :  { %s10224_s14 = sld [smem:[%s11951_s0 + %s10063_s10]]  }
  0x11   :  { %s10229_s19 = sld [smem:[%s11951_s0 + %s10064_s15]]   ;;  %s10069_s15 = smov 15  }
  0x12   :  { %s10234_s24 = sld [smem:[%s11951_s0 + %s10065_s20]]  }
  0x13   :  { %12066 = sst [smem:[#allocation69_spill]] %s10209_s29 }
  0x14   :  { %12067 = sst [smem:[#allocation70_spill]] %s10214_s3 }
  0x15   :  { %12068 = sst [smem:[#allocation71_spill]] %s10219_s8 }
  0x16   :  { %12069 = sst [smem:[#allocation72_spill]] %s10224_s14 }
  0x17   :  { %12070 = sst [smem:[#allocation73_spill]] %s10229_s19 }
  0x18   :  { %12071 = sst [smem:[#allocation74_spill]] %s10234_s24 }
  0x19   :  { %s10239_s30 = sld [smem:[%s11951_s0 + %s10066_s26]]  }
  0x1a   :  { %s10244_s6 = sld [smem:[%s11951_s0 + %s10067_s1]]  }
  0x1b   :  { %s10249_s12 = sld [smem:[%s11951_s0 + %s10068_s7]]   ;;  %s10072_s7 = smov 18  }
  0x1c   :  { %s10254_s20 = sld [smem:[%s11951_s0 + %s10069_s15]]   ;;  %s10073_s15 = smov 19  }
  0x1d   :  { %s10259_s27 = sld [smem:[%s11951_s0 + %s10070_s22]]   ;;  %s10074_s22 = smov 20  }
  0x1e   :  { %s10264_s4 = sld [smem:[%s11951_s0 + %s10071_s28]]   ;;  %s10075_s28 = smov 21  }
  0x1f   :  { %12072 = sst [smem:[#allocation75_spill]] %s10239_s30 }
  0x20   :  { %12073 = sst [smem:[#allocation76_spill]] %s10244_s6 }
  0x21   :  { %12074 = sst [smem:[#allocation77_spill]] %s10249_s12 }
  0x22   :  { %12075 = sst [smem:[#allocation78_spill]] %s10254_s20 }
  0x23   :  { %12076 = sst [smem:[#allocation79_spill]] %s10259_s27 }
  0x24   :  { %12077 = sst [smem:[#allocation80_spill]] %s10264_s4 }
  0x25   :  { %s10269_s9 = sld [smem:[%s11951_s0 + %s10072_s7]]   ;;  %s10076_s7 = smov 22  }
  0x26   :  { %s10274_s13 = sld [smem:[%s11951_s0 + %s10073_s15]]   ;;  %s10077_s15 = smov 23  }
  0x27   :  { %s10279_s29 = sld [smem:[%s11951_s0 + %s10074_s22]]   ;;  %s10078_s22 = smov 24  }
  0x28   :  { %s10284_s21 = sld [smem:[%s11951_s0 + %s10075_s28]]   ;;  %s10079_s28 = smov 25  }
  0x2b   :  { %12078 = sst [smem:[#allocation81_spill]] %s10269_s9 }
  0x2c   :  { %12079 = sst [smem:[#allocation82_spill]] %s10274_s13 }
  0x2d   :  { %12080 = sst [smem:[#allocation83_spill]] %s10279_s29 }
  0x2e   :  { %12081 = sst [smem:[#allocation84_spill]] %s10284_s21 }
  0x2f   :  { %s10289_s9 = sld [smem:[%s11951_s0 + %s10076_s7]]   ;;  %s10080_s7 = smov 26  }
  0x30   :  { %s10294_s13 = sld [smem:[%s11951_s0 + %s10077_s15]]   ;;  %s10081_s15 = smov 27  }
  0x31   :  { %s10299_s29 = sld [smem:[%s11951_s0 + %s10078_s22]]   ;;  %s10082_s22 = smov 28  }
  0x32   :  { %s10304_s21 = sld [smem:[%s11951_s0 + %s10079_s28]]   ;;  %s10083_s28 = smov 29  }
  0x33   :  { %s10319_s3 = sld [smem:[%s11951_s0 + %s10082_s22]]   ;;  %s10086_s22 = smov 32  }
  0x34   :  { %s10324_s19 = sld [smem:[%s11951_s0 + %s10083_s28]]   ;;  %s10087_s28 = smov 33  }
  0x35   :  { %12082 = sst [smem:[#allocation85_spill]] %s10289_s9 }
  0x36   :  { %12083 = sst [smem:[#allocation86_spill]] %s10294_s13 }
  0x37   :  { %s10309_s9 = sld [smem:[%s11951_s0 + %s10080_s7]]   ;;  %s10084_s7 = smov 30  }
  0x38   :  { %12084 = sst [smem:[#allocation87_spill]] %s10304_s21 }
  0x39   :  { %s10314_s13 = sld [smem:[%s11951_s0 + %s10081_s15]]   ;;  %s10085_s15 = smov 31  }
  0x3a   :  { %12087 = sst [smem:[#allocation90_spill]] %s10319_s3 }
  0x3b   :  { %12088 = sst [smem:[#allocation91_spill]] %s10324_s19 }
  0x3c   :  { %s10329_s24 = sld [smem:[%s11951_s0 + %s10084_s7]]   ;;  %s10088_s7 = smov 34  }
  0x3d   :  { %12085 = sst [smem:[#allocation88_spill]] %s10309_s9 }
  0x3e   :  { %s10339_s3 = sld [smem:[%s11951_s0 + %s10086_s22]]   ;;  %s10090_s22 = smov 36  }
  0x3f   :  { %12086 = sst [smem:[#allocation89_spill]] %s10314_s13 }
  0x40   :  { %s10334_s13 = sld [smem:[%s11951_s0 + %s10085_s15]]   ;;  %s10089_s15 = smov 35  }
  0x41   :  { %s10344_s25 = sld [smem:[%s11951_s0 + %s10087_s28]]   ;;  %s10091_s28 = smov 37  }
  0x42   :  { %12089 = sst [smem:[#allocation92_spill]] %s10329_s24 }
  0x43   :  { %s10349_s24 = sld [smem:[%s11951_s0 + %s10088_s7]]   ;;  %s10092_s7 = smov 38  }
  0x44   :  { %12091 = sst [smem:[#allocation94_spill]] %s10339_s3 }
  0x45   :  { %s10354_s12 = sld [smem:[%s11951_s0 + %s10089_s15]]   ;;  %s10093_s15 = smov 39  }
  0x46   :  { %12090 = sst [smem:[#allocation93_spill]] %s10334_s13 }
  0x47   :  { %s10359_s3 = sld [smem:[%s11951_s0 + %s10090_s22]]   ;;  %s10094_s22 = smov 40  }
  0x48   :  { %s10364_s6 = sld [smem:[%s11951_s0 + %s10091_s28]]   ;;  %s10095_s28 = smov 41  }
  0x49   :  { %12092 = sst [smem:[#allocation95_spill]] %s10349_s24 }
  0x4a   :  { %s10369_s20 = sld [smem:[%s11951_s0 + %s10092_s7]]   ;;  %s10096_s7 = smov 42  }
  0x4b   :  { %12093 = sst [smem:[#allocation96_spill]] %s10354_s12 }
  0x4c   :  { %s10374_s12 = sld [smem:[%s11951_s0 + %s10093_s15]]   ;;  %s10097_s15 = smov 43  }
  0x4d   :  { %12094 = sst [smem:[#allocation97_spill]] %s10359_s3 }
  0x4e   :  { %12095 = sst [smem:[#allocation98_spill]] %s10364_s6 }
  0x4f   :  { %s10379_s3 = sld [smem:[%s11951_s0 + %s10094_s22]]   ;;  %s10098_s22 = smov 44  }
  0x50   :  { %s10384_s6 = sld [smem:[%s11951_s0 + %s10095_s28]]   ;;  %s10099_s28 = smov 45  }
  0x51   :  { %s10389_s17 = sld [smem:[%s11951_s0 + %s10096_s7]]   ;;  %s10100_s7 = smov 46  }
  0x52   :  { %12096 = sst [smem:[#allocation99_spill]] %s10374_s12 }
  0x53   :  { %s10394_s12 = sld [smem:[%s11951_s0 + %s10097_s15]]   ;;  %s10101_s15 = smov 47  }
  0x54   :  { %s10399_s30 = sld [smem:[%s11951_s0 + %s10098_s22]]   ;;  %s10102_s22 = smov 48  }
  0x55   :  { %12097 = sst [smem:[#allocation100_spill]] %s10379_s3 }
  0x56   :  { %12098 = sst [smem:[#allocation101_spill]] %s10384_s6 }
  0x57   :  { %12099 = sst [smem:[#allocation102_spill]] %s10389_s17 }
  0x58   :  { %s10404_s6 = sld [smem:[%s11951_s0 + %s10099_s28]]   ;;  %s10103_s28 = smov 49  }
  0x59   :  { %12100 = sst [smem:[#allocation103_spill]] %s10394_s12 }
  0x5a   :  { %s10409_s27 = sld [smem:[%s11951_s0 + %s10100_s7]]   ;;  %s10104_s7 = smov 50  }
  0x5b   :  { %s10414_s8 = sld [smem:[%s11951_s0 + %s10101_s15]]   ;;  %s10105_s15 = smov 51  }
  0x5c   :  { %s10419_s14 = sld [smem:[%s11951_s0 + %s10102_s22]]   ;;  %s10106_s22 = smov 52  }
  0x5d   :  { %s10424_s4 = sld [smem:[%s11951_s0 + %s10103_s28]]   ;;  %s10107_s28 = smov 53  }
  0x5e   :  { %12101 = sst [smem:[#allocation104_spill]] %s10404_s6 }
  0x5f   :  { %s10429_s5 = sld [smem:[%s11951_s0 + %s10104_s7]]   ;;  %s10108_s7 = smov 54  }
  0x61   :  { %12102 = sst [smem:[#allocation105_spill]] %s10414_s8 }
  0x62   :  { %12103 = sst [smem:[#allocation106_spill]] %s10419_s14 }
  0x63   :  { %12104 = sst [smem:[#allocation107_spill]] %s10424_s4 }
  0x64   :  { %s10434_s8 = sld [smem:[%s11951_s0 + %s10105_s15]]   ;;  %s10109_s15 = smov 55  }
  0x65   :  { %12105 = sst [smem:[#allocation108_spill]] %s10429_s5 }
  0x66   :  { %s10439_s14 = sld [smem:[%s11951_s0 + %s10106_s22]]   ;;  %s10110_s22 = smov 56  }
  0x67   :  { %s10444_s4 = sld [smem:[%s11951_s0 + %s10107_s28]]   ;;  %s10111_s28 = smov 57  }
  0x68   :  { %s10449_s5 = sld [smem:[%s11951_s0 + %s10108_s7]]   ;;  %s10112_s7 = smov 58  }
  0x69   :  { %s10454_s6 = sld [smem:[%s11951_s0 + %s10109_s15]]   ;;  %s10113_s15 = smov 59  }
  0x6a   :  { %12106 = sst [smem:[#allocation109_spill]] %s10434_s8 }
  0x6b   :  { %s10474_s12 = sld [smem:[%s11951_s0 + %s10113_s15]]   ;;  %s10117_s15 = smov 63  }
  0x6c   :  { %12107 = sst [smem:[#allocation110_spill]] %s10439_s14 }
  0x6d   :  { %12108 = sst [smem:[#allocation111_spill]] %s10444_s4 }
  0x6e   :  { %12109 = sst [smem:[#allocation112_spill]] %s10449_s5 }
  0x6f   :  { %12110 = sst [smem:[#allocation113_spill]] %s10454_s6 }
  0x70   :  { %s10459_s14 = sld [smem:[%s11951_s0 + %s10110_s22]]   ;;  %s10114_s22 = smov 60  }
  0x71   :  { %s10464_s4 = sld [smem:[%s11951_s0 + %s10111_s28]]   ;;  %s10115_s28 = smov 61  }
  0x72   :  { %s10469_s5 = sld [smem:[%s11951_s0 + %s10112_s7]]   ;;  %s10116_s7 = smov 62  }
  0x73   :  { %12114 = sst [smem:[#allocation117_spill]] %s10474_s12 }
  0x74   :  { %s10484_s3 = sld [smem:[%s11951_s0 + %s10115_s28]]   ;;  %s10119_s28 = smov 65  }
  0x75   :  { %s10494_s24 = sld [smem:[%s11951_s0 + %s10117_s15]]   ;;  %s10121_s15 = smov 67  }
  0x76   :  { %12111 = sst [smem:[#allocation114_spill]] %s10459_s14 }
  0x77   :  { %12112 = sst [smem:[#allocation115_spill]] %s10464_s4 }
  0x78   :  { %12113 = sst [smem:[#allocation116_spill]] %s10469_s5 }
  0x79   :  { %s10479_s14 = sld [smem:[%s11951_s0 + %s10114_s22]]   ;;  %s10118_s22 = smov 64  }
  0x7a   :  { %12116 = sst [smem:[#allocation119_spill]] %s10484_s3 }
  0x7b   :  { %s10489_s5 = sld [smem:[%s11951_s0 + %s10116_s7]]   ;;  %s10120_s7 = smov 66  }
  0x7c   :  { %s10504_s3 = sld [smem:[%s11951_s0 + %s10119_s28]]   ;;  %s10123_s28 = smov 69  }
  0x7d   :  { %s10514_s13 = sld [smem:[%s11951_s0 + %s10121_s15]]  }
  0x7e   :  { %s10524_s9 = sld [smem:[%s11951_s0 + %s10123_s28]]  }
  0x7f   :  { %12115 = sst [smem:[#allocation118_spill]] %s10479_s14 }
  0x80   :  { %s10499_s14 = sld [smem:[%s11951_s0 + %s10118_s22]]   ;;  %s10122_s22 = smov 68  }
  0x81   :  { %12117 = sst [smem:[#allocation120_spill]] %s10489_s5 }
  0x82   :  { %12119 = sst [smem:[#allocation122_spill]] %s10504_s3 }
  0x83   :  { %s10509_s5 = sld [smem:[%s11951_s0 + %s10120_s7]]  }
  0x84   :  { %12121 = sst [smem:[#allocation124_spill]] %s10514_s13 }
  0x86   :  { %12118 = sst [smem:[#allocation121_spill]] %s10499_s14 }
  0x87   :  { %s10519_s14 = sld [smem:[%s11951_s0 + %s10122_s22]]  }
  0x89   :  { %12120 = sst [smem:[#allocation123_spill]] %s10509_s5 }
  0x8a   :  { %144 = vsyncpa [#allocation3], 0 }
  0x8b   :  { %145 = vsyncpa [#allocation6], 0 }
  0x8c   :  { %146 = vsyncpa [#allocation9], 0 }
  0x8d   :  { %147 = vsyncpa [#allocation12], 0 }
  0x8e   :  { %148 = vsyncpa [#allocation15], 0 }
  0x8f   :  { %149 = vsyncpa [#allocation18], 0 }
  0x90   :  { %150 = vsyncpa [#allocation21], 0 }
  0x91   :  { %151 = vsyncpa [#allocation24], 0 }
  0x92   :  { %152 = vsyncpa [#allocation27], 0 }
  0x93   :  { %153 = vsyncpa [#allocation30], 0 }
  0x94   :  { %154 = vsyncpa [#allocation33], 0 }
  0x95   :  { %155 = vsyncpa [#allocation36], 0 }
  0x96   :  { %156 = vsyncpa [#allocation39], 0 }
  0x97   :  { %157 = vsyncpa [#allocation42], 0 }
  0x98   :  { %158 = vsyncpa [#allocation45], 0 }
  0x99   :  { %159 = vsyncpa [#allocation4], 0 }
  0x9a   :  { %161 = vsyncpa [#allocation4 + $0x1], 0  ;;  %s10526_s7 = smov 0   ;;  %s10528_s0 = smov 0  }
  0x9b   :  { %s10530_s10 = smov 0   ;;  %s10532_s11 = smov 0  }
  0x9c LB: > { %s12122_s13 = sld [smem:[#allocation124_spill]]  ;;  %s12123_s5 = sld [smem:[#allocation123_spill]]  ;;  %s10045_s0 = sphi %s10528_s0, %s12253_s0   ;;  %s10041_s7 = sphi %s10526_s7, %s12252_s7   ;;  %s10053_s11 = sphi %s10532_s11, %s12249_s11   ;;  %s10049_s10 = sphi %s10530_s10, %s12251_s10  }
  0x9d   : > { %s12124_s17 = sld [smem:[#allocation102_spill]]  ;;  %s12125_s12 = sld [smem:[#allocation117_spill]] }
  0x9e   : > { %s12126_s8 = sld [smem:[#allocation109_spill]]  ;;  %s12127_s6 = sld [smem:[#allocation113_spill]] }
  0x9f   : > { %s12128_s4 = sld [smem:[#allocation115_spill]]  ;;  %s12129_s3 = sld [smem:[#allocation122_spill]] }
  0xa0   : > { %s12130_s21 = sld [smem:[#allocation87_spill]]  ;;  %s12131_s19 = sld [smem:[#allocation91_spill]] }
  0xa1   : > { %12132 = sst [smem:[#allocation125_spill]] %s10041_s7  ;;  %s10547_s15 = sadd.s32 4294967295, %s10053_s11  }
  0xa2   : > { %12133 = sst [smem:[#allocation126_spill]] %s10049_s10  ;;  %s7667_s16 = sadd.s32 4294967294, %s10053_s11  }
  0xa3   : > { %s10551_s18 = sadd.s32 1, %s10053_s11   ;;  %s1628_s22 = sadd.s32 1, %s10049_s10 }
  0xa4   : > { %12134 = sst [smem:[#allocation127_spill]] %s10551_s18  ;;  %s1625_s23 = ssub.s32 %s10053_s11, %s10551_s18 }
  0xa5   : > { %p1638_p0 = scmp.ne.s32.totalorder %s10049_s10, %s10045_s0  ;;  %p1626_p1 = scmp.eq.s32.totalorder %s1625_s23, 0 }
  0xa6   : > { %p1639_p2 = scmp.eq.s32.totalorder %s10547_s15, 1  ;;  %p1644_p3 = scmp.ne.s32.totalorder %s10045_s0, %s10041_s7 }
  0xa7   : > { %p1645_p4 = scmp.eq.s32.totalorder %s7667_s16, 1  ;;  %p7668_p7 = scmp.ge.s32.totalorder %s10053_s11, 1 }
  0xa8   : > { %s10562_s26 = scalar_select %p1626_p1, %s10049_s10, %s1628_s22  }
  0xa9   : > { %p10564_p5 = por %p1639_p2, %p1638_p0  ;;  %p10568_p6 = por %p1645_p4, %p1644_p3 }
  0xaa   : > { %12135 = sst [smem:[#allocation128_spill]] %s10562_s26  ;;  %p1652_p8 = scmp.lt.s32.totalorder %s10053_s11, 3 }
  0xab   : > { %s12136_s28 = scalar_select %p10564_p5, 1, 0 }
  0xac   : > { %s12137_s1 = scalar_select %p10568_p6, 1, 0 }
  0xad   : > { %p11996_p9 = scmp.eq.s32.totalorder %s10547_s15, 0  ;;  %p10575_p10 = pnand %p7668_p7, %p1652_p8 }
  0xae   : > { %12138 = sst [smem:[#allocation129_spill]] %s12137_s1  ;;  %s10124_s16 = smov [#allocation5]  }
  0xaf   : > { %s12139_s2 = scalar_select %p10575_p10, 1, 0 }
  0xb0   : > { %s1745_s22 = sshll.u32 %s10124_s16, 4  ;;  %p8678_p11 = pneg %p10575_p10  ;;  %s1746_s22 = int_to_ptr.vmem [resolvable:$true] %s1745_s22 }
  0xb1   : > { %s10125_s23 = smov [#allocation8]   ;;  %s10126_s18 = smov [#allocation11]  }
  0xb2   : > { %s1773_s26 = sshll.u32 %s10125_s23, 4  ;;  %p10583_p12 = pnand %p11996_p9, %p8678_p11  ;;  %s10587_s26 = int_to_ptr.vmem [resolvable:$true] %s1773_s26 }
  0xb3   : > { %s1801_s1 = sshll.u32 %s10126_s18, 4  ;;  %s9147_s7 = scalar_lea.hbm %s12130_s21, 16  ;;  %s10589_s1 = int_to_ptr.vmem [resolvable:$true] %s1801_s1 }
  0xb4   : > { %p9148_p13 = scmp.ne.s32.totalorder %s12130_s21, %s9147_s7  ;;  %p10595_p0 = pneg %p10583_p12 }
  0xb5   : > { %p9154_p3 = scmp.lt.u32.totalorder %s9147_s7, %s12130_s21 }
  0xb6   : > { %p9150_p1 = pnand %p10595_p0, %p9148_p13 }
  0xb8   : > { %p9151_p2 = pneg %p9150_p1 }
  0xba   : > { %p9156_p4 = pnand %p9154_p3, %p9151_p2 }
  0xbc   : > { %9159 = shalt.err (!%p9156_p4)
}
  0xbd   : > { %s9160_s23 = scalar_lea.vmem %s1746_s22, 16  ;;  %s9167_s18 = scalar_lea.vmem %s1746_s22, 32 }
  0xbe   : > { %p9161_p7 = scmp.ne.s32.totalorder %s1746_s22, %s9160_s23  ;;  %p9168_p9 = scmp.lt.s32.totalorder %s1746_s22, %s1746_s22 }
  0xbf   : > { %p9169_p6 = scmp.lt.s32.totalorder %s9167_s18, %s9160_s23 }
  0xc0   : > { %p9163_p8 = pnand %p9161_p7, %p10595_p0 }
  0xc1   : > { %p9170_p5 = por %p9169_p6, %p9168_p9 }
  0xc2   : > { %p9164_p11 = pneg %p9163_p8 }
  0xc4   : > { %p9171_p10 = pnand %p9170_p5, %p9164_p11 }
  0xc6   : > { %9174 = shalt.err (!%p9171_p10)
}
  0xc7   : > { %8684 = dma.hbm_to_vmem [thread:$0]  (!%p10583_p12), %s12130_s21, 16, %s1746_s22, [#allocation6]  }
  0xc8   : > { %s9175_s7 = scalar_lea.hbm %s12131_s19, 16 }
  0xc9   : > { %p9176_p13 = scmp.ne.s32.totalorder %s12131_s19, %s9175_s7  ;;  %p9182_p3 = scmp.lt.u32.totalorder %s9175_s7, %s12131_s19 }
  0xcb   : > { %p9178_p1 = pnand %p9176_p13, %p10595_p0 }
  0xcd   : > { %p9179_p2 = pneg %p9178_p1 }
  0xcf   : > { %p9184_p4 = pnand %p9182_p3, %p9179_p2 }
  0xd1   : > { %9187 = shalt.err (!%p9184_p4)
}
  0xd2   : > { %s9188_s23 = scalar_lea.vmem %s10587_s26, 16  ;;  %s9195_s18 = scalar_lea.vmem %s10587_s26, 32 }
  0xd3   : > { %p9189_p5 = scmp.ne.s32.totalorder %s10587_s26, %s9188_s23  ;;  %p9196_p10 = scmp.lt.s32.totalorder %s10587_s26, %s10587_s26 }
  0xd4   : > { %p9197_p7 = scmp.lt.s32.totalorder %s9195_s18, %s9188_s23 }
  0xd5   : > { %p9191_p6 = pnand %p9189_p5, %p10595_p0 }
  0xd6   : > { %p9198_p8 = por %p9197_p7, %p9196_p10 }
  0xd7   : > { %p9192_p9 = pneg %p9191_p6 }
  0xd9   : > { %p9199_p11 = pnand %p9198_p8, %p9192_p9 }
  0xdb   : > { %9202 = shalt.err (!%p9199_p11)
}
  0xdc   : > { %8690 = dma.hbm_to_vmem [thread:$0]  (!%p10583_p12), %s12131_s19, 16, %s10587_s26, [#allocation9]  }
  0xdd   : > { %s9203_s22 = scalar_lea.hbm %s10344_s25, 16 }
  0xde   : > { %p9204_p13 = scmp.ne.s32.totalorder %s10344_s25, %s9203_s22  ;;  %p9210_p3 = scmp.lt.u32.totalorder %s9203_s22, %s10344_s25 }
  0xe0   : > { %p9206_p1 = pnand %p9204_p13, %p10595_p0 }
  0xe2   : > { %p9207_p2 = pneg %p9206_p1 }
  0xe4   : > { %p9212_p4 = pnand %p9210_p3, %p9207_p2 }
  0xe6   : > { %9215 = shalt.err (!%p9212_p4)
}
  0xe7   : > { %s9216_s7 = scalar_lea.vmem %s10589_s1, 16  ;;  %s9223_s23 = scalar_lea.vmem %s10589_s1, 32 }
  0xe8   : > { %p9217_p5 = scmp.ne.s32.totalorder %s10589_s1, %s9216_s7  ;;  %p9224_p10 = scmp.lt.s32.totalorder %s10589_s1, %s10589_s1 }
  0xe9   : > { %p9225_p7 = scmp.lt.s32.totalorder %s9223_s23, %s9216_s7 }
  0xea   : > { %p9219_p6 = pnand %p9217_p5, %p10595_p0 }
  0xeb   : > { %p9226_p8 = por %p9225_p7, %p9224_p10 }
  0xec   : > { %p9220_p9 = pneg %p9219_p6 }
  0xee   : > { %p9227_p11 = pnand %p9226_p8, %p9220_p9 }
  0xf0   : > { %9230 = shalt.err (!%p9227_p11)
}
  0xf1   : > { %8696 = dma.hbm_to_vmem [thread:$0]  (!%p10583_p12), %s10344_s25, 16, %s10589_s1, [#allocation12]  }
  0xf2   : > { %s10127_s26 = smov [#allocation14]   ;;  %s10128_s22 = smov [#allocation17]  }
  0xf3   : > { %s1832_s18 = sshll.u32 %s10127_s26, 4  ;;  %s1860_s19 = sshll.u32 %s10128_s22, 4  ;;  %s1833_s18 = int_to_ptr.vmem [resolvable:$true] %s1832_s18  ;;  %s1861_s19 = int_to_ptr.vmem [resolvable:$true] %s1860_s19 }
  0xf4   : > { %s9231_s21 = scalar_lea.hbm %s10369_s20, 16 }
  0xf5   : > { %p9232_p13 = scmp.ne.s32.totalorder %s10369_s20, %s9231_s21  ;;  %p9238_p3 = scmp.lt.u32.totalorder %s9231_s21, %s10369_s20 }
  0xf7   : > { %p9234_p1 = pnand %p9232_p13, %p10595_p0 }
  0xf9   : > { %p9235_p2 = pneg %p9234_p1 }
  0xfb   : > { %p9240_p4 = pnand %p9238_p3, %p9235_p2 }
  0xfd   : > { %9243 = shalt.err (!%p9240_p4)
}
  0xfe   : > { %s9244_s7 = scalar_lea.vmem %s1833_s18, 16  ;;  %s9251_s1 = scalar_lea.vmem %s1833_s18, 32 }
  0xff   : > { %p9245_p5 = scmp.ne.s32.totalorder %s1833_s18, %s9244_s7  ;;  %p9252_p10 = scmp.lt.s32.totalorder %s1833_s18, %s1833_s18 }
 0x100   : > { %p9253_p7 = scmp.lt.s32.totalorder %s9251_s1, %s9244_s7 }
 0x101   : > { %p9247_p6 = pnand %p9245_p5, %p10595_p0 }
 0x102   : > { %p9254_p8 = por %p9253_p7, %p9252_p10 }
 0x103   : > { %p9248_p9 = pneg %p9247_p6 }
 0x105   : > { %p9255_p11 = pnand %p9254_p8, %p9248_p9 }
 0x107   : > { %9258 = shalt.err (!%p9255_p11)
}
 0x108   : > { %8702 = dma.hbm_to_vmem [thread:$0]  (!%p10583_p12), %s10369_s20, 16, %s1833_s18, [#allocation15]  }
 0x109   : > { %s9259_s21 = scalar_lea.hbm %s12124_s17, 16 }
 0x10a   : > { %p9260_p13 = scmp.ne.s32.totalorder %s12124_s17, %s9259_s21  ;;  %p9266_p3 = scmp.lt.u32.totalorder %s9259_s21, %s12124_s17 }
 0x10c   : > { %p9262_p1 = pnand %p9260_p13, %p10595_p0 }
 0x10e   : > { %p9263_p2 = pneg %p9262_p1 }
 0x110   : > { %p9268_p4 = pnand %p9266_p3, %p9263_p2 }
 0x112   : > { %9271 = shalt.err (!%p9268_p4)
}
 0x113   : > { %s9272_s23 = scalar_lea.vmem %s1861_s19, 16  ;;  %s9279_s26 = scalar_lea.vmem %s1861_s19, 32 }
 0x114   : > { %p9273_p5 = scmp.ne.s32.totalorder %s1861_s19, %s9272_s23  ;;  %p9280_p10 = scmp.lt.s32.totalorder %s1861_s19, %s1861_s19 }
 0x115   : > { %p9281_p7 = scmp.lt.s32.totalorder %s9279_s26, %s9272_s23 }
 0x116   : > { %p9275_p6 = pnand %p9273_p5, %p10595_p0 }
 0x117   : > { %p9282_p8 = por %p9281_p7, %p9280_p10 }
 0x118   : > { %p9276_p9 = pneg %p9275_p6 }
 0x11a   : > { %p9283_p11 = pnand %p9282_p8, %p9276_p9 }
 0x11c   : > { %9286 = shalt.err (!%p9283_p11)
}
 0x11d   : > { %8708 = dma.hbm_to_vmem [thread:$0]  (!%p10583_p12), %s12124_s17, 16, %s1861_s19, [#allocation18]  }
 0x11e   : > { %s10129_s18 = smov [#allocation20]   ;;  %s10130_s7 = smov [#allocation23]  }
 0x11f   : > { %s1882_s22 = sshll.u32 %s10129_s18, 4  ;;  %s1904_s1 = sshll.u32 %s10130_s7, 4  ;;  %s1883_s22 = int_to_ptr.vmem [resolvable:$true] %s1882_s22  ;;  %s1905_s1 = int_to_ptr.vmem [resolvable:$true] %s1904_s1 }
 0x120   : > { %s9287_s21 = scalar_lea.hbm %s10399_s30, 16 }
 0x121   : > { %p9288_p13 = scmp.ne.s32.totalorder %s10399_s30, %s9287_s21  ;;  %p9294_p3 = scmp.lt.u32.totalorder %s9287_s21, %s10399_s30 }
 0x123   : > { %p9290_p1 = pnand %p9288_p13, %p10595_p0 }
 0x125   : > { %p9291_p2 = pneg %p9290_p1 }
 0x127   : > { %p9296_p4 = pnand %p9294_p3, %p9291_p2 }
 0x129   : > { %9299 = shalt.err (!%p9296_p4)
}
 0x12a   : > { %s9300_s23 = scalar_lea.vmem %s1883_s22, 16  ;;  %s9307_s19 = scalar_lea.vmem %s1883_s22, 32 }
 0x12b   : > { %p9301_p5 = scmp.ne.s32.totalorder %s1883_s22, %s9300_s23  ;;  %p9308_p10 = scmp.lt.s32.totalorder %s1883_s22, %s1883_s22 }
 0x12c   : > { %p9309_p7 = scmp.lt.s32.totalorder %s9307_s19, %s9300_s23 }
 0x12d   : > { %p9303_p6 = pnand %p9301_p5, %p10595_p0 }
 0x12e   : > { %p9310_p8 = por %p9309_p7, %p9308_p10 }
 0x12f   : > { %p9304_p9 = pneg %p9303_p6 }
 0x131   : > { %p9311_p11 = pnand %p9310_p8, %p9304_p9 }
 0x133   : > { %9314 = shalt.err (!%p9311_p11)
}
 0x134   : > { %8714 = dma.hbm_to_vmem [thread:$0]  (!%p10583_p12), %s10399_s30, 16, %s1883_s22, [#allocation21]  }
 0x135   : > { %s9315_s26 = scalar_lea.hbm %s10409_s27, 16 }
 0x136   : > { %p9316_p13 = scmp.ne.s32.totalorder %s10409_s27, %s9315_s26  ;;  %p9322_p3 = scmp.lt.u32.totalorder %s9315_s26, %s10409_s27 }
 0x138   : > { %p9318_p1 = pnand %p9316_p13, %p10595_p0 }
 0x13a   : > { %p9319_p2 = pneg %p9318_p1 }
 0x13c   : > { %p9324_p4 = pnand %p9322_p3, %p9319_p2 }
 0x13e   : > { %9327 = shalt.err (!%p9324_p4)
}
 0x13f   : > { %s9328_s18 = scalar_lea.vmem %s1905_s1, 16  ;;  %s9335_s7 = scalar_lea.vmem %s1905_s1, 32 }
 0x140   : > { %p9329_p5 = scmp.ne.s32.totalorder %s1905_s1, %s9328_s18  ;;  %p9336_p10 = scmp.lt.s32.totalorder %s1905_s1, %s1905_s1 }
 0x141   : > { %p9337_p7 = scmp.lt.s32.totalorder %s9335_s7, %s9328_s18 }
 0x142   : > { %p9331_p6 = pnand %p9329_p5, %p10595_p0 }
 0x143   : > { %p9338_p8 = por %p9337_p7, %p9336_p10 }
 0x144   : > { %p9332_p9 = pneg %p9331_p6 }
 0x146   : > { %p9339_p11 = pnand %p9338_p8, %p9332_p9 }
 0x148   : > { %9342 = shalt.err (!%p9339_p11)
}
 0x149   : > { %8720 = dma.hbm_to_vmem [thread:$0]  (!%p10583_p12), %s10409_s27, 16, %s1905_s1, [#allocation24]  }
 0x14a   : > { %s10131_s22 = smov [#allocation26]   ;;  %s10132_s23 = smov [#allocation29]  }
 0x14b   : > { %s1935_s21 = sshll.u32 %s10131_s22, 4  ;;  %s1963_s19 = sshll.u32 %s10132_s23, 4  ;;  %s1936_s21 = int_to_ptr.vmem [resolvable:$true] %s1935_s21  ;;  %s1964_s19 = int_to_ptr.vmem [resolvable:$true] %s1963_s19 }
 0x14c   : > { %s9343_s26 = scalar_lea.hbm %s12126_s8, 16 }
 0x14d   : > { %p9344_p13 = scmp.ne.s32.totalorder %s12126_s8, %s9343_s26  ;;  %p9350_p3 = scmp.lt.u32.totalorder %s9343_s26, %s12126_s8 }
 0x14f   : > { %p9346_p1 = pnand %p9344_p13, %p10595_p0 }
 0x151   : > { %p9347_p2 = pneg %p9346_p1 }
 0x153   : > { %p9352_p4 = pnand %p9350_p3, %p9347_p2 }
 0x155   : > { %9355 = shalt.err (!%p9352_p4)
}
 0x156   : > { %s9356_s18 = scalar_lea.vmem %s1936_s21, 16  ;;  %s9363_s1 = scalar_lea.vmem %s1936_s21, 32 }
 0x157   : > { %p9357_p5 = scmp.ne.s32.totalorder %s1936_s21, %s9356_s18  ;;  %p9364_p10 = scmp.lt.s32.totalorder %s1936_s21, %s1936_s21 }
 0x158   : > { %p9365_p7 = scmp.lt.s32.totalorder %s9363_s1, %s9356_s18 }
 0x159   : > { %p9359_p6 = pnand %p9357_p5, %p10595_p0 }
 0x15a   : > { %p9366_p8 = por %p9365_p7, %p9364_p10 }
 0x15b   : > { %p9360_p9 = pneg %p9359_p6 }
 0x15d   : > { %p9367_p11 = pnand %p9366_p8, %p9360_p9 }
 0x15f   : > { %9370 = shalt.err (!%p9367_p11)
}
 0x160   : > { %8726 = dma.hbm_to_vmem [thread:$0]  (!%p10583_p12), %s12126_s8, 16, %s1936_s21, [#allocation27]  }
 0x161   : > { %s9371_s7 = scalar_lea.hbm %s12127_s6, 16 }
 0x162   : > { %p9372_p13 = scmp.ne.s32.totalorder %s12127_s6, %s9371_s7  ;;  %p9378_p3 = scmp.lt.u32.totalorder %s9371_s7, %s12127_s6 }
 0x164   : > { %p9374_p1 = pnand %p9372_p13, %p10595_p0 }
 0x166   : > { %p9375_p2 = pneg %p9374_p1 }
 0x168   : > { %p9380_p4 = pnand %p9378_p3, %p9375_p2 }
 0x16a   : > { %9383 = shalt.err (!%p9380_p4)
}
 0x16b   : > { %s9384_s22 = scalar_lea.vmem %s1964_s19, 16  ;;  %s9391_s23 = scalar_lea.vmem %s1964_s19, 32 }
 0x16c   : > { %p9385_p5 = scmp.ne.s32.totalorder %s1964_s19, %s9384_s22  ;;  %p9392_p10 = scmp.lt.s32.totalorder %s1964_s19, %s1964_s19 }
 0x16d   : > { %p9393_p7 = scmp.lt.s32.totalorder %s9391_s23, %s9384_s22 }
 0x16e   : > { %p9387_p6 = pnand %p9385_p5, %p10595_p0 }
 0x16f   : > { %p9394_p8 = por %p9393_p7, %p9392_p10 }
 0x170   : > { %p9388_p9 = pneg %p9387_p6 }
 0x172   : > { %p9395_p11 = pnand %p9394_p8, %p9388_p9 }
 0x174   : > { %9398 = shalt.err (!%p9395_p11)
}
 0x175   : > { %8732 = dma.hbm_to_vmem [thread:$0]  (!%p10583_p12), %s12127_s6, 16, %s1964_s19, [#allocation30]  }
 0x176   : > { %s10133_s21 = smov [#allocation32]   ;;  %s10134_s18 = smov [#allocation35]  }
 0x177   : > { %s1985_s26 = sshll.u32 %s10133_s21, 4  ;;  %s2007_s1 = sshll.u32 %s10134_s18, 4  ;;  %s1986_s26 = int_to_ptr.vmem [resolvable:$true] %s1985_s26  ;;  %s2008_s1 = int_to_ptr.vmem [resolvable:$true] %s2007_s1 }
 0x178   : > { %s9399_s7 = scalar_lea.hbm %s12128_s4, 16 }
 0x179   : > { %p9400_p13 = scmp.ne.s32.totalorder %s12128_s4, %s9399_s7  ;;  %p9406_p3 = scmp.lt.u32.totalorder %s9399_s7, %s12128_s4 }
 0x17b   : > { %p9402_p1 = pnand %p9400_p13, %p10595_p0 }
 0x17d   : > { %p9403_p2 = pneg %p9402_p1 }
 0x17f   : > { %p9408_p4 = pnand %p9406_p3, %p9403_p2 }
 0x181   : > { %9411 = shalt.err (!%p9408_p4)
}
 0x182   : > { %s9412_s22 = scalar_lea.vmem %s1986_s26, 16  ;;  %s9419_s19 = scalar_lea.vmem %s1986_s26, 32 }
 0x183   : > { %p9413_p5 = scmp.ne.s32.totalorder %s1986_s26, %s9412_s22  ;;  %p9420_p10 = scmp.lt.s32.totalorder %s1986_s26, %s1986_s26 }
 0x184   : > { %p9421_p7 = scmp.lt.s32.totalorder %s9419_s19, %s9412_s22 }
 0x185   : > { %p9415_p6 = pnand %p9413_p5, %p10595_p0 }
 0x186   : > { %p9422_p8 = por %p9421_p7, %p9420_p10 }
 0x187   : > { %p9416_p9 = pneg %p9415_p6 }
 0x189   : > { %p9423_p11 = pnand %p9422_p8, %p9416_p9 }
 0x18b   : > { %9426 = shalt.err (!%p9423_p11)
}
 0x18c   : > { %8738 = dma.hbm_to_vmem [thread:$0]  (!%p10583_p12), %s12128_s4, 16, %s1986_s26, [#allocation33]  }
 0x18d   : > { %s9427_s23 = scalar_lea.hbm %s12125_s12, 16 }
 0x18e   : > { %p9428_p13 = scmp.ne.s32.totalorder %s12125_s12, %s9427_s23  ;;  %p9434_p3 = scmp.lt.u32.totalorder %s9427_s23, %s12125_s12 }
 0x190   : > { %p9430_p1 = pnand %p9428_p13, %p10595_p0 }
 0x192   : > { %p9431_p2 = pneg %p9430_p1 }
 0x194   : > { %p9436_p4 = pnand %p9434_p3, %p9431_p2 }
 0x196   : > { %9439 = shalt.err (!%p9436_p4)
}
 0x197   : > { %s9440_s21 = scalar_lea.vmem %s2008_s1, 16  ;;  %s9447_s18 = scalar_lea.vmem %s2008_s1, 32 }
 0x198   : > { %p9441_p5 = scmp.ne.s32.totalorder %s2008_s1, %s9440_s21  ;;  %p9448_p10 = scmp.lt.s32.totalorder %s2008_s1, %s2008_s1 }
 0x199   : > { %p9449_p7 = scmp.lt.s32.totalorder %s9447_s18, %s9440_s21 }
 0x19a   : > { %p9443_p6 = pnand %p9441_p5, %p10595_p0 }
 0x19b   : > { %p9450_p8 = por %p9449_p7, %p9448_p10 }
 0x19c   : > { %p9444_p9 = pneg %p9443_p6 }
 0x19e   : > { %p9451_p11 = pnand %p9450_p8, %p9444_p9 }
 0x1a0   : > { %9454 = shalt.err (!%p9451_p11)
}
 0x1a1   : > { %8744 = dma.hbm_to_vmem [thread:$0]  (!%p10583_p12), %s12125_s12, 16, %s2008_s1, [#allocation36]  }
 0x1a2   : > { %s10135_s26 = smov [#allocation38]   ;;  %s10136_s22 = smov [#allocation41]  }
 0x1a3   : > { %s2035_s7 = sshll.u32 %s10135_s26, 4  ;;  %s2057_s19 = sshll.u32 %s10136_s22, 4  ;;  %s2036_s7 = int_to_ptr.vmem [resolvable:$true] %s2035_s7  ;;  %s2058_s19 = int_to_ptr.vmem [resolvable:$true] %s2057_s19 }
 0x1a4   : > { %s9455_s23 = scalar_lea.hbm %s10494_s24, 16 }
 0x1a5   : > { %p9456_p13 = scmp.ne.s32.totalorder %s10494_s24, %s9455_s23  ;;  %p9462_p3 = scmp.lt.u32.totalorder %s9455_s23, %s10494_s24 }
 0x1a7   : > { %p9458_p1 = pnand %p9456_p13, %p10595_p0 }
 0x1a9   : > { %p9459_p2 = pneg %p9458_p1 }
 0x1ab   : > { %p9464_p4 = pnand %p9462_p3, %p9459_p2 }
 0x1ad   : > { %9467 = shalt.err (!%p9464_p4)
}
 0x1ae   : > { %s9468_s21 = scalar_lea.vmem %s2036_s7, 16  ;;  %s9475_s1 = scalar_lea.vmem %s2036_s7, 32 }
 0x1af   : > { %p9469_p5 = scmp.ne.s32.totalorder %s2036_s7, %s9468_s21  ;;  %p9476_p10 = scmp.lt.s32.totalorder %s2036_s7, %s2036_s7 }
 0x1b0   : > { %p9477_p7 = scmp.lt.s32.totalorder %s9475_s1, %s9468_s21 }
 0x1b1   : > { %p9471_p6 = pnand %p9469_p5, %p10595_p0 }
 0x1b2   : > { %p9478_p8 = por %p9477_p7, %p9476_p10 }
 0x1b3   : > { %p9472_p9 = pneg %p9471_p6 }
 0x1b5   : > { %p9479_p11 = pnand %p9478_p8, %p9472_p9 }
 0x1b7   : > { %9482 = shalt.err (!%p9479_p11)
}
 0x1b8   : > { %8750 = dma.hbm_to_vmem [thread:$0]  (!%p10583_p12), %s10494_s24, 16, %s2036_s7, [#allocation39]  }
 0x1b9   : > { %s9483_s18 = scalar_lea.hbm %s12129_s3, 16 }
 0x1ba   : > { %p9484_p13 = scmp.ne.s32.totalorder %s12129_s3, %s9483_s18  ;;  %p9490_p3 = scmp.lt.u32.totalorder %s9483_s18, %s12129_s3 }
 0x1bc   : > { %p9486_p1 = pnand %p9484_p13, %p10595_p0 }
 0x1be   : > { %p9487_p2 = pneg %p9486_p1 }
 0x1c0   : > { %p9492_p4 = pnand %p9490_p3, %p9487_p2 }
 0x1c2   : > { %9495 = shalt.err (!%p9492_p4)
}
 0x1c3   : > { %s9496_s26 = scalar_lea.vmem %s2058_s19, 16  ;;  %s9503_s22 = scalar_lea.vmem %s2058_s19, 32 }
 0x1c4   : > { %p9497_p5 = scmp.ne.s32.totalorder %s2058_s19, %s9496_s26  ;;  %p9504_p10 = scmp.lt.s32.totalorder %s2058_s19, %s2058_s19 }
 0x1c5   : > { %p9505_p7 = scmp.lt.s32.totalorder %s9503_s22, %s9496_s26 }
 0x1c6   : > { %p9499_p6 = pnand %p9497_p5, %p10595_p0 }
 0x1c7   : > { %p9506_p8 = por %p9505_p7, %p9504_p10 }
 0x1c8   : > { %p9500_p9 = pneg %p9499_p6 }
 0x1ca   : > { %p9507_p11 = pnand %p9506_p8, %p9500_p9 }
 0x1cc   : > { %9510 = shalt.err (!%p9507_p11)
}
 0x1cd   : > { %8756 = dma.hbm_to_vmem [thread:$0]  (!%p10583_p12), %s12129_s3, 16, %s2058_s19, [#allocation42]  }
 0x1ce   : > { %s10137_s7 = smov [#allocation2]   ;;  %s10138_s21 = smov [#allocation7]  }
 0x1cf   : > { %s1734_s23 = sshll.u32 %s10137_s7, 4  ;;  %s1756_s1 = sshll.u32 %s10138_s21, 4  ;;  %s1735_s23 = int_to_ptr.vmem [resolvable:$true] %s1734_s23  ;;  %s1757_s1 = int_to_ptr.vmem [resolvable:$true] %s1756_s1 }
 0x1d0   : > { %s9511_s18 = scalar_lea.hbm %s10299_s29, 16 }
 0x1d1   : > { %p9512_p13 = scmp.ne.s32.totalorder %s10299_s29, %s9511_s18  ;;  %p9518_p3 = scmp.lt.u32.totalorder %s9511_s18, %s10299_s29 }
 0x1d3   : > { %p9514_p1 = pnand %p9512_p13, %p10595_p0 }
 0x1d5   : > { %p9515_p2 = pneg %p9514_p1 }
 0x1d7   : > { %p9520_p4 = pnand %p9518_p3, %p9515_p2 }
 0x1d9   : > { %9523 = shalt.err (!%p9520_p4)
}
 0x1da   : > { %s9524_s26 = scalar_lea.vmem %s1735_s23, 16  ;;  %s9531_s19 = scalar_lea.vmem %s1735_s23, 32 }
 0x1db   : > { %p9525_p5 = scmp.ne.s32.totalorder %s1735_s23, %s9524_s26  ;;  %p9532_p10 = scmp.lt.s32.totalorder %s1735_s23, %s1735_s23 }
 0x1dc   : > { %p9533_p7 = scmp.lt.s32.totalorder %s9531_s19, %s9524_s26 }
 0x1dd   : > { %p9527_p6 = pnand %p9525_p5, %p10595_p0 }
 0x1de   : > { %p9534_p8 = por %p9533_p7, %p9532_p10 }
 0x1df   : > { %p9528_p9 = pneg %p9527_p6 }
 0x1e1   : > { %p9535_p11 = pnand %p9534_p8, %p9528_p9 }
 0x1e3   : > { %9538 = shalt.err (!%p9535_p11)
}
 0x1e4   : > { %s12142_s22 = sld [smem:[#allocation88_spill]] }
 0x1e5   : > { %8681 = dma.hbm_to_vmem [thread:$0]  (!%p10583_p12), %s10299_s29, 16, %s1735_s23, [#allocation3]  }
 0x1ea   : > { %s9539_s7 = scalar_lea.hbm %s12142_s22, 16 }
 0x1eb   : > { %p9540_p13 = scmp.ne.s32.totalorder %s12142_s22, %s9539_s7  ;;  %p9546_p3 = scmp.lt.u32.totalorder %s9539_s7, %s12142_s22 }
 0x1ed   : > { %p9542_p1 = pnand %p9540_p13, %p10595_p0 }
 0x1ef   : > { %p9543_p2 = pneg %p9542_p1 }
 0x1f1   : > { %p9548_p4 = pnand %p9546_p3, %p9543_p2 }
 0x1f3   : > { %9551 = shalt.err (!%p9548_p4)
}
 0x1f4   : > { %s9552_s21 = scalar_lea.vmem %s1757_s1, 16  ;;  %s9559_s18 = scalar_lea.vmem %s1757_s1, 32 }
 0x1f5   : > { %p9553_p5 = scmp.ne.s32.totalorder %s1757_s1, %s9552_s21  ;;  %p9560_p10 = scmp.lt.s32.totalorder %s1757_s1, %s1757_s1 }
 0x1f6   : > { %p9561_p7 = scmp.lt.s32.totalorder %s9559_s18, %s9552_s21 }
 0x1f7   : > { %p9555_p6 = pnand %p9553_p5, %p10595_p0 }
 0x1f8   : > { %p9562_p8 = por %p9561_p7, %p9560_p10 }
 0x1f9   : > { %p9556_p9 = pneg %p9555_p6 }
 0x1fb   : > { %p9563_p11 = pnand %p9562_p8, %p9556_p9 }
 0x1fd   : > { %9566 = shalt.err (!%p9563_p11)
}
 0x1fe   : > { %s12143_s23 = sld [smem:[#allocation93_spill]]  ;;  %s10139_s26 = smov [#allocation10]  }
 0x1ff   : > { %8687 = dma.hbm_to_vmem [thread:$0]  (!%p10583_p12), %s12142_s22, 16, %s1757_s1, [#allocation6]  }
 0x200   : > { %s1787_s19 = sshll.u32 %s10139_s26, 4  ;;  %s10140_s7 = smov [#allocation13]   ;;  %s1788_s19 = int_to_ptr.vmem [resolvable:$true] %s1787_s19 }
 0x201   : > { %s1812_s3 = sshll.u32 %s10140_s7, 4  ;;  %s1813_s3 = int_to_ptr.vmem [resolvable:$true] %s1812_s3 }
 0x204   : > { %s9567_s4 = scalar_lea.hbm %s12143_s23, 16 }
 0x205   : > { %p9568_p13 = scmp.ne.s32.totalorder %s12143_s23, %s9567_s4  ;;  %p9574_p3 = scmp.lt.u32.totalorder %s9567_s4, %s12143_s23 }
 0x207   : > { %p9570_p1 = pnand %p9568_p13, %p10595_p0 }
 0x209   : > { %p9571_p2 = pneg %p9570_p1 }
 0x20b   : > { %p9576_p4 = pnand %p9574_p3, %p9571_p2 }
 0x20d   : > { %9579 = shalt.err (!%p9576_p4)
}
 0x20e   : > { %s9580_s21 = scalar_lea.vmem %s1788_s19, 16  ;;  %s9587_s1 = scalar_lea.vmem %s1788_s19, 32 }
 0x20f   : > { %p9581_p5 = scmp.ne.s32.totalorder %s1788_s19, %s9580_s21  ;;  %p9588_p10 = scmp.lt.s32.totalorder %s1788_s19, %s1788_s19 }
 0x210   : > { %p9589_p7 = scmp.lt.s32.totalorder %s9587_s1, %s9580_s21 }
 0x211   : > { %p9583_p6 = pnand %p9581_p5, %p10595_p0 }
 0x212   : > { %p9590_p8 = por %p9589_p7, %p9588_p10 }
 0x213   : > { %p9584_p9 = pneg %p9583_p6 }
 0x215   : > { %p9591_p11 = pnand %p9590_p8, %p9584_p9 }
 0x217   : > { %9594 = shalt.err (!%p9591_p11)
}
 0x218   : > { %s12144_s18 = sld [smem:[#allocation95_spill]] }
 0x219   : > { %8693 = dma.hbm_to_vmem [thread:$0]  (!%p10583_p12), %s12143_s23, 16, %s1788_s19, [#allocation9]  }
 0x21e   : > { %s9595_s4 = scalar_lea.hbm %s12144_s18, 16 }
 0x21f   : > { %p9596_p13 = scmp.ne.s32.totalorder %s12144_s18, %s9595_s4  ;;  %p9602_p3 = scmp.lt.u32.totalorder %s9595_s4, %s12144_s18 }
 0x221   : > { %p9598_p1 = pnand %p9596_p13, %p10595_p0 }
 0x223   : > { %p9599_p2 = pneg %p9598_p1 }
 0x225   : > { %p9604_p4 = pnand %p9602_p3, %p9599_p2 }
 0x227   : > { %9607 = shalt.err (!%p9604_p4)
}
 0x228   : > { %s9608_s26 = scalar_lea.vmem %s1813_s3, 16  ;;  %s9615_s7 = scalar_lea.vmem %s1813_s3, 32 }
 0x229   : > { %p9609_p5 = scmp.ne.s32.totalorder %s1813_s3, %s9608_s26  ;;  %p9616_p10 = scmp.lt.s32.totalorder %s1813_s3, %s1813_s3 }
 0x22a   : > { %p9617_p7 = scmp.lt.s32.totalorder %s9615_s7, %s9608_s26 }
 0x22b   : > { %p9611_p6 = pnand %p9609_p5, %p10595_p0 }
 0x22c   : > { %p9618_p8 = por %p9617_p7, %p9616_p10 }
 0x22d   : > { %p9612_p9 = pneg %p9611_p6 }
 0x22f   : > { %p9619_p11 = pnand %p9618_p8, %p9612_p9 }
 0x231   : > { %9622 = shalt.err (!%p9619_p11)
}
 0x232   : > { %s12145_s19 = sld [smem:[#allocation100_spill]]  ;;  %s10141_s21 = smov [#allocation16]  }
 0x233   : > { %8699 = dma.hbm_to_vmem [thread:$0]  (!%p10583_p12), %s12144_s18, 16, %s1813_s3, [#allocation12]  }
 0x234   : > { %s1846_s1 = sshll.u32 %s10141_s21, 4  ;;  %s10142_s4 = smov [#allocation19]   ;;  %s1847_s1 = int_to_ptr.vmem [resolvable:$true] %s1846_s1 }
 0x235   : > { %s1871_s6 = sshll.u32 %s10142_s4, 4  ;;  %s1872_s6 = int_to_ptr.vmem [resolvable:$true] %s1871_s6 }
 0x238   : > { %s9623_s8 = scalar_lea.hbm %s12145_s19, 16 }
 0x239   : > { %p9624_p13 = scmp.ne.s32.totalorder %s12145_s19, %s9623_s8  ;;  %p9630_p3 = scmp.lt.u32.totalorder %s9623_s8, %s12145_s19 }
 0x23b   : > { %p9626_p1 = pnand %p9624_p13, %p10595_p0 }
 0x23d   : > { %p9627_p2 = pneg %p9626_p1 }
 0x23f   : > { %p9632_p4 = pnand %p9630_p3, %p9627_p2 }
 0x241   : > { %9635 = shalt.err (!%p9632_p4)
}
 0x242   : > { %s9636_s26 = scalar_lea.vmem %s1847_s1, 16  ;;  %s9643_s3 = scalar_lea.vmem %s1847_s1, 32 }
 0x243   : > { %p9637_p5 = scmp.ne.s32.totalorder %s1847_s1, %s9636_s26  ;;  %p9644_p10 = scmp.lt.s32.totalorder %s1847_s1, %s1847_s1 }
 0x244   : > { %p9645_p7 = scmp.lt.s32.totalorder %s9643_s3, %s9636_s26 }
 0x245   : > { %p9639_p6 = pnand %p9637_p5, %p10595_p0 }
 0x246   : > { %p9646_p8 = por %p9645_p7, %p9644_p10 }
 0x247   : > { %p9640_p9 = pneg %p9639_p6 }
 0x249   : > { %p9647_p11 = pnand %p9646_p8, %p9640_p9 }
 0x24b   : > { %9650 = shalt.err (!%p9647_p11)
}
 0x24c   : > { %s12146_s7 = sld [smem:[#allocation103_spill]] }
 0x24d   : > { %8705 = dma.hbm_to_vmem [thread:$0]  (!%p10583_p12), %s12145_s19, 16, %s1847_s1, [#allocation15]  }
 0x252   : > { %s12147_s21 = smov %s12146_s7  ;;  %s9651_s8 = scalar_lea.hbm %s12146_s7, 16 }
 0x253   : > { %p9652_p13 = scmp.ne.s32.totalorder %s12147_s21, %s9651_s8  ;;  %p9658_p3 = scmp.lt.u32.totalorder %s9651_s8, %s12147_s21 }
 0x255   : > { %p9654_p1 = pnand %p9652_p13, %p10595_p0 }
 0x257   : > { %p9655_p2 = pneg %p9654_p1 }
 0x259   : > { %p9660_p4 = pnand %p9658_p3, %p9655_p2 }
 0x25b   : > { %9663 = shalt.err (!%p9660_p4)
}
 0x25c   : > { %s9664_s4 = scalar_lea.vmem %s1872_s6, 16  ;;  %s9671_s26 = scalar_lea.vmem %s1872_s6, 32 }
 0x25d   : > { %p9665_p5 = scmp.ne.s32.totalorder %s1872_s6, %s9664_s4  ;;  %p9672_p10 = scmp.lt.s32.totalorder %s1872_s6, %s1872_s6 }
 0x25e   : > { %p9673_p7 = scmp.lt.s32.totalorder %s9671_s26, %s9664_s4 }
 0x25f   : > { %p9667_p6 = pnand %p9665_p5, %p10595_p0 }
 0x260   : > { %p9674_p8 = por %p9673_p7, %p9672_p10 }
 0x261   : > { %p9668_p9 = pneg %p9667_p6 }
 0x263   : > { %p9675_p11 = pnand %p9674_p8, %p9668_p9 }
 0x265   : > { %9678 = shalt.err (!%p9675_p11)
}
 0x266   : > { %s12148_s1 = sld [smem:[#allocation104_spill]]  ;;  %s10143_s3 = smov [#allocation22]  }
 0x267   : > { %8711 = dma.hbm_to_vmem [thread:$0]  (!%p10583_p12), %s12147_s21, 16, %s1872_s6, [#allocation18]  }
 0x268   : > { %s1893_s7 = sshll.u32 %s10143_s3, 4  ;;  %s10144_s8 = smov [#allocation25]   ;;  %s1894_s7 = int_to_ptr.vmem [resolvable:$true] %s1893_s7 }
 0x269   : > { %s1918_s12 = sshll.u32 %s10144_s8, 4  ;;  %s1919_s12 = int_to_ptr.vmem [resolvable:$true] %s1918_s12 }
 0x26c   : > { %s9679_s17 = scalar_lea.hbm %s12148_s1, 16 }
 0x26d   : > { %p9680_p13 = scmp.ne.s32.totalorder %s12148_s1, %s9679_s17  ;;  %p9686_p3 = scmp.lt.u32.totalorder %s9679_s17, %s12148_s1 }
 0x26f   : > { %p9682_p1 = pnand %p9680_p13, %p10595_p0 }
 0x271   : > { %p9683_p2 = pneg %p9682_p1 }
 0x273   : > { %p9688_p4 = pnand %p9686_p3, %p9683_p2 }
 0x275   : > { %9691 = shalt.err (!%p9688_p4)
}
 0x276   : > { %s9692_s4 = scalar_lea.vmem %s1894_s7, 16  ;;  %s9699_s6 = scalar_lea.vmem %s1894_s7, 32 }
 0x277   : > { %p9693_p5 = scmp.ne.s32.totalorder %s1894_s7, %s9692_s4  ;;  %p9700_p10 = scmp.lt.s32.totalorder %s1894_s7, %s1894_s7 }
 0x278   : > { %p9701_p7 = scmp.lt.s32.totalorder %s9699_s6, %s9692_s4 }
 0x279   : > { %p9695_p6 = pnand %p9693_p5, %p10595_p0 }
 0x27a   : > { %p9702_p8 = por %p9701_p7, %p9700_p10 }
 0x27b   : > { %p9696_p9 = pneg %p9695_p6 }
 0x27d   : > { %p9703_p11 = pnand %p9702_p8, %p9696_p9 }
 0x27f   : > { %9706 = shalt.err (!%p9703_p11)
}
 0x280   : > { %s12149_s26 = sld [smem:[#allocation106_spill]] }
 0x281   : > { %8717 = dma.hbm_to_vmem [thread:$0]  (!%p10583_p12), %s12148_s1, 16, %s1894_s7, [#allocation21]  }
 0x286   : > { %s9707_s17 = scalar_lea.hbm %s12149_s26, 16 }
 0x287   : > { %p9708_p13 = scmp.ne.s32.totalorder %s12149_s26, %s9707_s17  ;;  %p9714_p3 = scmp.lt.u32.totalorder %s9707_s17, %s12149_s26 }
 0x289   : > { %p9710_p1 = pnand %p9708_p13, %p10595_p0 }
 0x28b   : > { %p9711_p2 = pneg %p9710_p1 }
 0x28d   : > { %p9716_p4 = pnand %p9714_p3, %p9711_p2 }
 0x28f   : > { %9719 = shalt.err (!%p9716_p4)
}
 0x290   : > { %s9720_s3 = scalar_lea.vmem %s1919_s12, 16  ;;  %s9727_s8 = scalar_lea.vmem %s1919_s12, 32 }
 0x291   : > { %p9721_p5 = scmp.ne.s32.totalorder %s1919_s12, %s9720_s3  ;;  %p9728_p10 = scmp.lt.s32.totalorder %s1919_s12, %s1919_s12 }
 0x292   : > { %p9729_p7 = scmp.lt.s32.totalorder %s9727_s8, %s9720_s3 }
 0x293   : > { %p9723_p6 = pnand %p9721_p5, %p10595_p0 }
 0x294   : > { %p9730_p8 = por %p9729_p7, %p9728_p10 }
 0x295   : > { %p9724_p9 = pneg %p9723_p6 }
 0x297   : > { %p9731_p11 = pnand %p9730_p8, %p9724_p9 }
 0x299   : > { %9734 = shalt.err (!%p9731_p11)
}
 0x29a   : > { %s12150_s7 = sld [smem:[#allocation111_spill]]  ;;  %s10145_s6 = smov [#allocation28]  }
 0x29b   : > { %8723 = dma.hbm_to_vmem [thread:$0]  (!%p10583_p12), %s12149_s26, 16, %s1919_s12, [#allocation24]  }
 0x29c   : > { %s1949_s17 = sshll.u32 %s10145_s6, 4  ;;  %s10146_s1 = smov [#allocation31]   ;;  %s1950_s17 = int_to_ptr.vmem [resolvable:$true] %s1949_s17 }
 0x29d   : > { %s1974_s18 = sshll.u32 %s10146_s1, 4  ;;  %s1975_s18 = int_to_ptr.vmem [resolvable:$true] %s1974_s18 }
 0x2a0   : > { %s12151_s4 = smov %s12150_s7  ;;  %s9735_s19 = scalar_lea.hbm %s12150_s7, 16 }
 0x2a1   : > { %p9736_p13 = scmp.ne.s32.totalorder %s12151_s4, %s9735_s19  ;;  %p9742_p3 = scmp.lt.u32.totalorder %s9735_s19, %s12151_s4 }
 0x2a3   : > { %p9738_p1 = pnand %p9736_p13, %p10595_p0 }
 0x2a5   : > { %p9739_p2 = pneg %p9738_p1 }
 0x2a7   : > { %p9744_p4 = pnand %p9742_p3, %p9739_p2 }
 0x2a9   : > { %9747 = shalt.err (!%p9744_p4)
}
 0x2aa   : > { %s9748_s3 = scalar_lea.vmem %s1950_s17, 16  ;;  %s9755_s12 = scalar_lea.vmem %s1950_s17, 32 }
 0x2ab   : > { %p9749_p5 = scmp.ne.s32.totalorder %s1950_s17, %s9748_s3  ;;  %p9756_p10 = scmp.lt.s32.totalorder %s1950_s17, %s1950_s17 }
 0x2ac   : > { %p9757_p7 = scmp.lt.s32.totalorder %s9755_s12, %s9748_s3 }
 0x2ad   : > { %p9751_p6 = pnand %p9749_p5, %p10595_p0 }
 0x2ae   : > { %p9758_p8 = por %p9757_p7, %p9756_p10 }
 0x2af   : > { %p9752_p9 = pneg %p9751_p6 }
 0x2b1   : > { %p9759_p11 = pnand %p9758_p8, %p9752_p9 }
 0x2b3   : > { %9762 = shalt.err (!%p9759_p11)
}
 0x2b4   : > { %s12152_s1 = sld [smem:[#allocation114_spill]] }
 0x2b5   : > { %8729 = dma.hbm_to_vmem [thread:$0]  (!%p10583_p12), %s12151_s4, 16, %s1950_s17, [#allocation27]  }
 0x2ba   : > { %s9763_s19 = scalar_lea.hbm %s12152_s1, 16 }
 0x2bb   : > { %p9764_p13 = scmp.ne.s32.totalorder %s12152_s1, %s9763_s19  ;;  %p9770_p3 = scmp.lt.u32.totalorder %s9763_s19, %s12152_s1 }
 0x2bd   : > { %p9766_p1 = pnand %p9764_p13, %p10595_p0 }
 0x2bf   : > { %p9767_p2 = pneg %p9766_p1 }
 0x2c1   : > { %p9772_p4 = pnand %p9770_p3, %p9767_p2 }
 0x2c3   : > { %9775 = shalt.err (!%p9772_p4)
}
 0x2c4   : > { %s9776_s8 = scalar_lea.vmem %s1975_s18, 16  ;;  %s9783_s7 = scalar_lea.vmem %s1975_s18, 32 }
 0x2c5   : > { %p9777_p5 = scmp.ne.s32.totalorder %s1975_s18, %s9776_s8  ;;  %p9784_p10 = scmp.lt.s32.totalorder %s1975_s18, %s1975_s18 }
 0x2c6   : > { %p9785_p7 = scmp.lt.s32.totalorder %s9783_s7, %s9776_s8 }
 0x2c7   : > { %p9779_p6 = pnand %p9777_p5, %p10595_p0 }
 0x2c8   : > { %p9786_p8 = por %p9785_p7, %p9784_p10 }
 0x2c9   : > { %p9780_p9 = pneg %p9779_p6 }
 0x2cb   : > { %p9787_p11 = pnand %p9786_p8, %p9780_p9 }
 0x2cd   : > { %9790 = shalt.err (!%p9787_p11)
}
 0x2ce   : > { %s12153_s6 = sld [smem:[#allocation116_spill]]  ;;  %s10147_s17 = smov [#allocation34]  }
 0x2cf   : > { %8735 = dma.hbm_to_vmem [thread:$0]  (!%p10583_p12), %s12152_s1, 16, %s1975_s18, [#allocation30]  }
 0x2d0   : > { %s1996_s3 = sshll.u32 %s10147_s17, 4  ;;  %s10148_s12 = smov [#allocation37]   ;;  %s1997_s3 = int_to_ptr.vmem [resolvable:$true] %s1996_s3 }
 0x2d1   : > { %s2021_s19 = sshll.u32 %s10148_s12, 4  ;;  %s2022_s19 = int_to_ptr.vmem [resolvable:$true] %s2021_s19 }
 0x2d4   : > { %s9791_s4 = scalar_lea.hbm %s12153_s6, 16 }
 0x2d5   : > { %p9792_p13 = scmp.ne.s32.totalorder %s12153_s6, %s9791_s4  ;;  %p9798_p3 = scmp.lt.u32.totalorder %s9791_s4, %s12153_s6 }
 0x2d7   : > { %p9794_p1 = pnand %p9792_p13, %p10595_p0 }
 0x2d9   : > { %p9795_p2 = pneg %p9794_p1 }
 0x2db   : > { %p9800_p4 = pnand %p9798_p3, %p9795_p2 }
 0x2dd   : > { %9803 = shalt.err (!%p9800_p4)
}
 0x2de   : > { %s9804_s8 = scalar_lea.vmem %s1997_s3, 16  ;;  %s9811_s18 = scalar_lea.vmem %s1997_s3, 32 }
 0x2df   : > { %p9805_p5 = scmp.ne.s32.totalorder %s1997_s3, %s9804_s8  ;;  %p9812_p10 = scmp.lt.s32.totalorder %s1997_s3, %s1997_s3 }
 0x2e0   : > { %p9813_p7 = scmp.lt.s32.totalorder %s9811_s18, %s9804_s8 }
 0x2e1   : > { %p9807_p6 = pnand %p9805_p5, %p10595_p0 }
 0x2e2   : > { %p9814_p8 = por %p9813_p7, %p9812_p10 }
 0x2e3   : > { %p9808_p9 = pneg %p9807_p6 }
 0x2e5   : > { %p9815_p11 = pnand %p9814_p8, %p9808_p9 }
 0x2e7   : > { %9818 = shalt.err (!%p9815_p11)
}
 0x2e8   : > { %s12154_s7 = sld [smem:[#allocation119_spill]] }
 0x2e9   : > { %8741 = dma.hbm_to_vmem [thread:$0]  (!%p10583_p12), %s12153_s6, 16, %s1997_s3, [#allocation33]  }
 0x2ee   : > { %s12155_s17 = smov %s12154_s7  ;;  %s9819_s4 = scalar_lea.hbm %s12154_s7, 16 }
 0x2ef   : > { %p9820_p13 = scmp.ne.s32.totalorder %s12155_s17, %s9819_s4  ;;  %p9826_p3 = scmp.lt.u32.totalorder %s9819_s4, %s12155_s17 }
 0x2f1   : > { %p9822_p1 = pnand %p9820_p13, %p10595_p0 }
 0x2f3   : > { %p9823_p2 = pneg %p9822_p1 }
 0x2f5   : > { %p9828_p4 = pnand %p9826_p3, %p9823_p2 }
 0x2f7   : > { %9831 = shalt.err (!%p9828_p4)
}
 0x2f8   : > { %s9832_s12 = scalar_lea.vmem %s2022_s19, 16  ;;  %s9839_s8 = scalar_lea.vmem %s2022_s19, 32 }
 0x2f9   : > { %p9833_p5 = scmp.ne.s32.totalorder %s2022_s19, %s9832_s12  ;;  %p9840_p10 = scmp.lt.s32.totalorder %s2022_s19, %s2022_s19 }
 0x2fa   : > { %p9841_p7 = scmp.lt.s32.totalorder %s9839_s8, %s9832_s12 }
 0x2fb   : > { %p9835_p6 = pnand %p9833_p5, %p10595_p0 }
 0x2fc   : > { %p9842_p8 = por %p9841_p7, %p9840_p10 }
 0x2fd   : > { %p9836_p9 = pneg %p9835_p6 }
 0x2ff   : > { %p9843_p11 = pnand %p9842_p8, %p9836_p9 }
 0x301   : > { %9846 = shalt.err (!%p9843_p11)
}
 0x302   : > { %s12156_s3 = sld [smem:[#allocation121_spill]]  ;;  %s10149_s18 = smov [#allocation40]  }
 0x303   : > { %8747 = dma.hbm_to_vmem [thread:$0]  (!%p10583_p12), %s12155_s17, 16, %s2022_s19, [#allocation36]  }
 0x304   : > { %s2046_s7 = sshll.u32 %s10149_s18, 4  ;;  %s10150_s4 = smov [#allocation43]   ;;  %s2047_s7 = int_to_ptr.vmem [resolvable:$true] %s2046_s7 }
 0x305   : > { %s2068_s1 = sshll.u32 %s10150_s4, 4  ;;  %s2069_s1 = int_to_ptr.vmem [resolvable:$true] %s2068_s1 }
 0x308   : > { %s9847_s6 = scalar_lea.hbm %s12156_s3, 16 }
 0x309   : > { %p9848_p13 = scmp.ne.s32.totalorder %s12156_s3, %s9847_s6  ;;  %p9854_p3 = scmp.lt.u32.totalorder %s9847_s6, %s12156_s3 }
 0x30b   : > { %p9850_p1 = pnand %p9848_p13, %p10595_p0 }
 0x30d   : > { %p9851_p2 = pneg %p9850_p1 }
 0x30f   : > { %p9856_p4 = pnand %p9854_p3, %p9851_p2 }
 0x311   : > { %9859 = shalt.err (!%p9856_p4)
}
 0x312   : > { %s9860_s12 = scalar_lea.vmem %s2047_s7, 16  ;;  %s9867_s19 = scalar_lea.vmem %s2047_s7, 32 }
 0x313   : > { %p9861_p5 = scmp.ne.s32.totalorder %s2047_s7, %s9860_s12  ;;  %p9868_p10 = scmp.lt.s32.totalorder %s2047_s7, %s2047_s7 }
 0x314   : > { %p9869_p7 = scmp.lt.s32.totalorder %s9867_s19, %s9860_s12 }
 0x315   : > { %p9863_p6 = pnand %p9861_p5, %p10595_p0 }
 0x316   : > { %p9870_p8 = por %p9869_p7, %p9868_p10 }
 0x317   : > { %p9864_p9 = pneg %p9863_p6 }
 0x319   : > { %p9871_p11 = pnand %p9870_p8, %p9864_p9 }
 0x31b   : > { %9874 = shalt.err (!%p9871_p11)
}
 0x31c   : > { %8753 = dma.hbm_to_vmem [thread:$0]  (!%p10583_p12), %s12156_s3, 16, %s2047_s7, [#allocation39]  }
 0x31d   : > { %s9875_s6 = scalar_lea.hbm %s12123_s5, 16 }
 0x31e   : > { %p9876_p13 = scmp.ne.s32.totalorder %s12123_s5, %s9875_s6  ;;  %p9882_p3 = scmp.lt.u32.totalorder %s9875_s6, %s12123_s5 }
 0x320   : > { %p9878_p1 = pnand %p9876_p13, %p10595_p0 }
 0x322   : > { %p9879_p2 = pneg %p9878_p1 }
 0x324   : > { %p9884_p4 = pnand %p9882_p3, %p9879_p2 }
 0x326   : > { %9887 = shalt.err (!%p9884_p4)
}
 0x327   : > { %s9888_s8 = scalar_lea.vmem %s2069_s1, 16  ;;  %s9895_s18 = scalar_lea.vmem %s2069_s1, 32 }
 0x328   : > { %p9889_p5 = scmp.ne.s32.totalorder %s2069_s1, %s9888_s8  ;;  %p9896_p10 = scmp.lt.s32.totalorder %s2069_s1, %s2069_s1 }
 0x329   : > { %p9897_p7 = scmp.lt.s32.totalorder %s9895_s18, %s9888_s8 }
 0x32a   : > { %p9891_p6 = pnand %p9889_p5, %p10595_p0 }
 0x32b   : > { %p9898_p8 = por %p9897_p7, %p9896_p10 }
 0x32c   : > { %p9892_p9 = pneg %p9891_p6 }
 0x32e   : > { %p9899_p11 = pnand %p9898_p8, %p9892_p9 }
 0x330   : > { %9902 = shalt.err (!%p9899_p11)
}
 0x331   : > { %8759 = dma.hbm_to_vmem [thread:$0]  (!%p10583_p12), %s12123_s5, 16, %s2069_s1, [#allocation42]  }
 0x332   : > { %s10151_s7 = smov [#allocation44]   ;;  %s9903_s12 = scalar_lea.hbm %s12122_s13, 16 }
 0x333   : > { %s2079_s4 = sshll.u32 %s10151_s7, 4  ;;  %p9904_p13 = scmp.ne.s32.totalorder %s12122_s13, %s9903_s12  ;;  %s2080_s4 = int_to_ptr.vmem [resolvable:$true] %s2079_s4 }
 0x334   : > { %p9910_p3 = scmp.lt.u32.totalorder %s9903_s12, %s12122_s13 }
 0x335   : > { %p9906_p1 = pnand %p9904_p13, %p10595_p0 }
 0x337   : > { %p9907_p2 = pneg %p9906_p1 }
 0x339   : > { %p9912_p4 = pnand %p9910_p3, %p9907_p2 }
 0x33b   : > { %9915 = shalt.err (!%p9912_p4)
}
 0x33c   : > { %s9916_s19 = scalar_lea.vmem %s2080_s4, 16  ;;  %s9923_s6 = scalar_lea.vmem %s2080_s4, 32 }
 0x33d   : > { %p9917_p5 = scmp.ne.s32.totalorder %s2080_s4, %s9916_s19  ;;  %p9924_p10 = scmp.lt.s32.totalorder %s2080_s4, %s2080_s4 }
 0x33e   : > { %p9925_p7 = scmp.lt.s32.totalorder %s9923_s6, %s9916_s19 }
 0x33f   : > { %p9919_p6 = pnand %p9917_p5, %p10595_p0 }
 0x340   : > { %p9926_p8 = por %p9925_p7, %p9924_p10 }
 0x341   : > { %p9920_p9 = pneg %p9919_p6 }
 0x343   : > { %p9927_p11 = pnand %p9926_p8, %p9920_p9 }
 0x345   : > { %9930 = shalt.err (!%p9927_p11)
}
 0x346   : > { %8762 = dma.hbm_to_vmem [thread:$0]  (!%p10583_p12), %s12122_s13, 16, %s2080_s4, [#allocation45]  }
 0x347   : > { %p12157_p13 = scmp.ne.s32.totalorder %s12139_s2, 0 }
 0x348   : > { %p12158_p1 = scmp.eq.s32.totalorder (!%p12157_p13), %s10547_s15, 0 }
 0x349   : > { %2103 = sbr.rel (%p12157_p13) target bundleno = 15052 (0x3acc), region = 296 }
 0x350   : > { %9976 = dma.done.wait (%p12158_p1), [#allocation3], 16   ;;  %p12159_p2 = pmov %p12158_p1 }
 0x351   : > { %p12160_p0 = pmov %p12158_p1 }
 0x352   : > { %9978 = vsyncadd (%p12159_p2), [#allocation3], 4294967280 }
 0x353   : > { %9980 = dma.done.wait (%p12160_p0), [#allocation6], 32   ;;  %p12161_p3 = pmov %p12160_p0 }
 0x354   : > { %p12162_p4 = pmov %p12160_p0 }
 0x355   : > { %9982 = vsyncadd (%p12161_p3), [#allocation6], 4294967264 }
 0x356   : > { %9984 = dma.done.wait (%p12162_p4), [#allocation9], 32   ;;  %p12163_p12 = pmov %p12160_p0 }
 0x357   : > { %p12164_p5 = pmov %p12160_p0 }
 0x358   : > { %9986 = vsyncadd (%p12163_p12), [#allocation9], 4294967264 }
 0x359   : > { %9988 = dma.done.wait (%p12164_p5), [#allocation12], 32   ;;  %p12165_p6 = pmov %p12160_p0 }
 0x35a   : > { %p12166_p9 = pmov %p12160_p0 }
 0x35b   : > { %9990 = vsyncadd (%p12165_p6), [#allocation12], 4294967264 }
 0x35c   : > { %9992 = dma.done.wait (%p12166_p9), [#allocation15], 32   ;;  %p12167_p10 = pmov %p12160_p0 }
 0x35d   : > { %p12168_p7 = pmov %p12160_p0 }
 0x35e   : > { %9994 = vsyncadd (%p12167_p10), [#allocation15], 4294967264 }
 0x35f   : > { %9996 = dma.done.wait (%p12168_p7), [#allocation18], 32   ;;  %p12169_p8 = pmov %p12160_p0 }
 0x360   : > { %p12170_p11 = pmov %p12160_p0 }
 0x361   : > { %9998 = vsyncadd (%p12169_p8), [#allocation18], 4294967264 }
 0x362   : > { %10000 = dma.done.wait (%p12170_p11), [#allocation21], 32   ;;  %p12171_p13 = pmov %p12160_p0 }
 0x363   : > { %p12172_p1 = pmov %p12160_p0 }
 0x364   : > { %10002 = vsyncadd (%p12171_p13), [#allocation21], 4294967264 }
 0x365   : > { %10004 = dma.done.wait (%p12172_p1), [#allocation24], 32   ;;  %p12173_p2 = pmov %p12160_p0 }
 0x367   : > { %10006 = vsyncadd (%p12173_p2), [#allocation24], 4294967264 }
 0x368   : > { %10008 = dma.done.wait (%p12160_p0), [#allocation27], 32   ;;  %p12174_p3 = pmov %p12160_p0 }
 0x369   : > { %p12175_p4 = pmov %p12160_p0 }
 0x36a   : > { %10010 = vsyncadd (%p12174_p3), [#allocation27], 4294967264 }
 0x36b   : > { %10012 = dma.done.wait (%p12175_p4), [#allocation30], 32   ;;  %p12176_p12 = pmov %p12160_p0 }
 0x36c   : > { %p12177_p5 = pmov %p12160_p0 }
 0x36d   : > { %10014 = vsyncadd (%p12176_p12), [#allocation30], 4294967264 }
 0x36e   : > { %10016 = dma.done.wait (%p12177_p5), [#allocation33], 32   ;;  %p12178_p6 = pmov %p12160_p0 }
 0x36f   : > { %p12179_p9 = pmov %p12160_p0 }
 0x370   : > { %10018 = vsyncadd (%p12178_p6), [#allocation33], 4294967264 }
 0x371   : > { %10020 = dma.done.wait (%p12179_p9), [#allocation36], 32   ;;  %p12180_p10 = pmov %p12160_p0 }
 0x372   : > { %p12181_p7 = pmov %p12160_p0 }
 0x373   : > { %10022 = vsyncadd (%p12180_p10), [#allocation36], 4294967264 }
 0x374   : > { %10024 = dma.done.wait (%p12181_p7), [#allocation39], 32   ;;  %p12182_p8 = pmov %p12160_p0 }
 0x375   : > { %p12183_p11 = pmov %p12160_p0 }
 0x376   : > { %10026 = vsyncadd (%p12182_p8), [#allocation39], 4294967264 }
 0x377   : > { %10028 = dma.done.wait (%p12183_p11), [#allocation42], 32   ;;  %p12184_p13 = pmov %p12160_p0 }
 0x378   : > { %p12185_p1 = pmov %p12160_p0 }
 0x379   : > { %10030 = vsyncadd (%p12184_p13), [#allocation42], 4294967264 }
 0x37a   : > { %10032 = dma.done.wait (%p12185_p1), [#allocation45], 16   ;;  %p12186_p2 = pmov %p12160_p0 }
 0x37b   : > { %p2366_p0 = scmp.lt.s32.totalorder %s10547_s15, 1  ;;  %v10152_v0 = vmov 0.0   ;;  %vm10153_vm0 = vmmov 0   ;;  %s12187_s10 = sld [smem:[#allocation63_spill]]  ;;  %v2374_v1 = vld [vmem:[%s10519_s14] sm:$0xff]  ;;  %v2375_v2 = vld [vmem:[%s10519_s14 + $0x8] sm:$0xff] }
 0x37c   : > { %10034 = vsyncadd (%p12186_p2), [#allocation45], 4294967280  ;;  %8050 = vmatprep.subr.bf16.mxu1 %v10152_v0  ;;  %8056 = vmatprep.mubr.msk.bf16.mxu1 %vm10153_vm0, %v10152_v0  ;;  %v2376_v3 = vld [vmem:[%s10519_s14 + $0x10] sm:$0xff]  ;;  %v2381_v4 = vpack.c.bf16 %v2375_v2, %v2374_v1  ;;  %v2377_v5 = vld [vmem:[%s10519_s14 + $0x18] sm:$0xff]  ;;  %vm2391_vm1 = vcmask 392192   ;;  %vm2438_vm2 = vcmask 130048  }
 0x37d   : > { %8072 = vmatprep.subr.bf16.mxu0 %v10152_v0  ;;  %8074 = vmatprep.mubr.msk.bf16.mxu0 %vm10153_vm0, %v10152_v0  ;;  %s2367_s2 = scalar_select %p2366_p0, %s10547_s15, 1  ;;  %v2382_v6 = vpack.c.bf16 %v2377_v5, %v2376_v3  ;;  %v2378_v7 = vld [vmem:[%s10519_s14 + $0x20] sm:$0xff]  ;;  %v2379_v8 = vld [vmem:[%s10519_s14 + $0x28] sm:$0xff]  ;;  %v7729_v13 = vld [vmem:[#allocation44] ss:$0 sm:$0xff]  ;;  %vm2634_vm3 = vcmask 64512  }
 0x37e   : > { %8051 = vmatpush3.bf16.msra.mxu1 %v2381_v4  ;;  %v2383_v9 = vpack.c.bf16 %v2379_v8, %v2378_v7  ;;  %v7731_v39 = vld [vmem:[#allocation43] ss:$0 sm:$0xff]  ;;  %v7732_v41 = vld [vmem:[#allocation41] ss:$0 sm:$0xff]  ;;  %s12188_s8 = sld [smem:[#allocation80_spill]]  ;;  %s12190_s7 = sld [smem:[#allocation71_spill]] }
 0x37f   : > { %s7867_s16 = sshll.u32 %s2367_s2, 4  ;;  %8052 = vmatprep.subr.bf16.mxu1 %v10152_v0  ;;  %s12189_s18 = sld [smem:[#allocation72_spill]]  ;;  %vm2681_vm4 = vcmask 27648   ;;  %vm2700_vm5 = vcmask 1041408   ;;  %vm2696_vm6 = vcmask 31744   ;;  %vm3552_vm7 = vcmask 1043456  }
 0x380   : > { %s12191_s4 = sld [smem:[#allocation79_spill]]  ;;  %s12192_s12 = sld [smem:[#allocation75_spill]]  ;;  %vm3828_vm10 = vcmask 523264   ;;  %vm5477_vm13 = vcmask 261120   ;;  %vm5482_vm14 = vcmask 519168   ;;  %vm5569_vm15 = vcmask 257024  }
 0x381   : > { %s2370_s1 = scalar_lea.vmem %s12187_s10, %s7867_s16  ;;  %s12023_s19 = smov 104  }
 0x382   : > { %8053 = vmatpush3.bf16.msra.mxu1 %v2382_v6  ;;  %v2372_v10 = vld [vmem:[%s2370_s1] sm:$0xff]  ;;  %v2373_v11 = vld [vmem:[%s2370_s1 + $0x8] sm:$0xff]  ;;  %s12021_s6 = smov 112   ;;  %s12019_s10 = smov 120  }
 0x383   : > { %8054 = vmatprep.subr.bf16.mxu1 %v10152_v0  ;;  %v2380_v12 = vpack.c.bf16 %v2373_v11, %v2372_v10  ;;  %s12017_s2 = smov 88   ;;  %s12193_s16 = sld [smem:[#allocation66_spill]] }
 0x384   : > { %v2526_v60 = vld [vmem:[%s12188_s8] sm:$0xff]  ;;  %v2527_v61 = vld [vmem:[%s12188_s8 + $0x8] sm:$0xff]  ;;  %s12015_s1 = smov 96   ;;  %s12213_s3 = sld [smem:[#allocation81_spill]] }
 0x385   : > { %v2529_v62 = vpack.c.bf16 %v2527_v61, %v2526_v60  ;;  %v7733_v8 = vld [vmem:[%s12189_s18] ss:$0 sm:$0xff]  ;;  %s12194_s18 = sld [smem:[#allocation78_spill]]  ;;  %s12216_s5 = smov 8  }
 0x386   : > { %8055 = vmatpush3.bf16.msra.mxu1 %v2383_v9  ;;  %s12040_s8 = smov 48   ;;  %s12234_s13 = smov 72  }
 0x387   : > { %8060 = vmatprep.subr.bf16.mxu1 %v10152_v0  ;;  %p12245_p4 = scmp.ne.s32.totalorder %s12136_s28, 0 }
 0x389   : > { %8057 = vmatmul.mubr.msk.bf16.vlgmr.msra.gmra.mrb[0].mxu1 %vm2391_vm1, %v2380_v12  ;;  %v7734_v12 = vld [vmem:[%s12190_s7] ss:$0 sm:$0xff]  ;;  %s12013_s7 = smov 8  }
 0x38a   : > { %8062 = vmatprep.mubr.msk.bf16.mxu1 %vm10153_vm0, %v10152_v0  ;;  %8061 = vmatpush3.bf16.msra.mxu1 %v2529_v62 }
 0x38b   : > { %8066 = vmatprep.subr.bf16.mxu1 %v10152_v0 }
 0x45c   : > { %v2429_v14 = vpop.f32.mrb[0].mxu1 }
 0x45d   : > { %v2430_v15 = vadd.f32 %v7729_v13, %v2429_v14  ;;  %v8058_v16 = vpop.f32.mrb[1].mxu1 }
 0x45e   : > { %v2432_v17 = vpop.f32.mrb[2].mxu1 }
 0x45f   : > { %v2433_v18 = vadd.f32 %v7729_v13, %v2432_v17  ;;  %v8059_v19 = vpop.f32.mrb[3].mxu1  ;;  %v2439_v20 = vsel %vm2438_vm2, %v2430_v15, 0.0  ;;  %v7735_v17 = vld [vmem:[%s12191_s4] ss:$0 sm:$0xff]  ;;  %s12195_s4 = sld [smem:[#allocation76_spill]] }
 0x460   : > { %2440 = vadd.xlane.f32.xlu0 %v2439_v20 }
 0x461   : > { %v2442_v21 = vsel %vm2438_vm2, %v2433_v18, 0.0 }
 0x464   : > { %2443 = vadd.xlane.f32.xlu0 %v2442_v21 }
 0x4ed   : > { %v2441_v22 = vpop.xlane.xlu0 %2440 }
 0x4ee   : > { %v2446_v23 = vmul.f32 0.0625, %v2441_v22 }
 0x4f0   : > { %v2448_v24 = vsub.f32 %v2430_v15, %v2446_v23 }
 0x4f1   : > { %v2444_v25 = vpop.xlane.xlu0 %2443 }
 0x4f2   : > { %v2447_v26 = vmul.f32 0.0625, %v2444_v25  ;;  %v2450_v27 = vmul.f32 %v2448_v24, %v2448_v24  ;;  %v2582_v25 = vld [vmem:[%s12192_s12 + $0x8] sm:$0xff] }
 0x4f4   : > { %v2449_v28 = vsub.f32 %v2433_v18, %v2447_v26  ;;  %v2452_v29 = vsel %vm2438_vm2, %v2450_v27, 0.0 }
 0x4f5   : > { %2453 = vadd.xlane.f32.xlu1 %v2452_v29 }
 0x4f6   : > { %v2451_v30 = vmul.f32 %v2449_v28, %v2449_v28 }
 0x4f8   : > { %v2455_v31 = vsel %vm2438_vm2, %v2451_v30, 0.0 }
 0x4f9   : > { %2456 = vadd.xlane.f32.xlu1 %v2455_v31 }
 0x582   : > { %v2454_v32 = vpop.xlane.xlu1 %2453 }
 0x583   : > { %v2458_v33 = vmul.f32 0.0625, %v2454_v32 }
 0x585   : > { %v2460_v34 = vadd.f32 1e-05, %v2458_v33 }
 0x586   : > { %v2457_v35 = vpop.xlane.xlu1 %2456 }
 0x587   : > { %8991 = vrsqrt.f32 %v2460_v34  ;;  %v2459_v36 = vmul.f32 0.0625, %v2457_v35 }
 0x589   : > { %v2461_v37 = vadd.f32 1e-05, %v2459_v36 }
 0x58b   : > { %8993 = vrsqrt.f32 %v2461_v37 }
 0x591   : > { %v8992_v38 = vpop.eup %8991 }
 0x592   : > { %v2464_v40 = vmul.f32 %v8992_v38, %v2448_v24  ;;  %v2581_v24 = vld [vmem:[%s12192_s12] sm:$0xff]  ;;  %s12048_s12 = smov 40  }
 0x593   : > { %v2583_v27 = vpack.c.bf16 %v2582_v25, %v2581_v24 }
 0x594   : > { %v2472_v42 = vmul.f32 %v7731_v39, %v2464_v40 }
 0x595   : > { %v8994_v43 = vpop.eup %8993 }
 0x596   : > { %v10976_v44 = vadd.f32 %v7732_v41, %v2472_v42  ;;  %v2465_v45 = vmul.f32 %v8994_v43, %v2449_v28 }
 0x598   : > { %v2484_v46 = vsel %vm2438_vm2, %v10976_v44, 0.0  ;;  %v2473_v47 = vmul.f32 %v7731_v39, %v2465_v45 }
 0x599   : > { %2485 = vadd.xlane.f32.xlu0 %v2484_v46 }
 0x59a   : > { %v10980_v48 = vadd.f32 %v7732_v41, %v2473_v47 }
 0x59c   : > { %v2487_v49 = vsel %vm2438_vm2, %v10980_v48, 0.0 }
 0x59d   : > { %2488 = vadd.xlane.f32.xlu1 %v2487_v49 }
 0x626   : > { %v2486_v50 = vpop.xlane.xlu0 %2485 }
 0x627   : > { %v2490_v51 = vmul.f32 0.0625, %v2486_v50 }
 0x629   : > { %v2492_v52 = vsub.f32 %v10976_v44, %v2490_v51 }
 0x62a   : > { %v2489_v53 = vpop.xlane.xlu1 %2488 }
 0x62b   : > { %v2491_v54 = vmul.f32 0.0625, %v2489_v53  ;;  %v2494_v55 = vmul.f32 %v2492_v52, %v2492_v52 }
 0x62d   : > { %v2493_v56 = vsub.f32 %v10980_v48, %v2491_v54  ;;  %v2496_v57 = vsel %vm2438_vm2, %v2494_v55, 0.0 }
 0x62e   : > { %2497 = vadd.xlane.f32.xlu0 %v2496_v57 }
 0x62f   : > { %v2495_v58 = vmul.f32 %v2493_v56, %v2493_v56 }
 0x631   : > { %v2499_v59 = vsel %vm2438_vm2, %v2495_v58, 0.0  ;;  %v2630_v58 = vld [vmem:[%s12193_s16] sm:$0xf] }
 0x632   : > { %2500 = vadd.xlane.f32.xlu1 %v2499_v59 }
 0x6bb   : > { %v2498_v63 = vpop.xlane.xlu0 %2497 }
 0x6bc   : > { %v2502_v1 = vmul.f32 0.0625, %v2498_v63 }
 0x6be   : > { %v2504_v2 = vadd.f32 1e-05, %v2502_v1 }
 0x6bf   : > { %v2501_v3 = vpop.xlane.xlu1 %2500 }
 0x6c0   : > { %8995 = vrsqrt.f32 %v2504_v2  ;;  %v2503_v4 = vmul.f32 0.0625, %v2501_v3  ;;  %v7740_v2 = vld [vmem:[%s12193_s16 + $0x4] sm:$0xf] }
 0x6c2   : > { %v2505_v5 = vadd.f32 1e-05, %v2503_v4 }
 0x6c4   : > { %8997 = vrsqrt.f32 %v2505_v5 }
 0x6ca   : > { %v8996_v6 = vpop.eup %8995 }
 0x6cb   : > { %v2508_v7 = vmul.f32 %v8996_v6, %v2492_v52 }
 0x6cd   : > { %v2516_v10 = vmul.f32 %v7733_v8, %v2508_v7 }
 0x6ce   : > { %v8998_v9 = vpop.eup %8997 }
 0x6cf   : > { %v2509_v11 = vmul.f32 %v8998_v9, %v2493_v56  ;;  %v2524_v14 = vadd.f32 %v7734_v12, %v2516_v10 }
 0x6d1   : > { %v2517_v13 = vmul.f32 %v7733_v8, %v2509_v11 }
 0x6d3   : > { %v2525_v15 = vadd.f32 %v7734_v12, %v2517_v13 }
 0x6d5   : > { %v2528_v16 = vpack.c.bf16 %v2525_v15, %v2524_v14 }
 0x6d7   : > { %8063 = vmatmul.mubr.msk.bf16.vlgmr.msra.gmra.mrb[4].mxu1 %vm2438_vm2, %v2528_v16 }
 0x6d8   : > { %8068 = vmatprep.mubr.msk.bf16.mxu1 %vm10153_vm0, %v10152_v0 }
 0x7aa   : > { %v2574_v18 = vpop.f32.mrb[4].mxu1 }
 0x7ab   : > { %v8064_v19 = vpop.f32.mrb[5].mxu1  ;;  %v2575_v21 = vadd.f32 %v7735_v17, %v2574_v18 }
 0x7ac   : > { %v2577_v20 = vpop.f32.mrb[6].mxu1 }
 0x7ad   : > { %v2578_v22 = vadd.f32 %v7735_v17, %v2577_v20  ;;  %v8065_v23 = vpop.f32.mrb[7].mxu1 }
 0x7af   : > { %v2584_v26 = vpack.c.bf16 %v2578_v22, %v2575_v21  ;;  %v7752_v21 = vld [vmem:[%s12193_s16 + $0x14] sm:$0xf] }
 0x7b1   : > { %8067 = vmatpush3.bf16.msra.mxu1 %v2584_v26 }
 0x7b2   : > { %8078 = vmatprep.subr.bf16.mxu1 %v10152_v0 }
 0x7b4   : > { %8069 = vmatmul.mubr.msk.bf16.vlgmr.msra.gmra.mrb[8].mxu1 %vm2438_vm2, %v2583_v27 }
 0x7b5   : > { %8080 = vmatprep.mubr.msk.bf16.mxu1 %vm10153_vm0, %v10152_v0 }
 0x887   : > { %v2622_v28 = vpop.f32.mrb[8].mxu1 }
 0x888   : > { %v11003_v29 = vpack.c.bf16 %v2622_v28, %v2622_v28  ;;  %v8070_v30 = vpop.f32.mrb[9].mxu1 }
 0x889   : > { %v2625_v31 = vpop.f32.mrb[10].mxu1 }
 0x88a   : > { %2748 = vrot.lane.b32.xlu1 %v11003_v29, %s12023_s19  ;;  %2632 = vrot.lane.b32.xlu0 %v11003_v29, %s12021_s6  ;;  %v8071_v32 = vpop.f32.mrb[11].mxu1  ;;  %v11010_v33 = vrot.slane %v11003_v29, 2  ;;  %v11016_v34 = vpack.c.bf16 %v2625_v31, %v2625_v31 }
 0x88c   : > { %v11027_v35 = vrot.slane %v11016_v34, 2 }
 0x88e   : > { %2746 = vrot.lane.b32.xlu1 %v11003_v29, %s12019_s10  ;;  %2976 = vrot.lane.b32.xlu0 %v11010_v33, %s12023_s19 }
 0x892   : > { %2864 = vrot.lane.b32.xlu1 %v11010_v33, %s12021_s6  ;;  %3093 = vrot.lane.b32.xlu0 %v11016_v34, %s12021_s6 }
 0x896   : > { %2974 = vrot.lane.b32.xlu1 %v11010_v33, %s12019_s10  ;;  %3203 = vrot.lane.b32.xlu0 %v11016_v34, %s12019_s10 }
 0x89a   : > { %3205 = vrot.lane.b32.xlu1 %v11016_v34, %s12023_s19  ;;  %3433 = vrot.lane.b32.xlu0 %v11027_v35, %s12023_s19 }
 0x89e   : > { %3321 = vrot.lane.b32.xlu1 %v11027_v35, %s12021_s6 }
 0x8a2   : > { %3431 = vrot.lane.b32.xlu1 %v11027_v35, %s12019_s10  ;;  %s12200_s10 = sld [smem:[#allocation70_spill]] }
 0x8a6   : > { %2808 = vrot.lane.b32.xlu1 %v11003_v29, %s12017_s2 }
 0x8a8   : > { %s12201_s6 = smov %s12200_s10 }
 0x8fc   : > { %v2633_v36 = vpop.permute.xlu0 %2632  ;;  %v2749_v38 = vpop.permute.xlu1 %2748 }
 0x8fd   : > { %v2639_v37 = vsel %vm2634_vm3, %v2633_v36, 0  ;;  %v2754_v40 = vsel %vm2634_vm3, %v2749_v38, 0  ;;  %v7758_v38 = vld [vmem:[%s12193_s16 + $0x1c] sm:$0xf] }
 0x8fe   : > { %8073 = vmatpush3.bf16.xpose.msra.mxu0 %v2639_v37  ;;  %v7746_v37 = vld [vmem:[%s12193_s16 + $0xc] sm:$0xf] }
 0x8ff   : > { %8084 = vmatprep.subr.bf16.mxu0 %v10152_v0 }
 0x900   : > { %v2747_v39 = vpop.permute.xlu1 %2746  ;;  %v2977_v43 = vpop.permute.xlu0 %2976 }
 0x901   : > { %v2982_v45 = vsel %vm2634_vm3, %v2977_v43, 0 }
 0x904   : > { %v2865_v41 = vpop.permute.xlu1 %2864  ;;  %v3094_v46 = vpop.permute.xlu0 %3093 }
 0x905   : > { %8075 = vmatmul.mubr.msk.bf16.vlgmr.msra.gmra.mrb[0].mxu0 %vm2634_vm3, %v11003_v29  ;;  %v2870_v42 = vsel %vm2634_vm3, %v2865_v41, 0  ;;  %v3099_v49 = vsel %vm2634_vm3, %v3094_v46, 0 }
 0x906   : > { %8085 = vmatpush3.bf16.xpose.msra.mxu0 %v2754_v40  ;;  %8086 = vmatprep.mubr.msk.bf16.mxu0 %vm10153_vm0, %v10152_v0 }
 0x907   : > { %8096 = vmatprep.subr.bf16.mxu0 %v10152_v0 }
 0x908   : > { %v2975_v47 = vpop.permute.xlu1 %2974  ;;  %v3204_v53 = vpop.permute.xlu0 %3203 }
 0x90c   : > { %v3206_v50 = vpop.permute.xlu1 %3205  ;;  %v3434_v55 = vpop.permute.xlu0 %3433 }
 0x90d   : > { %8087 = vmatmul.mubr.msk.bf16.vlgmr.msra.gmra.mrb[4].mxu0 %vm2634_vm3, %v2747_v39  ;;  %v3211_v51 = vsel %vm2634_vm3, %v3206_v50, 0  ;;  %v3439_v56 = vsel %vm2634_vm3, %v3434_v55, 0 }
 0x90e   : > { %8097 = vmatpush3.bf16.xpose.msra.mxu0 %v2870_v42  ;;  %8098 = vmatprep.mubr.msk.bf16.mxu0 %vm10153_vm0, %v10152_v0  ;;  %v7749_v42 = vld [vmem:[%s12193_s16 + $0x10] sm:$0xf] }
 0x90f   : > { %8108 = vmatprep.subr.bf16.mxu0 %v10152_v0 }
 0x910   : > { %v3322_v52 = vpop.permute.xlu1 %3321 }
 0x911   : > { %v3327_v54 = vsel %vm2634_vm3, %v3322_v52, 0  ;;  %v7755_v52 = vld [vmem:[%s12193_s16 + $0x18] sm:$0xf] }
 0x914   : > { %v3432_v57 = vpop.permute.xlu1 %3431 }
 0x915   : > { %8099 = vmatmul.mubr.msk.bf16.vlgmr.msra.gmra.mrb[8].mxu0 %vm2634_vm3, %v11010_v33 }
 0x916   : > { %8109 = vmatpush3.bf16.xpose.msra.mxu0 %v2982_v45  ;;  %8110 = vmatprep.mubr.msk.bf16.mxu0 %vm10153_vm0, %v10152_v0 }
 0x917   : > { %8120 = vmatprep.subr.bf16.mxu0 %v10152_v0 }
 0x91d   : > { %8111 = vmatmul.mubr.msk.bf16.vlgmr.msra.gmra.mrb[12].mxu0 %vm2634_vm3, %v2975_v47 }
 0x91e   : > { %8121 = vmatpush3.bf16.xpose.msra.mxu0 %v3099_v49  ;;  %8122 = vmatprep.mubr.msk.bf16.mxu0 %vm10153_vm0, %v10152_v0 }
 0x91f   : > { %8132 = vmatprep.subr.bf16.mxu0 %v10152_v0 }
 0x925   : > { %8123 = vmatmul.mubr.msk.bf16.vlgmr.msra.gmra.mrb[16].mxu0 %vm2634_vm3, %v11016_v34 }
 0x926   : > { %8133 = vmatpush3.bf16.xpose.msra.mxu0 %v3211_v51  ;;  %8134 = vmatprep.mubr.msk.bf16.mxu0 %vm10153_vm0, %v10152_v0 }
 0x927   : > { %8144 = vmatprep.subr.bf16.mxu0 %v10152_v0 }
 0x92d   : > { %8135 = vmatmul.mubr.msk.bf16.vlgmr.msra.gmra.mrb[20].mxu0 %vm2634_vm3, %v3204_v53 }
 0x92e   : > { %8145 = vmatpush3.bf16.xpose.msra.mxu0 %v3327_v54  ;;  %8146 = vmatprep.mubr.msk.bf16.mxu0 %vm10153_vm0, %v10152_v0 }
 0x92f   : > { %8156 = vmatprep.subr.bf16.mxu0 %v10152_v0 }
 0x935   : > { %8147 = vmatmul.mubr.msk.bf16.vlgmr.msra.gmra.mrb[24].mxu0 %vm2634_vm3, %v11027_v35 }
 0x936   : > { %8157 = vmatpush3.bf16.xpose.msra.mxu0 %v3439_v56  ;;  %8158 = vmatprep.mubr.msk.bf16.mxu0 %vm10153_vm0, %v10152_v0 }
 0x937   : > { %8168 = vmatprep.subr.bf16.mxu0 %v10152_v0 }
 0x93d   : > { %8159 = vmatmul.mubr.msk.bf16.vlgmr.msra.gmra.mrb[28].mxu0 %vm2634_vm3, %v3432_v57 }
 0x93e   : > { %8170 = vmatprep.mubr.msk.bf16.mxu0 %vm10153_vm0, %v10152_v0 }
 0x9d8   : > { %v2675_v59 = vpop.f32.mrb[0].mxu0 }
 0x9d9   : > { %v11084_v60 = vadd.f32 %v2675_v59, %v2630_v58  ;;  %v8076_v61 = vpop.f32.mrb[1].mxu0  ;;  %v11116_v59 = vpop.permute.xlu1 %2808 }
 0x9da   : > { %v2678_v62 = vpop.f32.mrb[2].mxu0 }
 0x9db   : > { %v8077_v63 = vpop.f32.mrb[3].mxu0  ;;  %v2682_v1 = vsel %vm2681_vm4, %v11084_v60, -inf }
 0x9dc   : > { %2683 = vmax.xlane.f32.xlu0 %v2682_v1 }
 0x9e0   : > { %v2790_v3 = vpop.f32.mrb[4].mxu0 }
 0x9e1   : > { %v11089_v4 = vadd.f32 %v7740_v2, %v2790_v3  ;;  %v8088_v5 = vpop.f32.mrb[5].mxu0 }
 0x9e2   : > { %v2793_v6 = vpop.f32.mrb[6].mxu0 }
 0x9e3   : > { %v8089_v7 = vpop.f32.mrb[7].mxu0  ;;  %v2796_v8 = vsel %vm2681_vm4, %v11089_v4, -inf }
 0x9e4   : > { %2797 = vmax.xlane.f32.xlu1 %v2796_v8 }
 0x9e8   : > { %v2906_v9 = vpop.f32.mrb[8].mxu0 }
 0x9e9   : > { %v8100_v10 = vpop.f32.mrb[9].mxu0 }
 0x9ea   : > { %v2909_v11 = vpop.f32.mrb[10].mxu0 }
 0x9eb   : > { %v8101_v12 = vpop.f32.mrb[11].mxu0 }
 0x9f0   : > { %v3018_v13 = vpop.f32.mrb[12].mxu0 }
 0x9f1   : > { %v8112_v14 = vpop.f32.mrb[13].mxu0  ;;  %v3019_v39 = vadd.f32 %v7746_v37, %v3018_v13 }
 0x9f2   : > { %v3021_v15 = vpop.f32.mrb[14].mxu0  ;;  %2694 = vrot.lane.b32.xlu0 %v11003_v29, %s12015_s1  ;;  %v7743_v29 = vld [vmem:[%s12193_s16 + $0x8] sm:$0xf] }
 0x9f3   : > { %v8113_v16 = vpop.f32.mrb[15].mxu0  ;;  %v2907_v36 = vadd.f32 %v7743_v29, %v2906_v9  ;;  %v3024_v51 = vsel %vm2681_vm4, %v3019_v39, -inf }
 0x9f5   : > { %v2912_v41 = vsel %vm2681_vm4, %v2907_v36, -inf }
 0x9f8   : > { %v3135_v17 = vpop.f32.mrb[16].mxu0 }
 0x9f9   : > { %v8124_v18 = vpop.f32.mrb[17].mxu0  ;;  %v3136_v50 = vadd.f32 %v7749_v42, %v3135_v17 }
 0x9fa   : > { %v3138_v19 = vpop.f32.mrb[18].mxu0 }
 0x9fb   : > { %v8125_v20 = vpop.f32.mrb[19].mxu0  ;;  %v3141_v54 = vsel %vm2681_vm4, %v3136_v50, -inf }
 0xa00   : > { %v3247_v22 = vpop.f32.mrb[20].mxu0 }
 0xa01   : > { %v11096_v23 = vadd.f32 %v7752_v21, %v3247_v22  ;;  %v8136_v24 = vpop.f32.mrb[21].mxu0 }
 0xa02   : > { %v3250_v25 = vpop.f32.mrb[22].mxu0 }
 0xa03   : > { %v8137_v26 = vpop.f32.mrb[23].mxu0  ;;  %v3253_v27 = vsel %vm2681_vm4, %v11096_v23, -inf }
 0xa04   : > { %3254 = vmax.xlane.f32.xlu1 %v3253_v27 }
 0xa08   : > { %v3363_v28 = vpop.f32.mrb[24].mxu0 }
 0xa09   : > { %v8148_v30 = vpop.f32.mrb[25].mxu0  ;;  %v3364_v53 = vadd.f32 %v7755_v52, %v3363_v28 }
 0xa0a   : > { %v3366_v31 = vpop.f32.mrb[26].mxu0 }
 0xa0b   : > { %v8149_v32 = vpop.f32.mrb[27].mxu0  ;;  %v3369_v55 = vsel %vm2681_vm4, %v3364_v53, -inf }
 0xa10   : > { %v3475_v40 = vpop.f32.mrb[28].mxu0 }
 0xa11   : > { %v11105_v43 = vadd.f32 %v7758_v38, %v3475_v40  ;;  %2913 = vmax.xlane.f32.xlu0 %v2912_v41  ;;  %v8160_v45 = vpop.f32.mrb[29].mxu0 }
 0xa12   : > { %v3478_v46 = vpop.f32.mrb[30].mxu0 }
 0xa13   : > { %v8161_v47 = vpop.f32.mrb[31].mxu0  ;;  %v3481_v49 = vsel %vm2681_vm4, %v11105_v43, -inf }
 0xa14   : > { %3482 = vmax.xlane.f32.xlu1 %v3481_v49 }
 0xa15   : > { %3025 = vmax.xlane.f32.xlu0 %v3024_v51 }
 0xa19   : > { %3142 = vmax.xlane.f32.xlu0 %v3141_v54 }
 0xa1d   : > { %3370 = vmax.xlane.f32.xlu0 %v3369_v55 }
 0xa33   : > { %2924 = vrot.lane.b32.xlu0 %v11010_v33, %s12015_s1 }
 0xa69   : > { %v2684_v56 = vpop.xlane.xlu0 %2683 }
 0xa6a   : > { %v2685_v57 = vsub.f32 %v11084_v60, %v2684_v56 }
 0xa6c   : > { %v2686_v58 = vmul.f32 1.442695, %v2685_v57 }
 0xa6d   : > { %v2695_v61 = vpop.permute.xlu0 %2694 }
 0xa6e   : > { %8999 = vpow2.f32 %v2686_v58  ;;  %v2702_v62 = vsel %vm2700_vm5, %v2695_v61, 0 }
 0xa6f   : > { %8079 = vmatpush3.bf16.msra.mxu1 %v2702_v62 }
 0xa70   : > { %8090 = vmatprep.subr.bf16.mxu1 %v10152_v0 }
 0xa71   : > { %v2798_v63 = vpop.xlane.xlu1 %2797 }
 0xa72   : > { %v2799_v1 = vsub.f32 %v11089_v4, %v2798_v63 }
 0xa74   : > { %v2800_v2 = vmul.f32 1.442695, %v2799_v1 }
 0xa76   : > { %9001 = vpow2.f32 %v2800_v2 }
 0xa78   : > { %v9000_v3 = vpop.eup %8999 }
 0xa79   : > { %v2688_v5 = vsel %vm2681_vm4, %v9000_v3, 0.0 }
 0xa7a   : > { %2689 = vadd.xlane.f32.xlu0 %v2688_v5 }
 0xa80   : > { %v11122_v60 = vpop.eup %9001 }
 0xa81   : > { %v2802_v6 = vsel %vm2681_vm4, %v11122_v60, 0.0 }
 0xa82   : > { %2803 = vadd.xlane.f32.xlu1 %v2802_v6 }
 0xa91   : > { %v3255_v12 = vpop.xlane.xlu1 %3254 }
 0xa92   : > { %v3256_v15 = vsub.f32 %v11096_v23, %v3255_v12 }
 0xa93   : > { %3153 = vrot.lane.b32.xlu1 %v11016_v34, %s12015_s1 }
 0xa94   : > { %v3257_v18 = vmul.f32 1.442695, %v3256_v15 }
 0xa9e   : > { %v2914_v7 = vpop.xlane.xlu0 %2913 }
 0xa9f   : > { %v2915_v8 = vsub.f32 %v2907_v36, %v2914_v7 }
 0xaa1   : > { %v2916_v9 = vmul.f32 1.442695, %v2915_v8  ;;  %v3483_v29 = vpop.xlane.xlu1 %3482 }
 0xaa2   : > { %v3026_v10 = vpop.xlane.xlu0 %3025  ;;  %v3484_v30 = vsub.f32 %v11105_v43, %v3483_v29  ;;  %v2814_v43 = vsel %vm2700_vm5, %v11116_v59, 0 }
 0xaa3   : > { %9003 = vpow2.f32 %v2916_v9  ;;  %v3027_v4 = vsub.f32 %v3019_v39, %v3026_v10 }
 0xaa4   : > { %v3485_v32 = vmul.f32 1.442695, %v3484_v30 }
 0xaa5   : > { %v3028_v11 = vmul.f32 1.442695, %v3027_v4 }
 0xaa6   : > { %v3143_v13 = vpop.xlane.xlu0 %3142 }
 0xaa7   : > { %v3144_v14 = vsub.f32 %v3136_v50, %v3143_v13  ;;  %9005 = vpow2.f32 %v3028_v11 }
 0xaa9   : > { %v3145_v16 = vmul.f32 1.442695, %v3144_v14 }
 0xaaa   : > { %v3371_v26 = vpop.xlane.xlu0 %3370 }
 0xaab   : > { %9007 = vpow2.f32 %v3145_v16  ;;  %v3372_v27 = vsub.f32 %v3364_v53, %v3371_v26 }
 0xaac   : > { %9009 = vpow2.f32 %v3257_v18 }
 0xaad   : > { %v9004_v17 = vpop.eup %9003  ;;  %v3373_v28 = vmul.f32 1.442695, %v3372_v27 }
 0xaae   : > { %v2918_v19 = vsel %vm2681_vm4, %v9004_v17, 0.0 }
 0xaaf   : > { %2919 = vadd.xlane.f32.xlu0 %v2918_v19  ;;  %9011 = vpow2.f32 %v3373_v28 }
 0xab0   : > { %9013 = vpow2.f32 %v3485_v32 }
 0xab1   : > { %v11130_v20 = vpop.eup %9005 }
 0xab2   : > { %v3030_v21 = vsel %vm2681_vm4, %v11130_v20, 0.0 }
 0xab5   : > { %v11134_v22 = vpop.eup %9007 }
 0xab6   : > { %v3147_v23 = vsel %vm2681_vm4, %v11134_v22, 0.0  ;;  %v11138_v24 = vpop.eup %9009 }
 0xab7   : > { %3031 = vadd.xlane.f32.xlu1 %v3030_v21  ;;  %v3259_v25 = vsel %vm2681_vm4, %v11138_v24, 0.0 }
 0xab9   : > { %v11147_v31 = vpop.eup %9011 }
 0xaba   : > { %v3375_v36 = vsel %vm2681_vm4, %v11147_v31, 0.0  ;;  %v11151_v37 = vpop.eup %9013 }
 0xabb   : > { %3148 = vadd.xlane.f32.xlu1 %v3147_v23 }
 0xabf   : > { %3260 = vadd.xlane.f32.xlu1 %v3259_v25 }
 0xac5   : > { %3036 = vrot.lane.b32.xlu0 %v11010_v33, %s12017_s2  ;;  %v3487_v33 = vsel %vm2681_vm4, %v11151_v37, 0.0 }
 0xad0   : > { %3265 = vrot.lane.b32.xlu1 %v11016_v34, %s12017_s2  ;;  %v2925_v34 = vpop.permute.xlu0 %2924 }
 0xad1   : > { %v2930_v47 = vsel %vm2700_vm5, %v2925_v34, 0 }
 0xae4   : > { %3376 = vadd.xlane.f32.xlu0 %v3375_v36 }
 0xaf4   : > { %3488 = vadd.xlane.f32.xlu1 %v3487_v33 }
 0xafa   : > { %3381 = vrot.lane.b32.xlu0 %v11027_v35, %s12015_s1  ;;  %s12197_s1 = sld [smem:[#allocation68_spill]] }
 0xb05   : > { %3493 = vrot.lane.b32.xlu1 %v11027_v35, %s12017_s2  ;;  %s12199_s2 = sld [smem:[#allocation73_spill]] }
 0xb07   : > { %v2690_v38 = vpop.xlane.xlu0 %2689 }
 0xb08   : > { %9015 = vrcp.f32 %v2690_v38 }
 0xb0f   : > { %v2804_v39 = vpop.xlane.xlu1 %2803 }
 0xb10   : > { %9017 = vrcp.f32 %v2804_v39 }
 0xb12   : > { %v9016_v40 = vpop.eup %9015 }
 0xb13   : > { %v2692_v41 = vmul.f32 %v9016_v40, %v9000_v3  ;;  %v3154_v50 = vpop.permute.xlu1 %3153 }
 0xb14   : > { %v3159_v1 = vsel %vm2700_vm5, %v3154_v50, 0 }
 0xb15   : > { %v2693_v42 = vpack.c.bf16 %v2692_v41, %v2692_v41 }
 0xb17   : > { %8081 = vmatmul.mubr.msk.bf16.vlgmr.msra.gmra.mrb[12].mxu1 %vm2696_vm6, %v2693_v42 }
 0xb18   : > { %8091 = vmatpush3.bf16.msra.mxu1 %v2814_v43  ;;  %8092 = vmatprep.mubr.msk.bf16.mxu1 %vm10153_vm0, %v10152_v0 }
 0xb19   : > { %8102 = vmatprep.subr.bf16.mxu1 %v10152_v0 }
 0xb1a   : > { %v9018_v35 = vpop.eup %9017 }
 0xb1b   : > { %v2806_v45 = vmul.f32 %v9018_v35, %v11122_v60 }
 0xb1d   : > { %v2807_v46 = vpack.c.bf16 %v2806_v45, %v2806_v45 }
 0xb1f   : > { %8093 = vmatmul.mubr.msk.bf16.vlgmr.msra.gmra.mrb[16].mxu1 %vm2696_vm6, %v2807_v46 }
 0xb20   : > { %8103 = vmatpush3.bf16.msra.mxu1 %v2930_v47  ;;  %8104 = vmatprep.mubr.msk.bf16.mxu1 %vm10153_vm0, %v10152_v0 }
 0xb21   : > { %8114 = vmatprep.subr.bf16.mxu1 %v10152_v0 }
 0xb3c   : > { %v2920_v49 = vpop.xlane.xlu0 %2919 }
 0xb3d   : > { %9019 = vrcp.f32 %v2920_v49 }
 0xb40   : > { %v3037_v55 = vpop.permute.xlu0 %3036 }
 0xb41   : > { %v3042_v57 = vsel %vm2700_vm5, %v3037_v55, 0 }
 0xb44   : > { %v3032_v51 = vpop.xlane.xlu1 %3031 }
 0xb45   : > { %9021 = vrcp.f32 %v3032_v51  ;;  %v3555_v51 = vld [vmem:[%s12194_s18] sm:$0xff] }
 0xb47   : > { %v9020_v52 = vpop.eup %9019 }
 0xb48   : > { %v3149_v53 = vpop.xlane.xlu1 %3148  ;;  %v2922_v54 = vmul.f32 %v9020_v52, %v9004_v17  ;;  %v3556_v52 = vld [vmem:[%s12194_s18 + $0x8] sm:$0xff] }
 0xb49   : > { %9023 = vrcp.f32 %v3149_v53  ;;  %v3558_v53 = vpack.c.bf16 %v3556_v52, %v3555_v51 }
 0xb4a   : > { %v2923_v56 = vpack.c.bf16 %v2922_v54, %v2922_v54 }
 0xb4b   : > { %8169 = vmatpush3.bf16.msra.mxu0 %v3558_v53 }
 0xb4c   : > { %8105 = vmatmul.mubr.msk.bf16.vlgmr.msra.gmra.mrb[20].mxu1 %vm2696_vm6, %v2923_v56  ;;  %v3261_v58 = vpop.xlane.xlu1 %3260  ;;  %8180 = vmatprep.subr.bf16.mxu0 %v10152_v0 }
 0xb4d   : > { %8115 = vmatpush3.bf16.msra.mxu1 %v3042_v57  ;;  %8116 = vmatprep.mubr.msk.bf16.mxu1 %vm10153_vm0, %v10152_v0  ;;  %9025 = vrcp.f32 %v3261_v58 }
 0xb4e   : > { %8126 = vmatprep.subr.bf16.mxu1 %v10152_v0 }
 0xb4f   : > { %v9022_v59 = vpop.eup %9021 }
 0xb50   : > { %v3034_v61 = vmul.f32 %v9022_v59, %v11130_v20  ;;  %v3266_v3 = vpop.permute.xlu1 %3265 }
 0xb51   : > { %v3271_v6 = vsel %vm2700_vm5, %v3266_v3, 0 }
 0xb52   : > { %v3035_v62 = vpack.c.bf16 %v3034_v61, %v3034_v61 }
 0xb53   : > { %v9024_v63 = vpop.eup %9023 }
 0xb54   : > { %8117 = vmatmul.mubr.msk.bf16.vlgmr.msra.gmra.mrb[24].mxu1 %vm2696_vm6, %v3035_v62  ;;  %v3151_v2 = vmul.f32 %v9024_v63, %v11134_v22 }
 0xb55   : > { %8127 = vmatpush3.bf16.msra.mxu1 %v3159_v1  ;;  %8128 = vmatprep.mubr.msk.bf16.mxu1 %vm10153_vm0, %v10152_v0 }
 0xb56   : > { %8138 = vmatprep.subr.bf16.mxu1 %v10152_v0  ;;  %v3152_v5 = vpack.c.bf16 %v3151_v2, %v3151_v2 }
 0xb57   : > { %v9026_v60 = vpop.eup %9025 }
 0xb58   : > { %v3263_v7 = vmul.f32 %v9026_v60, %v11138_v24 }
 0xb5a   : > { %v3264_v8 = vpack.c.bf16 %v3263_v7, %v3263_v7 }
 0xb5c   : > { %8129 = vmatmul.mubr.msk.bf16.vlgmr.msra.gmra.mrb[28].mxu1 %vm2696_vm6, %v3152_v5 }
 0xb5d   : > { %8139 = vmatpush3.bf16.msra.mxu1 %v3271_v6  ;;  %8140 = vmatprep.mubr.msk.bf16.mxu1 %vm10153_vm0, %v10152_v0 }
 0xb5e   : > { %8150 = vmatprep.subr.bf16.mxu1 %v10152_v0 }
 0xb64   : > { %8141 = vmatmul.mubr.msk.bf16.vlgmr.msra.gmra.mrb[32].mxu1 %vm2696_vm6, %v3264_v8 }
 0xb65   : > { %8152 = vmatprep.mubr.msk.bf16.mxu1 %vm10153_vm0, %v10152_v0 }
 0xb71   : > { %v3377_v9 = vpop.xlane.xlu0 %3376 }
 0xb72   : > { %9027 = vrcp.f32 %v3377_v9 }
 0xb75   : > { %v3382_v10 = vpop.permute.xlu0 %3381 }
 0xb76   : > { %v3387_v4 = vsel %vm2700_vm5, %v3382_v10, 0 }
 0xb77   : > { %8151 = vmatpush3.bf16.msra.mxu1 %v3387_v4 }
 0xb78   : > { %8162 = vmatprep.subr.bf16.mxu1 %v10152_v0 }
 0xb7c   : > { %v9028_v11 = vpop.eup %9027 }
 0xb7d   : > { %v3379_v12 = vmul.f32 %v9028_v11, %v11147_v31 }
 0xb7f   : > { %v3380_v13 = vpack.c.bf16 %v3379_v12, %v3379_v12 }
 0xb81   : > { %8153 = vmatmul.mubr.msk.bf16.vlgmr.msra.gmra.mrb[36].mxu1 %vm2696_vm6, %v3380_v13  ;;  %v3489_v14 = vpop.xlane.xlu1 %3488  ;;  %v3603_v13 = vld [vmem:[%s12195_s4] sm:$0xff] }
 0xb82   : > { %9029 = vrcp.f32 %v3489_v14  ;;  %8164 = vmatprep.mubr.msk.bf16.mxu1 %vm10153_vm0, %v10152_v0  ;;  %v3604_v14 = vld [vmem:[%s12195_s4 + $0x8] sm:$0xff]  ;;  %s12214_s4 = smov 96  }
 0xb85   : > { %v3494_v15 = vpop.permute.xlu1 %3493 }
 0xb86   : > { %v3499_v16 = vsel %vm2700_vm5, %v3494_v15, 0 }
 0xb87   : > { %8163 = vmatpush3.bf16.msra.mxu1 %v3499_v16 }
 0xb88   : > { %8174 = vmatprep.subr.bf16.mxu1 %v10152_v0 }
 0xb8c   : > { %v9030_v17 = vpop.eup %9029 }
 0xb8d   : > { %v3491_v18 = vmul.f32 %v9030_v17, %v11151_v37 }
 0xb8f   : > { %v3492_v19 = vpack.c.bf16 %v3491_v18, %v3491_v18  ;;  %v3605_v18 = vpack.c.bf16 %v3604_v14, %v3603_v13 }
 0xb91   : > { %8165 = vmatmul.mubr.msk.bf16.vlgmr.msra.gmra.mrb[40].mxu1 %vm2696_vm6, %v3492_v19 }
 0xb92   : > { %8176 = vmatprep.mubr.msk.bf16.mxu1 %vm10153_vm0, %v10152_v0 }
 0xbea   : > { %v2738_v20 = vpop.f32.mrb[12].mxu1 }
 0xbeb   : > { %v8082_v21 = vpop.f32.mrb[13].mxu1 }
 0xbec   : > { %v2741_v22 = vpop.f32.mrb[14].mxu1 }
 0xbed   : > { %v8083_v23 = vpop.f32.mrb[15].mxu1 }
 0xbf2   : > { %v2850_v24 = vpop.f32.mrb[16].mxu1 }
 0xbf3   : > { %v8094_v25 = vpop.f32.mrb[17].mxu1 }
 0xbf4   : > { %v2853_v26 = vpop.f32.mrb[18].mxu1 }
 0xbf5   : > { %v8095_v27 = vpop.f32.mrb[19].mxu1 }
 0xc1f   : > { %v2966_v28 = vpop.f32.mrb[20].mxu1 }
 0xc20   : > { %v8106_v29 = vpop.f32.mrb[21].mxu1 }
 0xc21   : > { %v2969_v30 = vpop.f32.mrb[22].mxu1 }
 0xc22   : > { %v8107_v31 = vpop.f32.mrb[23].mxu1 }
 0xc27   : > { %v3078_v32 = vpop.f32.mrb[24].mxu1 }
 0xc28   : > { %v8118_v36 = vpop.f32.mrb[25].mxu1 }
 0xc29   : > { %v3081_v37 = vpop.f32.mrb[26].mxu1 }
 0xc2a   : > { %v8119_v33 = vpop.f32.mrb[27].mxu1 }
 0xc2f   : > { %v3195_v34 = vpop.f32.mrb[28].mxu1 }
 0xc30   : > { %v8130_v38 = vpop.f32.mrb[29].mxu1 }
 0xc31   : > { %v3198_v39 = vpop.f32.mrb[30].mxu1 }
 0xc32   : > { %v8131_v40 = vpop.f32.mrb[31].mxu1  ;;  %v3706_v39 = vld [vmem:[%s12197_s1] sm:$0xff] }
 0xc33   : > { %v3707_v40 = vld [vmem:[%s12197_s1 + $0x8] sm:$0xff]  ;;  %s12211_s1 = smov 120  }
 0xc37   : > { %v3307_v41 = vpop.f32.mrb[32].mxu1 }
 0xc38   : > { %v8976_v42 = vpack.i.bf16 %v3307_v41, %v2850_v24  ;;  %v8142_v43 = vpop.f32.mrb[33].mxu1  ;;  %v3709_v41 = vpack.c.bf16 %v3707_v40, %v3706_v39 }
 0xc39   : > { %v3310_v35 = vpop.f32.mrb[34].mxu1 }
 0xc3a   : > { %8977 = vrot.lane.b32.xlu1 %v8976_v42, %s12013_s7  ;;  %v8143_v45 = vpop.f32.mrb[35].mxu1 }
 0xc54   : > { %v3423_v46 = vpop.f32.mrb[36].mxu1 }
 0xc55   : > { %v8154_v47 = vpop.f32.mrb[37].mxu1 }
 0xc56   : > { %v3426_v49 = vpop.f32.mrb[38].mxu1 }
 0xc57   : > { %v8155_v50 = vpop.f32.mrb[39].mxu1 }
 0xc64   : > { %v3535_v54 = vpop.f32.mrb[40].mxu1 }
 0xc65   : > { %v8971_v55 = vpack.i.bf16 %v3535_v54, %v3078_v32  ;;  %v8166_v56 = vpop.f32.mrb[41].mxu1 }
 0xc66   : > { %v3538_v57 = vpop.f32.mrb[42].mxu1 }
 0xc67   : > { %8972 = vrot.lane.b32.xlu0 %v8971_v55, %s12013_s7  ;;  %v8167_v58 = vpop.f32.mrb[43].mxu1  ;;  %s12196_s7 = sld [smem:[#allocation77_spill]]  ;;  %v7765_v55 = vld [vmem:[%s12199_s2] ss:$0 sm:$0xff]  ;;  %s12202_s2 = sld [smem:[#allocation67_spill]] }
 0xcac   : > { %v8978_v59 = vpop.permute.xlu1 %8977 }
 0xcad   : > { %v8980_v62 = vunpack.i.h.bf16 %v8978_v59  ;;  %v8979_v63 = vunpack.i.l.bf16 %v8978_v59 }
 0xcaf   : > { %v3317_v7 = vsel %vm2634_vm3, %v3195_v34, %v8980_v62  ;;  %v2860_v8 = vsel %vm2634_vm3, %v2738_v20, %v8979_v63  ;;  %v7763_v20 = vld [vmem:[%s12196_s7] ss:$0 sm:$0xff]  ;;  %s12198_s7 = sld [smem:[#allocation74_spill]]  ;;  %v3816_v62 = vld [vmem:[%s12201_s6 + $0x8] sm:$0xff] }
 0xcb5   : > { %v7764_v51 = vld [vmem:[%s12198_s7] ss:$0 sm:$0xff]  ;;  %s12204_s7 = sld [smem:[#allocation94_spill]] }
 0xcd9   : > { %v8973_v61 = vpop.permute.xlu0 %8972 }
 0xcda   : > { %v8975_v1 = vunpack.i.h.bf16 %v8973_v61  ;;  %v8974_v2 = vunpack.i.l.bf16 %v8973_v61  ;;  %v3815_v61 = vld [vmem:[%s12200_s10] sm:$0xff]  ;;  %s12203_s10 = sld [smem:[#allocation69_spill]] }
 0xcdb   : > { %v3824_v63 = vpack.c.bf16 %v3816_v62, %v3815_v61 }
 0xcdc   : > { %v3545_v3 = vsel %vm2634_vm3, %v3423_v46, %v8975_v1  ;;  %v3088_v5 = vsel %vm2634_vm3, %v2966_v28, %v8974_v2  ;;  %v3817_v1 = vld [vmem:[%s12201_s6 + $0x10] sm:$0xff]  ;;  %v3818_v2 = vld [vmem:[%s12201_s6 + $0x18] sm:$0xff] }
 0xcdd   : > { %v3550_v60 = vrot.slane %v3545_v3, 4  ;;  %v3547_v6 = vrot.slane %v3088_v5, 4  ;;  %v3825_v3 = vpack.c.bf16 %v3818_v2, %v3817_v1  ;;  %v3819_v5 = vld [vmem:[%s12201_s6 + $0x20] sm:$0xff] }
 0xcdf   : > { %v3554_v9 = vsel %vm3552_vm7, %v3317_v7, %v3550_v60  ;;  %v3553_v10 = vsel %vm3552_vm7, %v2860_v8, %v3547_v6  ;;  %v3820_v60 = vld [vmem:[%s12201_s6 + $0x28] sm:$0xff]  ;;  %v3821_v7 = vld [vmem:[%s12201_s6 + $0x30] sm:$0xff]  ;;  %v3822_v8 = vld [vmem:[%s12201_s6 + $0x38] sm:$0xff]  ;;  %s12217_s6 = sld [smem:[#allocation90_spill]] }
 0xce0   : > { %v3557_v4 = vpack.c.bf16 %v3554_v9, %v3553_v10  ;;  %v3826_v6 = vpack.c.bf16 %v3820_v60, %v3819_v5  ;;  %v3827_v9 = vpack.c.bf16 %v3822_v8, %v3821_v7  ;;  %v7766_v10 = vld [vmem:[%s12202_s2] ss:$0 sm:$0xff]  ;;  %s12205_s2 = smov %s12204_s7 }
 0xce2   : > { %8171 = vmatmul.mubr.msk.bf16.vlgmr.msra.gmra.mrb[32].mxu0 %vm2438_vm2, %v3557_v4 }
 0xce3   : > { %8182 = vmatprep.mubr.msk.bf16.mxu0 %vm10153_vm0, %v10152_v0  ;;  %8181 = vmatpush3.bf16.msra.mxu0 %v3709_v41 }
 0xce4   : > { %8198 = vmatprep.subr.bf16.mxu0 %v10152_v0 }
 0xdb5   : > { %v3596_v11 = vpop.f32.mrb[32].mxu0 }
 0xdb6   : > { %v8172_v12 = vpop.f32.mrb[33].mxu0 }
 0xdb7   : > { %v3599_v15 = vpop.f32.mrb[34].mxu0 }
 0xdb8   : > { %v3606_v16 = vpack.c.bf16 %v3599_v15, %v3596_v11  ;;  %v8173_v17 = vpop.f32.mrb[35].mxu0 }
 0xdba   : > { %8175 = vmatpush3.bf16.msra.mxu1 %v3606_v16 }
 0xdbb   : > { %8186 = vmatprep.subr.bf16.mxu1 %v10152_v0 }
 0xdbd   : > { %8177 = vmatmul.mubr.msk.bf16.vlgmr.msra.gmra.mrb[44].mxu1 %vm2438_vm2, %v3605_v18 }
 0xdbe   : > { %8194 = vmatprep.mubr.msk.bf16.mxu1 %vm10153_vm0, %v10152_v0  ;;  %8187 = vmatpush3.bf16.msra.mxu1 %v3824_v63 }
 0xdbf   : > { %8188 = vmatprep.subr.bf16.mxu1 %v10152_v0 }
 0xdc2   : > { %8189 = vmatpush3.bf16.msra.mxu1 %v3825_v3 }
 0xdc3   : > { %8190 = vmatprep.subr.bf16.mxu1 %v10152_v0 }
 0xdc6   : > { %8191 = vmatpush3.bf16.msra.mxu1 %v3826_v6 }
 0xdc7   : > { %8192 = vmatprep.subr.bf16.mxu1 %v10152_v0 }
 0xdca   : > { %8193 = vmatpush3.bf16.msra.mxu1 %v3827_v9  ;;  %v7769_v9 = vld [vmem:[%s12203_s10] ss:$0 sm:$0xff]  ;;  %s12206_s10 = sld [smem:[#allocation86_spill]] }
 0xdcb   : > { %8210 = vmatprep.subr.bf16.mxu1 %v10152_v0 }
 0xe90   : > { %v3644_v19 = vpop.f32.mrb[44].mxu1 }
 0xe91   : > { %v3651_v21 = vadd.f32 %v3644_v19, %v10976_v44  ;;  %v8178_v22 = vpop.f32.mrb[45].mxu1 }
 0xe92   : > { %v3647_v23 = vpop.f32.mrb[46].mxu1 }
 0xe93   : > { %v11226_v24 = vadd.f32 %v7763_v20, %v3651_v21  ;;  %v3652_v25 = vadd.f32 %v3647_v23, %v10980_v48  ;;  %v8179_v26 = vpop.f32.mrb[47].mxu1 }
 0xe95   : > { %v11229_v27 = vadd.f32 %v7763_v20, %v3652_v25  ;;  %v3664_v28 = vsel %vm2438_vm2, %v11226_v24, 0.0 }
 0xe96   : > { %3665 = vadd.xlane.f32.xlu0 %v3664_v28 }
 0xe97   : > { %v3667_v29 = vsel %vm2438_vm2, %v11229_v27, 0.0 }
 0xe98   : > { %3668 = vadd.xlane.f32.xlu1 %v3667_v29 }
 0xf23   : > { %v3666_v44 = vpop.xlane.xlu0 %3665 }
 0xf24   : > { %v3670_v30 = vmul.f32 0.0625, %v3666_v44 }
 0xf25   : > { %v3669_v31 = vpop.xlane.xlu1 %3668 }
 0xf26   : > { %v3672_v32 = vsub.f32 %v11226_v24, %v3670_v30  ;;  %v3671_v36 = vmul.f32 0.0625, %v3669_v31 }
 0xf28   : > { %v3673_v48 = vsub.f32 %v11229_v27, %v3671_v36  ;;  %v3674_v37 = vmul.f32 %v3672_v32, %v3672_v32 }
 0xf2a   : > { %v3676_v33 = vsel %vm2438_vm2, %v3674_v37, 0.0  ;;  %v3675_v34 = vmul.f32 %v3673_v48, %v3673_v48 }
 0xf2b   : > { %3677 = vadd.xlane.f32.xlu0 %v3676_v33 }
 0xf2c   : > { %v3679_v38 = vsel %vm2438_vm2, %v3675_v34, 0.0 }
 0xf2f   : > { %3680 = vadd.xlane.f32.xlu0 %v3679_v38 }
 0xfb8   : > { %v3678_v42 = vpop.xlane.xlu0 %3677 }
 0xfb9   : > { %v3682_v43 = vmul.f32 0.0625, %v3678_v42 }
 0xfbb   : > { %v3684_v35 = vadd.f32 1e-05, %v3682_v43 }
 0xfbc   : > { %v3681_v45 = vpop.xlane.xlu0 %3680 }
 0xfbd   : > { %9031 = vrsqrt.f32 %v3684_v35  ;;  %v3683_v46 = vmul.f32 0.0625, %v3681_v45 }
 0xfbf   : > { %v3685_v47 = vadd.f32 1e-05, %v3683_v46 }
 0xfc1   : > { %9033 = vrsqrt.f32 %v3685_v47 }
 0xfc7   : > { %v9032_v49 = vpop.eup %9031 }
 0xfc8   : > { %v3688_v50 = vmul.f32 %v9032_v49, %v3672_v32 }
 0xfca   : > { %v3696_v53 = vmul.f32 %v7764_v51, %v3688_v50 }
 0xfcb   : > { %v9034_v52 = vpop.eup %9033 }
 0xfcc   : > { %v3689_v54 = vmul.f32 %v9034_v52, %v3673_v48  ;;  %v3704_v57 = vadd.f32 %v7765_v55, %v3696_v53 }
 0xfce   : > { %v3697_v56 = vmul.f32 %v7764_v51, %v3689_v54 }
 0xfd0   : > { %v3705_v58 = vadd.f32 %v7765_v55, %v3697_v56  ;;  %v10160_v56 = vmov -1.0  }
 0xfd2   : > { %v3708_v59 = vpack.c.bf16 %v3705_v58, %v3704_v57 }
 0xfd4   : > { %8183 = vmatmul.mubr.msk.bf16.vlgmr.msra.gmra.mrb[36].mxu0 %vm2438_vm2, %v3708_v59 }
 0xfd5   : > { %8200 = vmatprep.mubr.msk.bf16.mxu0 %vm10153_vm0, %v10152_v0 }
0x10a7   : > { %v3754_v4 = vpop.f32.mrb[36].mxu0 }
0x10a8   : > { %v3755_v11 = vadd.f32 %v7766_v10, %v3754_v4  ;;  %v8184_v12 = vpop.f32.mrb[37].mxu0 }
0x10a9   : > { %v3757_v13 = vpop.f32.mrb[38].mxu0 }
0x10aa   : > { %v3763_v14 = vmul.f32 0.70710677, %v3755_v11  ;;  %v3758_v15 = vadd.f32 %v7766_v10, %v3757_v13  ;;  %v8185_v16 = vpop.f32.mrb[39].mxu0  ;;  %v3761_v2 = vmul.f32 0.5, %v3755_v11 }
0x10ac   : > { %v3769_v17 = vand.u32 2147483647, %v3763_v14  ;;  %v3764_v18 = vmul.f32 0.70710677, %v3758_v15  ;;  %vm3765_vm8 = vcmp.ge.f32.partialorder %v3763_v14, 0.0  ;;  %v3762_v3 = vmul.f32 0.5, %v3758_v15 }
0x10ad   : > { %v3767_v57 = vsel %vm3765_vm8, 1.0, %v10160_v56 }
0x10ae   : > { %v3771_v19 = vmul.f32 0.3275911, %v3769_v17  ;;  %v3770_v20 = vand.u32 2147483647, %v3764_v18  ;;  %v3797_v25 = vsub.f32 0.0, %v3769_v17  ;;  %vm3766_vm9 = vcmp.ge.f32.partialorder %v3764_v18, 0.0 }
0x10af   : > { %v3768_v62 = vsel %vm3766_vm9, 1.0, %v10160_v56 }
0x10b0   : > { %v3773_v21 = vadd.f32 1.0, %v3771_v19  ;;  %v3772_v22 = vmul.f32 0.3275911, %v3770_v20  ;;  %v3798_v26 = vsub.f32 0.0, %v3770_v20  ;;  %v3799_v29 = vmul.f32 %v3797_v25, %v3769_v17 }
0x10b2   : > { %9035 = vrcp.f32 %v3773_v21  ;;  %v3774_v23 = vadd.f32 1.0, %v3772_v22  ;;  %v3800_v32 = vmul.f32 %v3798_v26, %v3770_v20  ;;  %v3801_v36 = vmul.f32 1.442695, %v3799_v29  ;;  %v3929_v29 = vld [vmem:[%s12205_s2 + $0x8] sm:$0xff]  ;;  %s12212_s2 = smov 88  }
0x10b4   : > { %9037 = vrcp.f32 %v3774_v23  ;;  %v3803_v38 = vmul.f32 1.442695, %v3800_v32 }
0x10b5   : > { %9039 = vpow2.f32 %v3801_v36 }
0x10b6   : > { %9041 = vpow2.f32 %v3803_v38 }
0x10bc   : > { %v9036_v28 = vpop.eup %9035 }
0x10bd   : > { %v3779_v44 = vmul.f32 1.0614054, %v9036_v28 }
0x10be   : > { %v9038_v30 = vpop.eup %9037 }
0x10bf   : > { %v3781_v31 = vadd.f32 -1.4531521, %v3779_v44  ;;  %v3780_v48 = vmul.f32 1.0614054, %v9038_v30  ;;  %v9040_v50 = vpop.eup %9039 }
0x10c0   : > { %v9042_v54 = vpop.eup %9041 }
0x10c1   : > { %v3783_v37 = vmul.f32 %v9036_v28, %v3781_v31  ;;  %v3782_v33 = vadd.f32 -1.4531521, %v3780_v48 }
0x10c3   : > { %v3785_v34 = vadd.f32 1.4214138, %v3783_v37  ;;  %v3784_v39 = vmul.f32 %v9038_v30, %v3782_v33 }
0x10c5   : > { %v3787_v40 = vmul.f32 %v9036_v28, %v3785_v34  ;;  %v3786_v41 = vadd.f32 1.4214138, %v3784_v39  ;;  %v7770_v34 = vld [vmem:[#allocation2] ss:$0 sm:$0xff] }
0x10c7   : > { %v3789_v42 = vadd.f32 -0.28449672, %v3787_v40  ;;  %v3788_v43 = vmul.f32 %v9038_v30, %v3786_v41 }
0x10c9   : > { %v3791_v35 = vmul.f32 %v9036_v28, %v3789_v42  ;;  %v3790_v45 = vadd.f32 -0.28449672, %v3788_v43  ;;  %v7771_v42 = vld [vmem:[%s12206_s10] ss:$0 sm:$0xff]  ;;  %s12209_s10 = smov 104  }
0x10cb   : > { %v3793_v46 = vadd.f32 0.2548296, %v3791_v35  ;;  %v3792_v47 = vmul.f32 %v9038_v30, %v3790_v45 }
0x10cd   : > { %v3795_v49 = vmul.f32 %v9036_v28, %v3793_v46  ;;  %v3794_v51 = vadd.f32 0.2548296, %v3792_v47  ;;  %v3928_v28 = vld [vmem:[%s12204_s7] sm:$0xff]  ;;  %s12207_s7 = sld [smem:[#allocation89_spill]]  ;;  %v7772_v47 = vld [vmem:[#allocation10] ss:$0 sm:$0xff] }
0x10ce   : > { %v3931_v44 = vpack.c.bf16 %v3929_v29, %v3928_v28 }
0x10cf   : > { %v3805_v52 = vmul.f32 %v9040_v50, %v3795_v49  ;;  %v3796_v53 = vmul.f32 %v9038_v30, %v3794_v51 }
0x10d0   : > { %8199 = vmatpush3.bf16.msra.mxu0 %v3931_v44 }
0x10d1   : > { %v3807_v55 = vsub.f32 1.0, %v3805_v52  ;;  %v3806_v58 = vmul.f32 %v9042_v54, %v3796_v53  ;;  %8204 = vmatprep.subr.bf16.mxu0 %v10152_v0 }
0x10d3   : > { %v3809_v59 = vmul.f32 %v3807_v55, %v3767_v57  ;;  %v3808_v61 = vsub.f32 1.0, %v3806_v58  ;;  %s12208_s19 = smov %s12207_s7  ;;  %v3983_v55 = vld [vmem:[%s12207_s7] sm:$0xff]  ;;  %s12210_s7 = smov 112  }
0x10d4   : > { %v3984_v57 = vld [vmem:[%s12208_s19 + $0x8] sm:$0xff] }
0x10d5   : > { %v3811_v63 = vadd.f32 1.0, %v3809_v59  ;;  %v3810_v1 = vmul.f32 %v3808_v61, %v3768_v62  ;;  %v3985_v59 = vpack.c.bf16 %v3984_v57, %v3983_v55 }
0x10d7   : > { %v3812_v5 = vadd.f32 1.0, %v3810_v1  ;;  %v3813_v60 = vmul.f32 %v3811_v63, %v3761_v2 }
0x10d9   : > { %v3814_v6 = vmul.f32 %v3812_v5, %v3762_v3 }
0x10db   : > { %v3823_v7 = vpack.c.bf16 %v3814_v6, %v3813_v60 }
0x10dd   : > { %8195 = vmatmul.mubr.msk.bf16.vlgmr.msra.gmra.mrb[48].mxu1 %vm3828_vm10, %v3823_v7 }
0x10de   : > { %8212 = vmatprep.mubr.msk.bf16.mxu1 %vm10153_vm0, %v10152_v0 }
0x11b0   : > { %v3866_v8 = vpop.f32.mrb[48].mxu1 }
0x11b1   : > { %v3873_v10 = vadd.f32 %v3866_v8, %v11226_v24  ;;  %v8196_v4 = vpop.f32.mrb[49].mxu1 }
0x11b2   : > { %v3869_v12 = vpop.f32.mrb[50].mxu1 }
0x11b3   : > { %v11267_v13 = vadd.f32 %v7769_v9, %v3873_v10  ;;  %v3874_v11 = vadd.f32 %v3869_v12, %v11229_v27  ;;  %v8197_v14 = vpop.f32.mrb[51].mxu1 }
0x11b5   : > { %v11270_v15 = vadd.f32 %v7769_v9, %v3874_v11  ;;  %v3886_v16 = vsel %vm2438_vm2, %v11267_v13, 0.0 }
0x11b6   : > { %3887 = vadd.xlane.f32.xlu0 %v3886_v16 }
0x11b7   : > { %v3889_v17 = vsel %vm2438_vm2, %v11270_v15, 0.0 }
0x11b8   : > { %3890 = vadd.xlane.f32.xlu1 %v3889_v17 }
0x1243   : > { %v3888_v24 = vpop.xlane.xlu0 %3887 }
0x1244   : > { %v3892_v18 = vmul.f32 0.0625, %v3888_v24 }
0x1245   : > { %v3891_v19 = vpop.xlane.xlu1 %3890 }
0x1246   : > { %v3894_v20 = vsub.f32 %v11267_v13, %v3892_v18  ;;  %v3893_v21 = vmul.f32 0.0625, %v3891_v19 }
0x1248   : > { %v3895_v27 = vsub.f32 %v11270_v15, %v3893_v21  ;;  %v3896_v22 = vmul.f32 %v3894_v20, %v3894_v20 }
0x124a   : > { %v3898_v23 = vsel %vm2438_vm2, %v3896_v22, 0.0  ;;  %v3897_v25 = vmul.f32 %v3895_v27, %v3895_v27 }
0x124b   : > { %3899 = vadd.xlane.f32.xlu0 %v3898_v23 }
0x124c   : > { %v3901_v26 = vsel %vm2438_vm2, %v3897_v25, 0.0 }
0x124d   : > { %3902 = vadd.xlane.f32.xlu1 %v3901_v26  ;;  %v4032_v26 = vld [vmem:[%s12213_s3] sm:$0xf] }
0x12d8   : > { %v3900_v30 = vpop.xlane.xlu0 %3899 }
0x12d9   : > { %v3904_v31 = vmul.f32 0.0625, %v3900_v30 }
0x12da   : > { %v3903_v32 = vpop.xlane.xlu1 %3902 }
0x12db   : > { %v3906_v36 = vadd.f32 1e-05, %v3904_v31  ;;  %v3905_v48 = vmul.f32 0.0625, %v3903_v32 }
0x12dd   : > { %9043 = vrsqrt.f32 %v3906_v36  ;;  %v3907_v37 = vadd.f32 1e-05, %v3905_v48  ;;  %v7777_v36 = vld [vmem:[%s12213_s3 + $0x4] sm:$0xf] }
0x12df   : > { %9045 = vrsqrt.f32 %v3907_v37 }
0x12e7   : > { %v9044_v33 = vpop.eup %9043 }
0x12e8   : > { %v3910_v38 = vmul.f32 %v9044_v33, %v3894_v20 }
0x12e9   : > { %v9046_v39 = vpop.eup %9045 }
0x12ea   : > { %v3918_v40 = vmul.f32 %v7770_v34, %v3910_v38  ;;  %v3911_v41 = vmul.f32 %v9046_v39, %v3895_v27 }
0x12ec   : > { %v3919_v43 = vmul.f32 %v7770_v34, %v3911_v41  ;;  %v3926_v35 = vadd.f32 %v7771_v42, %v3918_v40 }
0x12ee   : > { %v3927_v45 = vadd.f32 %v7771_v42, %v3919_v43 }
0x12f0   : > { %v3930_v46 = vpack.c.bf16 %v3927_v45, %v3926_v35 }
0x12f2   : > { %8201 = vmatmul.mubr.msk.bf16.vlgmr.msra.gmra.mrb[40].mxu0 %vm2438_vm2, %v3930_v46 }
0x12f3   : > { %8206 = vmatprep.mubr.msk.bf16.mxu0 %vm10153_vm0, %v10152_v0 }
0x13c5   : > { %v3976_v49 = vpop.f32.mrb[40].mxu0 }
0x13c6   : > { %v8202_v50 = vpop.f32.mrb[41].mxu0  ;;  %v3977_v52 = vadd.f32 %v7772_v47, %v3976_v49 }
0x13c7   : > { %v3979_v51 = vpop.f32.mrb[42].mxu0 }
0x13c8   : > { %v3980_v53 = vadd.f32 %v7772_v47, %v3979_v51  ;;  %v8203_v54 = vpop.f32.mrb[43].mxu0 }
0x13ca   : > { %v3986_v58 = vpack.c.bf16 %v3980_v53, %v3977_v52  ;;  %v7789_v53 = vld [vmem:[%s12213_s3 + $0x14] sm:$0xf] }
0x13cc   : > { %8205 = vmatpush3.bf16.msra.mxu0 %v3986_v58 }
0x13cd   : > { %8216 = vmatprep.subr.bf16.mxu0 %v10152_v0 }
0x13cf   : > { %8207 = vmatmul.mubr.msk.bf16.vlgmr.msra.gmra.mrb[44].mxu0 %vm2438_vm2, %v3985_v59 }
0x13d0   : > { %8218 = vmatprep.mubr.msk.bf16.mxu0 %vm10153_vm0, %v10152_v0 }
0x14a2   : > { %v4024_v61 = vpop.f32.mrb[44].mxu0 }
0x14a3   : > { %v11293_v62 = vpack.c.bf16 %v4024_v61, %v4024_v61  ;;  %v8208_v63 = vpop.f32.mrb[45].mxu0 }
0x14a4   : > { %v4027_v1 = vpop.f32.mrb[46].mxu0  ;;  %v7780_v63 = vld [vmem:[%s12213_s3 + $0x8] sm:$0xf] }
0x14a5   : > { %4146 = vrot.lane.b32.xlu1 %v11293_v62, %s12209_s10  ;;  %4034 = vrot.lane.b32.xlu0 %v11293_v62, %s12210_s7  ;;  %v8209_v2 = vpop.f32.mrb[47].mxu0  ;;  %v11300_v3 = vrot.slane %v11293_v62, 2  ;;  %v11306_v5 = vpack.c.bf16 %v4027_v1, %v4027_v1 }
0x14a7   : > { %v11317_v60 = vrot.slane %v11306_v5, 2 }
0x14a9   : > { %4144 = vrot.lane.b32.xlu1 %v11293_v62, %s12211_s1  ;;  %4374 = vrot.lane.b32.xlu0 %v11300_v3, %s12209_s10 }
0x14ad   : > { %4262 = vrot.lane.b32.xlu1 %v11300_v3, %s12210_s7  ;;  %4491 = vrot.lane.b32.xlu0 %v11306_v5, %s12210_s7 }
0x14b1   : > { %4372 = vrot.lane.b32.xlu1 %v11300_v3, %s12211_s1  ;;  %4601 = vrot.lane.b32.xlu0 %v11306_v5, %s12211_s1 }
0x14b5   : > { %4603 = vrot.lane.b32.xlu1 %v11306_v5, %s12209_s10  ;;  %4831 = vrot.lane.b32.xlu0 %v11317_v60, %s12209_s10 }
0x14b9   : > { %4719 = vrot.lane.b32.xlu1 %v11317_v60, %s12210_s7 }
0x14bd   : > { %4829 = vrot.lane.b32.xlu1 %v11317_v60, %s12211_s1 }
0x14c1   : > { %4206 = vrot.lane.b32.xlu1 %v11293_v62, %s12212_s2 }
0x1517   : > { %v4035_v6 = vpop.permute.xlu0 %4034  ;;  %v4147_v8 = vpop.permute.xlu1 %4146 }
0x1518   : > { %v4040_v7 = vsel %vm2634_vm3, %v4035_v6, 0  ;;  %v4152_v10 = vsel %vm2634_vm3, %v4147_v8, 0  ;;  %v7783_v8 = vld [vmem:[%s12213_s3 + $0xc] sm:$0xf] }
0x1519   : > { %8211 = vmatpush3.bf16.xpose.msra.mxu1 %v4040_v7 }
0x151a   : > { %8222 = vmatprep.subr.bf16.mxu1 %v10152_v0 }
0x151b   : > { %v4145_v9 = vpop.permute.xlu1 %4144  ;;  %v4375_v11 = vpop.permute.xlu0 %4374 }
0x151c   : > { %v4380_v14 = vsel %vm2634_vm3, %v4375_v11, 0  ;;  %v7786_v11 = vld [vmem:[%s12213_s3 + $0x10] sm:$0xf] }
0x151f   : > { %v4263_v4 = vpop.permute.xlu1 %4262  ;;  %v4492_v16 = vpop.permute.xlu0 %4491 }
0x1520   : > { %8213 = vmatmul.mubr.msk.bf16.vlgmr.msra.gmra.mrb[52].mxu1 %vm2634_vm3, %v11293_v62  ;;  %v4268_v12 = vsel %vm2634_vm3, %v4263_v4, 0  ;;  %v4497_v24 = vsel %vm2634_vm3, %v4492_v16, 0 }
0x1521   : > { %8223 = vmatpush3.bf16.xpose.msra.mxu1 %v4152_v10  ;;  %8224 = vmatprep.mubr.msk.bf16.mxu1 %vm10153_vm0, %v10152_v0 }
0x1522   : > { %8234 = vmatprep.subr.bf16.mxu1 %v10152_v0 }
0x1523   : > { %v4373_v17 = vpop.permute.xlu1 %4372  ;;  %v4602_v21 = vpop.permute.xlu0 %4601 }
0x1527   : > { %v4604_v18 = vpop.permute.xlu1 %4603  ;;  %v4832_v22 = vpop.permute.xlu0 %4831 }
0x1528   : > { %8225 = vmatmul.mubr.msk.bf16.vlgmr.msra.gmra.mrb[56].mxu1 %vm2634_vm3, %v4145_v9  ;;  %v4609_v19 = vsel %vm2634_vm3, %v4604_v18, 0  ;;  %v4837_v23 = vsel %vm2634_vm3, %v4832_v22, 0  ;;  %v7795_v9 = vld [vmem:[%s12213_s3 + $0x1c] sm:$0xf] }
0x1529   : > { %8235 = vmatpush3.bf16.xpose.msra.mxu1 %v4268_v12  ;;  %8236 = vmatprep.mubr.msk.bf16.mxu1 %vm10153_vm0, %v10152_v0 }
0x152a   : > { %8246 = vmatprep.subr.bf16.mxu1 %v10152_v0 }
0x152b   : > { %v4720_v20 = vpop.permute.xlu1 %4719 }
0x152c   : > { %v4725_v27 = vsel %vm2634_vm3, %v4720_v20, 0 }
0x152f   : > { %v4830_v25 = vpop.permute.xlu1 %4829 }
0x1530   : > { %8237 = vmatmul.mubr.msk.bf16.vlgmr.msra.gmra.mrb[60].mxu1 %vm2634_vm3, %v11300_v3 }
0x1531   : > { %8247 = vmatpush3.bf16.xpose.msra.mxu1 %v4380_v14  ;;  %8248 = vmatprep.mubr.msk.bf16.mxu1 %vm10153_vm0, %v10152_v0 }
0x1532   : > { %8258 = vmatprep.subr.bf16.mxu1 %v10152_v0 }
0x1538   : > { %8249 = vmatmul.mubr.msk.bf16.vlgmr.msra.gmra.mrb[64].mxu1 %vm2634_vm3, %v4373_v17 }
0x1539   : > { %8259 = vmatpush3.bf16.xpose.msra.mxu1 %v4497_v24  ;;  %8260 = vmatprep.mubr.msk.bf16.mxu1 %vm10153_vm0, %v10152_v0 }
0x153a   : > { %8270 = vmatprep.subr.bf16.mxu1 %v10152_v0 }
0x1540   : > { %8261 = vmatmul.mubr.msk.bf16.vlgmr.msra.gmra.mrb[68].mxu1 %vm2634_vm3, %v11306_v5 }
0x1541   : > { %8271 = vmatpush3.bf16.xpose.msra.mxu1 %v4609_v19  ;;  %8272 = vmatprep.mubr.msk.bf16.mxu1 %vm10153_vm0, %v10152_v0 }
0x1542   : > { %8282 = vmatprep.subr.bf16.mxu1 %v10152_v0 }
0x1548   : > { %8273 = vmatmul.mubr.msk.bf16.vlgmr.msra.gmra.mrb[72].mxu1 %vm2634_vm3, %v4602_v21  ;;  %v7792_v21 = vld [vmem:[%s12213_s3 + $0x18] sm:$0xf]  ;;  %s12215_s3 = sld [smem:[#allocation92_spill]] }
0x1549   : > { %8283 = vmatpush3.bf16.xpose.msra.mxu1 %v4725_v27  ;;  %8284 = vmatprep.mubr.msk.bf16.mxu1 %vm10153_vm0, %v10152_v0 }
0x154a   : > { %8294 = vmatprep.subr.bf16.mxu1 %v10152_v0 }
0x1550   : > { %8285 = vmatmul.mubr.msk.bf16.vlgmr.msra.gmra.mrb[76].mxu1 %vm2634_vm3, %v11317_v60 }
0x1551   : > { %8295 = vmatpush3.bf16.xpose.msra.mxu1 %v4837_v23  ;;  %8296 = vmatprep.mubr.msk.bf16.mxu1 %vm10153_vm0, %v10152_v0 }
0x1552   : > { %8306 = vmatprep.subr.bf16.mxu1 %v10152_v0 }
0x1558   : > { %8297 = vmatmul.mubr.msk.bf16.vlgmr.msra.gmra.mrb[80].mxu1 %vm2634_vm3, %v4830_v25 }
0x1559   : > { %8308 = vmatprep.mubr.msk.bf16.mxu1 %vm10153_vm0, %v10152_v0 }
0x15f3   : > { %v4076_v28 = vpop.f32.mrb[52].mxu1 }
0x15f4   : > { %v11374_v29 = vadd.f32 %v4076_v28, %v4032_v26  ;;  %v8214_v44 = vpop.f32.mrb[53].mxu1 }
0x15f5   : > { %v4079_v30 = vpop.f32.mrb[54].mxu1  ;;  %v11406_v44 = vpop.permute.xlu1 %4206 }
0x15f6   : > { %v8215_v31 = vpop.f32.mrb[55].mxu1  ;;  %v4082_v32 = vsel %vm2681_vm4, %v11374_v29, -inf }
0x15f7   : > { %4083 = vmax.xlane.f32.xlu0 %v4082_v32 }
0x15fb   : > { %v4188_v48 = vpop.f32.mrb[56].mxu1 }
0x15fc   : > { %v11379_v37 = vadd.f32 %v7777_v36, %v4188_v48  ;;  %v8226_v33 = vpop.f32.mrb[57].mxu1 }
0x15fd   : > { %v4191_v34 = vpop.f32.mrb[58].mxu1 }
0x15fe   : > { %v8227_v38 = vpop.f32.mrb[59].mxu1  ;;  %v4194_v39 = vsel %vm2681_vm4, %v11379_v37, -inf }
0x15ff   : > { %4195 = vmax.xlane.f32.xlu1 %v4194_v39 }
0x1603   : > { %v4304_v40 = vpop.f32.mrb[60].mxu1 }
0x1604   : > { %v8238_v41 = vpop.f32.mrb[61].mxu1  ;;  %v4305_v7 = vadd.f32 %v7780_v63, %v4304_v40 }
0x1605   : > { %v4307_v42 = vpop.f32.mrb[62].mxu1 }
0x1606   : > { %v8239_v43 = vpop.f32.mrb[63].mxu1  ;;  %v4310_v12 = vsel %vm2681_vm4, %v4305_v7, -inf }
0x160b   : > { %v4416_v35 = vpop.f32.mrb[64].mxu1 }
0x160c   : > { %v8250_v45 = vpop.f32.mrb[65].mxu1  ;;  %v4417_v10 = vadd.f32 %v7783_v8, %v4416_v35 }
0x160d   : > { %4094 = vrot.lane.b32.xlu0 %v11293_v62, %s12214_s4  ;;  %v4419_v46 = vpop.f32.mrb[66].mxu1 }
0x160e   : > { %v8251_v47 = vpop.f32.mrb[67].mxu1  ;;  %v4422_v20 = vsel %vm2681_vm4, %v4417_v10, -inf }
0x1613   : > { %v4533_v49 = vpop.f32.mrb[68].mxu1 }
0x1614   : > { %v8262_v50 = vpop.f32.mrb[69].mxu1  ;;  %v4534_v19 = vadd.f32 %v7786_v11, %v4533_v49 }
0x1615   : > { %v4536_v51 = vpop.f32.mrb[70].mxu1 }
0x1616   : > { %v8263_v52 = vpop.f32.mrb[71].mxu1  ;;  %v4539_v22 = vsel %vm2681_vm4, %v4534_v19, -inf }
0x161b   : > { %v4645_v54 = vpop.f32.mrb[72].mxu1 }
0x161c   : > { %v11386_v55 = vadd.f32 %v7789_v53, %v4645_v54  ;;  %v8274_v57 = vpop.f32.mrb[73].mxu1 }
0x161d   : > { %v4648_v58 = vpop.f32.mrb[74].mxu1 }
0x161e   : > { %v8275_v59 = vpop.f32.mrb[75].mxu1  ;;  %v4651_v61 = vsel %vm2681_vm4, %v11386_v55, -inf }
0x161f   : > { %4652 = vmax.xlane.f32.xlu1 %v4651_v61 }
0x1623   : > { %v4761_v62 = vpop.f32.mrb[76].mxu1 }
0x1624   : > { %v8286_v1 = vpop.f32.mrb[77].mxu1  ;;  %v4762_v27 = vadd.f32 %v7792_v21, %v4761_v62 }
0x1625   : > { %v4764_v2 = vpop.f32.mrb[78].mxu1 }
0x1626   : > { %v8287_v6 = vpop.f32.mrb[79].mxu1  ;;  %v4767_v23 = vsel %vm2681_vm4, %v4762_v27, -inf }
0x162b   : > { %v4873_v4 = vpop.f32.mrb[80].mxu1 }
0x162c   : > { %v11395_v14 = vadd.f32 %v7795_v9, %v4873_v4  ;;  %4311 = vmax.xlane.f32.xlu0 %v4310_v12  ;;  %v8298_v16 = vpop.f32.mrb[81].mxu1 }
0x162d   : > { %v4876_v17 = vpop.f32.mrb[82].mxu1  ;;  %v4212_v16 = vsel %vm2700_vm5, %v11406_v44, 0 }
0x162e   : > { %v8299_v24 = vpop.f32.mrb[83].mxu1  ;;  %v4879_v18 = vsel %vm2681_vm4, %v11395_v14, -inf }
0x162f   : > { %4880 = vmax.xlane.f32.xlu1 %v4879_v18 }
0x1630   : > { %4423 = vmax.xlane.f32.xlu0 %v4422_v20 }
0x1634   : > { %4540 = vmax.xlane.f32.xlu0 %v4539_v22 }
0x1638   : > { %4768 = vmax.xlane.f32.xlu0 %v4767_v23 }
0x164e   : > { %4322 = vrot.lane.b32.xlu0 %v11300_v3, %s12214_s4 }
0x1684   : > { %v4084_v25 = vpop.xlane.xlu0 %4083 }
0x1685   : > { %v4085_v26 = vsub.f32 %v11374_v29, %v4084_v25 }
0x1687   : > { %v4086_v28 = vmul.f32 1.442695, %v4085_v26 }
0x1688   : > { %v4095_v30 = vpop.permute.xlu0 %4094 }
0x1689   : > { %9047 = vpow2.f32 %v4086_v28  ;;  %v4100_v31 = vsel %vm2700_vm5, %v4095_v30, 0 }
0x168a   : > { %8217 = vmatpush3.bf16.msra.mxu0 %v4100_v31 }
0x168b   : > { %8228 = vmatprep.subr.bf16.mxu0 %v10152_v0 }
0x168c   : > { %v4196_v32 = vpop.xlane.xlu1 %4195 }
0x168d   : > { %v4197_v36 = vsub.f32 %v11379_v37, %v4196_v32 }
0x168f   : > { %v4198_v48 = vmul.f32 1.442695, %v4197_v36 }
0x1691   : > { %9049 = vpow2.f32 %v4198_v48 }
0x1693   : > { %v9048_v33 = vpop.eup %9047 }
0x1694   : > { %v4088_v34 = vsel %vm2681_vm4, %v9048_v33, 0.0 }
0x1695   : > { %4089 = vadd.xlane.f32.xlu0 %v4088_v34 }
0x169b   : > { %v11412_v29 = vpop.eup %9049 }
0x169c   : > { %v4200_v38 = vsel %vm2681_vm4, %v11412_v29, 0.0 }
0x169d   : > { %4201 = vadd.xlane.f32.xlu1 %v4200_v38 }
0x16ac   : > { %v4653_v35 = vpop.xlane.xlu1 %4652 }
0x16ad   : > { %v4654_v47 = vsub.f32 %v11386_v55, %v4653_v35 }
0x16ae   : > { %4551 = vrot.lane.b32.xlu1 %v11306_v5, %s12214_s4 }
0x16af   : > { %v4655_v51 = vmul.f32 1.442695, %v4654_v47 }
0x16b9   : > { %v4312_v39 = vpop.xlane.xlu0 %4311 }
0x16ba   : > { %v4313_v40 = vsub.f32 %v4305_v7, %v4312_v39 }
0x16bc   : > { %v4314_v41 = vmul.f32 1.442695, %v4313_v40  ;;  %v4881_v1 = vpop.xlane.xlu1 %4880 }
0x16bd   : > { %v4424_v42 = vpop.xlane.xlu0 %4423  ;;  %v4882_v2 = vsub.f32 %v11395_v14, %v4881_v1 }
0x16be   : > { %9051 = vpow2.f32 %v4314_v41  ;;  %v4425_v37 = vsub.f32 %v4417_v10, %v4424_v42 }
0x16bf   : > { %v4883_v7 = vmul.f32 1.442695, %v4882_v2 }
0x16c0   : > { %v4426_v43 = vmul.f32 1.442695, %v4425_v37 }
0x16c1   : > { %v4541_v45 = vpop.xlane.xlu0 %4540 }
0x16c2   : > { %v4542_v46 = vsub.f32 %v4534_v19, %v4541_v45  ;;  %9053 = vpow2.f32 %v4426_v43 }
0x16c4   : > { %v4543_v49 = vmul.f32 1.442695, %v4542_v46 }
0x16c5   : > { %v4769_v61 = vpop.xlane.xlu0 %4768 }
0x16c6   : > { %9055 = vpow2.f32 %v4543_v49  ;;  %v4770_v62 = vsub.f32 %v4762_v27, %v4769_v61 }
0x16c7   : > { %9057 = vpow2.f32 %v4655_v51 }
0x16c8   : > { %v9052_v50 = vpop.eup %9051  ;;  %v4771_v63 = vmul.f32 1.442695, %v4770_v62 }
0x16c9   : > { %v4316_v52 = vsel %vm2681_vm4, %v9052_v50, 0.0 }
0x16ca   : > { %4317 = vadd.xlane.f32.xlu0 %v4316_v52  ;;  %9059 = vpow2.f32 %v4771_v63 }
0x16cb   : > { %9061 = vpow2.f32 %v4883_v7 }
0x16cc   : > { %v11420_v53 = vpop.eup %9053 }
0x16cd   : > { %v4428_v54 = vsel %vm2681_vm4, %v11420_v53, 0.0 }
0x16d0   : > { %v11424_v57 = vpop.eup %9055 }
0x16d1   : > { %v4545_v55 = vsel %vm2681_vm4, %v11424_v57, 0.0  ;;  %v11428_v58 = vpop.eup %9057 }
0x16d2   : > { %4429 = vadd.xlane.f32.xlu1 %v4428_v54  ;;  %v4657_v59 = vsel %vm2681_vm4, %v11428_v58, 0.0 }
0x16d4   : > { %v11437_v6 = vpop.eup %9059 }
0x16d5   : > { %v4773_v8 = vsel %vm2681_vm4, %v11437_v6, 0.0  ;;  %v11441_v9 = vpop.eup %9061 }
0x16d6   : > { %4546 = vadd.xlane.f32.xlu1 %v4545_v55 }
0x16da   : > { %4658 = vadd.xlane.f32.xlu1 %v4657_v59 }
0x16e0   : > { %4434 = vrot.lane.b32.xlu0 %v11300_v3, %s12212_s2  ;;  %v4885_v3 = vsel %vm2681_vm4, %v11441_v9, 0.0 }
0x16eb   : > { %4663 = vrot.lane.b32.xlu1 %v11306_v5, %s12212_s2  ;;  %v4323_v5 = vpop.permute.xlu0 %4322 }
0x16ec   : > { %v4328_v18 = vsel %vm2700_vm5, %v4323_v5, 0 }
0x16ff   : > { %4774 = vadd.xlane.f32.xlu0 %v4773_v8 }
0x170f   : > { %4886 = vadd.xlane.f32.xlu1 %v4885_v3 }
0x1715   : > { %4779 = vrot.lane.b32.xlu0 %v11317_v60, %s12214_s4 }
0x1720   : > { %4891 = vrot.lane.b32.xlu1 %v11317_v60, %s12212_s2 }
0x1722   : > { %v4090_v10 = vpop.xlane.xlu0 %4089 }
0x1723   : > { %9063 = vrcp.f32 %v4090_v10 }
0x172a   : > { %v4202_v4 = vpop.xlane.xlu1 %4201 }
0x172b   : > { %9065 = vrcp.f32 %v4202_v4 }
0x172d   : > { %v9064_v12 = vpop.eup %9063 }
0x172e   : > { %v4092_v11 = vmul.f32 %v9064_v12, %v9048_v33  ;;  %v4552_v20 = vpop.permute.xlu1 %4551 }
0x172f   : > { %v4557_v48 = vsel %vm2700_vm5, %v4552_v20, 0 }
0x1730   : > { %v4093_v14 = vpack.c.bf16 %v4092_v11, %v4092_v11 }
0x1732   : > { %8219 = vmatmul.mubr.msk.bf16.vlgmr.msra.gmra.mrb[48].mxu0 %vm2696_vm6, %v4093_v14 }
0x1733   : > { %8229 = vmatpush3.bf16.msra.mxu0 %v4212_v16  ;;  %8230 = vmatprep.mubr.msk.bf16.mxu0 %vm10153_vm0, %v10152_v0 }
0x1734   : > { %8240 = vmatprep.subr.bf16.mxu0 %v10152_v0 }
0x1735   : > { %v9066_v17 = vpop.eup %9065 }
0x1736   : > { %v4204_v60 = vmul.f32 %v9066_v17, %v11412_v29 }
0x1738   : > { %v4205_v24 = vpack.c.bf16 %v4204_v60, %v4204_v60 }
0x173a   : > { %8231 = vmatmul.mubr.msk.bf16.vlgmr.msra.gmra.mrb[52].mxu0 %vm2696_vm6, %v4205_v24 }
0x173b   : > { %8241 = vmatpush3.bf16.msra.mxu0 %v4328_v18  ;;  %8242 = vmatprep.mubr.msk.bf16.mxu0 %vm10153_vm0, %v10152_v0 }
0x173c   : > { %8252 = vmatprep.subr.bf16.mxu0 %v10152_v0 }
0x1757   : > { %v4318_v19 = vpop.xlane.xlu0 %4317 }
0x1758   : > { %9067 = vrcp.f32 %v4318_v19 }
0x175b   : > { %v4435_v25 = vpop.permute.xlu0 %4434 }
0x175c   : > { %v4440_v28 = vsel %vm2700_vm5, %v4435_v25, 0 }
0x175f   : > { %v4430_v21 = vpop.xlane.xlu1 %4429 }
0x1760   : > { %9069 = vrcp.f32 %v4430_v21 }
0x1762   : > { %v9068_v27 = vpop.eup %9067 }
0x1763   : > { %v4320_v22 = vmul.f32 %v9068_v27, %v9052_v50  ;;  %v4547_v23 = vpop.xlane.xlu1 %4546  ;;  %v4952_v27 = vld [vmem:[%s12215_s3] sm:$0xff] }
0x1764   : > { %9071 = vrcp.f32 %v4547_v23 }
0x1765   : > { %v4321_v26 = vpack.c.bf16 %v4320_v22, %v4320_v22  ;;  %v4953_v22 = vld [vmem:[%s12215_s3 + $0x8] sm:$0xff]  ;;  %s12218_s3 = sld [smem:[#allocation83_spill]] }
0x1766   : > { %v4955_v23 = vpack.c.bf16 %v4953_v22, %v4952_v27  ;;  %v7801_v22 = vld [vmem:[#allocation7] ss:$0 sm:$0xff] }
0x1767   : > { %8243 = vmatmul.mubr.msk.bf16.vlgmr.msra.gmra.mrb[56].mxu0 %vm2696_vm6, %v4321_v26  ;;  %v4659_v44 = vpop.xlane.xlu1 %4658 }
0x1768   : > { %8253 = vmatpush3.bf16.msra.mxu0 %v4440_v28  ;;  %8254 = vmatprep.mubr.msk.bf16.mxu0 %vm10153_vm0, %v10152_v0  ;;  %9073 = vrcp.f32 %v4659_v44 }
0x1769   : > { %8264 = vmatprep.subr.bf16.mxu0 %v10152_v0  ;;  %8307 = vmatpush3.bf16.msra.mxu1 %v4955_v23 }
0x176a   : > { %v9070_v30 = vpop.eup %9069  ;;  %8318 = vmatprep.subr.bf16.mxu1 %v10152_v0 }
0x176b   : > { %v4432_v31 = vmul.f32 %v9070_v30, %v11420_v53  ;;  %v4664_v34 = vpop.permute.xlu1 %4663 }
0x176c   : > { %v4669_v39 = vsel %vm2700_vm5, %v4664_v34, 0 }
0x176d   : > { %v4433_v32 = vpack.c.bf16 %v4432_v31, %v4432_v31 }
0x176e   : > { %v9072_v36 = vpop.eup %9071 }
0x176f   : > { %8255 = vmatmul.mubr.msk.bf16.vlgmr.msra.gmra.mrb[60].mxu0 %vm2696_vm6, %v4433_v32  ;;  %v4549_v33 = vmul.f32 %v9072_v36, %v11424_v57 }
0x1770   : > { %8265 = vmatpush3.bf16.msra.mxu0 %v4557_v48  ;;  %8266 = vmatprep.mubr.msk.bf16.mxu0 %vm10153_vm0, %v10152_v0 }
0x1771   : > { %8276 = vmatprep.subr.bf16.mxu0 %v10152_v0  ;;  %v4550_v29 = vpack.c.bf16 %v4549_v33, %v4549_v33 }
0x1772   : > { %v9074_v38 = vpop.eup %9073 }
0x1773   : > { %v4661_v40 = vmul.f32 %v9074_v38, %v11428_v58 }
0x1775   : > { %v4662_v41 = vpack.c.bf16 %v4661_v40, %v4661_v40 }
0x1777   : > { %8267 = vmatmul.mubr.msk.bf16.vlgmr.msra.gmra.mrb[64].mxu0 %vm2696_vm6, %v4550_v29 }
0x1778   : > { %8277 = vmatpush3.bf16.msra.mxu0 %v4669_v39  ;;  %8278 = vmatprep.mubr.msk.bf16.mxu0 %vm10153_vm0, %v10152_v0 }
0x1779   : > { %8288 = vmatprep.subr.bf16.mxu0 %v10152_v0 }
0x177f   : > { %8279 = vmatmul.mubr.msk.bf16.vlgmr.msra.gmra.mrb[68].mxu0 %vm2696_vm6, %v4662_v41 }
0x1780   : > { %8290 = vmatprep.mubr.msk.bf16.mxu0 %vm10153_vm0, %v10152_v0 }
0x178c   : > { %v4775_v42 = vpop.xlane.xlu0 %4774 }
0x178d   : > { %9075 = vrcp.f32 %v4775_v42 }
0x1790   : > { %v4780_v37 = vpop.permute.xlu0 %4779 }
0x1791   : > { %v4785_v43 = vsel %vm2700_vm5, %v4780_v37, 0 }
0x1792   : > { %8289 = vmatpush3.bf16.msra.mxu0 %v4785_v43 }
0x1793   : > { %8300 = vmatprep.subr.bf16.mxu0 %v10152_v0 }
0x1797   : > { %v9076_v35 = vpop.eup %9075 }
0x1798   : > { %v4777_v45 = vmul.f32 %v9076_v35, %v11437_v6 }
0x179a   : > { %v4778_v46 = vpack.c.bf16 %v4777_v45, %v4777_v45 }
0x179c   : > { %8291 = vmatmul.mubr.msk.bf16.vlgmr.msra.gmra.mrb[72].mxu0 %vm2696_vm6, %v4778_v46  ;;  %v4887_v47 = vpop.xlane.xlu1 %4886 }
0x179d   : > { %9077 = vrcp.f32 %v4887_v47  ;;  %8302 = vmatprep.mubr.msk.bf16.mxu0 %vm10153_vm0, %v10152_v0  ;;  %v5000_v47 = vld [vmem:[%s12217_s6] sm:$0xff] }
0x17a0   : > { %v4892_v49 = vpop.permute.xlu1 %4891 }
0x17a1   : > { %v4897_v50 = vsel %vm2700_vm5, %v4892_v49, 0  ;;  %v5001_v49 = vld [vmem:[%s12217_s6 + $0x8] sm:$0xff]  ;;  %s12219_s6 = sld [smem:[#allocation85_spill]] }
0x17a2   : > { %8301 = vmatpush3.bf16.msra.mxu0 %v4897_v50 }
0x17a3   : > { %8312 = vmatprep.subr.bf16.mxu0 %v10152_v0 }
0x17a7   : > { %v9078_v51 = vpop.eup %9077 }
0x17a8   : > { %v4889_v52 = vmul.f32 %v9078_v51, %v11441_v9 }
0x17aa   : > { %v4890_v53 = vpack.c.bf16 %v4889_v52, %v4889_v52 }
0x17ac   : > { %8303 = vmatmul.mubr.msk.bf16.vlgmr.msra.gmra.mrb[76].mxu0 %vm2696_vm6, %v4890_v53  ;;  %v5002_v53 = vpack.c.bf16 %v5001_v49, %v5000_v47 }
0x17ad   : > { %8314 = vmatprep.mubr.msk.bf16.mxu0 %vm10153_vm0, %v10152_v0 }
0x1805   : > { %v4136_v54 = vpop.f32.mrb[48].mxu0 }
0x1806   : > { %v8220_v57 = vpop.f32.mrb[49].mxu0 }
0x1807   : > { %v4139_v55 = vpop.f32.mrb[50].mxu0  ;;  %v7800_v57 = vld [vmem:[#allocation8] ss:$0 sm:$0xff] }
0x1808   : > { %v8221_v58 = vpop.f32.mrb[51].mxu0 }
0x180d   : > { %v4248_v59 = vpop.f32.mrb[52].mxu0 }
0x180e   : > { %v8232_v61 = vpop.f32.mrb[53].mxu0 }
0x180f   : > { %v4251_v62 = vpop.f32.mrb[54].mxu0 }
0x1810   : > { %v8233_v63 = vpop.f32.mrb[55].mxu0 }
0x183a   : > { %v4364_v1 = vpop.f32.mrb[56].mxu0 }
0x183b   : > { %v8244_v2 = vpop.f32.mrb[57].mxu0 }
0x183c   : > { %v4367_v6 = vpop.f32.mrb[58].mxu0 }
0x183d   : > { %v8245_v7 = vpop.f32.mrb[59].mxu0 }
0x1842   : > { %v4476_v8 = vpop.f32.mrb[60].mxu0 }
0x1843   : > { %v8256_v9 = vpop.f32.mrb[61].mxu0 }
0x1844   : > { %v4479_v3 = vpop.f32.mrb[62].mxu0 }
0x1845   : > { %v8257_v5 = vpop.f32.mrb[63].mxu0 }
0x184a   : > { %v4593_v10 = vpop.f32.mrb[64].mxu0 }
0x184b   : > { %v8268_v4 = vpop.f32.mrb[65].mxu0 }
0x184c   : > { %v4596_v12 = vpop.f32.mrb[66].mxu0 }
0x184d   : > { %v8269_v11 = vpop.f32.mrb[67].mxu0 }
0x184e   : > { %v5103_v11 = vld [vmem:[%s12218_s3] sm:$0xff] }
0x1852   : > { %v4705_v14 = vpop.f32.mrb[68].mxu0 }
0x1853   : > { %v8986_v16 = vpack.i.bf16 %v4705_v14, %v4248_v59  ;;  %v8280_v17 = vpop.f32.mrb[69].mxu0  ;;  %v5104_v14 = vld [vmem:[%s12218_s3 + $0x8] sm:$0xff]  ;;  %s12220_s3 = sld [smem:[#allocation82_spill]] }
0x1854   : > { %v4708_v60 = vpop.f32.mrb[70].mxu0 }
0x1855   : > { %8987 = vrot.lane.b32.xlu1 %v8986_v16, %s12216_s5  ;;  %v8281_v24 = vpop.f32.mrb[71].mxu0  ;;  %v5106_v16 = vpack.c.bf16 %v5104_v14, %v5103_v11 }
0x186f   : > { %v4821_v18 = vpop.f32.mrb[72].mxu0 }
0x1870   : > { %v8292_v19 = vpop.f32.mrb[73].mxu0 }
0x1871   : > { %v4824_v20 = vpop.f32.mrb[74].mxu0 }
0x1872   : > { %v8293_v21 = vpop.f32.mrb[75].mxu0 }
0x187f   : > { %v4933_v25 = vpop.f32.mrb[76].mxu0 }
0x1880   : > { %v8981_v26 = vpack.i.bf16 %v4933_v25, %v4476_v8  ;;  %v8304_v28 = vpop.f32.mrb[77].mxu0 }
0x1881   : > { %v4936_v44 = vpop.f32.mrb[78].mxu0  ;;  %v7802_v28 = vld [vmem:[#allocation5] ss:$0 sm:$0xff] }
0x1882   : > { %8982 = vrot.lane.b32.xlu0 %v8981_v26, %s12216_s5  ;;  %v8305_v30 = vpop.f32.mrb[79].mxu0 }
0x18c7   : > { %v8988_v31 = vpop.permute.xlu1 %8987 }
0x18c8   : > { %v8990_v36 = vunpack.i.h.bf16 %v8988_v31  ;;  %v8989_v48 = vunpack.i.l.bf16 %v8988_v31 }
0x18ca   : > { %v4715_v41 = vsel %vm2634_vm3, %v4593_v10, %v8990_v36  ;;  %v4258_v42 = vsel %vm2634_vm3, %v4136_v54, %v8989_v48  ;;  %v5212_v36 = vld [vmem:[%s12219_s6] sm:$0xff]  ;;  %v5213_v48 = vld [vmem:[%s12219_s6 + $0x8] sm:$0xff] }
0x18f4   : > { %v8983_v32 = vpop.permute.xlu0 %8982 }
0x18f5   : > { %v8985_v33 = vunpack.i.h.bf16 %v8983_v32  ;;  %v8984_v34 = vunpack.i.l.bf16 %v8983_v32 }
0x18f7   : > { %v4943_v29 = vsel %vm2634_vm3, %v4821_v18, %v8985_v33  ;;  %v4486_v38 = vsel %vm2634_vm3, %v4364_v1, %v8984_v34  ;;  %v5221_v33 = vpack.c.bf16 %v5213_v48, %v5212_v36  ;;  %v5214_v34 = vld [vmem:[%s12219_s6 + $0x10] sm:$0xff] }
0x18f8   : > { %v4948_v39 = vrot.slane %v4943_v29, 4  ;;  %v4945_v40 = vrot.slane %v4486_v38, 4  ;;  %v5215_v29 = vld [vmem:[%s12219_s6 + $0x18] sm:$0xff] }
0x18f9   : > { %v5222_v38 = vpack.c.bf16 %v5215_v29, %v5214_v34 }
0x18fa   : > { %v4950_v37 = vsel %vm3552_vm7, %v4258_v42, %v4945_v40  ;;  %v4951_v43 = vsel %vm3552_vm7, %v4715_v41, %v4948_v39  ;;  %v5216_v39 = vld [vmem:[%s12219_s6 + $0x20] sm:$0xff]  ;;  %v5217_v40 = vld [vmem:[%s12219_s6 + $0x28] sm:$0xff]  ;;  %v5218_v42 = vld [vmem:[%s12219_s6 + $0x30] sm:$0xff] }
0x18fb   : > { %v4954_v35 = vpack.c.bf16 %v4951_v43, %v4950_v37  ;;  %v5223_v41 = vpack.c.bf16 %v5217_v40, %v5216_v39  ;;  %v5219_v37 = vld [vmem:[%s12219_s6 + $0x38] sm:$0xff]  ;;  %s12222_s6 = sld [smem:[#allocation97_spill]] }
0x18fc   : > { %v5224_v43 = vpack.c.bf16 %v5219_v37, %v5218_v42 }
0x18fd   : > { %8309 = vmatmul.mubr.msk.bf16.vlgmr.msra.gmra.mrb[84].mxu1 %vm2438_vm2, %v4954_v35  ;;  %v7803_v35 = vld [vmem:[%s12220_s3] ss:$0 sm:$0xff]  ;;  %s12221_s3 = sld [smem:[#allocation84_spill]] }
0x18fe   : > { %8320 = vmatprep.mubr.msk.bf16.mxu1 %vm10153_vm0, %v10152_v0  ;;  %8319 = vmatpush3.bf16.msra.mxu1 %v5106_v16 }
0x18ff   : > { %8336 = vmatprep.subr.bf16.mxu1 %v10152_v0 }
0x19d0   : > { %v4993_v45 = vpop.f32.mrb[84].mxu1 }
0x19d1   : > { %v8310_v46 = vpop.f32.mrb[85].mxu1 }
0x19d2   : > { %v4996_v50 = vpop.f32.mrb[86].mxu1 }
0x19d3   : > { %v5003_v51 = vpack.c.bf16 %v4996_v50, %v4993_v45  ;;  %v8311_v52 = vpop.f32.mrb[87].mxu1 }
0x19d5   : > { %8313 = vmatpush3.bf16.msra.mxu0 %v5003_v51 }
0x19d6   : > { %8324 = vmatprep.subr.bf16.mxu0 %v10152_v0 }
0x19d8   : > { %8315 = vmatmul.mubr.msk.bf16.vlgmr.msra.gmra.mrb[80].mxu0 %vm2438_vm2, %v5002_v53 }
0x19d9   : > { %8332 = vmatprep.mubr.msk.bf16.mxu0 %vm10153_vm0, %v10152_v0  ;;  %8325 = vmatpush3.bf16.msra.mxu0 %v5221_v33 }
0x19da   : > { %8326 = vmatprep.subr.bf16.mxu0 %v10152_v0 }
0x19dd   : > { %8327 = vmatpush3.bf16.msra.mxu0 %v5222_v38 }
0x19de   : > { %8328 = vmatprep.subr.bf16.mxu0 %v10152_v0 }
0x19e1   : > { %8329 = vmatpush3.bf16.msra.mxu0 %v5223_v41 }
0x19e2   : > { %8330 = vmatprep.subr.bf16.mxu0 %v10152_v0 }
0x19e5   : > { %8331 = vmatpush3.bf16.msra.mxu0 %v5224_v43 }
0x19e6   : > { %8348 = vmatprep.subr.bf16.mxu0 %v10152_v0 }
0x1aab   : > { %v5041_v54 = vpop.f32.mrb[80].mxu0 }
0x1aac   : > { %v5048_v55 = vadd.f32 %v5041_v54, %v11267_v13  ;;  %v8316_v58 = vpop.f32.mrb[81].mxu0 }
0x1aad   : > { %v5044_v59 = vpop.f32.mrb[82].mxu0 }
0x1aae   : > { %v11515_v61 = vadd.f32 %v7800_v57, %v5048_v55  ;;  %v5049_v62 = vadd.f32 %v5044_v59, %v11270_v15  ;;  %v8317_v63 = vpop.f32.mrb[83].mxu0 }
0x1ab0   : > { %v11518_v1 = vadd.f32 %v7800_v57, %v5049_v62  ;;  %v5061_v2 = vsel %vm2438_vm2, %v11515_v61, 0.0 }
0x1ab1   : > { %5062 = vadd.xlane.f32.xlu0 %v5061_v2 }
0x1ab2   : > { %v5064_v6 = vsel %vm2438_vm2, %v11518_v1, 0.0 }
0x1ab3   : > { %5065 = vadd.xlane.f32.xlu1 %v5064_v6 }
0x1b3e   : > { %v5063_v13 = vpop.xlane.xlu0 %5062 }
0x1b3f   : > { %v5067_v7 = vmul.f32 0.0625, %v5063_v13 }
0x1b40   : > { %v5066_v8 = vpop.xlane.xlu1 %5065 }
0x1b41   : > { %v5069_v9 = vsub.f32 %v11515_v61, %v5067_v7  ;;  %v5068_v3 = vmul.f32 0.0625, %v5066_v8 }
0x1b43   : > { %v5070_v15 = vsub.f32 %v11518_v1, %v5068_v3  ;;  %v5071_v5 = vmul.f32 %v5069_v9, %v5069_v9 }
0x1b45   : > { %v5073_v10 = vsel %vm2438_vm2, %v5071_v5, 0.0  ;;  %v5072_v4 = vmul.f32 %v5070_v15, %v5070_v15 }
0x1b46   : > { %5074 = vadd.xlane.f32.xlu0 %v5073_v10 }
0x1b47   : > { %v5076_v12 = vsel %vm2438_vm2, %v5072_v4, 0.0 }
0x1b4a   : > { %5077 = vadd.xlane.f32.xlu0 %v5076_v12 }
0x1bd3   : > { %v5075_v17 = vpop.xlane.xlu0 %5074 }
0x1bd4   : > { %v5079_v60 = vmul.f32 0.0625, %v5075_v17 }
0x1bd6   : > { %v5081_v24 = vadd.f32 1e-05, %v5079_v60 }
0x1bd7   : > { %v5078_v18 = vpop.xlane.xlu0 %5077 }
0x1bd8   : > { %9079 = vrsqrt.f32 %v5081_v24  ;;  %v5080_v19 = vmul.f32 0.0625, %v5078_v18 }
0x1bda   : > { %v5082_v20 = vadd.f32 1e-05, %v5080_v19 }
0x1bdc   : > { %9081 = vrsqrt.f32 %v5082_v20 }
0x1be2   : > { %v9080_v21 = vpop.eup %9079 }
0x1be3   : > { %v5085_v27 = vmul.f32 %v9080_v21, %v5069_v9 }
0x1be5   : > { %v5093_v25 = vmul.f32 %v7801_v22, %v5085_v27 }
0x1be6   : > { %v9082_v23 = vpop.eup %9081 }
0x1be7   : > { %v5086_v26 = vmul.f32 %v9082_v23, %v5070_v15  ;;  %v5101_v30 = vadd.f32 %v7802_v28, %v5093_v25 }
0x1be9   : > { %v5094_v44 = vmul.f32 %v7801_v22, %v5086_v26 }
0x1beb   : > { %v5102_v31 = vadd.f32 %v7802_v28, %v5094_v44 }
0x1bed   : > { %v5105_v32 = vpack.c.bf16 %v5102_v31, %v5101_v30 }
0x1bef   : > { %8321 = vmatmul.mubr.msk.bf16.vlgmr.msra.gmra.mrb[88].mxu1 %vm2438_vm2, %v5105_v32 }
0x1bf0   : > { %8338 = vmatprep.mubr.msk.bf16.mxu1 %vm10153_vm0, %v10152_v0 }
0x1cc2   : > { %v5151_v45 = vpop.f32.mrb[88].mxu1 }
0x1cc3   : > { %v5152_v46 = vadd.f32 %v7803_v35, %v5151_v45  ;;  %v8322_v47 = vpop.f32.mrb[89].mxu1  ;;  %v7806_v45 = vld [vmem:[%s12221_s3] ss:$0 sm:$0xff]  ;;  %s10161_s3 = smov 32  }
0x1cc4   : > { %v5154_v49 = vpop.f32.mrb[90].mxu1 }
0x1cc5   : > { %v5160_v50 = vmul.f32 0.70710677, %v5152_v46  ;;  %v5155_v51 = vadd.f32 %v7803_v35, %v5154_v49  ;;  %v8323_v52 = vpop.f32.mrb[91].mxu1  ;;  %v5158_v29 = vmul.f32 0.5, %v5152_v46 }
0x1cc6   : > { %v5280_v52 = vld [vmem:[%s12222_s6] sm:$0xf] }
0x1cc7   : > { %v5166_v53 = vand.u32 2147483647, %v5160_v50  ;;  %v5161_v54 = vmul.f32 0.70710677, %v5155_v51  ;;  %vm5162_vm11 = vcmp.ge.f32.partialorder %v5160_v50, 0.0  ;;  %v5159_v38 = vmul.f32 0.5, %v5155_v51 }
0x1cc8   : > { %v5164_v30 = vsel %vm5162_vm11, 1.0, %v10160_v56 }
0x1cc9   : > { %v5168_v57 = vmul.f32 0.3275911, %v5166_v53  ;;  %v5167_v55 = vand.u32 2147483647, %v5161_v54  ;;  %v5194_v63 = vsub.f32 0.0, %v5166_v53  ;;  %vm5163_vm12 = vcmp.ge.f32.partialorder %v5161_v54, 0.0 }
0x1cca   : > { %v5165_v48 = vsel %vm5163_vm12, 1.0, %v10160_v56 }
0x1ccb   : > { %v5170_v58 = vadd.f32 1.0, %v5168_v57  ;;  %v5169_v59 = vmul.f32 0.3275911, %v5167_v55  ;;  %v5195_v2 = vsub.f32 0.0, %v5167_v55  ;;  %v5196_v13 = vmul.f32 %v5194_v63, %v5166_v53  ;;  %v7810_v53 = vld [vmem:[%s12222_s6 + $0x8] sm:$0xf] }
0x1ccc   : > { %v5281_v57 = vpack.c.bf16 %v5280_v52, %v5280_v52 }
0x1ccd   : > { %9083 = vrcp.f32 %v5170_v58  ;;  %v5171_v62 = vadd.f32 1.0, %v5169_v59  ;;  %v5197_v3 = vmul.f32 %v5195_v2, %v5167_v55  ;;  %v5198_v15 = vmul.f32 1.442695, %v5196_v13  ;;  %v7812_v58 = vld [vmem:[%s12222_s6 + $0xc] sm:$0xf] }
0x1cce   : > { %v5374_v55 = vpack.c.bf16 %v7810_v53, %v7810_v53  ;;  %v5420_v59 = vpack.c.bf16 %v7812_v58, %v7812_v58 }
0x1ccf   : > { %9085 = vrcp.f32 %v5171_v62  ;;  %v5200_v11 = vmul.f32 1.442695, %v5197_v3 }
0x1cd0   : > { %9087 = vpow2.f32 %v5198_v15 }
0x1cd1   : > { %9089 = vpow2.f32 %v5200_v11 }
0x1cd7   : > { %v9084_v6 = vpop.eup %9083 }
0x1cd8   : > { %v5176_v7 = vmul.f32 1.0614054, %v9084_v6 }
0x1cd9   : > { %v9086_v8 = vpop.eup %9085 }
0x1cda   : > { %v5178_v9 = vadd.f32 -1.4531521, %v5176_v7  ;;  %v5177_v5 = vmul.f32 1.0614054, %v9086_v8  ;;  %v9088_v22 = vpop.eup %9087 }
0x1cdb   : > { %v9090_v28 = vpop.eup %9089 }
0x1cdc   : > { %v5180_v10 = vmul.f32 %v9084_v6, %v5178_v9  ;;  %v5179_v4 = vadd.f32 -1.4531521, %v5177_v5 }
0x1cde   : > { %v5182_v12 = vadd.f32 1.4214138, %v5180_v10  ;;  %v5181_v14 = vmul.f32 %v9086_v8, %v5179_v4 }
0x1ce0   : > { %v5184_v16 = vmul.f32 %v9084_v6, %v5182_v12  ;;  %v5183_v17 = vadd.f32 1.4214138, %v5181_v14 }
0x1ce2   : > { %v5186_v60 = vadd.f32 -0.28449672, %v5184_v16  ;;  %v5185_v24 = vmul.f32 %v9086_v8, %v5183_v17 }
0x1ce4   : > { %v5188_v18 = vmul.f32 %v9084_v6, %v5186_v60  ;;  %v5187_v19 = vadd.f32 -0.28449672, %v5185_v24 }
0x1ce6   : > { %v5190_v20 = vadd.f32 0.2548296, %v5188_v18  ;;  %v5189_v21 = vmul.f32 %v9086_v8, %v5187_v19 }
0x1ce8   : > { %v5192_v27 = vmul.f32 %v9084_v6, %v5190_v20  ;;  %v5191_v23 = vadd.f32 0.2548296, %v5189_v21 }
0x1cea   : > { %v5202_v25 = vmul.f32 %v9088_v22, %v5192_v27  ;;  %v5193_v26 = vmul.f32 %v9086_v8, %v5191_v23 }
0x1cec   : > { %v5204_v44 = vsub.f32 1.0, %v5202_v25  ;;  %v5203_v31 = vmul.f32 %v9090_v28, %v5193_v26 }
0x1cee   : > { %v5206_v32 = vmul.f32 %v5204_v44, %v5164_v30  ;;  %v5205_v36 = vsub.f32 1.0, %v5203_v31 }
0x1cf0   : > { %v5208_v33 = vadd.f32 1.0, %v5206_v32  ;;  %v5207_v34 = vmul.f32 %v5205_v36, %v5165_v48 }
0x1cf2   : > { %v5209_v39 = vadd.f32 1.0, %v5207_v34  ;;  %v5210_v40 = vmul.f32 %v5208_v33, %v5158_v29 }
0x1cf4   : > { %v5211_v41 = vmul.f32 %v5209_v39, %v5159_v38 }
0x1cf6   : > { %v5220_v42 = vpack.c.bf16 %v5211_v41, %v5210_v40 }
0x1cf8   : > { %8333 = vmatmul.mubr.msk.bf16.vlgmr.msra.gmra.mrb[84].mxu0 %vm3828_vm10, %v5220_v42 }
0x1cf9   : > { %8350 = vmatprep.mubr.msk.bf16.mxu0 %vm10153_vm0, %v10152_v0 }
0x1dcb   : > { %v5262_v37 = vpop.f32.mrb[84].mxu0 }
0x1dcc   : > { %v5269_v43 = vadd.f32 %v5262_v37, %v11515_v61  ;;  %v8334_v35 = vpop.f32.mrb[85].mxu0  ;;  %v7808_v61 = vld [vmem:[%s12222_s6 + $0x4] sm:$0xf]  ;;  %s12038_s6 = smov 16   ;;  %v7814_v37 = vld [vmem:[#allocation13] ss:$0 sm:$0xff] }
0x1dcd   : > { %v5265_v47 = vpop.f32.mrb[86].mxu0  ;;  %v7815_v35 = vld [vmem:[#allocation11] ss:$0 sm:$0xff] }
0x1dce   : > { %v5270_v46 = vadd.f32 %v5265_v47, %v11518_v1  ;;  %v8335_v49 = vpop.f32.mrb[87].mxu0  ;;  %v5278_v50 = vadd.f32 %v7806_v45, %v5269_v43  ;;  %v5328_v1 = vpack.c.bf16 %v7808_v61, %v7808_v61 }
0x1dd0   : > { %v5279_v51 = vadd.f32 %v7806_v45, %v5270_v46 }
0x1dd2   : > { %v5282_v54 = vpack.c.bf16 %v5279_v51, %v5278_v50 }
0x1dd4   : > { %8337 = vmatpush3.bf16.msra.mxu1 %v5282_v54  ;;  %8349 = vmatpush3.bf16.msra.mxu0 %v5282_v54 }
0x1dd5   : > { %8342 = vmatprep.subr.bf16.mxu1 %v10152_v0  ;;  %8360 = vmatprep.subr.bf16.mxu0 %v10152_v0 }
0x1dd7   : > { %8339 = vmatmul.mubr.msk.bf16.vlgmr.msra.gmra.mrb[92].mxu1 %vm2438_vm2, %v5281_v57  ;;  %8351 = vmatmul.mubr.msk.bf16.vlgmr.msra.gmra.mrb[88].mxu0 %vm2438_vm2, %v5374_v55 }
0x1dd8   : > { %8343 = vmatpush3.bf16.msra.mxu1 %v5282_v54  ;;  %8344 = vmatprep.mubr.msk.bf16.mxu1 %vm10153_vm0, %v10152_v0 }
0x1dd9   : > { %8354 = vmatprep.subr.bf16.mxu1 %v10152_v0  ;;  %8368 = vmatprep.mubr.msk.bf16.mxu0 %vm10153_vm0, %v10152_v0 }
0x1ddf   : > { %8345 = vmatmul.mubr.msk.bf16.vlgmr.msra.gmra.mrb[96].mxu1 %vm2438_vm2, %v5328_v1 }
0x1de0   : > { %8355 = vmatpush3.bf16.msra.mxu1 %v5282_v54  ;;  %8356 = vmatprep.mubr.msk.bf16.mxu1 %vm10153_vm0, %v10152_v0 }
0x1de1   : > { %8372 = vmatprep.subr.bf16.mxu1 %v10152_v0 }
0x1de7   : > { %8357 = vmatmul.mubr.msk.bf16.vlgmr.msra.gmra.mrb[100].mxu1 %vm2438_vm2, %v5420_v59 }
0x1de8   : > { %8376 = vmatprep.mubr.msk.bf16.mxu1 %vm10153_vm0, %v10152_v0 }
0x1eaa   : > { %v5320_v62 = vpop.f32.mrb[92].mxu1  ;;  %v5412_v63 = vpop.f32.mrb[88].mxu0 }
0x1eab   : > { %v8340_v2 = vpop.f32.mrb[93].mxu1  ;;  %5469 = vrot.lane.b32.xlu1 %v5412_v63, %s10161_s3  ;;  %v8352_v6 = vpop.f32.mrb[89].mxu0  ;;  %s12223_s3 = sld [smem:[#allocation96_spill]] }
0x1eac   : > { %v5323_v13 = vpop.f32.mrb[94].mxu1  ;;  %v5415_v7 = vpop.f32.mrb[90].mxu0 }
0x1ead   : > { %v8341_v8 = vpop.f32.mrb[95].mxu1  ;;  %v8353_v9 = vpop.f32.mrb[91].mxu0 }
0x1eb1   : > { %v5511_v26 = vld [vmem:[%s12223_s3] sm:$0xff]  ;;  %v5512_v28 = vld [vmem:[%s12223_s3 + $0x8] sm:$0xff]  ;;  %v5513_v30 = vld [vmem:[%s12223_s3 + $0x10] sm:$0xff] }
0x1eb2   : > { %v5366_v3 = vpop.f32.mrb[96].mxu1  ;;  %v5520_v44 = vpack.c.bf16 %v5512_v28, %v5511_v26  ;;  %v5514_v31 = vld [vmem:[%s12223_s3 + $0x18] sm:$0xff]  ;;  %v5515_v36 = vld [vmem:[%s12223_s3 + $0x20] sm:$0xff]  ;;  %v5516_v48 = vld [vmem:[%s12223_s3 + $0x28] sm:$0xff] }
0x1eb3   : > { %5465 = vrot.lane.b32.xlu0 %v5366_v3, %s12038_s6  ;;  %v8346_v15 = vpop.f32.mrb[97].mxu1  ;;  %v5521_v32 = vpack.c.bf16 %v5514_v31, %v5513_v30  ;;  %v5522_v33 = vpack.c.bf16 %v5516_v48, %v5515_v36  ;;  %v5517_v34 = vld [vmem:[%s12223_s3 + $0x30] sm:$0xff]  ;;  %v5518_v29 = vld [vmem:[%s12223_s3 + $0x38] sm:$0xff]  ;;  %s12224_s6 = sld [smem:[#allocation107_spill]]  ;;  %s12044_s3 = smov 80  }
0x1eb4   : > { %v5369_v5 = vpop.f32.mrb[98].mxu1  ;;  %8361 = vmatpush3.bf16.msra.mxu0 %v5520_v44  ;;  %v5523_v38 = vpack.c.bf16 %v5518_v29, %v5517_v34  ;;  %v7817_v3 = vld [vmem:[#allocation19] ss:$0 sm:$0xff] }
0x1eb5   : > { %v8347_v10 = vpop.f32.mrb[99].mxu1  ;;  %8362 = vmatprep.subr.bf16.mxu0 %v10152_v0  ;;  %v7818_v5 = vld [vmem:[#allocation17] ss:$0 sm:$0xff] }
0x1eb8   : > { %8363 = vmatpush3.bf16.msra.mxu0 %v5521_v32 }
0x1eb9   : > { %8364 = vmatprep.subr.bf16.mxu0 %v10152_v0  ;;  %v5598_v58 = vld [vmem:[%s12224_s6] sm:$0xff]  ;;  %v5599_v59 = vld [vmem:[%s12224_s6 + $0x8] sm:$0xff]  ;;  %v5600_v63 = vld [vmem:[%s12224_s6 + $0x10] sm:$0xff] }
0x1eba   : > { %v5458_v4 = vpop.f32.mrb[100].mxu1  ;;  %v5601_v2 = vld [vmem:[%s12224_s6 + $0x18] sm:$0xff]  ;;  %s12226_s6 = smov 48  }
0x1ebb   : > { %5473 = vrot.lane.b32.xlu1 %v5458_v4, %s12040_s8  ;;  %v8358_v12 = vpop.f32.mrb[101].mxu1  ;;  %v5604_v6 = vpack.c.bf16 %v5601_v2, %v5600_v63  ;;  %s12043_s8 = smov 72  }
0x1ebc   : > { %v5461_v11 = vpop.f32.mrb[102].mxu1  ;;  %8365 = vmatpush3.bf16.msra.mxu0 %v5522_v33 }
0x1ebd   : > { %v8359_v14 = vpop.f32.mrb[103].mxu1  ;;  %8366 = vmatprep.subr.bf16.mxu0 %v10152_v0  ;;  %v7819_v11 = vld [vmem:[#allocation25] ss:$0 sm:$0xff] }
0x1ec0   : > { %8367 = vmatpush3.bf16.msra.mxu0 %v5523_v38 }
0x1ec1   : > { %8386 = vmatprep.subr.bf16.mxu0 %v10152_v0 }
0x1f1d   : > { %v5470_v17 = vpop.permute.xlu1 %5469 }
0x1f25   : > { %v5466_v16 = vpop.permute.xlu0 %5465 }
0x1f26   : > { %v5476_v60 = vsel %vm2438_vm2, %v5320_v62, %v5466_v16  ;;  %v5603_v62 = vpack.c.bf16 %v5599_v59, %v5598_v58 }
0x1f27   : > { %v5478_v24 = vsel %vm5477_vm13, %v5476_v60, %v5470_v17 }
0x1f28   : > { %8373 = vmatpush3.bf16.msra.mxu1 %v5603_v62 }
0x1f29   : > { %8374 = vmatprep.subr.bf16.mxu1 %v10152_v0 }
0x1f2c   : > { %8375 = vmatpush3.bf16.msra.mxu1 %v5604_v6 }
0x1f2d   : > { %v5474_v18 = vpop.permute.xlu1 %5473  ;;  %8380 = vmatprep.subr.bf16.mxu1 %v10152_v0 }
0x1f2e   : > { %v5479_v19 = vsel %vm2391_vm1, %v5478_v24, %v5474_v18  ;;  %vm6116_vm1 = vcmask 195584  }
0x1f2f   : > { %v5483_v20 = vsel %vm5482_vm14, %v5479_v19, 0.0 }
0x1f30   : > { %5484 = vadd.xlane.f32.xlu1 %v5483_v20 }
0x1fbd   : > { %v5485_v21 = vpop.xlane.xlu1 %5484 }
0x1fbe   : > { %v5487_v27 = vmul.f32 0.015625, %v5485_v21 }
0x1fc0   : > { %v5488_v22 = vsub.f32 %v5479_v19, %v5487_v27 }
0x1fc2   : > { %v5489_v23 = vmul.f32 %v5488_v22, %v5488_v22 }
0x1fc4   : > { %v5490_v25 = vsel %vm5482_vm14, %v5489_v23, 0.0 }
0x1fc5   : > { %5491 = vadd.xlane.f32.xlu0 %v5490_v25 }
0x2052   : > { %v5492_v39 = vpop.xlane.xlu0 %5491 }
0x2053   : > { %v5493_v40 = vmul.f32 0.015625, %v5492_v39 }
0x2055   : > { %v5494_v41 = vadd.f32 1e-05, %v5493_v40 }
0x2057   : > { %9091 = vrsqrt.f32 %v5494_v41 }
0x2061   : > { %v9092_v42 = vpop.eup %9091 }
0x2062   : > { %v5496_v43 = vmul.f32 %v9092_v42, %v5488_v22 }
0x2064   : > { %v5503_v45 = vmul.f32 %v7814_v37, %v5496_v43 }
0x2066   : > { %v5510_v47 = vadd.f32 %v7815_v35, %v5503_v45 }
0x2068   : > { %v5519_v46 = vpack.c.bf16 %v5510_v47, %v5510_v47 }
0x206a   : > { %8369 = vmatmul.mubr.msk.bf16.vlgmr.msra.gmra.mrb[92].mxu0 %vm3828_vm10, %v5519_v46 }
0x206b   : > { %8388 = vmatprep.mubr.msk.bf16.mxu0 %vm10153_vm0, %v10152_v0 }
0x213d   : > { %v11595_v49 = vpop.f32.mrb[92].mxu0 }
0x213e   : > { %v8370_v50 = vpop.f32.mrb[93].mxu0  ;;  %v5570_v51 = vsel %vm5569_vm15, %v11595_v49, 0.0 }
0x213f   : > { %5571 = vadd.xlane.f32.xlu0 %v5570_v51  ;;  %v5564_v52 = vpop.f32.mrb[94].mxu0 }
0x2140   : > { %v8371_v53 = vpop.f32.mrb[95].mxu0 }
0x21cc   : > { %v5572_v54 = vpop.xlane.xlu0 %5571 }
0x21cd   : > { %v5574_v57 = vmul.f32 0.03125, %v5572_v54 }
0x21cf   : > { %v5575_v55 = vsub.f32 %v11595_v49, %v5574_v57 }
0x21d1   : > { %v5576_v61 = vmul.f32 %v5575_v55, %v5575_v55 }
0x21d3   : > { %v5577_v1 = vsel %vm5569_vm15, %v5576_v61, 0.0 }
0x21d4   : > { %5578 = vadd.xlane.f32.xlu0 %v5577_v1 }
0x2261   : > { %v5579_v13 = vpop.xlane.xlu0 %5578 }
0x2262   : > { %v5580_v7 = vmul.f32 0.03125, %v5579_v13 }
0x2264   : > { %v5581_v8 = vadd.f32 1e-05, %v5580_v7 }
0x2266   : > { %9093 = vrsqrt.f32 %v5581_v8 }
0x2270   : > { %v9094_v9 = vpop.eup %9093 }
0x2271   : > { %v5583_v15 = vmul.f32 %v9094_v9, %v5575_v55 }
0x2273   : > { %v5590_v10 = vmul.f32 %v7817_v3, %v5583_v15 }
0x2275   : > { %v5597_v4 = vadd.f32 %v7818_v5, %v5590_v10 }
0x2277   : > { %v5602_v12 = vpack.c.bf16 %v5597_v4, %v5597_v4 }
0x2279   : > { %8377 = vmatmul.mubr.msk.bf16.vlgmr.msra.gmra.mrb[104].mxu1 %vm5477_vm13, %v5602_v12 }
0x227a   : > { %8382 = vmatprep.mubr.msk.bf16.mxu1 %vm10153_vm0, %v10152_v0 }
0x234c   : > { %v5649_v14 = vpop.f32.mrb[104].mxu1 }
0x234d   : > { %v5650_v16 = vadd.f32 %v7819_v11, %v5649_v14  ;;  %v8378_v17 = vpop.f32.mrb[105].mxu1 }
0x234e   : > { %v5652_v60 = vpop.f32.mrb[106].mxu1 }
0x234f   : > { %v11610_v24 = vpack.c.bf16 %v5650_v16, %v5650_v16  ;;  %v8379_v18 = vpop.f32.mrb[107].mxu1 }
0x2351   : > { %5770 = vrot.lane.b32.xlu0 %v11610_v24, %s12212_s2  ;;  %5658 = vrot.lane.b32.xlu1 %v11610_v24, %s12214_s4 }
0x2355   : > { %5994 = vrot.lane.b32.xlu0 %v11610_v24, %s12043_s8  ;;  %5768 = vrot.lane.b32.xlu1 %v11610_v24, %s12211_s1  ;;  %s12225_s8 = sld [smem:[#allocation98_spill]] }
0x2359   : > { %5882 = vrot.lane.b32.xlu1 %v11610_v24, %s12044_s3  ;;  %s12049_s3 = smov 56  }
0x235b   : > { %v5656_v31 = vld [vmem:[%s12225_s8] sm:$0xf]  ;;  %v7823_v38 = vld [vmem:[%s12225_s8 + $0x4] sm:$0xf]  ;;  %v7826_v35 = vld [vmem:[%s12225_s8 + $0x8] sm:$0xf] }
0x235c   : > { %v7829_v53 = vld [vmem:[%s12225_s8 + $0xc] sm:$0xf]  ;;  %s12050_s8 = smov 64  }
0x235d   : > { %5880 = vrot.lane.b32.xlu1 %v11610_v24, %s12210_s7 }
0x2361   : > { %5992 = vrot.lane.b32.xlu1 %v11610_v24, %s12209_s10 }
0x23c3   : > { %v5659_v19 = vpop.permute.xlu1 %5658  ;;  %v5771_v21 = vpop.permute.xlu0 %5770 }
0x23c4   : > { %v5664_v20 = vsel %vm2634_vm3, %v5659_v19, 0  ;;  %v5776_v22 = vsel %vm2634_vm3, %v5771_v21, 0 }
0x23c5   : > { %8381 = vmatpush3.bf16.xpose.msra.mxu1 %v5664_v20 }
0x23c6   : > { %8392 = vmatprep.subr.bf16.mxu1 %v10152_v0 }
0x23c7   : > { %v5769_v27 = vpop.permute.xlu1 %5768  ;;  %v5995_v26 = vpop.permute.xlu0 %5994 }
0x23c8   : > { %v6000_v44 = vsel %vm2634_vm3, %v5995_v26, 0 }
0x23cb   : > { %v5883_v23 = vpop.permute.xlu1 %5882 }
0x23cc   : > { %8383 = vmatmul.mubr.msk.bf16.vlgmr.msra.gmra.mrb[108].mxu1 %vm2634_vm3, %v11610_v24  ;;  %v5888_v25 = vsel %vm2634_vm3, %v5883_v23, 0 }
0x23cd   : > { %8393 = vmatpush3.bf16.xpose.msra.mxu1 %v5776_v22  ;;  %8394 = vmatprep.mubr.msk.bf16.mxu1 %vm10153_vm0, %v10152_v0 }
0x23ce   : > { %8404 = vmatprep.subr.bf16.mxu1 %v10152_v0 }
0x23cf   : > { %v5881_v28 = vpop.permute.xlu1 %5880 }
0x23d3   : > { %v5993_v30 = vpop.permute.xlu1 %5992 }
0x23d4   : > { %8395 = vmatmul.mubr.msk.bf16.vlgmr.msra.gmra.mrb[112].mxu1 %vm2634_vm3, %v5769_v27 }
0x23d5   : > { %8405 = vmatpush3.bf16.xpose.msra.mxu1 %v5888_v25  ;;  %8406 = vmatprep.mubr.msk.bf16.mxu1 %vm10153_vm0, %v10152_v0 }
0x23d6   : > { %8416 = vmatprep.subr.bf16.mxu1 %v10152_v0 }
0x23dc   : > { %8407 = vmatmul.mubr.msk.bf16.vlgmr.msra.gmra.mrb[116].mxu1 %vm2634_vm3, %v5881_v28 }
0x23dd   : > { %8417 = vmatpush3.bf16.xpose.msra.mxu1 %v6000_v44  ;;  %8418 = vmatprep.mubr.msk.bf16.mxu1 %vm10153_vm0, %v10152_v0 }
0x23de   : > { %8428 = vmatprep.subr.bf16.mxu1 %v10152_v0 }
0x23e4   : > { %8419 = vmatmul.mubr.msk.bf16.vlgmr.msra.gmra.mrb[120].mxu1 %vm2634_vm3, %v5993_v30 }
0x23e5   : > { %8432 = vmatprep.mubr.msk.bf16.mxu1 %vm10153_vm0, %v10152_v0 }
0x249f   : > { %v5700_v32 = vpop.f32.mrb[108].mxu1 }
0x24a0   : > { %v5701_v36 = vadd.f32 %v5700_v32, %v5656_v31  ;;  %v8384_v48 = vpop.f32.mrb[109].mxu1 }
0x24a1   : > { %v5703_v33 = vpop.f32.mrb[110].mxu1 }
0x24a2   : > { %v8385_v34 = vpop.f32.mrb[111].mxu1  ;;  %v5706_v29 = vsel %vm2681_vm4, %v5701_v36, -inf }
0x24a3   : > { %5707 = vmax.xlane.f32.xlu0 %v5706_v29 }
0x24a7   : > { %v5812_v39 = vpop.f32.mrb[112].mxu1 }
0x24a8   : > { %v5813_v40 = vadd.f32 %v7823_v38, %v5812_v39  ;;  %v8396_v41 = vpop.f32.mrb[113].mxu1 }
0x24a9   : > { %v5815_v42 = vpop.f32.mrb[114].mxu1 }
0x24aa   : > { %v8397_v37 = vpop.f32.mrb[115].mxu1  ;;  %v5818_v43 = vsel %vm2681_vm4, %v5813_v40, -inf }
0x24ab   : > { %5819 = vmax.xlane.f32.xlu1 %v5818_v43 }
0x24af   : > { %v5924_v45 = vpop.f32.mrb[116].mxu1 }
0x24b0   : > { %v5925_v47 = vadd.f32 %v7826_v35, %v5924_v45  ;;  %v8408_v46 = vpop.f32.mrb[117].mxu1 }
0x24b1   : > { %v5927_v50 = vpop.f32.mrb[118].mxu1 }
0x24b2   : > { %v8409_v51 = vpop.f32.mrb[119].mxu1  ;;  %v5930_v52 = vsel %vm2681_vm4, %v5925_v47, -inf }
0x24b3   : > { %5931 = vmax.xlane.f32.xlu0 %v5930_v52 }
0x24b7   : > { %v6036_v54 = vpop.f32.mrb[120].mxu1 }
0x24b8   : > { %v6037_v57 = vadd.f32 %v7829_v53, %v6036_v54  ;;  %v8420_v55 = vpop.f32.mrb[121].mxu1 }
0x24b9   : > { %v6039_v61 = vpop.f32.mrb[122].mxu1 }
0x24ba   : > { %v8421_v1 = vpop.f32.mrb[123].mxu1  ;;  %v6042_v58 = vsel %vm2681_vm4, %v6037_v57, -inf }
0x24bb   : > { %6043 = vmax.xlane.f32.xlu0 %v6042_v58 }
0x2530   : > { %v5708_v59 = vpop.xlane.xlu0 %5707 }
0x2531   : > { %v5709_v62 = vsub.f32 %v5701_v36, %v5708_v59 }
0x2533   : > { %v5710_v63 = vmul.f32 1.442695, %v5709_v62 }
0x2535   : > { %9095 = vpow2.f32 %v5710_v63 }
0x2538   : > { %v5820_v2 = vpop.xlane.xlu1 %5819 }
0x2539   : > { %v5821_v6 = vsub.f32 %v5813_v40, %v5820_v2 }
0x253b   : > { %v5822_v13 = vmul.f32 1.442695, %v5821_v6 }
0x253d   : > { %9097 = vpow2.f32 %v5822_v13 }
0x253f   : > { %v9096_v7 = vpop.eup %9095 }
0x2540   : > { %v5932_v8 = vpop.xlane.xlu0 %5931  ;;  %v5712_v9 = vsel %vm2681_vm4, %v9096_v7, 0.0 }
0x2541   : > { %v5933_v3 = vsub.f32 %v5925_v47, %v5932_v8  ;;  %5713 = vadd.xlane.f32.xlu0 %v5712_v9 }
0x2543   : > { %v5934_v15 = vmul.f32 1.442695, %v5933_v3 }
0x2545   : > { %9099 = vpow2.f32 %v5934_v15 }
0x2547   : > { %v9098_v5 = vpop.eup %9097 }
0x2548   : > { %v5824_v10 = vsel %vm2681_vm4, %v9098_v5, 0.0  ;;  %v6044_v11 = vpop.xlane.xlu0 %6043 }
0x2549   : > { %5825 = vadd.xlane.f32.xlu1 %v5824_v10  ;;  %v6045_v14 = vsub.f32 %v6037_v57, %v6044_v11 }
0x254b   : > { %v6046_v16 = vmul.f32 1.442695, %v6045_v14 }
0x254d   : > { %9101 = vpow2.f32 %v6046_v16 }
0x254f   : > { %v9100_v4 = vpop.eup %9099 }
0x2550   : > { %v5936_v12 = vsel %vm2681_vm4, %v9100_v4, 0.0 }
0x2551   : > { %5937 = vadd.xlane.f32.xlu0 %v5936_v12 }
0x2557   : > { %v9102_v17 = vpop.eup %9101 }
0x2558   : > { %v6048_v60 = vsel %vm2681_vm4, %v9102_v17, 0.0 }
0x255a   : > { %5830 = vrot.lane.b32.xlu1 %v11610_v24, %s12049_s3  ;;  %s12228_s3 = smov 16  }
0x255e   : > { %5942 = vrot.lane.b32.xlu1 %v11610_v24, %s12226_s6 }
0x2567   : > { %5718 = vrot.lane.b32.xlu0 %v11610_v24, %s12050_s8  ;;  %s12051_s8 = smov 24  }
0x2582   : > { %6049 = vadd.xlane.f32.xlu1 %v6048_v60 }
0x2593   : > { %6054 = vrot.lane.b32.xlu1 %v11610_v24, %s12048_s12  ;;  %s12227_s12 = sld [smem:[#allocation105_spill]] }
0x2599   : > { %v6118_v45 = vld [vmem:[%s12227_s12] sm:$0xff]  ;;  %v6119_v47 = vld [vmem:[%s12227_s12 + $0x8] sm:$0xff]  ;;  %v6120_v1 = vld [vmem:[%s12227_s12 + $0x10] sm:$0xff] }
0x259a   : > { %v6123_v46 = vpack.c.bf16 %v6119_v47, %v6118_v45  ;;  %v6121_v58 = vld [vmem:[%s12227_s12 + $0x18] sm:$0xff]  ;;  %s12230_s12 = sld [smem:[#allocation101_spill]] }
0x259b   : > { %v6124_v59 = vpack.c.bf16 %v6121_v58, %v6120_v1 }
0x259c   : > { %8429 = vmatpush3.bf16.msra.mxu1 %v6123_v46 }
0x259d   : > { %8430 = vmatprep.subr.bf16.mxu1 %v10152_v0 }
0x25a0   : > { %8431 = vmatpush3.bf16.msra.mxu1 %v6124_v59  ;;  %v6296_v47 = vld [vmem:[%s12230_s12 + $0x30] sm:$0xff]  ;;  %v6297_v46 = vld [vmem:[%s12230_s12 + $0x38] sm:$0xff]  ;;  %v6303_v1 = vld [vmem:[%s12230_s12 + $0x68] sm:$0xff] }
0x25a1   : > { %8444 = vmatprep.subr.bf16.mxu1 %v10152_v0  ;;  %v6304_v59 = vld [vmem:[%s12230_s12 + $0x70] sm:$0xff] }
0x25ce   : > { %v5714_v18 = vpop.xlane.xlu0 %5713 }
0x25cf   : > { %9103 = vrcp.f32 %v5714_v18 }
0x25d6   : > { %v5826_v19 = vpop.xlane.xlu1 %5825 }
0x25d7   : > { %9105 = vrcp.f32 %v5826_v19 }
0x25d9   : > { %v9104_v20 = vpop.eup %9103 }
0x25da   : > { %v5716_v27 = vmul.f32 %v9104_v20, %v9096_v7  ;;  %v5831_v25 = vpop.permute.xlu1 %5830 }
0x25db   : > { %v5836_v44 = vsel %vm2700_vm5, %v5831_v25, 0 }
0x25dc   : > { %v5717_v26 = vpack.c.bf16 %v5716_v27, %v5716_v27 }
0x25de   : > { %v5938_v21 = vpop.xlane.xlu0 %5937  ;;  %v5943_v30 = vpop.permute.xlu1 %5942 }
0x25df   : > { %9107 = vrcp.f32 %v5938_v21  ;;  %v5948_v36 = vsel %vm2700_vm5, %v5943_v30, 0 }
0x25e1   : > { %v9106_v28 = vpop.eup %9105 }
0x25e2   : > { %v5719_v22 = vpop.permute.xlu0 %5718  ;;  %v5828_v24 = vmul.f32 %v9106_v28, %v9098_v5 }
0x25e3   : > { %v5724_v23 = vsel %vm2700_vm5, %v5719_v22, 0 }
0x25e4   : > { %8387 = vmatpush3.bf16.msra.mxu0 %v5724_v23  ;;  %v5829_v31 = vpack.c.bf16 %v5828_v24, %v5828_v24 }
0x25e5   : > { %8398 = vmatprep.subr.bf16.mxu0 %v10152_v0 }
0x25e7   : > { %8389 = vmatmul.mubr.msk.bf16.vlgmr.msra.gmra.mrb[96].mxu0 %vm2696_vm6, %v5717_v26 }
0x25e8   : > { %8399 = vmatpush3.bf16.msra.mxu0 %v5836_v44  ;;  %8400 = vmatprep.mubr.msk.bf16.mxu0 %vm10153_vm0, %v10152_v0 }
0x25e9   : > { %8410 = vmatprep.subr.bf16.mxu0 %v10152_v0  ;;  %v9108_v32 = vpop.eup %9107 }
0x25ea   : > { %v5940_v48 = vmul.f32 %v9108_v32, %v9100_v4  ;;  %v7833_v4 = vld [vmem:[#allocation23] ss:$0 sm:$0xff]  ;;  %v7834_v32 = vld [vmem:[#allocation22] ss:$0 sm:$0xff] }
0x25ec   : > { %v5941_v33 = vpack.c.bf16 %v5940_v48, %v5940_v48  ;;  %v7835_v48 = vld [vmem:[#allocation20] ss:$0 sm:$0xff] }
0x25ef   : > { %8401 = vmatmul.mubr.msk.bf16.vlgmr.msra.gmra.mrb[100].mxu0 %vm2696_vm6, %v5829_v31 }
0x25f0   : > { %8411 = vmatpush3.bf16.msra.mxu0 %v5948_v36  ;;  %8412 = vmatprep.mubr.msk.bf16.mxu0 %vm10153_vm0, %v10152_v0 }
0x25f1   : > { %8422 = vmatprep.subr.bf16.mxu0 %v10152_v0 }
0x25f7   : > { %8413 = vmatmul.mubr.msk.bf16.vlgmr.msra.gmra.mrb[104].mxu0 %vm2696_vm6, %v5941_v33 }
0x25f8   : > { %8424 = vmatprep.mubr.msk.bf16.mxu0 %vm10153_vm0, %v10152_v0 }
0x260f   : > { %v6050_v34 = vpop.xlane.xlu1 %6049 }
0x2610   : > { %9109 = vrcp.f32 %v6050_v34 }
0x2613   : > { %v6055_v29 = vpop.permute.xlu1 %6054 }
0x2614   : > { %v6060_v38 = vsel %vm2700_vm5, %v6055_v29, 0 }
0x2615   : > { %8423 = vmatpush3.bf16.msra.mxu0 %v6060_v38  ;;  %v6290_v38 = vld [vmem:[%s12230_s12] sm:$0xff] }
0x2616   : > { %8436 = vmatprep.subr.bf16.mxu0 %v10152_v0 }
0x261a   : > { %v9110_v39 = vpop.eup %9109 }
0x261b   : > { %v6052_v40 = vmul.f32 %v9110_v39, %v9102_v17  ;;  %v6291_v39 = vld [vmem:[%s12230_s12 + $0x8] sm:$0xff] }
0x261d   : > { %v6053_v41 = vpack.c.bf16 %v6052_v40, %v6052_v40  ;;  %v6307_v40 = vpack.c.bf16 %v6291_v39, %v6290_v38 }
0x261f   : > { %8425 = vmatmul.mubr.msk.bf16.vlgmr.msra.gmra.mrb[108].mxu0 %vm2696_vm6, %v6053_v41  ;;  %v6292_v41 = vld [vmem:[%s12230_s12 + $0x10] sm:$0xff] }
0x2620   : > { %8440 = vmatprep.mubr.msk.bf16.mxu0 %vm10153_vm0, %v10152_v0 }
0x26ba   : > { %v5760_v42 = vpop.f32.mrb[96].mxu0 }
0x26bb   : > { %v8390_v37 = vpop.f32.mrb[97].mxu0 }
0x26bc   : > { %v5763_v43 = vpop.f32.mrb[98].mxu0 }
0x26bd   : > { %v8391_v35 = vpop.f32.mrb[99].mxu0  ;;  %v6294_v43 = vld [vmem:[%s12230_s12 + $0x20] sm:$0xff] }
0x26be   : > { %v6295_v35 = vld [vmem:[%s12230_s12 + $0x28] sm:$0xff] }
0x26bf   : > { %v6309_v45 = vpack.c.bf16 %v6295_v35, %v6294_v43 }
0x26c2   : > { %v5872_v50 = vpop.f32.mrb[100].mxu0 }
0x26c3   : > { %6103 = vrot.lane.b32.xlu0 %v5872_v50, %s12216_s5  ;;  %v8402_v51 = vpop.f32.mrb[101].mxu0  ;;  %v6310_v50 = vpack.c.bf16 %v6297_v46, %v6296_v47 }
0x26c4   : > { %v5875_v52 = vpop.f32.mrb[102].mxu0  ;;  %v6298_v51 = vld [vmem:[%s12230_s12 + $0x40] sm:$0xff] }
0x26c5   : > { %v8403_v53 = vpop.f32.mrb[103].mxu0  ;;  %v6299_v52 = vld [vmem:[%s12230_s12 + $0x48] sm:$0xff] }
0x26c6   : > { %v6311_v53 = vpack.c.bf16 %v6299_v52, %v6298_v51 }
0x26ca   : > { %v5984_v54 = vpop.f32.mrb[104].mxu0 }
0x26cb   : > { %6107 = vrot.lane.b32.xlu1 %v5984_v54, %s12228_s3  ;;  %v8414_v57 = vpop.f32.mrb[105].mxu0  ;;  %v6300_v54 = vld [vmem:[%s12230_s12 + $0x50] sm:$0xff] }
0x26cc   : > { %v5987_v55 = vpop.f32.mrb[106].mxu0  ;;  %v6301_v57 = vld [vmem:[%s12230_s12 + $0x58] sm:$0xff] }
0x26cd   : > { %v8415_v61 = vpop.f32.mrb[107].mxu0  ;;  %v6312_v55 = vpack.c.bf16 %v6301_v57, %v6300_v54 }
0x26ce   : > { %v6302_v61 = vld [vmem:[%s12230_s12 + $0x60] sm:$0xff] }
0x26cf   : > { %v6313_v58 = vpack.c.bf16 %v6303_v1, %v6302_v61  ;;  %v7840_v1 = vld [vmem:[#allocation29] ss:$0 sm:$0xff] }
0x26f2   : > { %v6096_v62 = vpop.f32.mrb[108].mxu0 }
0x26f3   : > { %6111 = vrot.lane.b32.xlu0 %v6096_v62, %s12051_s8  ;;  %v8426_v63 = vpop.f32.mrb[109].mxu0  ;;  %s12229_s8 = sld [smem:[#allocation99_spill]]  ;;  %v6305_v62 = vld [vmem:[%s12230_s12 + $0x78] sm:$0xff] }
0x26f4   : > { %v6099_v2 = vpop.f32.mrb[110].mxu0  ;;  %v6314_v63 = vpack.c.bf16 %v6305_v62, %v6304_v59 }
0x26f5   : > { %v8427_v6 = vpop.f32.mrb[111].mxu0  ;;  %v7836_v2 = vld [vmem:[#allocation14] ss:$0 sm:$0xff] }
0x26f9   : > { %v6207_v22 = vld [vmem:[%s12229_s8 + $0x8] sm:$0xff]  ;;  %v6208_v25 = vld [vmem:[%s12229_s8 + $0x10] sm:$0xff]  ;;  %v6209_v26 = vld [vmem:[%s12229_s8 + $0x18] sm:$0xff] }
0x26fa   : > { %v6212_v28 = vpack.c.bf16 %v6209_v26, %v6208_v25 }
0x2735   : > { %v6104_v13 = vpop.permute.xlu0 %6103 }
0x2736   : > { %v6114_v8 = vsel %vm2634_vm3, %v5760_v42, %v6104_v13  ;;  %v6293_v42 = vld [vmem:[%s12230_s12 + $0x18] sm:$0xff]  ;;  %s12233_s12 = smov 80  }
0x2737   : > { %v6308_v37 = vpack.c.bf16 %v6293_v42, %v6292_v41 }
0x273d   : > { %v6108_v7 = vpop.permute.xlu1 %6107 }
0x273e   : > { %v6115_v9 = vsel %vm2438_vm2, %v6114_v8, %v6108_v7 }
0x2765   : > { %v6112_v3 = vpop.permute.xlu0 %6111 }
0x2766   : > { %v6117_v15 = vsel %vm6116_vm1, %v6115_v9, %v6112_v3 }
0x2767   : > { %v6122_v5 = vpack.c.bf16 %v6117_v15, %v6117_v15 }
0x2769   : > { %8433 = vmatmul.mubr.msk.bf16.vlgmr.msra.gmra.mrb[124].mxu1 %vm5477_vm13, %v6122_v5 }
0x276a   : > { %8460 = vmatprep.mubr.msk.bf16.mxu1 %vm10153_vm0, %v10152_v0  ;;  %8445 = vmatpush3.bf16.msra.mxu1 %v6307_v40 }
0x276b   : > { %8446 = vmatprep.subr.bf16.mxu1 %v10152_v0 }
0x276e   : > { %8447 = vmatpush3.bf16.msra.mxu1 %v6308_v37 }
0x276f   : > { %8448 = vmatprep.subr.bf16.mxu1 %v10152_v0 }
0x2772   : > { %8449 = vmatpush3.bf16.msra.mxu1 %v6309_v45 }
0x2773   : > { %8450 = vmatprep.subr.bf16.mxu1 %v10152_v0 }
0x2776   : > { %8451 = vmatpush3.bf16.msra.mxu1 %v6310_v50 }
0x2777   : > { %8452 = vmatprep.subr.bf16.mxu1 %v10152_v0 }
0x277a   : > { %8453 = vmatpush3.bf16.msra.mxu1 %v6311_v53 }
0x277b   : > { %8454 = vmatprep.subr.bf16.mxu1 %v10152_v0 }
0x277e   : > { %8455 = vmatpush3.bf16.msra.mxu1 %v6312_v55  ;;  %v7839_v55 = vld [vmem:[#allocation31] ss:$0 sm:$0xff] }
0x277f   : > { %8456 = vmatprep.subr.bf16.mxu1 %v10152_v0 }
0x2782   : > { %8457 = vmatpush3.bf16.msra.mxu1 %v6313_v58 }
0x2783   : > { %8458 = vmatprep.subr.bf16.mxu1 %v10152_v0 }
0x2786   : > { %8459 = vmatpush3.bf16.msra.mxu1 %v6314_v63  ;;  %v7841_v63 = vld [vmem:[#allocation37] ss:$0 sm:$0xff] }
0x2787   : > { %8490 = vmatprep.subr.bf16.mxu1 %v10152_v0 }
0x283c   : > { %v6162_v10 = vpop.f32.mrb[124].mxu1 }
0x283d   : > { %v6168_v12 = vadd.f32 %v6162_v10, %v11595_v49  ;;  %v8434_v11 = vpop.f32.mrb[125].mxu1  ;;  %v6206_v49 = vld [vmem:[%s12229_s8] sm:$0xff]  ;;  %s12231_s8 = sld [smem:[#allocation120_spill]] }
0x283e   : > { %v6165_v14 = vpop.f32.mrb[126].mxu1  ;;  %v6211_v23 = vpack.c.bf16 %v6207_v22, %v6206_v49 }
0x283f   : > { %v11703_v16 = vadd.f32 %v7833_v4, %v6168_v12  ;;  %v8435_v17 = vpop.f32.mrb[127].mxu1 }
0x2840   : > { %8437 = vmatpush3.bf16.msra.mxu0 %v6211_v23 }
0x2841   : > { %v6179_v60 = vsel %vm5569_vm15, %v11703_v16, 0.0  ;;  %8438 = vmatprep.subr.bf16.mxu0 %v10152_v0 }
0x2842   : > { %6180 = vadd.xlane.f32.xlu1 %v6179_v60 }
0x2843   : > { %v6394_v45 = vld [vmem:[%s12231_s8 + $0x8] sm:$0xff]  ;;  %v6395_v46 = vld [vmem:[%s12231_s8 + $0x10] sm:$0xff]  ;;  %v6396_v50 = vld [vmem:[%s12231_s8 + $0x18] sm:$0xff] }
0x2844   : > { %8439 = vmatpush3.bf16.msra.mxu0 %v6212_v28  ;;  %v6399_v51 = vpack.c.bf16 %v6396_v50, %v6395_v46 }
0x2845   : > { %8464 = vmatprep.subr.bf16.mxu0 %v10152_v0 }
0x28cf   : > { %v6181_v18 = vpop.xlane.xlu1 %6180 }
0x28d0   : > { %v6182_v19 = vmul.f32 0.03125, %v6181_v18 }
0x28d2   : > { %v6183_v20 = vsub.f32 %v11703_v16, %v6182_v19 }
0x28d4   : > { %v6184_v21 = vmul.f32 %v6183_v20, %v6183_v20 }
0x28d6   : > { %v6185_v27 = vsel %vm5569_vm15, %v6184_v21, 0.0 }
0x28d7   : > { %6186 = vadd.xlane.f32.xlu0 %v6185_v27 }
0x2964   : > { %v6187_v44 = vpop.xlane.xlu0 %6186 }
0x2965   : > { %v6188_v24 = vmul.f32 0.03125, %v6187_v44 }
0x2967   : > { %v6189_v30 = vadd.f32 1e-05, %v6188_v24 }
0x2969   : > { %9111 = vrsqrt.f32 %v6189_v30 }
0x2973   : > { %v9112_v31 = vpop.eup %9111 }
0x2974   : > { %v6191_v36 = vmul.f32 %v9112_v31, %v6183_v20 }
0x2976   : > { %v6198_v33 = vmul.f32 %v7834_v32, %v6191_v36 }
0x2978   : > { %v6205_v34 = vadd.f32 %v7835_v48, %v6198_v33  ;;  %v7838_v48 = vld [vmem:[#allocation16] ss:$0 sm:$0xff] }
0x297a   : > { %v6210_v29 = vpack.c.bf16 %v6205_v34, %v6205_v34 }
0x297c   : > { %8441 = vmatmul.mubr.msk.bf16.vlgmr.msra.gmra.mrb[112].mxu0 %vm5477_vm13, %v6210_v29 }
0x297d   : > { %8468 = vmatprep.mubr.msk.bf16.mxu0 %vm10153_vm0, %v10152_v0 }
0x2a4f   : > { %v6257_v6 = vpop.f32.mrb[112].mxu0 }
0x2a50   : > { %v6258_v13 = vadd.f32 %v7836_v2, %v6257_v6  ;;  %v8442_v7 = vpop.f32.mrb[113].mxu0 }
0x2a51   : > { %v6260_v8 = vpop.f32.mrb[114].mxu0 }
0x2a52   : > { %v6264_v9 = vmul.f32 0.70710677, %v6258_v13  ;;  %v8443_v3 = vpop.f32.mrb[115].mxu0  ;;  %v6263_v24 = vmul.f32 0.5, %v6258_v13 }
0x2a54   : > { %v6267_v15 = vand.u32 2147483647, %v6264_v9  ;;  %vm6265_vm7 = vcmp.ge.f32.partialorder %v6264_v9, 0.0 }
0x2a55   : > { %v6266_v28 = vsel %vm6265_vm7, 1.0, %v10160_v56 }
0x2a56   : > { %v6268_v5 = vmul.f32 0.3275911, %v6267_v15  ;;  %v6281_v4 = vsub.f32 0.0, %v6267_v15 }
0x2a58   : > { %v6269_v10 = vadd.f32 1.0, %v6268_v5  ;;  %v6282_v11 = vmul.f32 %v6281_v4, %v6267_v15 }
0x2a5a   : > { %9113 = vrcp.f32 %v6269_v10  ;;  %v6283_v60 = vmul.f32 1.442695, %v6282_v11 }
0x2a5c   : > { %9115 = vpow2.f32 %v6283_v60 }
0x2a64   : > { %v9114_v12 = vpop.eup %9113 }
0x2a65   : > { %v6272_v14 = vmul.f32 1.0614054, %v9114_v12 }
0x2a66   : > { %v9116_v23 = vpop.eup %9115 }
0x2a67   : > { %v6273_v17 = vadd.f32 -1.4531521, %v6272_v14 }
0x2a69   : > { %v6274_v18 = vmul.f32 %v9114_v12, %v6273_v17 }
0x2a6b   : > { %v6275_v19 = vadd.f32 1.4214138, %v6274_v18 }
0x2a6d   : > { %v6276_v20 = vmul.f32 %v9114_v12, %v6275_v19 }
0x2a6f   : > { %v6277_v21 = vadd.f32 -0.28449672, %v6276_v20 }
0x2a71   : > { %v6278_v27 = vmul.f32 %v9114_v12, %v6277_v21 }
0x2a73   : > { %v6279_v49 = vadd.f32 0.2548296, %v6278_v27 }
0x2a75   : > { %v6280_v22 = vmul.f32 %v9114_v12, %v6279_v49 }
0x2a77   : > { %v6285_v25 = vmul.f32 %v9116_v23, %v6280_v22 }
0x2a79   : > { %v6286_v26 = vsub.f32 1.0, %v6285_v25 }
0x2a7b   : > { %v6287_v44 = vmul.f32 %v6286_v26, %v6266_v28 }
0x2a7d   : > { %v6288_v30 = vadd.f32 1.0, %v6287_v44 }
0x2a7f   : > { %v6289_v31 = vmul.f32 %v6288_v30, %v6263_v24 }
0x2a81   : > { %v6306_v32 = vpack.c.bf16 %v6289_v31, %v6289_v31 }
0x2a83   : > { %8461 = vmatmul.mubr.bf16.vlgmr.msra.gmra.mrb[128].mxu1 %v6306_v32 }
0x2a84   : > { %8492 = vmatprep.mubr.msk.bf16.mxu1 %vm10153_vm0, %v10152_v0 }
0x2b56   : > { %v6349_v36 = vpop.f32.mrb[128].mxu1 }
0x2b57   : > { %v6355_v33 = vadd.f32 %v6349_v36, %v11703_v16  ;;  %v8462_v34 = vpop.f32.mrb[129].mxu1  ;;  %v6393_v16 = vld [vmem:[%s12231_s8] sm:$0xff]  ;;  %s12232_s8 = sld [smem:[#allocation108_spill]] }
0x2b58   : > { %v6352_v29 = vpop.f32.mrb[130].mxu1  ;;  %v6398_v47 = vpack.c.bf16 %v6394_v45, %v6393_v16 }
0x2b59   : > { %v11746_v38 = vadd.f32 %v7838_v48, %v6355_v33  ;;  %v8463_v39 = vpop.f32.mrb[131].mxu1 }
0x2b5a   : > { %8465 = vmatpush3.bf16.msra.mxu0 %v6398_v47 }
0x2b5b   : > { %v6366_v40 = vsel %vm5569_vm15, %v11746_v38, 0.0  ;;  %8466 = vmatprep.subr.bf16.mxu0 %v10152_v0 }
0x2b5c   : > { %6367 = vadd.xlane.f32.xlu0 %v6366_v40 }
0x2b5d   : > { %v6451_v5 = vld [vmem:[%s12232_s8] sm:$0xf]  ;;  %v7848_v47 = vld [vmem:[%s12232_s8 + $0x8] sm:$0xf] }
0x2b5e   : > { %8467 = vmatpush3.bf16.msra.mxu0 %v6399_v51 }
0x2b5f   : > { %8472 = vmatprep.subr.bf16.mxu0 %v10152_v0 }
0x2be9   : > { %v6368_v41 = vpop.xlane.xlu0 %6367 }
0x2bea   : > { %v6369_v42 = vmul.f32 0.03125, %v6368_v41  ;;  %v7845_v41 = vld [vmem:[%s12232_s8 + $0x4] sm:$0xf] }
0x2bec   : > { %v6370_v37 = vsub.f32 %v11746_v38, %v6369_v42 }
0x2bee   : > { %v6371_v43 = vmul.f32 %v6370_v37, %v6370_v37 }
0x2bf0   : > { %v6372_v35 = vsel %vm5569_vm15, %v6371_v43, 0.0 }
0x2bf1   : > { %6373 = vadd.xlane.f32.xlu0 %v6372_v35 }
0x2c7e   : > { %v6374_v52 = vpop.xlane.xlu0 %6373 }
0x2c7f   : > { %v6375_v53 = vmul.f32 0.03125, %v6374_v52 }
0x2c81   : > { %v6376_v54 = vadd.f32 1e-05, %v6375_v53 }
0x2c83   : > { %9117 = vrsqrt.f32 %v6376_v54 }
0x2c8d   : > { %v9118_v57 = vpop.eup %9117 }
0x2c8e   : > { %v6378_v61 = vmul.f32 %v9118_v57, %v6370_v37  ;;  %v7851_v57 = vld [vmem:[%s12232_s8 + $0xc] sm:$0xf] }
0x2c90   : > { %v6385_v58 = vmul.f32 %v7839_v55, %v6378_v61 }
0x2c92   : > { %v6392_v59 = vadd.f32 %v7840_v1, %v6385_v58 }
0x2c94   : > { %v6397_v62 = vpack.c.bf16 %v6392_v59, %v6392_v59 }
0x2c96   : > { %8469 = vmatmul.mubr.msk.bf16.vlgmr.msra.gmra.mrb[116].mxu0 %vm5477_vm13, %v6397_v62 }
0x2c97   : > { %8474 = vmatprep.mubr.msk.bf16.mxu0 %vm10153_vm0, %v10152_v0 }
0x2d69   : > { %v6444_v2 = vpop.f32.mrb[116].mxu0 }
0x2d6a   : > { %v6445_v6 = vadd.f32 %v7841_v63, %v6444_v2  ;;  %v8470_v13 = vpop.f32.mrb[117].mxu0 }
0x2d6b   : > { %v6447_v7 = vpop.f32.mrb[118].mxu0 }
0x2d6c   : > { %v11761_v8 = vpack.c.bf16 %v6445_v6, %v6445_v6  ;;  %v8471_v9 = vpop.f32.mrb[119].mxu0 }
0x2d6e   : > { %6453 = vrot.lane.b32.xlu1 %v11761_v8, %s12214_s4  ;;  %s12238_s4 = sld [smem:[#allocation118_spill]] }
0x2d72   : > { %6565 = vrot.lane.b32.xlu1 %v11761_v8, %s12212_s2  ;;  %s12241_s2 = sld [smem:[#allocation112_spill]] }
0x2d76   : > { %6563 = vrot.lane.b32.xlu1 %v11761_v8, %s12211_s1  ;;  %s12237_s1 = smov 40  }
0x2d7a   : > { %6677 = vrot.lane.b32.xlu1 %v11761_v8, %s12233_s12  ;;  %s12236_s12 = smov 56  }
0x2d7e   : > { %6675 = vrot.lane.b32.xlu1 %v11761_v8, %s12210_s7  ;;  %s12244_s7 = sld [smem:[#allocation64_spill]] }
0x2d82   : > { %6789 = vrot.lane.b32.xlu1 %v11761_v8, %s12234_s13  ;;  %s12235_s13 = smov 64  }
0x2de0   : > { %v6454_v3 = vpop.permute.xlu1 %6453 }
0x2de1   : > { %v6459_v15 = vsel %vm2634_vm3, %v6454_v3, 0 }
0x2de2   : > { %8473 = vmatpush3.bf16.xpose.msra.mxu0 %v6459_v15 }
0x2de3   : > { %8478 = vmatprep.subr.bf16.mxu0 %v10152_v0 }
0x2de4   : > { %v6566_v22 = vpop.permute.xlu1 %6565 }
0x2de5   : > { %v6571_v24 = vsel %vm2634_vm3, %v6566_v22, 0 }
0x2de8   : > { %v6564_v26 = vpop.permute.xlu1 %6563 }
0x2de9   : > { %8475 = vmatmul.mubr.msk.bf16.vlgmr.msra.gmra.mrb[120].mxu0 %vm2634_vm3, %v11761_v8 }
0x2dea   : > { %8480 = vmatprep.mubr.msk.bf16.mxu0 %vm10153_vm0, %v10152_v0 }
0x2dec   : > { %v6678_v30 = vpop.permute.xlu1 %6677 }
0x2ded   : > { %v6683_v32 = vsel %vm2634_vm3, %v6678_v30, 0 }
0x2df0   : > { %v6676_v31 = vpop.permute.xlu1 %6675 }
0x2df4   : > { %v6790_v36 = vpop.permute.xlu1 %6789 }
0x2df5   : > { %v6795_v48 = vsel %vm2634_vm3, %v6790_v36, 0  ;;  %v6912_v36 = vld [vmem:[%s12238_s4] sm:$0xff] }
0x2ebc   : > { %v6495_v10 = vpop.f32.mrb[120].mxu0 }
0x2ebd   : > { %v6496_v4 = vadd.f32 %v6495_v10, %v6451_v5  ;;  %v8476_v12 = vpop.f32.mrb[121].mxu0 }
0x2ebe   : > { %v6498_v11 = vpop.f32.mrb[122].mxu0 }
0x2ebf   : > { %v8477_v14 = vpop.f32.mrb[123].mxu0  ;;  %v6501_v17 = vsel %vm2681_vm4, %v6496_v4, -inf }
0x2ec0   : > { %6502 = vmax.xlane.f32.xlu0 %v6501_v17 }
0x2f4d   : > { %v6503_v60 = vpop.xlane.xlu0 %6502 }
0x2f4e   : > { %v6504_v18 = vsub.f32 %v6496_v4, %v6503_v60 }
0x2f50   : > { %v6505_v19 = vmul.f32 1.442695, %v6504_v18 }
0x2f52   : > { %9119 = vpow2.f32 %v6505_v19 }
0x2f5c   : > { %v9120_v20 = vpop.eup %9119 }
0x2f5d   : > { %v6507_v21 = vsel %vm2681_vm4, %v9120_v20, 0.0 }
0x2f5e   : > { %6508 = vadd.xlane.f32.xlu0 %v6507_v21 }
0x2f74   : > { %6513 = vrot.lane.b32.xlu0 %v11761_v8, %s12235_s13  ;;  %s2364_s13 = sand.u32 1, %s10045_s0  }
0x2f78   : > { %6787 = vrot.lane.b32.xlu0 %v11761_v8, %s12209_s10  ;;  %s12242_s10 = sld [smem:[#allocation65_spill]] }
0x2feb   : > { %v6509_v27 = vpop.xlane.xlu0 %6508 }
0x2fec   : > { %9121 = vrcp.f32 %v6509_v27 }
0x2fef   : > { %v6514_v49 = vpop.permute.xlu0 %6513 }
0x2ff0   : > { %v6519_v23 = vsel %vm2700_vm5, %v6514_v49, 0 }
0x2ff1   : > { %8479 = vmatpush3.bf16.msra.mxu0 %v6519_v23 }
0x2ff2   : > { %8484 = vmatprep.subr.bf16.mxu0 %v10152_v0 }
0x2ff3   : > { %v6788_v33 = vpop.permute.xlu0 %6787 }
0x2ff6   : > { %v9122_v25 = vpop.eup %9121 }
0x2ff7   : > { %v6511_v28 = vmul.f32 %v9122_v25, %v9120_v20 }
0x2ff9   : > { %v6512_v44 = vpack.c.bf16 %v6511_v28, %v6511_v28 }
0x2ffb   : > { %8481 = vmatmul.mubr.msk.bf16.vlgmr.msra.gmra.mrb[124].mxu0 %vm2696_vm6, %v6512_v44 }
0x2ffc   : > { %8485 = vmatpush3.bf16.xpose.msra.mxu0 %v6571_v24  ;;  %8486 = vmatprep.mubr.msk.bf16.mxu0 %vm10153_vm0, %v10152_v0 }
0x2ffd   : > { %8496 = vmatprep.subr.bf16.mxu0 %v10152_v0 }
0x3003   : > { %8487 = vmatmul.mubr.msk.bf16.vlgmr.msra.gmra.mrb[128].mxu0 %vm2634_vm3, %v6564_v26 }
0x3004   : > { %8497 = vmatpush3.bf16.xpose.msra.mxu0 %v6683_v32  ;;  %8498 = vmatprep.mubr.msk.bf16.mxu0 %vm10153_vm0, %v10152_v0 }
0x3005   : > { %8508 = vmatprep.subr.bf16.mxu0 %v10152_v0 }
0x300b   : > { %8499 = vmatmul.mubr.msk.bf16.vlgmr.msra.gmra.mrb[132].mxu0 %vm2634_vm3, %v6676_v31 }
0x300c   : > { %8509 = vmatpush3.bf16.xpose.msra.mxu0 %v6795_v48  ;;  %8510 = vmatprep.mubr.msk.bf16.mxu0 %vm10153_vm0, %v10152_v0  ;;  %v6913_v48 = vld [vmem:[%s12238_s4 + $0x8] sm:$0xff] }
0x300d   : > { %8520 = vmatprep.subr.bf16.mxu0 %v10152_v0 }
0x3013   : > { %8511 = vmatmul.mubr.msk.bf16.vlgmr.msra.gmra.mrb[136].mxu0 %vm2634_vm3, %v6788_v33  ;;  %v6917_v33 = vpack.c.bf16 %v6913_v48, %v6912_v36  ;;  %v7090_v48 = vld [vmem:[%s12241_s2 + $0x30] sm:$0xff] }
0x3014   : > { %8524 = vmatprep.mubr.msk.bf16.mxu0 %vm10153_vm0, %v10152_v0 }
0x3015   : > { %8521 = vmatpush3.bf16.msra.mxu0 %v6917_v33  ;;  %v7091_v33 = vld [vmem:[%s12241_s2 + $0x38] sm:$0xff] }
0x3016   : > { %8522 = vmatprep.subr.bf16.mxu0 %v10152_v0 }
0x30ce   : > { %v11808_v34 = vpop.f32.mrb[124].mxu0 }
0x30cf   : > { %v8482_v29 = vpop.f32.mrb[125].mxu0 }
0x30d0   : > { %v6558_v39 = vpop.f32.mrb[126].mxu0 }
0x30d1   : > { %v8483_v40 = vpop.f32.mrb[127].mxu0 }
0x30d6   : > { %v6607_v42 = vpop.f32.mrb[128].mxu0 }
0x30d7   : > { %v6608_v37 = vadd.f32 %v7845_v41, %v6607_v42  ;;  %v8488_v43 = vpop.f32.mrb[129].mxu0  ;;  %v6914_v42 = vld [vmem:[%s12238_s4 + $0x10] sm:$0xff] }
0x30d8   : > { %v6610_v35 = vpop.f32.mrb[130].mxu0 }
0x30d9   : > { %v8489_v16 = vpop.f32.mrb[131].mxu0  ;;  %v6613_v45 = vsel %vm2681_vm4, %v6608_v37, -inf }
0x30da   : > { %6614 = vmax.xlane.f32.xlu1 %v6613_v45 }
0x30de   : > { %v6719_v46 = vpop.f32.mrb[132].mxu0 }
0x30df   : > { %v6720_v50 = vadd.f32 %v7848_v47, %v6719_v46  ;;  %v8500_v51 = vpop.f32.mrb[133].mxu0 }
0x30e0   : > { %v6722_v52 = vpop.f32.mrb[134].mxu0 }
0x30e1   : > { %v8501_v53 = vpop.f32.mrb[135].mxu0  ;;  %v6725_v54 = vsel %vm2681_vm4, %v6720_v50, -inf }
0x30e2   : > { %6726 = vmax.xlane.f32.xlu0 %v6725_v54 }
0x30e6   : > { %v6831_v55 = vpop.f32.mrb[136].mxu0 }
0x30e7   : > { %v6832_v61 = vadd.f32 %v7851_v57, %v6831_v55  ;;  %v8512_v1 = vpop.f32.mrb[137].mxu0 }
0x30e8   : > { %v6834_v58 = vpop.f32.mrb[138].mxu0 }
0x30e9   : > { %v8513_v59 = vpop.f32.mrb[139].mxu0  ;;  %v6837_v62 = vsel %vm2681_vm4, %v6832_v61, -inf }
0x30ea   : > { %6838 = vmax.xlane.f32.xlu0 %v6837_v62  ;;  %v7855_v62 = vld [vmem:[#allocation35] ss:$0 sm:$0xff] }
0x30eb   : > { %6625 = vrot.lane.b32.xlu1 %v11761_v8, %s12236_s12  ;;  %s7864_s12 = sshll.u32 %s10547_s15, 4  ;;  %s10170_s15 = smov [#allocation46]  }
0x3167   : > { %v6615_v63 = vpop.xlane.xlu1 %6614 }
0x3168   : > { %v6616_v2 = vsub.f32 %v6608_v37, %v6615_v63  ;;  %v6915_v37 = vld [vmem:[%s12238_s4 + $0x18] sm:$0xff] }
0x3169   : > { %v6918_v43 = vpack.c.bf16 %v6915_v37, %v6914_v42  ;;  %v7094_v42 = vld [vmem:[%s12241_s2 + $0x50] sm:$0xff]  ;;  %v7095_v37 = vld [vmem:[%s12241_s2 + $0x58] sm:$0xff] }
0x316a   : > { %v6617_v6 = vmul.f32 1.442695, %v6616_v2 }
0x316b   : > { %v6626_v13 = vpop.permute.xlu1 %6625  ;;  %8523 = vmatpush3.bf16.msra.mxu0 %v6918_v43  ;;  %v7106_v43 = vpack.c.bf16 %v7095_v37, %v7094_v42  ;;  %v7861_v37 = vld [vmem:[#allocation40] ss:$0 sm:$0xff] }
0x316c   : > { %9123 = vpow2.f32 %v6617_v6  ;;  %v6631_v7 = vsel %vm2700_vm5, %v6626_v13, 0  ;;  %8536 = vmatprep.subr.bf16.mxu0 %v10152_v0 }
0x316d   : > { %8491 = vmatpush3.bf16.msra.mxu1 %v6631_v7 }
0x316e   : > { %8502 = vmatprep.subr.bf16.mxu1 %v10152_v0 }
0x316f   : > { %v6727_v9 = vpop.xlane.xlu0 %6726 }
0x3170   : > { %v6728_v3 = vsub.f32 %v6720_v50, %v6727_v9 }
0x3172   : > { %v6729_v15 = vmul.f32 1.442695, %v6728_v3 }
0x3174   : > { %9125 = vpow2.f32 %v6729_v15 }
0x3176   : > { %v9124_v5 = vpop.eup %9123 }
0x3177   : > { %v6839_v10 = vpop.xlane.xlu0 %6838  ;;  %v6619_v4 = vsel %vm2681_vm4, %v9124_v5, 0.0 }
0x3178   : > { %v6840_v12 = vsub.f32 %v6832_v61, %v6839_v10  ;;  %6620 = vadd.xlane.f32.xlu0 %v6619_v4 }
0x317a   : > { %v6841_v11 = vmul.f32 1.442695, %v6840_v12 }
0x317c   : > { %9127 = vpow2.f32 %v6841_v11 }
0x317e   : > { %v9126_v14 = vpop.eup %9125 }
0x317f   : > { %v6731_v17 = vsel %vm2681_vm4, %v9126_v14, 0.0 }
0x3180   : > { %6732 = vadd.xlane.f32.xlu1 %v6731_v17 }
0x3186   : > { %v9128_v60 = vpop.eup %9127 }
0x3187   : > { %v6843_v18 = vsel %vm2681_vm4, %v9128_v60, 0.0 }
0x3188   : > { %6844 = vadd.xlane.f32.xlu0 %v6843_v18 }
0x3191   : > { %6849 = vrot.lane.b32.xlu1 %v11761_v8, %s12237_s1  ;;  %s2365_s1 = scalar_lea.vmem [#allocation46], %s2364_s13 }
0x319e   : > { %6737 = vrot.lane.b32.xlu0 %v11761_v8, %s12226_s6  ;;  %s12239_s6 = smov 24  }
0x3205   : > { %v6621_v19 = vpop.xlane.xlu0 %6620 }
0x3206   : > { %9129 = vrcp.f32 %v6621_v19 }
0x320d   : > { %v6733_v20 = vpop.xlane.xlu1 %6732 }
0x320e   : > { %9131 = vrcp.f32 %v6733_v20 }
0x3210   : > { %v9130_v21 = vpop.eup %9129 }
0x3211   : > { %v6623_v27 = vmul.f32 %v9130_v21, %v9124_v5  ;;  %v6850_v28 = vpop.permute.xlu1 %6849  ;;  %v7856_v21 = vld [vmem:[#allocation34] ss:$0 sm:$0xff] }
0x3212   : > { %v6855_v24 = vsel %vm2700_vm5, %v6850_v28, 0 }
0x3213   : > { %v6624_v49 = vpack.c.bf16 %v6623_v27, %v6623_v27 }
0x3215   : > { %8493 = vmatmul.mubr.msk.bf16.vlgmr.msra.gmra.mrb[132].mxu1 %vm2696_vm6, %v6624_v49  ;;  %v6845_v22 = vpop.xlane.xlu0 %6844  ;;  %v7857_v49 = vld [vmem:[#allocation32] ss:$0 sm:$0xff] }
0x3216   : > { %9133 = vrcp.f32 %v6845_v22  ;;  %8504 = vmatprep.mubr.msk.bf16.mxu1 %vm10153_vm0, %v10152_v0 }
0x3218   : > { %v9132_v23 = vpop.eup %9131 }
0x3219   : > { %v6735_v25 = vmul.f32 %v9132_v23, %v9126_v14  ;;  %v6738_v26 = vpop.permute.xlu0 %6737 }
0x321a   : > { %v6743_v8 = vsel %vm2700_vm5, %v6738_v26, 0  ;;  %v7084_v26 = vld [vmem:[%s12241_s2] sm:$0xff] }
0x321b   : > { %8503 = vmatpush3.bf16.msra.mxu1 %v6743_v8  ;;  %v6736_v44 = vpack.c.bf16 %v6735_v25, %v6735_v25  ;;  %v7085_v8 = vld [vmem:[%s12241_s2 + $0x8] sm:$0xff] }
0x321c   : > { %8514 = vmatprep.subr.bf16.mxu1 %v10152_v0  ;;  %v7101_v28 = vpack.c.bf16 %v7085_v8, %v7084_v26 }
0x321e   : > { %8505 = vmatmul.mubr.msk.bf16.vlgmr.msra.gmra.mrb[136].mxu1 %vm2696_vm6, %v6736_v44  ;;  %v7086_v44 = vld [vmem:[%s12241_s2 + $0x10] sm:$0xff] }
0x321f   : > { %8515 = vmatpush3.bf16.msra.mxu1 %v6855_v24  ;;  %8516 = vmatprep.mubr.msk.bf16.mxu1 %vm10153_vm0, %v10152_v0  ;;  %v7087_v24 = vld [vmem:[%s12241_s2 + $0x18] sm:$0xff] }
0x3220   : > { %v9134_v30 = vpop.eup %9133  ;;  %8528 = vmatprep.subr.bf16.mxu1 %v10152_v0 }
0x3221   : > { %v6847_v31 = vmul.f32 %v9134_v30, %v9128_v60  ;;  %v7102_v30 = vpack.c.bf16 %v7087_v24, %v7086_v44 }
0x3223   : > { %v6848_v32 = vpack.c.bf16 %v6847_v31, %v6847_v31  ;;  %v7088_v31 = vld [vmem:[%s12241_s2 + $0x20] sm:$0xff] }
0x3226   : > { %8517 = vmatmul.mubr.msk.bf16.vlgmr.msra.gmra.mrb[140].mxu1 %vm2696_vm6, %v6848_v32  ;;  %v7089_v32 = vld [vmem:[%s12241_s2 + $0x28] sm:$0xff] }
0x3227   : > { %8532 = vmatprep.mubr.msk.bf16.mxu1 %vm10153_vm0, %v10152_v0  ;;  %v7103_v36 = vpack.c.bf16 %v7089_v32, %v7088_v31  ;;  %v7196_v32 = vld [vmem:[%s12242_s10] sm:$0xff] }
0x32e8   : > { %v6667_v29 = vpop.f32.mrb[132].mxu1 }
0x32e9   : > { %6898 = vrot.lane.b32.xlu1 %v6667_v29, %s12216_s5  ;;  %v8494_v39 = vpop.f32.mrb[133].mxu1  ;;  %s12240_s5 = sld [smem:[#allocation110_spill]]  ;;  %v7104_v29 = vpack.c.bf16 %v7091_v33, %v7090_v48 }
0x32ea   : > { %v6670_v40 = vpop.f32.mrb[134].mxu1  ;;  %v7092_v39 = vld [vmem:[%s12241_s2 + $0x40] sm:$0xff] }
0x32eb   : > { %v8495_v41 = vpop.f32.mrb[135].mxu1  ;;  %v7093_v40 = vld [vmem:[%s12241_s2 + $0x48] sm:$0xff] }
0x32ec   : > { %v7105_v41 = vpack.c.bf16 %v7093_v40, %v7092_v39 }
0x32ef   : > { %v7001_v4 = vld [vmem:[%s12240_s5 + $0x8] sm:$0xff]  ;;  %v7002_v11 = vld [vmem:[%s12240_s5 + $0x10] sm:$0xff]  ;;  %v7003_v14 = vld [vmem:[%s12240_s5 + $0x18] sm:$0xff] }
0x32f0   : > { %v7006_v17 = vpack.c.bf16 %v7003_v14, %v7002_v11 }
0x32f1   : > { %v6779_v35 = vpop.f32.mrb[136].mxu1 }
0x32f2   : > { %6902 = vrot.lane.b32.xlu1 %v6779_v35, %s12228_s3  ;;  %v8506_v16 = vpop.f32.mrb[137].mxu1  ;;  %v7096_v35 = vld [vmem:[%s12241_s2 + $0x60] sm:$0xff]  ;;  %s12243_s3 = smov %s12242_s10  ;;  %s11912_s10 = scalar_lea.hbm %s10524_s9, %s7864_s12 }
0x32f3   : > { %v6782_v45 = vpop.f32.mrb[138].mxu1  ;;  %v7097_v16 = vld [vmem:[%s12241_s2 + $0x68] sm:$0xff]  ;;  %v7198_v48 = vld [vmem:[%s12243_s3 + $0x10] sm:$0xff] }
0x32f4   : > { %v8507_v47 = vpop.f32.mrb[139].mxu1  ;;  %v7107_v45 = vpack.c.bf16 %v7097_v16, %v7096_v35  ;;  %v7862_v35 = vld [vmem:[#allocation38] ss:$0 sm:$0xff] }
0x32f5   : > { %v7098_v47 = vld [vmem:[%s12241_s2 + $0x70] sm:$0xff] }
0x32f9   : > { %v6891_v46 = vpop.f32.mrb[140].mxu1 }
0x32fa   : > { %6906 = vrot.lane.b32.xlu0 %v6891_v46, %s12239_s6  ;;  %v8518_v50 = vpop.f32.mrb[141].mxu1  ;;  %v7099_v46 = vld [vmem:[%s12241_s2 + $0x78] sm:$0xff]  ;;  %s7274_s6 = sshll.u32 %s2365_s1, 4  ;;  %s11914_s6 = int_to_ptr.vmem [resolvable:$true] %s7274_s6 }
0x32fb   : > { %v6894_v51 = vpop.f32.mrb[142].mxu1  ;;  %v7108_v50 = vpack.c.bf16 %v7099_v46, %v7098_v47  ;;  %s9931_s2 = scalar_lea.vmem %s11914_s6, 16 }
0x32fc   : > { %v8519_v52 = vpop.f32.mrb[143].mxu1  ;;  %v7858_v51 = vld [vmem:[#allocation26] ss:$0 sm:$0xff]  ;;  %p9932_p3 = scmp.ne.s32.totalorder %s11914_s6, %s9931_s2 }
0x32fe   : > { %p9933_p12 = pnand %p9932_p3, %p12245_p4 }
0x3300   : > { %p9934_p5 = pneg %p9933_p12 }
0x335b   : > { %v6899_v53 = vpop.permute.xlu1 %6898 }
0x335c   : > { %v6909_v57 = vsel %vm2634_vm3, %v11808_v34, %v6899_v53 }
0x3364   : > { %v6903_v54 = vpop.permute.xlu1 %6902 }
0x3365   : > { %v6910_v55 = vsel %vm2438_vm2, %v6909_v57, %v6903_v54  ;;  %vm7247_vm2 = vcmask 8192  }
0x336c   : > { %v6907_v61 = vpop.permute.xlu0 %6906 }
0x336d   : > { %v6911_v1 = vsel %vm6116_vm1, %v6910_v55, %v6907_v61 }
0x336e   : > { %v6916_v58 = vpack.c.bf16 %v6911_v1, %v6911_v1 }
0x3370   : > { %8525 = vmatmul.mubr.msk.bf16.vlgmr.msra.gmra.mrb[140].mxu0 %vm5477_vm13, %v6916_v58 }
0x3371   : > { %8552 = vmatprep.mubr.msk.bf16.mxu0 %vm10153_vm0, %v10152_v0  ;;  %8537 = vmatpush3.bf16.msra.mxu0 %v7101_v28 }
0x3372   : > { %8538 = vmatprep.subr.bf16.mxu0 %v10152_v0 }
0x3375   : > { %8539 = vmatpush3.bf16.msra.mxu0 %v7102_v30 }
0x3376   : > { %8540 = vmatprep.subr.bf16.mxu0 %v10152_v0 }
0x3379   : > { %8541 = vmatpush3.bf16.msra.mxu0 %v7103_v36  ;;  %v7197_v36 = vld [vmem:[%s12243_s3 + $0x8] sm:$0xff] }
0x337a   : > { %8542 = vmatprep.subr.bf16.mxu0 %v10152_v0  ;;  %v7201_v33 = vpack.c.bf16 %v7197_v36, %v7196_v32 }
0x337d   : > { %8543 = vmatpush3.bf16.msra.mxu0 %v7104_v29 }
0x337e   : > { %8544 = vmatprep.subr.bf16.mxu0 %v10152_v0 }
0x3381   : > { %8545 = vmatpush3.bf16.msra.mxu0 %v7105_v41 }
0x3382   : > { %8546 = vmatprep.subr.bf16.mxu0 %v10152_v0 }
0x3385   : > { %8547 = vmatpush3.bf16.msra.mxu0 %v7106_v43 }
0x3386   : > { %8548 = vmatprep.subr.bf16.mxu0 %v10152_v0 }
0x3389   : > { %8549 = vmatpush3.bf16.msra.mxu0 %v7107_v45 }
0x338a   : > { %8550 = vmatprep.subr.bf16.mxu0 %v10152_v0 }
0x338d   : > { %8551 = vmatpush3.bf16.msra.mxu0 %v7108_v50 }
0x3443   : > { %v6956_v59 = vpop.f32.mrb[140].mxu0 }
0x3444   : > { %v6962_v63 = vadd.f32 %v6956_v59, %v11746_v38  ;;  %v8526_v2 = vpop.f32.mrb[141].mxu0  ;;  %v7000_v38 = vld [vmem:[%s12240_s5] sm:$0xff] }
0x3445   : > { %v6959_v34 = vpop.f32.mrb[142].mxu0  ;;  %v7005_v12 = vpack.c.bf16 %v7001_v4, %v7000_v38 }
0x3446   : > { %v11857_v6 = vadd.f32 %v7855_v62, %v6962_v63  ;;  %v8527_v13 = vpop.f32.mrb[143].mxu0 }
0x3447   : > { %8529 = vmatpush3.bf16.msra.mxu1 %v7005_v12 }
0x3448   : > { %v6973_v7 = vsel %vm5569_vm15, %v11857_v6, 0.0  ;;  %8530 = vmatprep.subr.bf16.mxu1 %v10152_v0 }
0x3449   : > { %6974 = vadd.xlane.f32.xlu1 %v6973_v7 }
0x344b   : > { %8531 = vmatpush3.bf16.msra.mxu1 %v7006_v17 }
0x344c   : > { %8556 = vmatprep.subr.bf16.mxu1 %v10152_v0 }
0x34d6   : > { %v6975_v9 = vpop.xlane.xlu1 %6974 }
0x34d7   : > { %v6976_v3 = vmul.f32 0.03125, %v6975_v9 }
0x34d9   : > { %v6977_v15 = vsub.f32 %v11857_v6, %v6976_v3 }
0x34db   : > { %v6978_v5 = vmul.f32 %v6977_v15, %v6977_v15 }
0x34dd   : > { %v6979_v10 = vsel %vm5569_vm15, %v6978_v5, 0.0 }
0x34de   : > { %6980 = vadd.xlane.f32.xlu0 %v6979_v10 }
0x356b   : > { %v6981_v60 = vpop.xlane.xlu0 %6980 }
0x356c   : > { %v6982_v18 = vmul.f32 0.03125, %v6981_v60 }
0x356e   : > { %v6983_v19 = vadd.f32 1e-05, %v6982_v18 }
0x3570   : > { %9135 = vrsqrt.f32 %v6983_v19 }
0x357a   : > { %v9136_v20 = vpop.eup %9135 }
0x357b   : > { %v6985_v27 = vmul.f32 %v9136_v20, %v6977_v15 }
0x357d   : > { %v6992_v22 = vmul.f32 %v7856_v21, %v6985_v27 }
0x357f   : > { %v6999_v23 = vadd.f32 %v7857_v49, %v6992_v22  ;;  %v7860_v49 = vld [vmem:[#allocation28] ss:$0 sm:$0xff] }
0x3581   : > { %v7004_v25 = vpack.c.bf16 %v6999_v23, %v6999_v23 }
0x3583   : > { %8533 = vmatmul.mubr.msk.bf16.vlgmr.msra.gmra.mrb[144].mxu1 %vm5477_vm13, %v7004_v25 }
0x3584   : > { %8560 = vmatprep.mubr.msk.bf16.mxu1 %vm10153_vm0, %v10152_v0  ;;  %8557 = vmatpush3.bf16.msra.mxu1 %v7201_v33 }
0x3585   : > { %8558 = vmatprep.subr.bf16.mxu1 %v10152_v0 }
0x3656   : > { %v7051_v52 = vpop.f32.mrb[144].mxu1 }
0x3657   : > { %v7052_v53 = vadd.f32 %v7858_v51, %v7051_v52  ;;  %v8534_v54 = vpop.f32.mrb[145].mxu1 }
0x3658   : > { %v7054_v57 = vpop.f32.mrb[146].mxu1 }
0x3659   : > { %v7058_v55 = vmul.f32 0.70710677, %v7052_v53  ;;  %v8535_v61 = vpop.f32.mrb[147].mxu1  ;;  %v7057_v18 = vmul.f32 0.5, %v7052_v53 }
0x365b   : > { %v7061_v1 = vand.u32 2147483647, %v7058_v55  ;;  %vm7059_vm0 = vcmp.ge.f32.partialorder %v7058_v55, 0.0  ;;  %v7203_v55 = vld [vmem:[%s12244_s7] sm:$0x1]  ;;  %s7262_s7 = scalar_lea.sflag [#allocation4], %s2364_s13 }
0x365c   : > { %v7060_v17 = vsel %vm7059_vm0, 1.0, %v10160_v56 }
0x365d   : > { %v7062_v58 = vmul.f32 0.3275911, %v7061_v1  ;;  %v7075_v62 = vsub.f32 0.0, %v7061_v1 }
0x365f   : > { %v7063_v59 = vadd.f32 1.0, %v7062_v58  ;;  %v7076_v2 = vmul.f32 %v7075_v62, %v7061_v1 }
0x3661   : > { %9137 = vrcp.f32 %v7063_v59  ;;  %v7077_v7 = vmul.f32 1.442695, %v7076_v2 }
0x3663   : > { %9139 = vpow2.f32 %v7077_v7 }
0x366b   : > { %v9138_v63 = vpop.eup %9137 }
0x366c   : > { %v7066_v34 = vmul.f32 1.0614054, %v9138_v63 }
0x366d   : > { %v9140_v12 = vpop.eup %9139 }
0x366e   : > { %v7067_v13 = vadd.f32 -1.4531521, %v7066_v34 }
0x3670   : > { %v7068_v9 = vmul.f32 %v9138_v63, %v7067_v13 }
0x3672   : > { %v7069_v3 = vadd.f32 1.4214138, %v7068_v9 }
0x3674   : > { %v7070_v15 = vmul.f32 %v9138_v63, %v7069_v3 }
0x3676   : > { %v7071_v5 = vadd.f32 -0.28449672, %v7070_v15 }
0x3678   : > { %v7072_v10 = vmul.f32 %v9138_v63, %v7071_v5 }
0x367a   : > { %v7073_v38 = vadd.f32 0.2548296, %v7072_v10 }
0x367c   : > { %v7074_v4 = vmul.f32 %v9138_v63, %v7073_v38 }
0x367e   : > { %v7079_v11 = vmul.f32 %v9140_v12, %v7074_v4 }
0x3680   : > { %v7080_v14 = vsub.f32 1.0, %v7079_v11 }
0x3682   : > { %v7081_v60 = vmul.f32 %v7080_v14, %v7060_v17 }
0x3684   : > { %v7082_v19 = vadd.f32 1.0, %v7081_v60 }
0x3686   : > { %v7083_v20 = vmul.f32 %v7082_v19, %v7057_v18 }
0x3688   : > { %v7100_v21 = vpack.c.bf16 %v7083_v20, %v7083_v20 }
0x368a   : > { %8553 = vmatmul.mubr.bf16.vlgmr.msra.gmra.mrb[144].mxu0 %v7100_v21 }
0x375d   : > { %v7143_v27 = vpop.f32.mrb[144].mxu0 }
0x375e   : > { %v7149_v22 = vadd.f32 %v7143_v27, %v11857_v6  ;;  %v8554_v23 = vpop.f32.mrb[145].mxu0  ;;  %v7199_v6 = vld [vmem:[%s12243_s3 + $0x18] sm:$0xff]  ;;  %s9935_s3 = sshll.u32 %s10170_s15, 4  ;;  %s9936_s3 = int_to_ptr.vmem [resolvable:$false] %s9935_s3 }
0x375f   : > { %v7146_v25 = vpop.f32.mrb[146].mxu0  ;;  %v7202_v29 = vpack.c.bf16 %v7199_v6, %v7198_v48  ;;  %s9937_s4 = scalar_lea.vmem %s9936_s3, 32  ;;  %p9938_p6 = scmp.lt.s32.totalorder %s11914_s6, %s9936_s3 }
0x3760   : > { %v7157_v26 = vadd.f32 %v7860_v49, %v7149_v22  ;;  %v8555_v8 = vpop.f32.mrb[147].mxu0  ;;  %p9939_p9 = scmp.lt.s32.totalorder %s9937_s4, %s9931_s2 }
0x3761   : > { %8559 = vmatpush3.bf16.msra.mxu1 %v7202_v29 }
0x3762   : > { %v7160_v56 = vsel %vm5569_vm15, %v7157_v26, 0.0  ;;  %p9940_p10 = por %p9939_p9, %p9938_p6 }
0x3763   : > { %7161 = vadd.xlane.f32.xlu0 %v7160_v56 }
0x3764   : > { %p9941_p7 = pnand %p9940_p10, %p9934_p5 }
0x37f0   : > { %v7162_v28 = vpop.xlane.xlu0 %7161 }
0x37f1   : > { %v7163_v44 = vmul.f32 0.03125, %v7162_v28 }
0x37f3   : > { %v7164_v24 = vsub.f32 %v7157_v26, %v7163_v44 }
0x37f5   : > { %v7165_v30 = vmul.f32 %v7164_v24, %v7164_v24 }
0x37f7   : > { %v7166_v31 = vsel %vm5569_vm15, %v7165_v30, 0.0 }
0x37f8   : > { %7167 = vadd.xlane.f32.xlu0 %v7166_v31 }
0x3885   : > { %v7168_v39 = vpop.xlane.xlu0 %7167 }
0x3886   : > { %v7169_v40 = vmul.f32 0.03125, %v7168_v39 }
0x3888   : > { %v7170_v41 = vadd.f32 1e-05, %v7169_v40 }
0x388a   : > { %9141 = vrsqrt.f32 %v7170_v41 }
0x3894   : > { %v9142_v42 = vpop.eup %9141 }
0x3895   : > { %v7172_v43 = vmul.f32 %v9142_v42, %v7164_v24 }
0x3897   : > { %v7179_v16 = vmul.f32 %v7861_v37, %v7172_v43 }
0x3899   : > { %v7186_v45 = vadd.f32 %v7862_v35, %v7179_v16 }
0x389b   : > { %v7187_v47 = vsel %vm5569_vm15, %v7186_v45, 0.0 }
0x389c   : > { %v7188_v46 = vrot.slane %v7187_v47, 4 }
0x389e   : > { %v7189_v50 = vadd.f32 %v7188_v46, %v7187_v47 }
0x38a0   : > { %v7190_v51 = vrot.slane %v7189_v50, 2 }
0x38a2   : > { %v7191_v52 = vadd.f32 %v7190_v51, %v7189_v50 }
0x38a4   : > { %v7192_v53 = vrot.slane %v7191_v52, 1 }
0x38a6   : > { %v7193_v0 = vadd.f32 %v7192_v53, %v7191_v52 }
0x38a8   : > { %v7195_v54 = vmul.f32 0.25, %v7193_v0 }
0x38aa   : > { %v7200_v57 = vpack.c.bf16 %v7195_v54, %v7195_v54 }
0x38ac   : > { %8561 = vmatmul.mubr.msk.bf16.vlgmr.msra.gmra.mrb[148].mxu1 %vm5477_vm13, %v7200_v57 }
0x397f   : > { %v7241_v61 = vpop.f32.mrb[148].mxu1 }
0x3980   : > { %v7242_v1 = vadd.f32 %v7241_v61, %v7203_v55  ;;  %v8562_v58 = vpop.f32.mrb[149].mxu1 }
0x3981   : > { %v7244_v59 = vpop.f32.mrb[150].mxu1 }
0x3982   : > { %v8563_v62 = vpop.f32.mrb[151].mxu1  ;;  %v7248_v63 = vsel %vm7247_vm2, %v7242_v1, -inf }
0x3983   : > { %7249 = vmax.xlane.f32.xlu1 %v7248_v63 }
0x3a10   : > { %v7250_v2 = vpop.xlane.xlu1 %7249 }
0x3a11   : > { %v7251_v34 = vsub.f32 %v7242_v1, %v7250_v2 }
0x3a13   : > { %v7252_v13 = vmul.f32 1.442695, %v7251_v34 }
0x3a15   : > { %9143 = vpow2.f32 %v7252_v13 }
0x3a1f   : > { %v9144_v7 = vpop.eup %9143 }
0x3a20   : > { %v7254_v9 = vsel %vm7247_vm2, %v9144_v7, 0.0 }
0x3a21   : > { %7255 = vadd.xlane.f32.xlu0 %v7254_v9 }
0x3aae   : > { %v7256_v3 = vpop.xlane.xlu0 %7255 }
0x3aaf   : > { %9145 = vlog2.f32 %v7256_v3 }
0x3ab9   : > { %v9146_v15 = vpop.eup %9145 }
0x3aba   : > { %v7258_v5 = vmul.f32 0.6931472, %v9146_v15 }
0x3abc   : > { %v7259_v10 = vsub.f32 %v7251_v34, %v7258_v5 }
0x3abe   : > { %7260 = vst.msk [vmem:[%s2365_s1] sm:$0x1] %vm7247_vm2, %v7259_v10 }
0x3abf   : > { %9944 = shalt.err (!%p9941_p7)
}
0x3ac0   : > { %s9945_s13 = scalar_lea.hbm %s11912_s10, 16  ;;  %s9949_s12 = scalar_lea.hbm %s10524_s9, 32 }
0x3ac1   : > { %p9946_p8 = scmp.ne.s32.totalorder %s11912_s10, %s9945_s13  ;;  %p9950_p1 = scmp.lt.u32.totalorder %s11912_s10, %s10524_s9 }
0x3ac2   : > { %p9951_p2 = scmp.lt.u32.totalorder %s9949_s12, %s9945_s13  ;;  %p9953_p3 = scmp.lt.u32.totalorder %s9945_s13, %s11912_s10 }
0x3ac3   : > { %p9947_p11 = pnand %p9946_p8, %p12245_p4 }
0x3ac4   : > { %p9952_p0 = por %p9951_p2, %p9950_p1 }
0x3ac5   : > { %p9948_p13 = pneg %p9947_p11 }
0x3ac6   : > { %p9954_p12 = por %p9953_p3, %p9952_p0 }
0x3ac8   : > { %p9955_p5 = pnand %p9954_p12, %p9948_p13 }
0x3aca   : > { %9958 = shalt.err (!%p9955_p5)
}
0x3acb   : > { %8676 = dma.vmem_to_hbm [thread:$0]  (%p12245_p4), %s11914_s6, 16, %s11912_s10, %s7262_s7  }
0x3acc PF: > { %s12246_s4 = sld [smem:[#allocation125_spill]]  ;;  %s12247_s2 = sld [smem:[#allocation129_spill]] }
0x3acd   : > { %p8823_p6 = scmp.ge.s32.totalorder %s10053_s11, 2 }
0x3ad2   : > { %s7286_s3 = sand.u32 1, %s12246_s4   ;;  %p12248_p9 = scmp.ne.s32.totalorder %s12247_s2, 0 }
0x3ad3   : > { %s7287_s1 = scalar_lea.sflag [#allocation4], %s7286_s3 }
0x3ad4   : > { %p8764_p10 = pnand %p8823_p6, %p12248_p9 }
0x3ad6   : > { %10036 = dma.done.wait (!%p8764_p10), %s7287_s1, 16  }
0x3ad7   : > { %10038 = vsyncadd (!%p8764_p10), %s7287_s1, 4294967280  ;;  %s12249_s11 = sld [smem:[#allocation127_spill]]  ;;  %s12250_s15 = sld [smem:[#allocation126_spill]] }
0x3ad8   : > { %s12251_s10 = sld [smem:[#allocation128_spill]]  ;;  %s12252_s7 = smov %s10045_s0 }
0x3add   : > { %p164_p7 = scmp.ge.s32.totalorder %s12249_s11, 4   ;;  %s12253_s0 = smov %s12250_s15 }
0x3adf   :  { %166 = sbr.rel (!%p164_p7) target bundleno = 156 (0x9c), region = 536 }
0x3ae6   :  { %7291 = vsyncpa [#allocation3], 1 }
0x3ae7   :  { %7293 = vsyncpa [#allocation3 + $0x1], 1 }
0x3ae8   :  { %7294 = vsyncpa [#allocation6], 1 }
0x3ae9   :  { %7295 = vsyncpa [#allocation9], 1 }
0x3aea   :  { %7296 = vsyncpa [#allocation12], 1 }
0x3aeb   :  { %7297 = vsyncpa [#allocation15], 1 }
0x3aec   :  { %7298 = vsyncpa [#allocation18], 1 }
0x3aed   :  { %7299 = vsyncpa [#allocation21], 1 }
0x3aee   :  { %7300 = vsyncpa [#allocation24], 1 }
0x3aef   :  { %7301 = vsyncpa [#allocation27], 1 }
0x3af0   :  { %7302 = vsyncpa [#allocation30], 1 }
0x3af1   :  { %7303 = vsyncpa [#allocation33], 1 }
0x3af2   :  { %7304 = vsyncpa [#allocation36], 1 }
0x3af3   :  { %7305 = vsyncpa [#allocation39], 1 }
0x3af4   :  { %7306 = vsyncpa [#allocation42], 1 }
0x3af5   :  { %7307 = vsyncpa [#allocation45], 1 }
0x3af6   :  { %7308 = vsyncpa [#allocation4], 1 }
0x3af7   :  { %7310 = vsyncpa [#allocation4 + $0x1], 1 }

</bundles_post_ra>
